<compile_context>
chip_gen: v7x
topology: tpu7x:2x2x1
jax: 0.10.0
libtpu: 0.0.40
codegen_flags: <defaults>
</compile_context>

<pallas_src>
import jax
import jax.numpy as jnp
from jax.experimental import pallas as pl
from jax.experimental.pallas import tpu as pltpu


def lstm_vae_att_kernel(
    # ---- inputs ----
    x_ref,          # (T*B, F)    time-major flattened input, row = t*B + b
    enc_wih_ref,    # (2, F, 8H)  per-direction W_ih placed in gate-major 8H slots
    enc_b_ref,      # (2, 1, 8H)  per-direction bias placed in its slots
    enc_whh_ref,    # (2H, 8H)    block-diagonal recurrent weights (both dirs)
    dec_wih_ref,    # (F, 8H)     both decoder directions (same input)
    dec_b_ref,      # (1, 8H)
    dec_whh_ref,    # (2H, 8H)
    fc_z_w_ref,     # (H, 2H)     [mu | logvar] columns
    fc_z_b_ref,     # (1, 2H)
    fc_on_w_ref,    # (2H, 4H)    [mu | logvar] columns
    fc_on_b_ref,    # (1, 4H)
    att_w_ref,      # (2, 2H, 2H) [0]=W_1 (query), [1]=W_2 (values)
    att_b_ref,      # (2, 1, 2H)
    att_v_ref,      # (1, 2H)
    fc_out_w_ref,   # (4H, F)
    fc_out_b_ref,   # (1, F)
    eps_z_ref,      # (2, B, H)
    eps_on_ref,     # (T*B, 2H)
    # ---- outputs ----
    recon_ref,      # (T*B, F)
    z_ref,          # (2, B, H)
    on_ref,         # (T*B, 2H)
    mu_z_ref,       # (2, B, H)
    mu_on_ref,      # (T*B, 2H)
    logvar_z_ref,   # (2, B, H)
    logvar_on_ref,  # (T*B, 2H)
    # ---- scratch ----
    on_scr,         # (T*B, 2H)  raw bidirectional encoder hiddens
):
    TB, F_dim = x_ref.shape
    H = fc_z_w_ref.shape[0]
    B = eps_z_ref.shape[1]
    T = TB // B
    H2, H4, H6, H8 = 2 * H, 4 * H, 6 * H, 8 * H
    f32 = jnp.float32

    x_flat = x_ref[...]                                         # (T*B, F)

    # ---- hoisted input->hidden pre-activations (gate-major 8H layout) ----
    pre_f = (jnp.dot(x_flat, enc_wih_ref[0], preferred_element_type=f32)
             + enc_b_ref[0])                                    # (T*B, 8H)
    pre_b = (jnp.dot(x_flat, enc_wih_ref[1], preferred_element_type=f32)
             + enc_b_ref[1])                                    # (T*B, 8H)
    pre_d = jnp.dot(x_flat, dec_wih_ref[...],
                    preferred_element_type=f32)                 # (T*B, 8H)

    enc_whh = enc_whh_ref[...]
    dec_whh = dec_whh_ref[...]
    dec_b = dec_b_ref[...]

    def lstm_cell(h, c, pre, whh):
        # h, c: (B, 2H) = [fwd | bwd]; whh: block-diagonal (2H, 8H).
        # Gate-major columns: [i_f,i_b,f_f,f_b,g_f,g_b,o_f,o_b].
        gates = jnp.dot(h, whh, preferred_element_type=f32) + pre    # (B, 8H)
        sg = jax.nn.sigmoid(gates)     # one full-width EUP push
        th = jnp.tanh(gates)           # one full-width EUP push
        i_g = sg[:, 0:H2]
        f_g = sg[:, H2:H4]
        g_g = th[:, H4:H6]
        o_g = sg[:, H6:H8]
        c_new = f_g * c + i_g * g_g
        h_new = o_g * jnp.tanh(c_new)
        return h_new, c_new

    # ---------- fused bidirectional encoder (fully unrolled) ----------
    h = jnp.zeros((B, H2), f32)
    c = jnp.zeros((B, H2), f32)
    for s in range(T):
        pre = (pre_f[s * B:(s + 1) * B, :]
               + pre_b[(T - 1 - s) * B:(T - s) * B, :])
        h, c = lstm_cell(h, c, pre, enc_whh)
        # stage raw encoder outputs (off the recurrence dependency chain)
        on_scr[s * B:(s + 1) * B, 0:H] = h[:, 0:H]               # fwd @ time s
        on_scr[(T - 1 - s) * B:(T - s) * B, H:H2] = h[:, H:H2]   # bwd @ time T-1-s
    hn = h   # (B, 2H) = [h_fwd(T-1) | h_bwd(0)]  == PyTorch hn[0], hn[1]

    # ---------- VAE heads on hn (z) ----------
    wz = fc_z_w_ref[...]
    bz = fc_z_b_ref[...]
    z_parts = []
    for d in range(2):
        proj = jnp.dot(hn[:, d * H:(d + 1) * H], wz,
                       preferred_element_type=f32) + bz          # (B, 2H)
        mu_d = proj[:, 0:H]
        lv_d = proj[:, H:H2]
        z_d = mu_d + eps_z_ref[d] * jnp.exp(0.5 * lv_d)
        mu_z_ref[d] = mu_d
        logvar_z_ref[d] = lv_d
        z_ref[d] = z_d
        z_parts.append(z_d)
    z_cat = jnp.concatenate(z_parts, axis=1)                     # (B, 2H)

    # ---------- VAE heads on encoder outputs (one flat matmul) ----------
    on_raw = on_scr[...]                                         # (T*B, 2H)
    proj = (jnp.dot(on_raw, fc_on_w_ref[...], preferred_element_type=f32)
            + fc_on_b_ref[...])                                  # (T*B, 4H)
    mu_on = proj[:, 0:H2]
    lv_on = proj[:, H2:H4]
    on_vals = mu_on + eps_on_ref[...] * jnp.exp(0.5 * lv_on)     # (T*B, 2H)
    mu_on_ref[...] = mu_on
    logvar_on_ref[...] = lv_on
    on_ref[...] = on_vals

    # ---------- additive attention precompute (W_2 @ values) ----------
    att_vals = (jnp.dot(on_vals, att_w_ref[1], preferred_element_type=f32)
                + att_b_ref[1])                                  # (T*B, 2H)
    w1 = att_w_ref[0]
    b1 = att_b_ref[0]
    v_vec = att_v_ref[...]                                       # (1, 2H)
    # static per-timestep views (loop below is fully unrolled)
    att_t = [att_vals[t * B:(t + 1) * B, :] for t in range(T)]
    onv_t = [on_vals[t * B:(t + 1) * B, :] for t in range(T)]

    w_out = fc_out_w_ref[...]                                    # (4H, F)
    b_out = fc_out_b_ref[...]                                    # (1, F)
    inv_T = 1.0 / T

    # ---------- decoder (fully unrolled, state in vregs) ----------
    h = z_cat                       # h0 = z  (fwd | bwd)
    c = jnp.zeros((B, H2), f32)     # c0 = 0
    for t in range(T):
        # attention with the pre-step hidden state as query
        q = jnp.dot(h, w1, preferred_element_type=f32) + b1      # (B, 2H)
        scs = [jnp.sum(jnp.tanh(q + av) * v_vec, axis=-1, keepdims=True)
               for av in att_t]                                  # T x (B, 1)
        m = scs[0]
        for s_ in scs[1:]:
            m = jnp.maximum(m, s_)
        es = [jnp.exp(s_ - m) for s_ in scs]
        den = es[0]
        for e_ in es[1:]:
            den = den + e_
        ctx = es[0] * onv_t[0]
        for e_, ov in zip(es[1:], onv_t[1:]):
            ctx = ctx + e_ * ov
        # softmax-weighted *mean* over T (reference uses .mean(dim=1))
        context = ctx * ((1.0 / den) * inv_T)                    # (B, 2H)

        # teacher forcing: input at step t is x[t-1], zeros at t=0
        if t == 0:
            pre = dec_b
        else:
            pre = dec_b + pre_d[(t - 1) * B:t * B, :]
        h, c = lstm_cell(h, c, pre, dec_whh)

        # fc_output(cat([h_fwd, h_bwd, context]))  — single K=4H dot
        ho = jnp.concatenate([h, context], axis=1)               # (B, 4H)
        out_t = (jnp.dot(ho, w_out, preferred_element_type=f32)
                 + b_out)                                        # (B, F)
        recon_ref[t * B:(t + 1) * B, :] = out_t


def lstm_vae_att_forward(x, params, eps_z, eps_on):
    """x: (B, T, F) batch-first like PyTorch. Returns the same tuple as forward()."""
    B, T, F_dim = x.shape
    H = params['enc_whh'].shape[1]
    H2 = 2 * H
    f32 = jnp.float32

    # time-major flattened layouts (row = t*B + b)
    x_flat = jnp.transpose(x, (1, 0, 2)).reshape(T * B, F_dim).astype(f32)
    eps_on_flat = jnp.transpose(eps_on, (1, 0, 2)).reshape(T * B, H2).astype(f32)

    def place(w, d):
        # w: (..., 4H) in gate order [i,f,g,o]; scatter into the gate-major 8H
        # layout [i_f,i_b,f_f,f_b,g_f,g_b,o_f,o_b], filling direction d's slots.
        z = jnp.zeros(w.shape[:-1] + (H,), f32)
        parts = []
        for g in range(4):
            blk = w[..., g * H:(g + 1) * H].astype(f32)
            parts.extend([blk, z] if d == 0 else [z, blk])
        return jnp.concatenate(parts, axis=-1)

    enc_wih_p = jnp.stack([place(params['enc_wih'][0], 0),
                           place(params['enc_wih'][1], 1)])            # (2, F, 8H)
    enc_b_p = jnp.stack([place(params['enc_b'][0], 0),
                         place(params['enc_b'][1], 1)])                # (2, 1, 8H)
    enc_whh_blk = jnp.concatenate([place(params['enc_whh'][0], 0),
                                   place(params['enc_whh'][1], 1)], axis=0)  # (2H, 8H)

    dec_wih_cat = place(params['dec_wih'][0], 0) + place(params['dec_wih'][1], 1)  # (F, 8H)
    dec_b_cat = place(params['dec_b'][0], 0) + place(params['dec_b'][1], 1)        # (1, 8H)
    dec_whh_blk = jnp.concatenate([place(params['dec_whh'][0], 0),
                                   place(params['dec_whh'][1], 1)], axis=0)        # (2H, 8H)

    fc_z_w_cat = jnp.concatenate([params['fc_z_w'][0], params['fc_z_w'][1]],
                                 axis=1).astype(f32)                   # (H, 2H)
    fc_z_b_cat = jnp.concatenate([params['fc_z_b'][0], params['fc_z_b'][1]],
                                 axis=1).astype(f32)                   # (1, 2H)
    fc_on_w_cat = jnp.concatenate([params['fc_on_w'][0], params['fc_on_w'][1]],
                                  axis=1).astype(f32)                  # (2H, 4H)
    fc_on_b_cat = jnp.concatenate([params['fc_on_b'][0], params['fc_on_b'][1]],
                                  axis=1).astype(f32)                  # (1, 4H)

    out_shape = (
        jax.ShapeDtypeStruct((T * B, F_dim), f32),   # recon (flat)
        jax.ShapeDtypeStruct((2, B, H), f32),        # z
        jax.ShapeDtypeStruct((T * B, H2), f32),      # on (flat)
        jax.ShapeDtypeStruct((2, B, H), f32),        # mu_z
        jax.ShapeDtypeStruct((T * B, H2), f32),      # mu_on (flat)
        jax.ShapeDtypeStruct((2, B, H), f32),        # logvar_z
        jax.ShapeDtypeStruct((T * B, H2), f32),      # logvar_on (flat)
    )

    vmem = pl.BlockSpec(memory_space=pltpu.MemorySpace.VMEM)
    n_inputs = 18

    outs = pl.pallas_call(
        lstm_vae_att_kernel,
        out_shape=out_shape,
        in_specs=[vmem] * n_inputs,
        out_specs=tuple([vmem] * len(out_shape)),
        scratch_shapes=[pltpu.VMEM((T * B, H2), f32)],   # raw encoder hiddens
    )(
        x_flat,
        enc_wih_p, enc_b_p, enc_whh_blk,
        dec_wih_cat, dec_b_cat, dec_whh_blk,
        fc_z_w_cat, fc_z_b_cat, fc_on_w_cat, fc_on_b_cat,
        params['att_w'].astype(f32), params['att_b'].astype(f32),
        params['att_v'].astype(f32),
        params['fc_out_w'].astype(f32), params['fc_out_b'].astype(f32),
        eps_z.astype(f32), eps_on_flat,
    )

    recon_f, z, on_f, mu_z, mu_on_f, logvar_z, logvar_on_f = outs

    def unflatten(a, last):
        return jnp.transpose(a.reshape(T, B, last), (1, 0, 2))

    recon = unflatten(recon_f, F_dim)
    on = unflatten(on_f, H2)
    mu_on = unflatten(mu_on_f, H2)
    logvar_on = unflatten(logvar_on_f, H2)
    return recon, (z, on), (mu_z, mu_on), (logvar_z, logvar_on)


def init_params(key, F_dim, H):
    """Deterministic synthetic parameters, uniform(-0.1, 0.1) like the module."""
    ks = jax.random.split(key, 15)

    def u(k, shape, scale=0.1):
        return jax.random.uniform(k, shape, jnp.float32, -scale, scale)

    return {
        # encoder bidirectional LSTM (gate order i,f,g,o); stored (in, out)
        'enc_wih': u(ks[0], (2, F_dim, 4 * H)),
        'enc_whh': u(ks[1], (2, H, 4 * H)),
        'enc_b':   u(ks[2], (2, 1, 4 * H)),
        # fc_z_mu / fc_z_logvar
        'fc_z_w':  u(ks[3], (2, H, H)),
        'fc_z_b':  u(ks[4], (2, 1, H)),
        # fc_hidden_mu / fc_hidden_logvar
        'fc_on_w': u(ks[5], (2, 2 * H, 2 * H)),
        'fc_on_b': u(ks[6], (2, 1, 2 * H)),
        # additive attention: W_1, W_2, v
        'att_w':   u(ks[7], (2, 2 * H, 2 * H)),
        'att_b':   u(ks[8], (2, 1, 2 * H)),
        'att_v':   u(ks[9], (1, 2 * H)),
        # decoder bidirectional LSTM
        'dec_wih': u(ks[10], (2, F_dim, 4 * H)),
        'dec_whh': u(ks[11], (2, H, 4 * H)),
        'dec_b':   u(ks[12], (2, 1, 4 * H)),
        # fc_output: Linear(4H, F)
        'fc_out_w': u(ks[13], (4 * H, F_dim)),
        'fc_out_b': u(ks[14], (1, F_dim)),
    }


if __name__ == "__main__":
    B, T, F_dim, H = 2, 8, 16, 32   # input_dim = (B, T, F), n_hidden = H

    key = jax.random.PRNGKey(0)
    k_params, k_x, k_ez, k_eon = jax.random.split(key, 4)

    params = init_params(k_params, F_dim, H)
    x = jax.random.normal(k_x, (B, T, F_dim), jnp.float32)
    eps_z = jax.random.normal(k_ez, (2, B, H), jnp.float32)          # randn_like(logvar_z)
    eps_on = jax.random.normal(k_eon, (B, T, 2 * H), jnp.float32)    # randn_like(logvar_on)

    recon, (z, on), (mu_z, mu_on), (logvar_z, logvar_on) = jax.block_until_ready(
        lstm_vae_att_forward(x, params, eps_z, eps_on)
    )

    assert recon.shape == (B, T, F_dim)
    assert z.shape == (2, B, H) and on.shape == (B, T, 2 * H)
    assert mu_z.shape == (2, B, H) and logvar_z.shape == (2, B, H)
    assert mu_on.shape == (B, T, 2 * H) and logvar_on.shape == (B, T, 2 * H)
    assert bool(jnp.all(jnp.isfinite(recon)))
    print("KERNEL_OK")
</pallas_src>

<mosaic_0001>
module attributes {stable_mosaic.version = 11 : i64} {
  func.func @lstm_vae_att_kernel(%arg0: memref<16x16xf32, #tpu.memory_space<vmem>>, %arg1: memref<2x16x256xf32, #tpu.memory_space<vmem>>, %arg2: memref<2x1x256xf32, #tpu.memory_space<vmem>>, %arg3: memref<64x256xf32, #tpu.memory_space<vmem>>, %arg4: memref<16x256xf32, #tpu.memory_space<vmem>>, %arg5: memref<1x256xf32, #tpu.memory_space<vmem>>, %arg6: memref<64x256xf32, #tpu.memory_space<vmem>>, %arg7: memref<32x64xf32, #tpu.memory_space<vmem>>, %arg8: memref<1x64xf32, #tpu.memory_space<vmem>>, %arg9: memref<64x128xf32, #tpu.memory_space<vmem>>, %arg10: memref<1x128xf32, #tpu.memory_space<vmem>>, %arg11: memref<2x64x64xf32, #tpu.memory_space<vmem>>, %arg12: memref<2x1x64xf32, #tpu.memory_space<vmem>>, %arg13: memref<1x64xf32, #tpu.memory_space<vmem>>, %arg14: memref<128x16xf32, #tpu.memory_space<vmem>>, %arg15: memref<1x16xf32, #tpu.memory_space<vmem>>, %arg16: memref<2x2x32xf32, #tpu.memory_space<vmem>>, %arg17: memref<16x64xf32, #tpu.memory_space<vmem>>, %arg18: memref<16x16xf32, #tpu.memory_space<vmem>>, %arg19: memref<2x2x32xf32, #tpu.memory_space<vmem>>, %arg20: memref<16x64xf32, #tpu.memory_space<vmem>>, %arg21: memref<2x2x32xf32, #tpu.memory_space<vmem>>, %arg22: memref<16x64xf32, #tpu.memory_space<vmem>>, %arg23: memref<2x2x32xf32, #tpu.memory_space<vmem>>, %arg24: memref<16x64xf32, #tpu.memory_space<vmem>>, %arg25: memref<16x64xf32, #tpu.memory_space<vmem>>) attributes {dimension_semantics = [], scalar_prefetch = 0 : i64, scratch_operands = 1 : i64, tpu.core_type = #tpu.core_type<tc>} {
    %c0 = arith.constant 0 : index
    %c0_0 = arith.constant 0 : index
    %0 = vector.load %arg0[%c0, %c0_0] : memref<16x16xf32, #tpu.memory_space<vmem>>, vector<16x16xf32>
    %c0_1 = arith.constant 0 : index
    %c0_2 = arith.constant 0 : index
    %c0_3 = arith.constant 0 : index
    %1 = vector.load %arg1[%c0_1, %c0_2, %c0_3] : memref<2x16x256xf32, #tpu.memory_space<vmem>>, vector<1x16x256xf32>
    %2 = vector.shape_cast %1 : vector<1x16x256xf32> to vector<16x256xf32>
    %cst = arith.constant dense<0.000000e+00> : vector<16x256xf32>
    %3 = tpu.matmul %0, %2, %cst {dimension_numbers = #tpu.dot_dimension_numbers<[1], [0], [0], [1], [0, 0, 1, 1], [], []>} : vector<16x16xf32>, vector<16x256xf32>, vector<16x256xf32> -> vector<16x256xf32>
    %c0_4 = arith.constant 0 : index
    %c0_5 = arith.constant 0 : index
    %c0_6 = arith.constant 0 : index
    %4 = vector.load %arg2[%c0_4, %c0_5, %c0_6] : memref<2x1x256xf32, #tpu.memory_space<vmem>>, vector<1x1x256xf32>
    %5 = vector.shape_cast %4 : vector<1x1x256xf32> to vector<1x256xf32>
    %6 = vector.broadcast %5 : vector<1x256xf32> to vector<16x256xf32>
    %7 = arith.addf %3, %6 : vector<16x256xf32>
    %c1 = arith.constant 1 : index
    %c0_7 = arith.constant 0 : index
    %c0_8 = arith.constant 0 : index
    %8 = vector.load %arg1[%c1, %c0_7, %c0_8] : memref<2x16x256xf32, #tpu.memory_space<vmem>>, vector<1x16x256xf32>
    %9 = vector.shape_cast %8 : vector<1x16x256xf32> to vector<16x256xf32>
    %cst_9 = arith.constant dense<0.000000e+00> : vector<16x256xf32>
    %10 = tpu.matmul %0, %9, %cst_9 {dimension_numbers = #tpu.dot_dimension_numbers<[1], [0], [0], [1], [0, 0, 1, 1], [], []>} : vector<16x16xf32>, vector<16x256xf32>, vector<16x256xf32> -> vector<16x256xf32>
    %c1_10 = arith.constant 1 : index
    %c0_11 = arith.constant 0 : index
    %c0_12 = arith.constant 0 : index
    %11 = vector.load %arg2[%c1_10, %c0_11, %c0_12] : memref<2x1x256xf32, #tpu.memory_space<vmem>>, vector<1x1x256xf32>
    %12 = vector.shape_cast %11 : vector<1x1x256xf32> to vector<1x256xf32>
    %13 = vector.broadcast %12 : vector<1x256xf32> to vector<16x256xf32>
    %14 = arith.addf %10, %13 : vector<16x256xf32>
    %c0_13 = arith.constant 0 : index
    %c0_14 = arith.constant 0 : index
    %15 = vector.load %arg4[%c0_13, %c0_14] : memref<16x256xf32, #tpu.memory_space<vmem>>, vector<16x256xf32>
    %cst_15 = arith.constant dense<0.000000e+00> : vector<16x256xf32>
    %16 = tpu.matmul %0, %15, %cst_15 {dimension_numbers = #tpu.dot_dimension_numbers<[1], [0], [0], [1], [0, 0, 1, 1], [], []>} : vector<16x16xf32>, vector<16x256xf32>, vector<16x256xf32> -> vector<16x256xf32>
    %c0_16 = arith.constant 0 : index
    %c0_17 = arith.constant 0 : index
    %17 = vector.load %arg3[%c0_16, %c0_17] : memref<64x256xf32, #tpu.memory_space<vmem>>, vector<64x256xf32>
    %c0_18 = arith.constant 0 : index
    %c0_19 = arith.constant 0 : index
    %18 = vector.load %arg6[%c0_18, %c0_19] : memref<64x256xf32, #tpu.memory_space<vmem>>, vector<64x256xf32>
    %c0_20 = arith.constant 0 : index
    %c0_21 = arith.constant 0 : index
    %19 = vector.load %arg5[%c0_20, %c0_21] : memref<1x256xf32, #tpu.memory_space<vmem>>, vector<1x256xf32>
    %cst_22 = arith.constant 0.000000e+00 : f32
    %20 = vector.broadcast %cst_22 : f32 to vector<2x64xf32>
    %cst_23 = arith.constant 0.000000e+00 : f32
    %21 = vector.broadcast %cst_23 : f32 to vector<2x64xf32>
    %22 = vector.extract_strided_slice %7 {offsets = [0, 0], sizes = [2, 256], strides = [1, 1]} : vector<16x256xf32> to vector<2x256xf32>
    %23 = vector.extract_strided_slice %14 {offsets = [14, 0], sizes = [2, 256], strides = [1, 1]} : vector<16x256xf32> to vector<2x256xf32>
    %24 = arith.addf %22, %23 : vector<2x256xf32>
    %cst_24 = arith.constant dense<0.000000e+00> : vector<2x256xf32>
    %25 = tpu.matmul %20, %17, %cst_24 {dimension_numbers = #tpu.dot_dimension_numbers<[1], [0], [0], [1], [0, 0, 1, 1], [], []>} : vector<2x64xf32>, vector<64x256xf32>, vector<2x256xf32> -> vector<2x256xf32>
    %26 = arith.addf %25, %24 : vector<2x256xf32>
    %27 = arith.negf %26 : vector<2x256xf32>
    %28 = math.exp %27 : vector<2x256xf32>
    %cst_25 = arith.constant 1.000000e+00 : f32
    %29 = vector.broadcast %cst_25 : f32 to vector<2x256xf32>
    %30 = arith.addf %29, %28 : vector<2x256xf32>
    %31 = arith.divf %29, %30 : vector<2x256xf32>
    %32 = math.tanh %26 : vector<2x256xf32>
    %33 = vector.extract_strided_slice %31 {offsets = [0, 0], sizes = [2, 64], strides = [1, 1]} : vector<2x256xf32> to vector<2x64xf32>
    %34 = vector.extract_strided_slice %31 {offsets = [0, 64], sizes = [2, 64], strides = [1, 1]} : vector<2x256xf32> to vector<2x64xf32>
    %35 = vector.extract_strided_slice %32 {offsets = [0, 128], sizes = [2, 64], strides = [1, 1]} : vector<2x256xf32> to vector<2x64xf32>
    %36 = vector.extract_strided_slice %31 {offsets = [0, 192], sizes = [2, 64], strides = [1, 1]} : vector<2x256xf32> to vector<2x64xf32>
    %37 = arith.mulf %34, %21 : vector<2x64xf32>
    %38 = arith.mulf %33, %35 : vector<2x64xf32>
    %39 = arith.addf %37, %38 : vector<2x64xf32>
    %40 = math.tanh %39 : vector<2x64xf32>
    %41 = arith.mulf %36, %40 : vector<2x64xf32>
    %42 = vector.extract_strided_slice %41 {offsets = [0, 0], sizes = [2, 32], strides = [1, 1]} : vector<2x64xf32> to vector<2x32xf32>
    %c0_26 = arith.constant 0 : index
    %c0_27 = arith.constant 0 : index
    %43 = vector.load %arg25[%c0_26, %c0_27] : memref<16x64xf32, #tpu.memory_space<vmem>>, vector<2x32xf32>
    tpu.vector_store %arg25[%c0_26, %c0_27], %42 {strides = array<i32>} : memref<16x64xf32, #tpu.memory_space<vmem>>, vector<2x32xf32>,
    %44 = vector.extract_strided_slice %41 {offsets = [0, 32], sizes = [2, 32], strides = [1, 1]} : vector<2x64xf32> to vector<2x32xf32>
    %c14 = arith.constant 14 : index
    %c32 = arith.constant 32 : index
    %45 = vector.load %arg25[%c14, %c32] : memref<16x64xf32, #tpu.memory_space<vmem>>, vector<2x32xf32>
    tpu.vector_store %arg25[%c14, %c32], %44 {strides = array<i32>} : memref<16x64xf32, #tpu.memory_space<vmem>>, vector<2x32xf32>,
    %46 = vector.extract_strided_slice %7 {offsets = [2, 0], sizes = [2, 256], strides = [1, 1]} : vector<16x256xf32> to vector<2x256xf32>
    %47 = vector.extract_strided_slice %14 {offsets = [12, 0], sizes = [2, 256], strides = [1, 1]} : vector<16x256xf32> to vector<2x256xf32>
    %48 = arith.addf %46, %47 : vector<2x256xf32>
    %cst_28 = arith.constant dense<0.000000e+00> : vector<2x256xf32>
    %49 = tpu.matmul %41, %17, %cst_28 {dimension_numbers = #tpu.dot_dimension_numbers<[1], [0], [0], [1], [0, 0, 1, 1], [], []>} : vector<2x64xf32>, vector<64x256xf32>, vector<2x256xf32> -> vector<2x256xf32>
    %50 = arith.addf %49, %48 : vector<2x256xf32>
    %51 = arith.negf %50 : vector<2x256xf32>
    %52 = math.exp %51 : vector<2x256xf32>
    %cst_29 = arith.constant 1.000000e+00 : f32
    %53 = vector.broadcast %cst_29 : f32 to vector<2x256xf32>
    %54 = arith.addf %53, %52 : vector<2x256xf32>
    %55 = arith.divf %53, %54 : vector<2x256xf32>
    %56 = math.tanh %50 : vector<2x256xf32>
    %57 = vector.extract_strided_slice %55 {offsets = [0, 0], sizes = [2, 64], strides = [1, 1]} : vector<2x256xf32> to vector<2x64xf32>
    %58 = vector.extract_strided_slice %55 {offsets = [0, 64], sizes = [2, 64], strides = [1, 1]} : vector<2x256xf32> to vector<2x64xf32>
    %59 = vector.extract_strided_slice %56 {offsets = [0, 128], sizes = [2, 64], strides = [1, 1]} : vector<2x256xf32> to vector<2x64xf32>
    %60 = vector.extract_strided_slice %55 {offsets = [0, 192], sizes = [2, 64], strides = [1, 1]} : vector<2x256xf32> to vector<2x64xf32>
    %61 = arith.mulf %58, %39 : vector<2x64xf32>
    %62 = arith.mulf %57, %59 : vector<2x64xf32>
    %63 = arith.addf %61, %62 : vector<2x64xf32>
    %64 = math.tanh %63 : vector<2x64xf32>
    %65 = arith.mulf %60, %64 : vector<2x64xf32>
    %66 = vector.extract_strided_slice %65 {offsets = [0, 0], sizes = [2, 32], strides = [1, 1]} : vector<2x64xf32> to vector<2x32xf32>
    %c2 = arith.constant 2 : index
    %c0_30 = arith.constant 0 : index
    %67 = vector.load %arg25[%c2, %c0_30] : memref<16x64xf32, #tpu.memory_space<vmem>>, vector<2x32xf32>
    tpu.vector_store %arg25[%c2, %c0_30], %66 {strides = array<i32>} : memref<16x64xf32, #tpu.memory_space<vmem>>, vector<2x32xf32>,
    %68 = vector.extract_strided_slice %65 {offsets = [0, 32], sizes = [2, 32], strides = [1, 1]} : vector<2x64xf32> to vector<2x32xf32>
    %c12 = arith.constant 12 : index
    %c32_31 = arith.constant 32 : index
    %69 = vector.load %arg25[%c12, %c32_31] : memref<16x64xf32, #tpu.memory_space<vmem>>, vector<2x32xf32>
    tpu.vector_store %arg25[%c12, %c32_31], %68 {strides = array<i32>} : memref<16x64xf32, #tpu.memory_space<vmem>>, vector<2x32xf32>,
    %70 = vector.extract_strided_slice %7 {offsets = [4, 0], sizes = [2, 256], strides = [1, 1]} : vector<16x256xf32> to vector<2x256xf32>
    %71 = vector.extract_strided_slice %14 {offsets = [10, 0], sizes = [2, 256], strides = [1, 1]} : vector<16x256xf32> to vector<2x256xf32>
    %72 = arith.addf %70, %71 : vector<2x256xf32>
    %cst_32 = arith.constant dense<0.000000e+00> : vector<2x256xf32>
    %73 = tpu.matmul %65, %17, %cst_32 {dimension_numbers = #tpu.dot_dimension_numbers<[1], [0], [0], [1], [0, 0, 1, 1], [], []>} : vector<2x64xf32>, vector<64x256xf32>, vector<2x256xf32> -> vector<2x256xf32>
    %74 = arith.addf %73, %72 : vector<2x256xf32>
    %75 = arith.negf %74 : vector<2x256xf32>
    %76 = math.exp %75 : vector<2x256xf32>
    %cst_33 = arith.constant 1.000000e+00 : f32
    %77 = vector.broadcast %cst_33 : f32 to vector<2x256xf32>
    %78 = arith.addf %77, %76 : vector<2x256xf32>
    %79 = arith.divf %77, %78 : vector<2x256xf32>
    %80 = math.tanh %74 : vector<2x256xf32>
    %81 = vector.extract_strided_slice %79 {offsets = [0, 0], sizes = [2, 64], strides = [1, 1]} : vector<2x256xf32> to vector<2x64xf32>
    %82 = vector.extract_strided_slice %79 {offsets = [0, 64], sizes = [2, 64], strides = [1, 1]} : vector<2x256xf32> to vector<2x64xf32>
    %83 = vector.extract_strided_slice %80 {offsets = [0, 128], sizes = [2, 64], strides = [1, 1]} : vector<2x256xf32> to vector<2x64xf32>
    %84 = vector.extract_strided_slice %79 {offsets = [0, 192], sizes = [2, 64], strides = [1, 1]} : vector<2x256xf32> to vector<2x64xf32>
    %85 = arith.mulf %82, %63 : vector<2x64xf32>
    %86 = arith.mulf %81, %83 : vector<2x64xf32>
    %87 = arith.addf %85, %86 : vector<2x64xf32>
    %88 = math.tanh %87 : vector<2x64xf32>
    %89 = arith.mulf %84, %88 : vector<2x64xf32>
    %90 = vector.extract_strided_slice %89 {offsets = [0, 0], sizes = [2, 32], strides = [1, 1]} : vector<2x64xf32> to vector<2x32xf32>
    %c4 = arith.constant 4 : index
    %c0_34 = arith.constant 0 : index
    %91 = vector.load %arg25[%c4, %c0_34] : memref<16x64xf32, #tpu.memory_space<vmem>>, vector<2x32xf32>
    tpu.vector_store %arg25[%c4, %c0_34], %90 {strides = array<i32>} : memref<16x64xf32, #tpu.memory_space<vmem>>, vector<2x32xf32>,
    %92 = vector.extract_strided_slice %89 {offsets = [0, 32], sizes = [2, 32], strides = [1, 1]} : vector<2x64xf32> to vector<2x32xf32>
    %c10 = arith.constant 10 : index
    %c32_35 = arith.constant 32 : index
    %93 = vector.load %arg25[%c10, %c32_35] : memref<16x64xf32, #tpu.memory_space<vmem>>, vector<2x32xf32>
    tpu.vector_store %arg25[%c10, %c32_35], %92 {strides = array<i32>} : memref<16x64xf32, #tpu.memory_space<vmem>>, vector<2x32xf32>,
    %94 = vector.extract_strided_slice %7 {offsets = [6, 0], sizes = [2, 256], strides = [1, 1]} : vector<16x256xf32> to vector<2x256xf32>
    %95 = vector.extract_strided_slice %14 {offsets = [8, 0], sizes = [2, 256], strides = [1, 1]} : vector<16x256xf32> to vector<2x256xf32>
    %96 = arith.addf %94, %95 : vector<2x256xf32>
    %cst_36 = arith.constant dense<0.000000e+00> : vector<2x256xf32>
    %97 = tpu.matmul %89, %17, %cst_36 {dimension_numbers = #tpu.dot_dimension_numbers<[1], [0], [0], [1], [0, 0, 1, 1], [], []>} : vector<2x64xf32>, vector<64x256xf32>, vector<2x256xf32> -> vector<2x256xf32>
    %98 = arith.addf %97, %96 : vector<2x256xf32>
    %99 = arith.negf %98 : vector<2x256xf32>
    %100 = math.exp %99 : vector<2x256xf32>
    %cst_37 = arith.constant 1.000000e+00 : f32
    %101 = vector.broadcast %cst_37 : f32 to vector<2x256xf32>
    %102 = arith.addf %101, %100 : vector<2x256xf32>
    %103 = arith.divf %101, %102 : vector<2x256xf32>
    %104 = math.tanh %98 : vector<2x256xf32>
    %105 = vector.extract_strided_slice %103 {offsets = [0, 0], sizes = [2, 64], strides = [1, 1]} : vector<2x256xf32> to vector<2x64xf32>
    %106 = vector.extract_strided_slice %103 {offsets = [0, 64], sizes = [2, 64], strides = [1, 1]} : vector<2x256xf32> to vector<2x64xf32>
    %107 = vector.extract_strided_slice %104 {offsets = [0, 128], sizes = [2, 64], strides = [1, 1]} : vector<2x256xf32> to vector<2x64xf32>
    %108 = vector.extract_strided_slice %103 {offsets = [0, 192], sizes = [2, 64], strides = [1, 1]} : vector<2x256xf32> to vector<2x64xf32>
    %109 = arith.mulf %106, %87 : vector<2x64xf32>
    %110 = arith.mulf %105, %107 : vector<2x64xf32>
    %111 = arith.addf %109, %110 : vector<2x64xf32>
    %112 = math.tanh %111 : vector<2x64xf32>
    %113 = arith.mulf %108, %112 : vector<2x64xf32>
    %114 = vector.extract_strided_slice %113 {offsets = [0, 0], sizes = [2, 32], strides = [1, 1]} : vector<2x64xf32> to vector<2x32xf32>
    %c6 = arith.constant 6 : index
    %c0_38 = arith.constant 0 : index
    %115 = vector.load %arg25[%c6, %c0_38] : memref<16x64xf32, #tpu.memory_space<vmem>>, vector<2x32xf32>
    tpu.vector_store %arg25[%c6, %c0_38], %114 {strides = array<i32>} : memref<16x64xf32, #tpu.memory_space<vmem>>, vector<2x32xf32>,
    %116 = vector.extract_strided_slice %113 {offsets = [0, 32], sizes = [2, 32], strides = [1, 1]} : vector<2x64xf32> to vector<2x32xf32>
    %c8 = arith.constant 8 : index
    %c32_39 = arith.constant 32 : index
    %117 = vector.load %arg25[%c8, %c32_39] : memref<16x64xf32, #tpu.memory_space<vmem>>, vector<2x32xf32>
    tpu.vector_store %arg25[%c8, %c32_39], %116 {strides = array<i32>} : memref<16x64xf32, #tpu.memory_space<vmem>>, vector<2x32xf32>,
    %118 = vector.extract_strided_slice %7 {offsets = [8, 0], sizes = [2, 256], strides = [1, 1]} : vector<16x256xf32> to vector<2x256xf32>
    %119 = vector.extract_strided_slice %14 {offsets = [6, 0], sizes = [2, 256], strides = [1, 1]} : vector<16x256xf32> to vector<2x256xf32>
    %120 = arith.addf %118, %119 : vector<2x256xf32>
    %cst_40 = arith.constant dense<0.000000e+00> : vector<2x256xf32>
    %121 = tpu.matmul %113, %17, %cst_40 {dimension_numbers = #tpu.dot_dimension_numbers<[1], [0], [0], [1], [0, 0, 1, 1], [], []>} : vector<2x64xf32>, vector<64x256xf32>, vector<2x256xf32> -> vector<2x256xf32>
    %122 = arith.addf %121, %120 : vector<2x256xf32>
    %123 = arith.negf %122 : vector<2x256xf32>
    %124 = math.exp %123 : vector<2x256xf32>
    %cst_41 = arith.constant 1.000000e+00 : f32
    %125 = vector.broadcast %cst_41 : f32 to vector<2x256xf32>
    %126 = arith.addf %125, %124 : vector<2x256xf32>
    %127 = arith.divf %125, %126 : vector<2x256xf32>
    %128 = math.tanh %122 : vector<2x256xf32>
    %129 = vector.extract_strided_slice %127 {offsets = [0, 0], sizes = [2, 64], strides = [1, 1]} : vector<2x256xf32> to vector<2x64xf32>
    %130 = vector.extract_strided_slice %127 {offsets = [0, 64], sizes = [2, 64], strides = [1, 1]} : vector<2x256xf32> to vector<2x64xf32>
    %131 = vector.extract_strided_slice %128 {offsets = [0, 128], sizes = [2, 64], strides = [1, 1]} : vector<2x256xf32> to vector<2x64xf32>
    %132 = vector.extract_strided_slice %127 {offsets = [0, 192], sizes = [2, 64], strides = [1, 1]} : vector<2x256xf32> to vector<2x64xf32>
    %133 = arith.mulf %130, %111 : vector<2x64xf32>
    %134 = arith.mulf %129, %131 : vector<2x64xf32>
    %135 = arith.addf %133, %134 : vector<2x64xf32>
    %136 = math.tanh %135 : vector<2x64xf32>
    %137 = arith.mulf %132, %136 : vector<2x64xf32>
    %138 = vector.extract_strided_slice %137 {offsets = [0, 0], sizes = [2, 32], strides = [1, 1]} : vector<2x64xf32> to vector<2x32xf32>
    %c8_42 = arith.constant 8 : index
    %c0_43 = arith.constant 0 : index
    %139 = vector.load %arg25[%c8_42, %c0_43] : memref<16x64xf32, #tpu.memory_space<vmem>>, vector<2x32xf32>
    tpu.vector_store %arg25[%c8_42, %c0_43], %138 {strides = array<i32>} : memref<16x64xf32, #tpu.memory_space<vmem>>, vector<2x32xf32>,
    %140 = vector.extract_strided_slice %137 {offsets = [0, 32], sizes = [2, 32], strides = [1, 1]} : vector<2x64xf32> to vector<2x32xf32>
    %c6_44 = arith.constant 6 : index
    %c32_45 = arith.constant 32 : index
    %141 = vector.load %arg25[%c6_44, %c32_45] : memref<16x64xf32, #tpu.memory_space<vmem>>, vector<2x32xf32>
    tpu.vector_store %arg25[%c6_44, %c32_45], %140 {strides = array<i32>} : memref<16x64xf32, #tpu.memory_space<vmem>>, vector<2x32xf32>,
    %142 = vector.extract_strided_slice %7 {offsets = [10, 0], sizes = [2, 256], strides = [1, 1]} : vector<16x256xf32> to vector<2x256xf32>
    %143 = vector.extract_strided_slice %14 {offsets = [4, 0], sizes = [2, 256], strides = [1, 1]} : vector<16x256xf32> to vector<2x256xf32>
    %144 = arith.addf %142, %143 : vector<2x256xf32>
    %cst_46 = arith.constant dense<0.000000e+00> : vector<2x256xf32>
    %145 = tpu.matmul %137, %17, %cst_46 {dimension_numbers = #tpu.dot_dimension_numbers<[1], [0], [0], [1], [0, 0, 1, 1], [], []>} : vector<2x64xf32>, vector<64x256xf32>, vector<2x256xf32> -> vector<2x256xf32>
    %146 = arith.addf %145, %144 : vector<2x256xf32>
    %147 = arith.negf %146 : vector<2x256xf32>
    %148 = math.exp %147 : vector<2x256xf32>
    %cst_47 = arith.constant 1.000000e+00 : f32
    %149 = vector.broadcast %cst_47 : f32 to vector<2x256xf32>
    %150 = arith.addf %149, %148 : vector<2x256xf32>
    %151 = arith.divf %149, %150 : vector<2x256xf32>
    %152 = math.tanh %146 : vector<2x256xf32>
    %153 = vector.extract_strided_slice %151 {offsets = [0, 0], sizes = [2, 64], strides = [1, 1]} : vector<2x256xf32> to vector<2x64xf32>
    %154 = vector.extract_strided_slice %151 {offsets = [0, 64], sizes = [2, 64], strides = [1, 1]} : vector<2x256xf32> to vector<2x64xf32>
    %155 = vector.extract_strided_slice %152 {offsets = [0, 128], sizes = [2, 64], strides = [1, 1]} : vector<2x256xf32> to vector<2x64xf32>
    %156 = vector.extract_strided_slice %151 {offsets = [0, 192], sizes = [2, 64], strides = [1, 1]} : vector<2x256xf32> to vector<2x64xf32>
    %157 = arith.mulf %154, %135 : vector<2x64xf32>
    %158 = arith.mulf %153, %155 : vector<2x64xf32>
    %159 = arith.addf %157, %158 : vector<2x64xf32>
    %160 = math.tanh %159 : vector<2x64xf32>
    %161 = arith.mulf %156, %160 : vector<2x64xf32>
    %162 = vector.extract_strided_slice %161 {offsets = [0, 0], sizes = [2, 32], strides = [1, 1]} : vector<2x64xf32> to vector<2x32xf32>
    %c10_48 = arith.constant 10 : index
    %c0_49 = arith.constant 0 : index
    %163 = vector.load %arg25[%c10_48, %c0_49] : memref<16x64xf32, #tpu.memory_space<vmem>>, vector<2x32xf32>
    tpu.vector_store %arg25[%c10_48, %c0_49], %162 {strides = array<i32>} : memref<16x64xf32, #tpu.memory_space<vmem>>, vector<2x32xf32>,
    %164 = vector.extract_strided_slice %161 {offsets = [0, 32], sizes = [2, 32], strides = [1, 1]} : vector<2x64xf32> to vector<2x32xf32>
    %c4_50 = arith.constant 4 : index
    %c32_51 = arith.constant 32 : index
    %165 = vector.load %arg25[%c4_50, %c32_51] : memref<16x64xf32, #tpu.memory_space<vmem>>, vector<2x32xf32>
    tpu.vector_store %arg25[%c4_50, %c32_51], %164 {strides = array<i32>} : memref<16x64xf32, #tpu.memory_space<vmem>>, vector<2x32xf32>,
    %166 = vector.extract_strided_slice %7 {offsets = [12, 0], sizes = [2, 256], strides = [1, 1]} : vector<16x256xf32> to vector<2x256xf32>
    %167 = vector.extract_strided_slice %14 {offsets = [2, 0], sizes = [2, 256], strides = [1, 1]} : vector<16x256xf32> to vector<2x256xf32>
    %168 = arith.addf %166, %167 : vector<2x256xf32>
    %cst_52 = arith.constant dense<0.000000e+00> : vector<2x256xf32>
    %169 = tpu.matmul %161, %17, %cst_52 {dimension_numbers = #tpu.dot_dimension_numbers<[1], [0], [0], [1], [0, 0, 1, 1], [], []>} : vector<2x64xf32>, vector<64x256xf32>, vector<2x256xf32> -> vector<2x256xf32>
    %170 = arith.addf %169, %168 : vector<2x256xf32>
    %171 = arith.negf %170 : vector<2x256xf32>
    %172 = math.exp %171 : vector<2x256xf32>
    %cst_53 = arith.constant 1.000000e+00 : f32
    %173 = vector.broadcast %cst_53 : f32 to vector<2x256xf32>
    %174 = arith.addf %173, %172 : vector<2x256xf32>
    %175 = arith.divf %173, %174 : vector<2x256xf32>
    %176 = math.tanh %170 : vector<2x256xf32>
    %177 = vector.extract_strided_slice %175 {offsets = [0, 0], sizes = [2, 64], strides = [1, 1]} : vector<2x256xf32> to vector<2x64xf32>
    %178 = vector.extract_strided_slice %175 {offsets = [0, 64], sizes = [2, 64], strides = [1, 1]} : vector<2x256xf32> to vector<2x64xf32>
    %179 = vector.extract_strided_slice %176 {offsets = [0, 128], sizes = [2, 64], strides = [1, 1]} : vector<2x256xf32> to vector<2x64xf32>
    %180 = vector.extract_strided_slice %175 {offsets = [0, 192], sizes = [2, 64], strides = [1, 1]} : vector<2x256xf32> to vector<2x64xf32>
    %181 = arith.mulf %178, %159 : vector<2x64xf32>
    %182 = arith.mulf %177, %179 : vector<2x64xf32>
    %183 = arith.addf %181, %182 : vector<2x64xf32>
    %184 = math.tanh %183 : vector<2x64xf32>
    %185 = arith.mulf %180, %184 : vector<2x64xf32>
    %186 = vector.extract_strided_slice %185 {offsets = [0, 0], sizes = [2, 32], strides = [1, 1]} : vector<2x64xf32> to vector<2x32xf32>
    %c12_54 = arith.constant 12 : index
    %c0_55 = arith.constant 0 : index
    %187 = vector.load %arg25[%c12_54, %c0_55] : memref<16x64xf32, #tpu.memory_space<vmem>>, vector<2x32xf32>
    tpu.vector_store %arg25[%c12_54, %c0_55], %186 {strides = array<i32>} : memref<16x64xf32, #tpu.memory_space<vmem>>, vector<2x32xf32>,
    %188 = vector.extract_strided_slice %185 {offsets = [0, 32], sizes = [2, 32], strides = [1, 1]} : vector<2x64xf32> to vector<2x32xf32>
    %c2_56 = arith.constant 2 : index
    %c32_57 = arith.constant 32 : index
    %189 = vector.load %arg25[%c2_56, %c32_57] : memref<16x64xf32, #tpu.memory_space<vmem>>, vector<2x32xf32>
    tpu.vector_store %arg25[%c2_56, %c32_57], %188 {strides = array<i32>} : memref<16x64xf32, #tpu.memory_space<vmem>>, vector<2x32xf32>,
    %190 = vector.extract_strided_slice %7 {offsets = [14, 0], sizes = [2, 256], strides = [1, 1]} : vector<16x256xf32> to vector<2x256xf32>
    %191 = vector.extract_strided_slice %14 {offsets = [0, 0], sizes = [2, 256], strides = [1, 1]} : vector<16x256xf32> to vector<2x256xf32>
    %192 = arith.addf %190, %191 : vector<2x256xf32>
    %cst_58 = arith.constant dense<0.000000e+00> : vector<2x256xf32>
    %193 = tpu.matmul %185, %17, %cst_58 {dimension_numbers = #tpu.dot_dimension_numbers<[1], [0], [0], [1], [0, 0, 1, 1], [], []>} : vector<2x64xf32>, vector<64x256xf32>, vector<2x256xf32> -> vector<2x256xf32>
    %194 = arith.addf %193, %192 : vector<2x256xf32>
    %195 = arith.negf %194 : vector<2x256xf32>
    %196 = math.exp %195 : vector<2x256xf32>
    %cst_59 = arith.constant 1.000000e+00 : f32
    %197 = vector.broadcast %cst_59 : f32 to vector<2x256xf32>
    %198 = arith.addf %197, %196 : vector<2x256xf32>
    %199 = arith.divf %197, %198 : vector<2x256xf32>
    %200 = math.tanh %194 : vector<2x256xf32>
    %201 = vector.extract_strided_slice %199 {offsets = [0, 0], sizes = [2, 64], strides = [1, 1]} : vector<2x256xf32> to vector<2x64xf32>
    %202 = vector.extract_strided_slice %199 {offsets = [0, 64], sizes = [2, 64], strides = [1, 1]} : vector<2x256xf32> to vector<2x64xf32>
    %203 = vector.extract_strided_slice %200 {offsets = [0, 128], sizes = [2, 64], strides = [1, 1]} : vector<2x256xf32> to vector<2x64xf32>
    %204 = vector.extract_strided_slice %199 {offsets = [0, 192], sizes = [2, 64], strides = [1, 1]} : vector<2x256xf32> to vector<2x64xf32>
    %205 = arith.mulf %202, %183 : vector<2x64xf32>
    %206 = arith.mulf %201, %203 : vector<2x64xf32>
    %207 = arith.addf %205, %206 : vector<2x64xf32>
    %208 = math.tanh %207 : vector<2x64xf32>
    %209 = arith.mulf %204, %208 : vector<2x64xf32>
    %210 = vector.extract_strided_slice %209 {offsets = [0, 0], sizes = [2, 32], strides = [1, 1]} : vector<2x64xf32> to vector<2x32xf32>
    %c14_60 = arith.constant 14 : index
    %c0_61 = arith.constant 0 : index
    %211 = vector.load %arg25[%c14_60, %c0_61] : memref<16x64xf32, #tpu.memory_space<vmem>>, vector<2x32xf32>
    tpu.vector_store %arg25[%c14_60, %c0_61], %210 {strides = array<i32>} : memref<16x64xf32, #tpu.memory_space<vmem>>, vector<2x32xf32>,
    %212 = vector.extract_strided_slice %209 {offsets = [0, 32], sizes = [2, 32], strides = [1, 1]} : vector<2x64xf32> to vector<2x32xf32>
    %c0_62 = arith.constant 0 : index
    %c32_63 = arith.constant 32 : index
    %213 = vector.load %arg25[%c0_62, %c32_63] : memref<16x64xf32, #tpu.memory_space<vmem>>, vector<2x32xf32>
    tpu.vector_store %arg25[%c0_62, %c32_63], %212 {strides = array<i32>} : memref<16x64xf32, #tpu.memory_space<vmem>>, vector<2x32xf32>,
    %c0_64 = arith.constant 0 : index
    %c0_65 = arith.constant 0 : index
    %214 = vector.load %arg7[%c0_64, %c0_65] : memref<32x64xf32, #tpu.memory_space<vmem>>, vector<32x64xf32>
    %c0_66 = arith.constant 0 : index
    %c0_67 = arith.constant 0 : index
    %215 = vector.load %arg8[%c0_66, %c0_67] : memref<1x64xf32, #tpu.memory_space<vmem>>, vector<1x64xf32>
    %216 = vector.extract_strided_slice %209 {offsets = [0, 0], sizes = [2, 32], strides = [1, 1]} : vector<2x64xf32> to vector<2x32xf32>
    %cst_68 = arith.constant dense<0.000000e+00> : vector<2x64xf32>
    %217 = tpu.matmul %216, %214, %cst_68 {dimension_numbers = #tpu.dot_dimension_numbers<[1], [0], [0], [1], [0, 0, 1, 1], [], []>} : vector<2x32xf32>, vector<32x64xf32>, vector<2x64xf32> -> vector<2x64xf32>
    %218 = vector.broadcast %215 : vector<1x64xf32> to vector<2x64xf32>
    %219 = arith.addf %217, %218 : vector<2x64xf32>
    %220 = vector.extract_strided_slice %219 {offsets = [0, 0], sizes = [2, 32], strides = [1, 1]} : vector<2x64xf32> to vector<2x32xf32>
    %221 = vector.extract_strided_slice %219 {offsets = [0, 32], sizes = [2, 32], strides = [1, 1]} : vector<2x64xf32> to vector<2x32xf32>
    %c0_69 = arith.constant 0 : index
    %c0_70 = arith.constant 0 : index
    %c0_71 = arith.constant 0 : index
    %222 = vector.load %arg16[%c0_69, %c0_70, %c0_71] : memref<2x2x32xf32, #tpu.memory_space<vmem>>, vector<1x2x32xf32>
    %223 = vector.shape_cast %222 : vector<1x2x32xf32> to vector<2x32xf32>
    %cst_72 = arith.constant 5.000000e-01 : f32
    %224 = vector.broadcast %cst_72 : f32 to vector<2x32xf32>
    %225 = arith.mulf %224, %221 : vector<2x32xf32>
    %226 = math.exp %225 : vector<2x32xf32>
    %227 = arith.mulf %223, %226 : vector<2x32xf32>
    %228 = arith.addf %220, %227 : vector<2x32xf32>
    %c0_73 = arith.constant 0 : index
    %c0_74 = arith.constant 0 : index
    %c0_75 = arith.constant 0 : index
    %229 = vector.load %arg21[%c0_73, %c0_74, %c0_75] : memref<2x2x32xf32, #tpu.memory_space<vmem>>, vector<1x2x32xf32>
    %230 = vector.shape_cast %229 : vector<1x2x32xf32> to vector<2x32xf32>
    %231 = vector.shape_cast %220 : vector<2x32xf32> to vector<1x2x32xf32>
    tpu.vector_store %arg21[%c0_73, %c0_74, %c0_75], %231 {strides = array<i32>} : memref<2x2x32xf32, #tpu.memory_space<vmem>>, vector<1x2x32xf32>,
    %c0_76 = arith.constant 0 : index
    %c0_77 = arith.constant 0 : index
    %c0_78 = arith.constant 0 : index
    %232 = vector.load %arg23[%c0_76, %c0_77, %c0_78] : memref<2x2x32xf32, #tpu.memory_space<vmem>>, vector<1x2x32xf32>
    %233 = vector.shape_cast %232 : vector<1x2x32xf32> to vector<2x32xf32>
    %234 = vector.shape_cast %221 : vector<2x32xf32> to vector<1x2x32xf32>
    tpu.vector_store %arg23[%c0_76, %c0_77, %c0_78], %234 {strides = array<i32>} : memref<2x2x32xf32, #tpu.memory_space<vmem>>, vector<1x2x32xf32>,
    %c0_79 = arith.constant 0 : index
    %c0_80 = arith.constant 0 : index
    %c0_81 = arith.constant 0 : index
    %235 = vector.load %arg19[%c0_79, %c0_80, %c0_81] : memref<2x2x32xf32, #tpu.memory_space<vmem>>, vector<1x2x32xf32>
    %236 = vector.shape_cast %235 : vector<1x2x32xf32> to vector<2x32xf32>
    %237 = vector.shape_cast %228 : vector<2x32xf32> to vector<1x2x32xf32>
    tpu.vector_store %arg19[%c0_79, %c0_80, %c0_81], %237 {strides = array<i32>} : memref<2x2x32xf32, #tpu.memory_space<vmem>>, vector<1x2x32xf32>,
    %238 = vector.extract_strided_slice %209 {offsets = [0, 32], sizes = [2, 32], strides = [1, 1]} : vector<2x64xf32> to vector<2x32xf32>
    %cst_82 = arith.constant dense<0.000000e+00> : vector<2x64xf32>
    %239 = tpu.matmul %238, %214, %cst_82 {dimension_numbers = #tpu.dot_dimension_numbers<[1], [0], [0], [1], [0, 0, 1, 1], [], []>} : vector<2x32xf32>, vector<32x64xf32>, vector<2x64xf32> -> vector<2x64xf32>
    %240 = vector.broadcast %215 : vector<1x64xf32> to vector<2x64xf32>
    %241 = arith.addf %239, %240 : vector<2x64xf32>
    %242 = vector.extract_strided_slice %241 {offsets = [0, 0], sizes = [2, 32], strides = [1, 1]} : vector<2x64xf32> to vector<2x32xf32>
    %243 = vector.extract_strided_slice %241 {offsets = [0, 32], sizes = [2, 32], strides = [1, 1]} : vector<2x64xf32> to vector<2x32xf32>
    %c1_83 = arith.constant 1 : index
    %c0_84 = arith.constant 0 : index
    %c0_85 = arith.constant 0 : index
    %244 = vector.load %arg16[%c1_83, %c0_84, %c0_85] : memref<2x2x32xf32, #tpu.memory_space<vmem>>, vector<1x2x32xf32>
    %245 = vector.shape_cast %244 : vector<1x2x32xf32> to vector<2x32xf32>
    %cst_86 = arith.constant 5.000000e-01 : f32
    %246 = vector.broadcast %cst_86 : f32 to vector<2x32xf32>
    %247 = arith.mulf %246, %243 : vector<2x32xf32>
    %248 = math.exp %247 : vector<2x32xf32>
    %249 = arith.mulf %245, %248 : vector<2x32xf32>
    %250 = arith.addf %242, %249 : vector<2x32xf32>
    %c1_87 = arith.constant 1 : index
    %c0_88 = arith.constant 0 : index
    %c0_89 = arith.constant 0 : index
    %251 = vector.load %arg21[%c1_87, %c0_88, %c0_89] : memref<2x2x32xf32, #tpu.memory_space<vmem>>, vector<1x2x32xf32>
    %252 = vector.shape_cast %251 : vector<1x2x32xf32> to vector<2x32xf32>
    %253 = vector.shape_cast %242 : vector<2x32xf32> to vector<1x2x32xf32>
    tpu.vector_store %arg21[%c1_87, %c0_88, %c0_89], %253 {strides = array<i32>} : memref<2x2x32xf32, #tpu.memory_space<vmem>>, vector<1x2x32xf32>,
    %c1_90 = arith.constant 1 : index
    %c0_91 = arith.constant 0 : index
    %c0_92 = arith.constant 0 : index
    %254 = vector.load %arg23[%c1_90, %c0_91, %c0_92] : memref<2x2x32xf32, #tpu.memory_space<vmem>>, vector<1x2x32xf32>
    %255 = vector.shape_cast %254 : vector<1x2x32xf32> to vector<2x32xf32>
    %256 = vector.shape_cast %243 : vector<2x32xf32> to vector<1x2x32xf32>
    tpu.vector_store %arg23[%c1_90, %c0_91, %c0_92], %256 {strides = array<i32>} : memref<2x2x32xf32, #tpu.memory_space<vmem>>, vector<1x2x32xf32>,
    %c1_93 = arith.constant 1 : index
    %c0_94 = arith.constant 0 : index
    %c0_95 = arith.constant 0 : index
    %257 = vector.load %arg19[%c1_93, %c0_94, %c0_95] : memref<2x2x32xf32, #tpu.memory_space<vmem>>, vector<1x2x32xf32>
    %258 = vector.shape_cast %257 : vector<1x2x32xf32> to vector<2x32xf32>
    %259 = vector.shape_cast %250 : vector<2x32xf32> to vector<1x2x32xf32>
    tpu.vector_store %arg19[%c1_93, %c0_94, %c0_95], %259 {strides = array<i32>} : memref<2x2x32xf32, #tpu.memory_space<vmem>>, vector<1x2x32xf32>,
    %260 = tpu.concatenate %228, %250 in 1 : vector<2x32xf32>, vector<2x32xf32> -> vector<2x64xf32>
    %c0_96 = arith.constant 0 : index
    %c0_97 = arith.constant 0 : index
    %261 = vector.load %arg25[%c0_96, %c0_97] : memref<16x64xf32, #tpu.memory_space<vmem>>, vector<16x64xf32>
    %c0_98 = arith.constant 0 : index
    %c0_99 = arith.constant 0 : index
    %262 = vector.load %arg9[%c0_98, %c0_99] : memref<64x128xf32, #tpu.memory_space<vmem>>, vector<64x128xf32>
    %cst_100 = arith.constant dense<0.000000e+00> : vector<16x128xf32>
    %263 = tpu.matmul %261, %262, %cst_100 {dimension_numbers = #tpu.dot_dimension_numbers<[1], [0], [0], [1], [0, 0, 1, 1], [], []>} : vector<16x64xf32>, vector<64x128xf32>, vector<16x128xf32> -> vector<16x128xf32>
    %c0_101 = arith.constant 0 : index
    %c0_102 = arith.constant 0 : index
    %264 = vector.load %arg10[%c0_101, %c0_102] : memref<1x128xf32, #tpu.memory_space<vmem>>, vector<1x128xf32>
    %265 = vector.broadcast %264 : vector<1x128xf32> to vector<16x128xf32>
    %266 = arith.addf %263, %265 : vector<16x128xf32>
    %267 = vector.extract_strided_slice %266 {offsets = [0, 0], sizes = [16, 64], strides = [1, 1]} : vector<16x128xf32> to vector<16x64xf32>
    %268 = vector.extract_strided_slice %266 {offsets = [0, 64], sizes = [16, 64], strides = [1, 1]} : vector<16x128xf32> to vector<16x64xf32>
    %c0_103 = arith.constant 0 : index
    %c0_104 = arith.constant 0 : index
    %269 = vector.load %arg17[%c0_103, %c0_104] : memref<16x64xf32, #tpu.memory_space<vmem>>, vector<16x64xf32>
    %cst_105 = arith.constant 5.000000e-01 : f32
    %270 = vector.broadcast %cst_105 : f32 to vector<16x64xf32>
    %271 = arith.mulf %270, %268 : vector<16x64xf32>
    %272 = math.exp %271 : vector<16x64xf32>
    %273 = arith.mulf %269, %272 : vector<16x64xf32>
    %274 = arith.addf %267, %273 : vector<16x64xf32>
    %c0_106 = arith.constant 0 : index
    %c0_107 = arith.constant 0 : index
    %275 = vector.load %arg22[%c0_106, %c0_107] : memref<16x64xf32, #tpu.memory_space<vmem>>, vector<16x64xf32>
    tpu.vector_store %arg22[%c0_106, %c0_107], %267 {strides = array<i32>} : memref<16x64xf32, #tpu.memory_space<vmem>>, vector<16x64xf32>,
    %c0_108 = arith.constant 0 : index
    %c0_109 = arith.constant 0 : index
    %276 = vector.load %arg24[%c0_108, %c0_109] : memref<16x64xf32, #tpu.memory_space<vmem>>, vector<16x64xf32>
    tpu.vector_store %arg24[%c0_108, %c0_109], %268 {strides = array<i32>} : memref<16x64xf32, #tpu.memory_space<vmem>>, vector<16x64xf32>,
    %c0_110 = arith.constant 0 : index
    %c0_111 = arith.constant 0 : index
    %277 = vector.load %arg20[%c0_110, %c0_111] : memref<16x64xf32, #tpu.memory_space<vmem>>, vector<16x64xf32>
    tpu.vector_store %arg20[%c0_110, %c0_111], %274 {strides = array<i32>} : memref<16x64xf32, #tpu.memory_space<vmem>>, vector<16x64xf32>,
    %c1_112 = arith.constant 1 : index
    %c0_113 = arith.constant 0 : index
    %c0_114 = arith.constant 0 : index
    %278 = vector.load %arg11[%c1_112, %c0_113, %c0_114] : memref<2x64x64xf32, #tpu.memory_space<vmem>>, vector<1x64x64xf32>
    %279 = vector.shape_cast %278 : vector<1x64x64xf32> to vector<64x64xf32>
    %cst_115 = arith.constant dense<0.000000e+00> : vector<16x64xf32>
    %280 = tpu.matmul %274, %279, %cst_115 {dimension_numbers = #tpu.dot_dimension_numbers<[1], [0], [0], [1], [0, 0, 1, 1], [], []>} : vector<16x64xf32>, vector<64x64xf32>, vector<16x64xf32> -> vector<16x64xf32>
    %c1_116 = arith.constant 1 : index
    %c0_117 = arith.constant 0 : index
    %c0_118 = arith.constant 0 : index
    %281 = vector.load %arg12[%c1_116, %c0_117, %c0_118] : memref<2x1x64xf32, #tpu.memory_space<vmem>>, vector<1x1x64xf32>
    %282 = vector.shape_cast %281 : vector<1x1x64xf32> to vector<1x64xf32>
    %283 = vector.broadcast %282 : vector<1x64xf32> to vector<16x64xf32>
    %284 = arith.addf %280, %283 : vector<16x64xf32>
    %c0_119 = arith.constant 0 : index
    %c0_120 = arith.constant 0 : index
    %c0_121 = arith.constant 0 : index
    %285 = vector.load %arg11[%c0_119, %c0_120, %c0_121] : memref<2x64x64xf32, #tpu.memory_space<vmem>>, vector<1x64x64xf32>
    %286 = vector.shape_cast %285 : vector<1x64x64xf32> to vector<64x64xf32>
    %c0_122 = arith.constant 0 : index
    %c0_123 = arith.constant 0 : index
    %c0_124 = arith.constant 0 : index
    %287 = vector.load %arg12[%c0_122, %c0_123, %c0_124] : memref<2x1x64xf32, #tpu.memory_space<vmem>>, vector<1x1x64xf32>
    %288 = vector.shape_cast %287 : vector<1x1x64xf32> to vector<1x64xf32>
    %c0_125 = arith.constant 0 : index
    %c0_126 = arith.constant 0 : index
    %289 = vector.load %arg13[%c0_125, %c0_126] : memref<1x64xf32, #tpu.memory_space<vmem>>, vector<1x64xf32>
    %290 = vector.extract_strided_slice %284 {offsets = [0, 0], sizes = [2, 64], strides = [1, 1]} : vector<16x64xf32> to vector<2x64xf32>
    %291 = vector.extract_strided_slice %284 {offsets = [2, 0], sizes = [2, 64], strides = [1, 1]} : vector<16x64xf32> to vector<2x64xf32>
    %292 = vector.extract_strided_slice %284 {offsets = [4, 0], sizes = [2, 64], strides = [1, 1]} : vector<16x64xf32> to vector<2x64xf32>
    %293 = vector.extract_strided_slice %284 {offsets = [6, 0], sizes = [2, 64], strides = [1, 1]} : vector<16x64xf32> to vector<2x64xf32>
    %294 = vector.extract_strided_slice %284 {offsets = [8, 0], sizes = [2, 64], strides = [1, 1]} : vector<16x64xf32> to vector<2x64xf32>
    %295 = vector.extract_strided_slice %284 {offsets = [10, 0], sizes = [2, 64], strides = [1, 1]} : vector<16x64xf32> to vector<2x64xf32>
    %296 = vector.extract_strided_slice %284 {offsets = [12, 0], sizes = [2, 64], strides = [1, 1]} : vector<16x64xf32> to vector<2x64xf32>
    %297 = vector.extract_strided_slice %284 {offsets = [14, 0], sizes = [2, 64], strides = [1, 1]} : vector<16x64xf32> to vector<2x64xf32>
    %298 = vector.extract_strided_slice %274 {offsets = [0, 0], sizes = [2, 64], strides = [1, 1]} : vector<16x64xf32> to vector<2x64xf32>
    %299 = vector.extract_strided_slice %274 {offsets = [2, 0], sizes = [2, 64], strides = [1, 1]} : vector<16x64xf32> to vector<2x64xf32>
    %300 = vector.extract_strided_slice %274 {offsets = [4, 0], sizes = [2, 64], strides = [1, 1]} : vector<16x64xf32> to vector<2x64xf32>
    %301 = vector.extract_strided_slice %274 {offsets = [6, 0], sizes = [2, 64], strides = [1, 1]} : vector<16x64xf32> to vector<2x64xf32>
    %302 = vector.extract_strided_slice %274 {offsets = [8, 0], sizes = [2, 64], strides = [1, 1]} : vector<16x64xf32> to vector<2x64xf32>
    %303 = vector.extract_strided_slice %274 {offsets = [10, 0], sizes = [2, 64], strides = [1, 1]} : vector<16x64xf32> to vector<2x64xf32>
    %304 = vector.extract_strided_slice %274 {offsets = [12, 0], sizes = [2, 64], strides = [1, 1]} : vector<16x64xf32> to vector<2x64xf32>
    %305 = vector.extract_strided_slice %274 {offsets = [14, 0], sizes = [2, 64], strides = [1, 1]} : vector<16x64xf32> to vector<2x64xf32>
    %c0_127 = arith.constant 0 : index
    %c0_128 = arith.constant 0 : index
    %306 = vector.load %arg14[%c0_127, %c0_128] : memref<128x16xf32, #tpu.memory_space<vmem>>, vector<128x16xf32>
    %c0_129 = arith.constant 0 : index
    %c0_130 = arith.constant 0 : index
    %307 = vector.load %arg15[%c0_129, %c0_130] : memref<1x16xf32, #tpu.memory_space<vmem>>, vector<1x16xf32>
    %cst_131 = arith.constant 0.000000e+00 : f32
    %308 = vector.broadcast %cst_131 : f32 to vector<2x64xf32>
    %cst_132 = arith.constant dense<0.000000e+00> : vector<2x64xf32>
    %309 = tpu.matmul %260, %286, %cst_132 {dimension_numbers = #tpu.dot_dimension_numbers<[1], [0], [0], [1], [0, 0, 1, 1], [], []>} : vector<2x64xf32>, vector<64x64xf32>, vector<2x64xf32> -> vector<2x64xf32>
    %310 = vector.broadcast %288 : vector<1x64xf32> to vector<2x64xf32>
    %311 = arith.addf %309, %310 : vector<2x64xf32>
    %312 = arith.addf %311, %290 : vector<2x64xf32>
    %313 = math.tanh %312 : vector<2x64xf32>
    %314 = vector.broadcast %289 : vector<1x64xf32> to vector<2x64xf32>
    %315 = arith.mulf %313, %314 : vector<2x64xf32>
    %cst_133 = arith.constant dense<0.000000e+00> : vector<2xf32>
    %316 = vector.multi_reduction <add>, %315, %cst_133 [1] : vector<2x64xf32> to vector<2xf32>
    %317 = vector.shape_cast %316 : vector<2xf32> to vector<2x1xf32>
    %318 = arith.addf %311, %291 : vector<2x64xf32>
    %319 = math.tanh %318 : vector<2x64xf32>
    %320 = vector.broadcast %289 : vector<1x64xf32> to vector<2x64xf32>
    %321 = arith.mulf %319, %320 : vector<2x64xf32>
    %cst_134 = arith.constant dense<0.000000e+00> : vector<2xf32>
    %322 = vector.multi_reduction <add>, %321, %cst_134 [1] : vector<2x64xf32> to vector<2xf32>
    %323 = vector.shape_cast %322 : vector<2xf32> to vector<2x1xf32>
    %324 = arith.addf %311, %292 : vector<2x64xf32>
    %325 = math.tanh %324 : vector<2x64xf32>
    %326 = vector.broadcast %289 : vector<1x64xf32> to vector<2x64xf32>
    %327 = arith.mulf %325, %326 : vector<2x64xf32>
    %cst_135 = arith.constant dense<0.000000e+00> : vector<2xf32>
    %328 = vector.multi_reduction <add>, %327, %cst_135 [1] : vector<2x64xf32> to vector<2xf32>
    %329 = vector.shape_cast %328 : vector<2xf32> to vector<2x1xf32>
    %330 = arith.addf %311, %293 : vector<2x64xf32>
    %331 = math.tanh %330 : vector<2x64xf32>
    %332 = vector.broadcast %289 : vector<1x64xf32> to vector<2x64xf32>
    %333 = arith.mulf %331, %332 : vector<2x64xf32>
    %cst_136 = arith.constant dense<0.000000e+00> : vector<2xf32>
    %334 = vector.multi_reduction <add>, %333, %cst_136 [1] : vector<2x64xf32> to vector<2xf32>
    %335 = vector.shape_cast %334 : vector<2xf32> to vector<2x1xf32>
    %336 = arith.addf %311, %294 : vector<2x64xf32>
    %337 = math.tanh %336 : vector<2x64xf32>
    %338 = vector.broadcast %289 : vector<1x64xf32> to vector<2x64xf32>
    %339 = arith.mulf %337, %338 : vector<2x64xf32>
    %cst_137 = arith.constant dense<0.000000e+00> : vector<2xf32>
    %340 = vector.multi_reduction <add>, %339, %cst_137 [1] : vector<2x64xf32> to vector<2xf32>
    %341 = vector.shape_cast %340 : vector<2xf32> to vector<2x1xf32>
    %342 = arith.addf %311, %295 : vector<2x64xf32>
    %343 = math.tanh %342 : vector<2x64xf32>
    %344 = vector.broadcast %289 : vector<1x64xf32> to vector<2x64xf32>
    %345 = arith.mulf %343, %344 : vector<2x64xf32>
    %cst_138 = arith.constant dense<0.000000e+00> : vector<2xf32>
    %346 = vector.multi_reduction <add>, %345, %cst_138 [1] : vector<2x64xf32> to vector<2xf32>
    %347 = vector.shape_cast %346 : vector<2xf32> to vector<2x1xf32>
    %348 = arith.addf %311, %296 : vector<2x64xf32>
    %349 = math.tanh %348 : vector<2x64xf32>
    %350 = vector.broadcast %289 : vector<1x64xf32> to vector<2x64xf32>
    %351 = arith.mulf %349, %350 : vector<2x64xf32>
    %cst_139 = arith.constant dense<0.000000e+00> : vector<2xf32>
    %352 = vector.multi_reduction <add>, %351, %cst_139 [1] : vector<2x64xf32> to vector<2xf32>
    %353 = vector.shape_cast %352 : vector<2xf32> to vector<2x1xf32>
    %354 = arith.addf %311, %297 : vector<2x64xf32>
    %355 = math.tanh %354 : vector<2x64xf32>
    %356 = vector.broadcast %289 : vector<1x64xf32> to vector<2x64xf32>
    %357 = arith.mulf %355, %356 : vector<2x64xf32>
    %cst_140 = arith.constant dense<0.000000e+00> : vector<2xf32>
    %358 = vector.multi_reduction <add>, %357, %cst_140 [1] : vector<2x64xf32> to vector<2xf32>
    %359 = vector.shape_cast %358 : vector<2xf32> to vector<2x1xf32>
    %360 = arith.maximumf %317, %323 : vector<2x1xf32>
    %361 = arith.maximumf %360, %329 : vector<2x1xf32>
    %362 = arith.maximumf %361, %335 : vector<2x1xf32>
    %363 = arith.maximumf %362, %341 : vector<2x1xf32>
    %364 = arith.maximumf %363, %347 : vector<2x1xf32>
    %365 = arith.maximumf %364, %353 : vector<2x1xf32>
    %366 = arith.maximumf %365, %359 : vector<2x1xf32>
    %367 = arith.subf %317, %366 : vector<2x1xf32>
    %368 = math.exp %367 : vector<2x1xf32>
    %369 = arith.subf %323, %366 : vector<2x1xf32>
    %370 = math.exp %369 : vector<2x1xf32>
    %371 = arith.subf %329, %366 : vector<2x1xf32>
    %372 = math.exp %371 : vector<2x1xf32>
    %373 = arith.subf %335, %366 : vector<2x1xf32>
    %374 = math.exp %373 : vector<2x1xf32>
    %375 = arith.subf %341, %366 : vector<2x1xf32>
    %376 = math.exp %375 : vector<2x1xf32>
    %377 = arith.subf %347, %366 : vector<2x1xf32>
    %378 = math.exp %377 : vector<2x1xf32>
    %379 = arith.subf %353, %366 : vector<2x1xf32>
    %380 = math.exp %379 : vector<2x1xf32>
    %381 = arith.subf %359, %366 : vector<2x1xf32>
    %382 = math.exp %381 : vector<2x1xf32>
    %383 = arith.addf %368, %370 : vector<2x1xf32>
    %384 = arith.addf %383, %372 : vector<2x1xf32>
    %385 = arith.addf %384, %374 : vector<2x1xf32>
    %386 = arith.addf %385, %376 : vector<2x1xf32>
    %387 = arith.addf %386, %378 : vector<2x1xf32>
    %388 = arith.addf %387, %380 : vector<2x1xf32>
    %389 = arith.addf %388, %382 : vector<2x1xf32>
    %390 = vector.broadcast %368 : vector<2x1xf32> to vector<2x64xf32>
    %391 = arith.mulf %390, %298 : vector<2x64xf32>
    %392 = vector.broadcast %370 : vector<2x1xf32> to vector<2x64xf32>
    %393 = arith.mulf %392, %299 : vector<2x64xf32>
    %394 = arith.addf %391, %393 : vector<2x64xf32>
    %395 = vector.broadcast %372 : vector<2x1xf32> to vector<2x64xf32>
    %396 = arith.mulf %395, %300 : vector<2x64xf32>
    %397 = arith.addf %394, %396 : vector<2x64xf32>
    %398 = vector.broadcast %374 : vector<2x1xf32> to vector<2x64xf32>
    %399 = arith.mulf %398, %301 : vector<2x64xf32>
    %400 = arith.addf %397, %399 : vector<2x64xf32>
    %401 = vector.broadcast %376 : vector<2x1xf32> to vector<2x64xf32>
    %402 = arith.mulf %401, %302 : vector<2x64xf32>
    %403 = arith.addf %400, %402 : vector<2x64xf32>
    %404 = vector.broadcast %378 : vector<2x1xf32> to vector<2x64xf32>
    %405 = arith.mulf %404, %303 : vector<2x64xf32>
    %406 = arith.addf %403, %405 : vector<2x64xf32>
    %407 = vector.broadcast %380 : vector<2x1xf32> to vector<2x64xf32>
    %408 = arith.mulf %407, %304 : vector<2x64xf32>
    %409 = arith.addf %406, %408 : vector<2x64xf32>
    %410 = vector.broadcast %382 : vector<2x1xf32> to vector<2x64xf32>
    %411 = arith.mulf %410, %305 : vector<2x64xf32>
    %412 = arith.addf %409, %411 : vector<2x64xf32>
    %cst_141 = arith.constant 1.000000e+00 : f32
    %413 = vector.broadcast %cst_141 : f32 to vector<2x1xf32>
    %414 = arith.divf %413, %389 : vector<2x1xf32>
    %cst_142 = arith.constant 1.250000e-01 : f32
    %415 = vector.broadcast %cst_142 : f32 to vector<2x1xf32>
    %416 = arith.mulf %414, %415 : vector<2x1xf32>
    %417 = vector.broadcast %416 : vector<2x1xf32> to vector<2x64xf32>
    %418 = arith.mulf %412, %417 : vector<2x64xf32>
    %cst_143 = arith.constant dense<0.000000e+00> : vector<2x256xf32>
    %419 = tpu.matmul %260, %18, %cst_143 {dimension_numbers = #tpu.dot_dimension_numbers<[1], [0], [0], [1], [0, 0, 1, 1], [], []>} : vector<2x64xf32>, vector<64x256xf32>, vector<2x256xf32> -> vector<2x256xf32>
    %420 = vector.broadcast %19 : vector<1x256xf32> to vector<2x256xf32>
    %421 = arith.addf %419, %420 : vector<2x256xf32>
    %422 = arith.negf %421 : vector<2x256xf32>
    %423 = math.exp %422 : vector<2x256xf32>
    %cst_144 = arith.constant 1.000000e+00 : f32
    %424 = vector.broadcast %cst_144 : f32 to vector<2x256xf32>
    %425 = arith.addf %424, %423 : vector<2x256xf32>
    %426 = arith.divf %424, %425 : vector<2x256xf32>
    %427 = math.tanh %421 : vector<2x256xf32>
    %428 = vector.extract_strided_slice %426 {offsets = [0, 0], sizes = [2, 64], strides = [1, 1]} : vector<2x256xf32> to vector<2x64xf32>
    %429 = vector.extract_strided_slice %426 {offsets = [0, 64], sizes = [2, 64], strides = [1, 1]} : vector<2x256xf32> to vector<2x64xf32>
    %430 = vector.extract_strided_slice %427 {offsets = [0, 128], sizes = [2, 64], strides = [1, 1]} : vector<2x256xf32> to vector<2x64xf32>
    %431 = vector.extract_strided_slice %426 {offsets = [0, 192], sizes = [2, 64], strides = [1, 1]} : vector<2x256xf32> to vector<2x64xf32>
    %432 = arith.mulf %429, %308 : vector<2x64xf32>
    %433 = arith.mulf %428, %430 : vector<2x64xf32>
    %434 = arith.addf %432, %433 : vector<2x64xf32>
    %435 = math.tanh %434 : vector<2x64xf32>
    %436 = arith.mulf %431, %435 : vector<2x64xf32>
    %437 = tpu.concatenate %436, %418 in 1 : vector<2x64xf32>, vector<2x64xf32> -> vector<2x128xf32>
    %cst_145 = arith.constant dense<0.000000e+00> : vector<2x16xf32>
    %438 = tpu.matmul %437, %306, %cst_145 {dimension_numbers = #tpu.dot_dimension_numbers<[1], [0], [0], [1], [0, 0, 1, 1], [], []>} : vector<2x128xf32>, vector<128x16xf32>, vector<2x16xf32> -> vector<2x16xf32>
    %439 = vector.broadcast %307 : vector<1x16xf32> to vector<2x16xf32>
    %440 = arith.addf %438, %439 : vector<2x16xf32>
    %c0_146 = arith.constant 0 : index
    %c0_147 = arith.constant 0 : index
    %441 = vector.load %arg18[%c0_146, %c0_147] : memref<16x16xf32, #tpu.memory_space<vmem>>, vector<2x16xf32>
    tpu.vector_store %arg18[%c0_146, %c0_147], %440 {strides = array<i32>} : memref<16x16xf32, #tpu.memory_space<vmem>>, vector<2x16xf32>,
    %cst_148 = arith.constant dense<0.000000e+00> : vector<2x64xf32>
    %442 = tpu.matmul %436, %286, %cst_148 {dimension_numbers = #tpu.dot_dimension_numbers<[1], [0], [0], [1], [0, 0, 1, 1], [], []>} : vector<2x64xf32>, vector<64x64xf32>, vector<2x64xf32> -> vector<2x64xf32>
    %443 = vector.broadcast %288 : vector<1x64xf32> to vector<2x64xf32>
    %444 = arith.addf %442, %443 : vector<2x64xf32>
    %445 = arith.addf %444, %290 : vector<2x64xf32>
    %446 = math.tanh %445 : vector<2x64xf32>
    %447 = vector.broadcast %289 : vector<1x64xf32> to vector<2x64xf32>
    %448 = arith.mulf %446, %447 : vector<2x64xf32>
    %cst_149 = arith.constant dense<0.000000e+00> : vector<2xf32>
    %449 = vector.multi_reduction <add>, %448, %cst_149 [1] : vector<2x64xf32> to vector<2xf32>
    %450 = vector.shape_cast %449 : vector<2xf32> to vector<2x1xf32>
    %451 = arith.addf %444, %291 : vector<2x64xf32>
    %452 = math.tanh %451 : vector<2x64xf32>
    %453 = vector.broadcast %289 : vector<1x64xf32> to vector<2x64xf32>
    %454 = arith.mulf %452, %453 : vector<2x64xf32>
    %cst_150 = arith.constant dense<0.000000e+00> : vector<2xf32>
    %455 = vector.multi_reduction <add>, %454, %cst_150 [1] : vector<2x64xf32> to vector<2xf32>
    %456 = vector.shape_cast %455 : vector<2xf32> to vector<2x1xf32>
    %457 = arith.addf %444, %292 : vector<2x64xf32>
    %458 = math.tanh %457 : vector<2x64xf32>
    %459 = vector.broadcast %289 : vector<1x64xf32> to vector<2x64xf32>
    %460 = arith.mulf %458, %459 : vector<2x64xf32>
    %cst_151 = arith.constant dense<0.000000e+00> : vector<2xf32>
    %461 = vector.multi_reduction <add>, %460, %cst_151 [1] : vector<2x64xf32> to vector<2xf32>
    %462 = vector.shape_cast %461 : vector<2xf32> to vector<2x1xf32>
    %463 = arith.addf %444, %293 : vector<2x64xf32>
    %464 = math.tanh %463 : vector<2x64xf32>
    %465 = vector.broadcast %289 : vector<1x64xf32> to vector<2x64xf32>
    %466 = arith.mulf %464, %465 : vector<2x64xf32>
    %cst_152 = arith.constant dense<0.000000e+00> : vector<2xf32>
    %467 = vector.multi_reduction <add>, %466, %cst_152 [1] : vector<2x64xf32> to vector<2xf32>
    %468 = vector.shape_cast %467 : vector<2xf32> to vector<2x1xf32>
    %469 = arith.addf %444, %294 : vector<2x64xf32>
    %470 = math.tanh %469 : vector<2x64xf32>
    %471 = vector.broadcast %289 : vector<1x64xf32> to vector<2x64xf32>
    %472 = arith.mulf %470, %471 : vector<2x64xf32>
    %cst_153 = arith.constant dense<0.000000e+00> : vector<2xf32>
    %473 = vector.multi_reduction <add>, %472, %cst_153 [1] : vector<2x64xf32> to vector<2xf32>
    %474 = vector.shape_cast %473 : vector<2xf32> to vector<2x1xf32>
    %475 = arith.addf %444, %295 : vector<2x64xf32>
    %476 = math.tanh %475 : vector<2x64xf32>
    %477 = vector.broadcast %289 : vector<1x64xf32> to vector<2x64xf32>
    %478 = arith.mulf %476, %477 : vector<2x64xf32>
    %cst_154 = arith.constant dense<0.000000e+00> : vector<2xf32>
    %479 = vector.multi_reduction <add>, %478, %cst_154 [1] : vector<2x64xf32> to vector<2xf32>
    %480 = vector.shape_cast %479 : vector<2xf32> to vector<2x1xf32>
    %481 = arith.addf %444, %296 : vector<2x64xf32>
    %482 = math.tanh %481 : vector<2x64xf32>
    %483 = vector.broadcast %289 : vector<1x64xf32> to vector<2x64xf32>
    %484 = arith.mulf %482, %483 : vector<2x64xf32>
    %cst_155 = arith.constant dense<0.000000e+00> : vector<2xf32>
    %485 = vector.multi_reduction <add>, %484, %cst_155 [1] : vector<2x64xf32> to vector<2xf32>
    %486 = vector.shape_cast %485 : vector<2xf32> to vector<2x1xf32>
    %487 = arith.addf %444, %297 : vector<2x64xf32>
    %488 = math.tanh %487 : vector<2x64xf32>
    %489 = vector.broadcast %289 : vector<1x64xf32> to vector<2x64xf32>
    %490 = arith.mulf %488, %489 : vector<2x64xf32>
    %cst_156 = arith.constant dense<0.000000e+00> : vector<2xf32>
    %491 = vector.multi_reduction <add>, %490, %cst_156 [1] : vector<2x64xf32> to vector<2xf32>
    %492 = vector.shape_cast %491 : vector<2xf32> to vector<2x1xf32>
    %493 = arith.maximumf %450, %456 : vector<2x1xf32>
    %494 = arith.maximumf %493, %462 : vector<2x1xf32>
    %495 = arith.maximumf %494, %468 : vector<2x1xf32>
    %496 = arith.maximumf %495, %474 : vector<2x1xf32>
    %497 = arith.maximumf %496, %480 : vector<2x1xf32>
    %498 = arith.maximumf %497, %486 : vector<2x1xf32>
    %499 = arith.maximumf %498, %492 : vector<2x1xf32>
    %500 = arith.subf %450, %499 : vector<2x1xf32>
    %501 = math.exp %500 : vector<2x1xf32>
    %502 = arith.subf %456, %499 : vector<2x1xf32>
    %503 = math.exp %502 : vector<2x1xf32>
    %504 = arith.subf %462, %499 : vector<2x1xf32>
    %505 = math.exp %504 : vector<2x1xf32>
    %506 = arith.subf %468, %499 : vector<2x1xf32>
    %507 = math.exp %506 : vector<2x1xf32>
    %508 = arith.subf %474, %499 : vector<2x1xf32>
    %509 = math.exp %508 : vector<2x1xf32>
    %510 = arith.subf %480, %499 : vector<2x1xf32>
    %511 = math.exp %510 : vector<2x1xf32>
    %512 = arith.subf %486, %499 : vector<2x1xf32>
    %513 = math.exp %512 : vector<2x1xf32>
    %514 = arith.subf %492, %499 : vector<2x1xf32>
    %515 = math.exp %514 : vector<2x1xf32>
    %516 = arith.addf %501, %503 : vector<2x1xf32>
    %517 = arith.addf %516, %505 : vector<2x1xf32>
    %518 = arith.addf %517, %507 : vector<2x1xf32>
    %519 = arith.addf %518, %509 : vector<2x1xf32>
    %520 = arith.addf %519, %511 : vector<2x1xf32>
    %521 = arith.addf %520, %513 : vector<2x1xf32>
    %522 = arith.addf %521, %515 : vector<2x1xf32>
    %523 = vector.broadcast %501 : vector<2x1xf32> to vector<2x64xf32>
    %524 = arith.mulf %523, %298 : vector<2x64xf32>
    %525 = vector.broadcast %503 : vector<2x1xf32> to vector<2x64xf32>
    %526 = arith.mulf %525, %299 : vector<2x64xf32>
    %527 = arith.addf %524, %526 : vector<2x64xf32>
    %528 = vector.broadcast %505 : vector<2x1xf32> to vector<2x64xf32>
    %529 = arith.mulf %528, %300 : vector<2x64xf32>
    %530 = arith.addf %527, %529 : vector<2x64xf32>
    %531 = vector.broadcast %507 : vector<2x1xf32> to vector<2x64xf32>
    %532 = arith.mulf %531, %301 : vector<2x64xf32>
    %533 = arith.addf %530, %532 : vector<2x64xf32>
    %534 = vector.broadcast %509 : vector<2x1xf32> to vector<2x64xf32>
    %535 = arith.mulf %534, %302 : vector<2x64xf32>
    %536 = arith.addf %533, %535 : vector<2x64xf32>
    %537 = vector.broadcast %511 : vector<2x1xf32> to vector<2x64xf32>
    %538 = arith.mulf %537, %303 : vector<2x64xf32>
    %539 = arith.addf %536, %538 : vector<2x64xf32>
    %540 = vector.broadcast %513 : vector<2x1xf32> to vector<2x64xf32>
    %541 = arith.mulf %540, %304 : vector<2x64xf32>
    %542 = arith.addf %539, %541 : vector<2x64xf32>
    %543 = vector.broadcast %515 : vector<2x1xf32> to vector<2x64xf32>
    %544 = arith.mulf %543, %305 : vector<2x64xf32>
    %545 = arith.addf %542, %544 : vector<2x64xf32>
    %cst_157 = arith.constant 1.000000e+00 : f32
    %546 = vector.broadcast %cst_157 : f32 to vector<2x1xf32>
    %547 = arith.divf %546, %522 : vector<2x1xf32>
    %cst_158 = arith.constant 1.250000e-01 : f32
    %548 = vector.broadcast %cst_158 : f32 to vector<2x1xf32>
    %549 = arith.mulf %547, %548 : vector<2x1xf32>
    %550 = vector.broadcast %549 : vector<2x1xf32> to vector<2x64xf32>
    %551 = arith.mulf %545, %550 : vector<2x64xf32>
    %552 = vector.extract_strided_slice %16 {offsets = [0, 0], sizes = [2, 256], strides = [1, 1]} : vector<16x256xf32> to vector<2x256xf32>
    %553 = vector.broadcast %19 : vector<1x256xf32> to vector<2x256xf32>
    %554 = arith.addf %553, %552 : vector<2x256xf32>
    %cst_159 = arith.constant dense<0.000000e+00> : vector<2x256xf32>
    %555 = tpu.matmul %436, %18, %cst_159 {dimension_numbers = #tpu.dot_dimension_numbers<[1], [0], [0], [1], [0, 0, 1, 1], [], []>} : vector<2x64xf32>, vector<64x256xf32>, vector<2x256xf32> -> vector<2x256xf32>
    %556 = arith.addf %555, %554 : vector<2x256xf32>
    %557 = arith.negf %556 : vector<2x256xf32>
    %558 = math.exp %557 : vector<2x256xf32>
    %cst_160 = arith.constant 1.000000e+00 : f32
    %559 = vector.broadcast %cst_160 : f32 to vector<2x256xf32>
    %560 = arith.addf %559, %558 : vector<2x256xf32>
    %561 = arith.divf %559, %560 : vector<2x256xf32>
    %562 = math.tanh %556 : vector<2x256xf32>
    %563 = vector.extract_strided_slice %561 {offsets = [0, 0], sizes = [2, 64], strides = [1, 1]} : vector<2x256xf32> to vector<2x64xf32>
    %564 = vector.extract_strided_slice %561 {offsets = [0, 64], sizes = [2, 64], strides = [1, 1]} : vector<2x256xf32> to vector<2x64xf32>
    %565 = vector.extract_strided_slice %562 {offsets = [0, 128], sizes = [2, 64], strides = [1, 1]} : vector<2x256xf32> to vector<2x64xf32>
    %566 = vector.extract_strided_slice %561 {offsets = [0, 192], sizes = [2, 64], strides = [1, 1]} : vector<2x256xf32> to vector<2x64xf32>
    %567 = arith.mulf %564, %434 : vector<2x64xf32>
    %568 = arith.mulf %563, %565 : vector<2x64xf32>
    %569 = arith.addf %567, %568 : vector<2x64xf32>
    %570 = math.tanh %569 : vector<2x64xf32>
    %571 = arith.mulf %566, %570 : vector<2x64xf32>
    %572 = tpu.concatenate %571, %551 in 1 : vector<2x64xf32>, vector<2x64xf32> -> vector<2x128xf32>
    %cst_161 = arith.constant dense<0.000000e+00> : vector<2x16xf32>
    %573 = tpu.matmul %572, %306, %cst_161 {dimension_numbers = #tpu.dot_dimension_numbers<[1], [0], [0], [1], [0, 0, 1, 1], [], []>} : vector<2x128xf32>, vector<128x16xf32>, vector<2x16xf32> -> vector<2x16xf32>
    %574 = vector.broadcast %307 : vector<1x16xf32> to vector<2x16xf32>
    %575 = arith.addf %573, %574 : vector<2x16xf32>
    %c2_162 = arith.constant 2 : index
    %c0_163 = arith.constant 0 : index
    %576 = vector.load %arg18[%c2_162, %c0_163] : memref<16x16xf32, #tpu.memory_space<vmem>>, vector<2x16xf32>
    tpu.vector_store %arg18[%c2_162, %c0_163], %575 {strides = array<i32>} : memref<16x16xf32, #tpu.memory_space<vmem>>, vector<2x16xf32>,
    %cst_164 = arith.constant dense<0.000000e+00> : vector<2x64xf32>
    %577 = tpu.matmul %571, %286, %cst_164 {dimension_numbers = #tpu.dot_dimension_numbers<[1], [0], [0], [1], [0, 0, 1, 1], [], []>} : vector<2x64xf32>, vector<64x64xf32>, vector<2x64xf32> -> vector<2x64xf32>
    %578 = vector.broadcast %288 : vector<1x64xf32> to vector<2x64xf32>
    %579 = arith.addf %577, %578 : vector<2x64xf32>
    %580 = arith.addf %579, %290 : vector<2x64xf32>
    %581 = math.tanh %580 : vector<2x64xf32>
    %582 = vector.broadcast %289 : vector<1x64xf32> to vector<2x64xf32>
    %583 = arith.mulf %581, %582 : vector<2x64xf32>
    %cst_165 = arith.constant dense<0.000000e+00> : vector<2xf32>
    %584 = vector.multi_reduction <add>, %583, %cst_165 [1] : vector<2x64xf32> to vector<2xf32>
    %585 = vector.shape_cast %584 : vector<2xf32> to vector<2x1xf32>
    %586 = arith.addf %579, %291 : vector<2x64xf32>
    %587 = math.tanh %586 : vector<2x64xf32>
    %588 = vector.broadcast %289 : vector<1x64xf32> to vector<2x64xf32>
    %589 = arith.mulf %587, %588 : vector<2x64xf32>
    %cst_166 = arith.constant dense<0.000000e+00> : vector<2xf32>
    %590 = vector.multi_reduction <add>, %589, %cst_166 [1] : vector<2x64xf32> to vector<2xf32>
    %591 = vector.shape_cast %590 : vector<2xf32> to vector<2x1xf32>
    %592 = arith.addf %579, %292 : vector<2x64xf32>
    %593 = math.tanh %592 : vector<2x64xf32>
    %594 = vector.broadcast %289 : vector<1x64xf32> to vector<2x64xf32>
    %595 = arith.mulf %593, %594 : vector<2x64xf32>
    %cst_167 = arith.constant dense<0.000000e+00> : vector<2xf32>
    %596 = vector.multi_reduction <add>, %595, %cst_167 [1] : vector<2x64xf32> to vector<2xf32>
    %597 = vector.shape_cast %596 : vector<2xf32> to vector<2x1xf32>
    %598 = arith.addf %579, %293 : vector<2x64xf32>
    %599 = math.tanh %598 : vector<2x64xf32>
    %600 = vector.broadcast %289 : vector<1x64xf32> to vector<2x64xf32>
    %601 = arith.mulf %599, %600 : vector<2x64xf32>
    %cst_168 = arith.constant dense<0.000000e+00> : vector<2xf32>
    %602 = vector.multi_reduction <add>, %601, %cst_168 [1] : vector<2x64xf32> to vector<2xf32>
    %603 = vector.shape_cast %602 : vector<2xf32> to vector<2x1xf32>
    %604 = arith.addf %579, %294 : vector<2x64xf32>
    %605 = math.tanh %604 : vector<2x64xf32>
    %606 = vector.broadcast %289 : vector<1x64xf32> to vector<2x64xf32>
    %607 = arith.mulf %605, %606 : vector<2x64xf32>
    %cst_169 = arith.constant dense<0.000000e+00> : vector<2xf32>
    %608 = vector.multi_reduction <add>, %607, %cst_169 [1] : vector<2x64xf32> to vector<2xf32>
    %609 = vector.shape_cast %608 : vector<2xf32> to vector<2x1xf32>
    %610 = arith.addf %579, %295 : vector<2x64xf32>
    %611 = math.tanh %610 : vector<2x64xf32>
    %612 = vector.broadcast %289 : vector<1x64xf32> to vector<2x64xf32>
    %613 = arith.mulf %611, %612 : vector<2x64xf32>
    %cst_170 = arith.constant dense<0.000000e+00> : vector<2xf32>
    %614 = vector.multi_reduction <add>, %613, %cst_170 [1] : vector<2x64xf32> to vector<2xf32>
    %615 = vector.shape_cast %614 : vector<2xf32> to vector<2x1xf32>
    %616 = arith.addf %579, %296 : vector<2x64xf32>
    %617 = math.tanh %616 : vector<2x64xf32>
    %618 = vector.broadcast %289 : vector<1x64xf32> to vector<2x64xf32>
    %619 = arith.mulf %617, %618 : vector<2x64xf32>
    %cst_171 = arith.constant dense<0.000000e+00> : vector<2xf32>
    %620 = vector.multi_reduction <add>, %619, %cst_171 [1] : vector<2x64xf32> to vector<2xf32>
    %621 = vector.shape_cast %620 : vector<2xf32> to vector<2x1xf32>
    %622 = arith.addf %579, %297 : vector<2x64xf32>
    %623 = math.tanh %622 : vector<2x64xf32>
    %624 = vector.broadcast %289 : vector<1x64xf32> to vector<2x64xf32>
    %625 = arith.mulf %623, %624 : vector<2x64xf32>
    %cst_172 = arith.constant dense<0.000000e+00> : vector<2xf32>
    %626 = vector.multi_reduction <add>, %625, %cst_172 [1] : vector<2x64xf32> to vector<2xf32>
    %627 = vector.shape_cast %626 : vector<2xf32> to vector<2x1xf32>
    %628 = arith.maximumf %585, %591 : vector<2x1xf32>
    %629 = arith.maximumf %628, %597 : vector<2x1xf32>
    %630 = arith.maximumf %629, %603 : vector<2x1xf32>
    %631 = arith.maximumf %630, %609 : vector<2x1xf32>
    %632 = arith.maximumf %631, %615 : vector<2x1xf32>
    %633 = arith.maximumf %632, %621 : vector<2x1xf32>
    %634 = arith.maximumf %633, %627 : vector<2x1xf32>
    %635 = arith.subf %585, %634 : vector<2x1xf32>
    %636 = math.exp %635 : vector<2x1xf32>
    %637 = arith.subf %591, %634 : vector<2x1xf32>
    %638 = math.exp %637 : vector<2x1xf32>
    %639 = arith.subf %597, %634 : vector<2x1xf32>
    %640 = math.exp %639 : vector<2x1xf32>
    %641 = arith.subf %603, %634 : vector<2x1xf32>
    %642 = math.exp %641 : vector<2x1xf32>
    %643 = arith.subf %609, %634 : vector<2x1xf32>
    %644 = math.exp %643 : vector<2x1xf32>
    %645 = arith.subf %615, %634 : vector<2x1xf32>
    %646 = math.exp %645 : vector<2x1xf32>
    %647 = arith.subf %621, %634 : vector<2x1xf32>
    %648 = math.exp %647 : vector<2x1xf32>
    %649 = arith.subf %627, %634 : vector<2x1xf32>
    %650 = math.exp %649 : vector<2x1xf32>
    %651 = arith.addf %636, %638 : vector<2x1xf32>
    %652 = arith.addf %651, %640 : vector<2x1xf32>
    %653 = arith.addf %652, %642 : vector<2x1xf32>
    %654 = arith.addf %653, %644 : vector<2x1xf32>
    %655 = arith.addf %654, %646 : vector<2x1xf32>
    %656 = arith.addf %655, %648 : vector<2x1xf32>
    %657 = arith.addf %656, %650 : vector<2x1xf32>
    %658 = vector.broadcast %636 : vector<2x1xf32> to vector<2x64xf32>
    %659 = arith.mulf %658, %298 : vector<2x64xf32>
    %660 = vector.broadcast %638 : vector<2x1xf32> to vector<2x64xf32>
    %661 = arith.mulf %660, %299 : vector<2x64xf32>
    %662 = arith.addf %659, %661 : vector<2x64xf32>
    %663 = vector.broadcast %640 : vector<2x1xf32> to vector<2x64xf32>
    %664 = arith.mulf %663, %300 : vector<2x64xf32>
    %665 = arith.addf %662, %664 : vector<2x64xf32>
    %666 = vector.broadcast %642 : vector<2x1xf32> to vector<2x64xf32>
    %667 = arith.mulf %666, %301 : vector<2x64xf32>
    %668 = arith.addf %665, %667 : vector<2x64xf32>
    %669 = vector.broadcast %644 : vector<2x1xf32> to vector<2x64xf32>
    %670 = arith.mulf %669, %302 : vector<2x64xf32>
    %671 = arith.addf %668, %670 : vector<2x64xf32>
    %672 = vector.broadcast %646 : vector<2x1xf32> to vector<2x64xf32>
    %673 = arith.mulf %672, %303 : vector<2x64xf32>
    %674 = arith.addf %671, %673 : vector<2x64xf32>
    %675 = vector.broadcast %648 : vector<2x1xf32> to vector<2x64xf32>
    %676 = arith.mulf %675, %304 : vector<2x64xf32>
    %677 = arith.addf %674, %676 : vector<2x64xf32>
    %678 = vector.broadcast %650 : vector<2x1xf32> to vector<2x64xf32>
    %679 = arith.mulf %678, %305 : vector<2x64xf32>
    %680 = arith.addf %677, %679 : vector<2x64xf32>
    %cst_173 = arith.constant 1.000000e+00 : f32
    %681 = vector.broadcast %cst_173 : f32 to vector<2x1xf32>
    %682 = arith.divf %681, %657 : vector<2x1xf32>
    %cst_174 = arith.constant 1.250000e-01 : f32
    %683 = vector.broadcast %cst_174 : f32 to vector<2x1xf32>
    %684 = arith.mulf %682, %683 : vector<2x1xf32>
    %685 = vector.broadcast %684 : vector<2x1xf32> to vector<2x64xf32>
    %686 = arith.mulf %680, %685 : vector<2x64xf32>
    %687 = vector.extract_strided_slice %16 {offsets = [2, 0], sizes = [2, 256], strides = [1, 1]} : vector<16x256xf32> to vector<2x256xf32>
    %688 = vector.broadcast %19 : vector<1x256xf32> to vector<2x256xf32>
    %689 = arith.addf %688, %687 : vector<2x256xf32>
    %cst_175 = arith.constant dense<0.000000e+00> : vector<2x256xf32>
    %690 = tpu.matmul %571, %18, %cst_175 {dimension_numbers = #tpu.dot_dimension_numbers<[1], [0], [0], [1], [0, 0, 1, 1], [], []>} : vector<2x64xf32>, vector<64x256xf32>, vector<2x256xf32> -> vector<2x256xf32>
    %691 = arith.addf %690, %689 : vector<2x256xf32>
    %692 = arith.negf %691 : vector<2x256xf32>
    %693 = math.exp %692 : vector<2x256xf32>
    %cst_176 = arith.constant 1.000000e+00 : f32
    %694 = vector.broadcast %cst_176 : f32 to vector<2x256xf32>
    %695 = arith.addf %694, %693 : vector<2x256xf32>
    %696 = arith.divf %694, %695 : vector<2x256xf32>
    %697 = math.tanh %691 : vector<2x256xf32>
    %698 = vector.extract_strided_slice %696 {offsets = [0, 0], sizes = [2, 64], strides = [1, 1]} : vector<2x256xf32> to vector<2x64xf32>
    %699 = vector.extract_strided_slice %696 {offsets = [0, 64], sizes = [2, 64], strides = [1, 1]} : vector<2x256xf32> to vector<2x64xf32>
    %700 = vector.extract_strided_slice %697 {offsets = [0, 128], sizes = [2, 64], strides = [1, 1]} : vector<2x256xf32> to vector<2x64xf32>
    %701 = vector.extract_strided_slice %696 {offsets = [0, 192], sizes = [2, 64], strides = [1, 1]} : vector<2x256xf32> to vector<2x64xf32>
    %702 = arith.mulf %699, %569 : vector<2x64xf32>
    %703 = arith.mulf %698, %700 : vector<2x64xf32>
    %704 = arith.addf %702, %703 : vector<2x64xf32>
    %705 = math.tanh %704 : vector<2x64xf32>
    %706 = arith.mulf %701, %705 : vector<2x64xf32>
    %707 = tpu.concatenate %706, %686 in 1 : vector<2x64xf32>, vector<2x64xf32> -> vector<2x128xf32>
    %cst_177 = arith.constant dense<0.000000e+00> : vector<2x16xf32>
    %708 = tpu.matmul %707, %306, %cst_177 {dimension_numbers = #tpu.dot_dimension_numbers<[1], [0], [0], [1], [0, 0, 1, 1], [], []>} : vector<2x128xf32>, vector<128x16xf32>, vector<2x16xf32> -> vector<2x16xf32>
    %709 = vector.broadcast %307 : vector<1x16xf32> to vector<2x16xf32>
    %710 = arith.addf %708, %709 : vector<2x16xf32>
    %c4_178 = arith.constant 4 : index
    %c0_179 = arith.constant 0 : index
    %711 = vector.load %arg18[%c4_178, %c0_179] : memref<16x16xf32, #tpu.memory_space<vmem>>, vector<2x16xf32>
    tpu.vector_store %arg18[%c4_178, %c0_179], %710 {strides = array<i32>} : memref<16x16xf32, #tpu.memory_space<vmem>>, vector<2x16xf32>,
    %cst_180 = arith.constant dense<0.000000e+00> : vector<2x64xf32>
    %712 = tpu.matmul %706, %286, %cst_180 {dimension_numbers = #tpu.dot_dimension_numbers<[1], [0], [0], [1], [0, 0, 1, 1], [], []>} : vector<2x64xf32>, vector<64x64xf32>, vector<2x64xf32> -> vector<2x64xf32>
    %713 = vector.broadcast %288 : vector<1x64xf32> to vector<2x64xf32>
    %714 = arith.addf %712, %713 : vector<2x64xf32>
    %715 = arith.addf %714, %290 : vector<2x64xf32>
    %716 = math.tanh %715 : vector<2x64xf32>
    %717 = vector.broadcast %289 : vector<1x64xf32> to vector<2x64xf32>
    %718 = arith.mulf %716, %717 : vector<2x64xf32>
    %cst_181 = arith.constant dense<0.000000e+00> : vector<2xf32>
    %719 = vector.multi_reduction <add>, %718, %cst_181 [1] : vector<2x64xf32> to vector<2xf32>
    %720 = vector.shape_cast %719 : vector<2xf32> to vector<2x1xf32>
    %721 = arith.addf %714, %291 : vector<2x64xf32>
    %722 = math.tanh %721 : vector<2x64xf32>
    %723 = vector.broadcast %289 : vector<1x64xf32> to vector<2x64xf32>
    %724 = arith.mulf %722, %723 : vector<2x64xf32>
    %cst_182 = arith.constant dense<0.000000e+00> : vector<2xf32>
    %725 = vector.multi_reduction <add>, %724, %cst_182 [1] : vector<2x64xf32> to vector<2xf32>
    %726 = vector.shape_cast %725 : vector<2xf32> to vector<2x1xf32>
    %727 = arith.addf %714, %292 : vector<2x64xf32>
    %728 = math.tanh %727 : vector<2x64xf32>
    %729 = vector.broadcast %289 : vector<1x64xf32> to vector<2x64xf32>
    %730 = arith.mulf %728, %729 : vector<2x64xf32>
    %cst_183 = arith.constant dense<0.000000e+00> : vector<2xf32>
    %731 = vector.multi_reduction <add>, %730, %cst_183 [1] : vector<2x64xf32> to vector<2xf32>
    %732 = vector.shape_cast %731 : vector<2xf32> to vector<2x1xf32>
    %733 = arith.addf %714, %293 : vector<2x64xf32>
    %734 = math.tanh %733 : vector<2x64xf32>
    %735 = vector.broadcast %289 : vector<1x64xf32> to vector<2x64xf32>
    %736 = arith.mulf %734, %735 : vector<2x64xf32>
    %cst_184 = arith.constant dense<0.000000e+00> : vector<2xf32>
    %737 = vector.multi_reduction <add>, %736, %cst_184 [1] : vector<2x64xf32> to vector<2xf32>
    %738 = vector.shape_cast %737 : vector<2xf32> to vector<2x1xf32>
    %739 = arith.addf %714, %294 : vector<2x64xf32>
    %740 = math.tanh %739 : vector<2x64xf32>
    %741 = vector.broadcast %289 : vector<1x64xf32> to vector<2x64xf32>
    %742 = arith.mulf %740, %741 : vector<2x64xf32>
    %cst_185 = arith.constant dense<0.000000e+00> : vector<2xf32>
    %743 = vector.multi_reduction <add>, %742, %cst_185 [1] : vector<2x64xf32> to vector<2xf32>
    %744 = vector.shape_cast %743 : vector<2xf32> to vector<2x1xf32>
    %745 = arith.addf %714, %295 : vector<2x64xf32>
    %746 = math.tanh %745 : vector<2x64xf32>
    %747 = vector.broadcast %289 : vector<1x64xf32> to vector<2x64xf32>
    %748 = arith.mulf %746, %747 : vector<2x64xf32>
    %cst_186 = arith.constant dense<0.000000e+00> : vector<2xf32>
    %749 = vector.multi_reduction <add>, %748, %cst_186 [1] : vector<2x64xf32> to vector<2xf32>
    %750 = vector.shape_cast %749 : vector<2xf32> to vector<2x1xf32>
    %751 = arith.addf %714, %296 : vector<2x64xf32>
    %752 = math.tanh %751 : vector<2x64xf32>
    %753 = vector.broadcast %289 : vector<1x64xf32> to vector<2x64xf32>
    %754 = arith.mulf %752, %753 : vector<2x64xf32>
    %cst_187 = arith.constant dense<0.000000e+00> : vector<2xf32>
    %755 = vector.multi_reduction <add>, %754, %cst_187 [1] : vector<2x64xf32> to vector<2xf32>
    %756 = vector.shape_cast %755 : vector<2xf32> to vector<2x1xf32>
    %757 = arith.addf %714, %297 : vector<2x64xf32>
    %758 = math.tanh %757 : vector<2x64xf32>
    %759 = vector.broadcast %289 : vector<1x64xf32> to vector<2x64xf32>
    %760 = arith.mulf %758, %759 : vector<2x64xf32>
    %cst_188 = arith.constant dense<0.000000e+00> : vector<2xf32>
    %761 = vector.multi_reduction <add>, %760, %cst_188 [1] : vector<2x64xf32> to vector<2xf32>
    %762 = vector.shape_cast %761 : vector<2xf32> to vector<2x1xf32>
    %763 = arith.maximumf %720, %726 : vector<2x1xf32>
    %764 = arith.maximumf %763, %732 : vector<2x1xf32>
    %765 = arith.maximumf %764, %738 : vector<2x1xf32>
    %766 = arith.maximumf %765, %744 : vector<2x1xf32>
    %767 = arith.maximumf %766, %750 : vector<2x1xf32>
    %768 = arith.maximumf %767, %756 : vector<2x1xf32>
    %769 = arith.maximumf %768, %762 : vector<2x1xf32>
    %770 = arith.subf %720, %769 : vector<2x1xf32>
    %771 = math.exp %770 : vector<2x1xf32>
    %772 = arith.subf %726, %769 : vector<2x1xf32>
    %773 = math.exp %772 : vector<2x1xf32>
    %774 = arith.subf %732, %769 : vector<2x1xf32>
    %775 = math.exp %774 : vector<2x1xf32>
    %776 = arith.subf %738, %769 : vector<2x1xf32>
    %777 = math.exp %776 : vector<2x1xf32>
    %778 = arith.subf %744, %769 : vector<2x1xf32>
    %779 = math.exp %778 : vector<2x1xf32>
    %780 = arith.subf %750, %769 : vector<2x1xf32>
    %781 = math.exp %780 : vector<2x1xf32>
    %782 = arith.subf %756, %769 : vector<2x1xf32>
    %783 = math.exp %782 : vector<2x1xf32>
    %784 = arith.subf %762, %769 : vector<2x1xf32>
    %785 = math.exp %784 : vector<2x1xf32>
    %786 = arith.addf %771, %773 : vector<2x1xf32>
    %787 = arith.addf %786, %775 : vector<2x1xf32>
    %788 = arith.addf %787, %777 : vector<2x1xf32>
    %789 = arith.addf %788, %779 : vector<2x1xf32>
    %790 = arith.addf %789, %781 : vector<2x1xf32>
    %791 = arith.addf %790, %783 : vector<2x1xf32>
    %792 = arith.addf %791, %785 : vector<2x1xf32>
    %793 = vector.broadcast %771 : vector<2x1xf32> to vector<2x64xf32>
    %794 = arith.mulf %793, %298 : vector<2x64xf32>
    %795 = vector.broadcast %773 : vector<2x1xf32> to vector<2x64xf32>
    %796 = arith.mulf %795, %299 : vector<2x64xf32>
    %797 = arith.addf %794, %796 : vector<2x64xf32>
    %798 = vector.broadcast %775 : vector<2x1xf32> to vector<2x64xf32>
    %799 = arith.mulf %798, %300 : vector<2x64xf32>
    %800 = arith.addf %797, %799 : vector<2x64xf32>
    %801 = vector.broadcast %777 : vector<2x1xf32> to vector<2x64xf32>
    %802 = arith.mulf %801, %301 : vector<2x64xf32>
    %803 = arith.addf %800, %802 : vector<2x64xf32>
    %804 = vector.broadcast %779 : vector<2x1xf32> to vector<2x64xf32>
    %805 = arith.mulf %804, %302 : vector<2x64xf32>
    %806 = arith.addf %803, %805 : vector<2x64xf32>
    %807 = vector.broadcast %781 : vector<2x1xf32> to vector<2x64xf32>
    %808 = arith.mulf %807, %303 : vector<2x64xf32>
    %809 = arith.addf %806, %808 : vector<2x64xf32>
    %810 = vector.broadcast %783 : vector<2x1xf32> to vector<2x64xf32>
    %811 = arith.mulf %810, %304 : vector<2x64xf32>
    %812 = arith.addf %809, %811 : vector<2x64xf32>
    %813 = vector.broadcast %785 : vector<2x1xf32> to vector<2x64xf32>
    %814 = arith.mulf %813, %305 : vector<2x64xf32>
    %815 = arith.addf %812, %814 : vector<2x64xf32>
    %cst_189 = arith.constant 1.000000e+00 : f32
    %816 = vector.broadcast %cst_189 : f32 to vector<2x1xf32>
    %817 = arith.divf %816, %792 : vector<2x1xf32>
    %cst_190 = arith.constant 1.250000e-01 : f32
    %818 = vector.broadcast %cst_190 : f32 to vector<2x1xf32>
    %819 = arith.mulf %817, %818 : vector<2x1xf32>
    %820 = vector.broadcast %819 : vector<2x1xf32> to vector<2x64xf32>
    %821 = arith.mulf %815, %820 : vector<2x64xf32>
    %822 = vector.extract_strided_slice %16 {offsets = [4, 0], sizes = [2, 256], strides = [1, 1]} : vector<16x256xf32> to vector<2x256xf32>
    %823 = vector.broadcast %19 : vector<1x256xf32> to vector<2x256xf32>
    %824 = arith.addf %823, %822 : vector<2x256xf32>
    %cst_191 = arith.constant dense<0.000000e+00> : vector<2x256xf32>
    %825 = tpu.matmul %706, %18, %cst_191 {dimension_numbers = #tpu.dot_dimension_numbers<[1], [0], [0], [1], [0, 0, 1, 1], [], []>} : vector<2x64xf32>, vector<64x256xf32>, vector<2x256xf32> -> vector<2x256xf32>
    %826 = arith.addf %825, %824 : vector<2x256xf32>
    %827 = arith.negf %826 : vector<2x256xf32>
    %828 = math.exp %827 : vector<2x256xf32>
    %cst_192 = arith.constant 1.000000e+00 : f32
    %829 = vector.broadcast %cst_192 : f32 to vector<2x256xf32>
    %830 = arith.addf %829, %828 : vector<2x256xf32>
    %831 = arith.divf %829, %830 : vector<2x256xf32>
    %832 = math.tanh %826 : vector<2x256xf32>
    %833 = vector.extract_strided_slice %831 {offsets = [0, 0], sizes = [2, 64], strides = [1, 1]} : vector<2x256xf32> to vector<2x64xf32>
    %834 = vector.extract_strided_slice %831 {offsets = [0, 64], sizes = [2, 64], strides = [1, 1]} : vector<2x256xf32> to vector<2x64xf32>
    %835 = vector.extract_strided_slice %832 {offsets = [0, 128], sizes = [2, 64], strides = [1, 1]} : vector<2x256xf32> to vector<2x64xf32>
    %836 = vector.extract_strided_slice %831 {offsets = [0, 192], sizes = [2, 64], strides = [1, 1]} : vector<2x256xf32> to vector<2x64xf32>
    %837 = arith.mulf %834, %704 : vector<2x64xf32>
    %838 = arith.mulf %833, %835 : vector<2x64xf32>
    %839 = arith.addf %837, %838 : vector<2x64xf32>
    %840 = math.tanh %839 : vector<2x64xf32>
    %841 = arith.mulf %836, %840 : vector<2x64xf32>
    %842 = tpu.concatenate %841, %821 in 1 : vector<2x64xf32>, vector<2x64xf32> -> vector<2x128xf32>
    %cst_193 = arith.constant dense<0.000000e+00> : vector<2x16xf32>
    %843 = tpu.matmul %842, %306, %cst_193 {dimension_numbers = #tpu.dot_dimension_numbers<[1], [0], [0], [1], [0, 0, 1, 1], [], []>} : vector<2x128xf32>, vector<128x16xf32>, vector<2x16xf32> -> vector<2x16xf32>
    %844 = vector.broadcast %307 : vector<1x16xf32> to vector<2x16xf32>
    %845 = arith.addf %843, %844 : vector<2x16xf32>
    %c6_194 = arith.constant 6 : index
    %c0_195 = arith.constant 0 : index
    %846 = vector.load %arg18[%c6_194, %c0_195] : memref<16x16xf32, #tpu.memory_space<vmem>>, vector<2x16xf32>
    tpu.vector_store %arg18[%c6_194, %c0_195], %845 {strides = array<i32>} : memref<16x16xf32, #tpu.memory_space<vmem>>, vector<2x16xf32>,
    %cst_196 = arith.constant dense<0.000000e+00> : vector<2x64xf32>
    %847 = tpu.matmul %841, %286, %cst_196 {dimension_numbers = #tpu.dot_dimension_numbers<[1], [0], [0], [1], [0, 0, 1, 1], [], []>} : vector<2x64xf32>, vector<64x64xf32>, vector<2x64xf32> -> vector<2x64xf32>
    %848 = vector.broadcast %288 : vector<1x64xf32> to vector<2x64xf32>
    %849 = arith.addf %847, %848 : vector<2x64xf32>
    %850 = arith.addf %849, %290 : vector<2x64xf32>
    %851 = math.tanh %850 : vector<2x64xf32>
    %852 = vector.broadcast %289 : vector<1x64xf32> to vector<2x64xf32>
    %853 = arith.mulf %851, %852 : vector<2x64xf32>
    %cst_197 = arith.constant dense<0.000000e+00> : vector<2xf32>
    %854 = vector.multi_reduction <add>, %853, %cst_197 [1] : vector<2x64xf32> to vector<2xf32>
    %855 = vector.shape_cast %854 : vector<2xf32> to vector<2x1xf32>
    %856 = arith.addf %849, %291 : vector<2x64xf32>
    %857 = math.tanh %856 : vector<2x64xf32>
    %858 = vector.broadcast %289 : vector<1x64xf32> to vector<2x64xf32>
    %859 = arith.mulf %857, %858 : vector<2x64xf32>
    %cst_198 = arith.constant dense<0.000000e+00> : vector<2xf32>
    %860 = vector.multi_reduction <add>, %859, %cst_198 [1] : vector<2x64xf32> to vector<2xf32>
    %861 = vector.shape_cast %860 : vector<2xf32> to vector<2x1xf32>
    %862 = arith.addf %849, %292 : vector<2x64xf32>
    %863 = math.tanh %862 : vector<2x64xf32>
    %864 = vector.broadcast %289 : vector<1x64xf32> to vector<2x64xf32>
    %865 = arith.mulf %863, %864 : vector<2x64xf32>
    %cst_199 = arith.constant dense<0.000000e+00> : vector<2xf32>
    %866 = vector.multi_reduction <add>, %865, %cst_199 [1] : vector<2x64xf32> to vector<2xf32>
    %867 = vector.shape_cast %866 : vector<2xf32> to vector<2x1xf32>
    %868 = arith.addf %849, %293 : vector<2x64xf32>
    %869 = math.tanh %868 : vector<2x64xf32>
    %870 = vector.broadcast %289 : vector<1x64xf32> to vector<2x64xf32>
    %871 = arith.mulf %869, %870 : vector<2x64xf32>
    %cst_200 = arith.constant dense<0.000000e+00> : vector<2xf32>
    %872 = vector.multi_reduction <add>, %871, %cst_200 [1] : vector<2x64xf32> to vector<2xf32>
    %873 = vector.shape_cast %872 : vector<2xf32> to vector<2x1xf32>
    %874 = arith.addf %849, %294 : vector<2x64xf32>
    %875 = math.tanh %874 : vector<2x64xf32>
    %876 = vector.broadcast %289 : vector<1x64xf32> to vector<2x64xf32>
    %877 = arith.mulf %875, %876 : vector<2x64xf32>
    %cst_201 = arith.constant dense<0.000000e+00> : vector<2xf32>
    %878 = vector.multi_reduction <add>, %877, %cst_201 [1] : vector<2x64xf32> to vector<2xf32>
    %879 = vector.shape_cast %878 : vector<2xf32> to vector<2x1xf32>
    %880 = arith.addf %849, %295 : vector<2x64xf32>
    %881 = math.tanh %880 : vector<2x64xf32>
    %882 = vector.broadcast %289 : vector<1x64xf32> to vector<2x64xf32>
    %883 = arith.mulf %881, %882 : vector<2x64xf32>
    %cst_202 = arith.constant dense<0.000000e+00> : vector<2xf32>
    %884 = vector.multi_reduction <add>, %883, %cst_202 [1] : vector<2x64xf32> to vector<2xf32>
    %885 = vector.shape_cast %884 : vector<2xf32> to vector<2x1xf32>
    %886 = arith.addf %849, %296 : vector<2x64xf32>
    %887 = math.tanh %886 : vector<2x64xf32>
    %888 = vector.broadcast %289 : vector<1x64xf32> to vector<2x64xf32>
    %889 = arith.mulf %887, %888 : vector<2x64xf32>
    %cst_203 = arith.constant dense<0.000000e+00> : vector<2xf32>
    %890 = vector.multi_reduction <add>, %889, %cst_203 [1] : vector<2x64xf32> to vector<2xf32>
    %891 = vector.shape_cast %890 : vector<2xf32> to vector<2x1xf32>
    %892 = arith.addf %849, %297 : vector<2x64xf32>
    %893 = math.tanh %892 : vector<2x64xf32>
    %894 = vector.broadcast %289 : vector<1x64xf32> to vector<2x64xf32>
    %895 = arith.mulf %893, %894 : vector<2x64xf32>
    %cst_204 = arith.constant dense<0.000000e+00> : vector<2xf32>
    %896 = vector.multi_reduction <add>, %895, %cst_204 [1] : vector<2x64xf32> to vector<2xf32>
    %897 = vector.shape_cast %896 : vector<2xf32> to vector<2x1xf32>
    %898 = arith.maximumf %855, %861 : vector<2x1xf32>
    %899 = arith.maximumf %898, %867 : vector<2x1xf32>
    %900 = arith.maximumf %899, %873 : vector<2x1xf32>
    %901 = arith.maximumf %900, %879 : vector<2x1xf32>
    %902 = arith.maximumf %901, %885 : vector<2x1xf32>
    %903 = arith.maximumf %902, %891 : vector<2x1xf32>
    %904 = arith.maximumf %903, %897 : vector<2x1xf32>
    %905 = arith.subf %855, %904 : vector<2x1xf32>
    %906 = math.exp %905 : vector<2x1xf32>
    %907 = arith.subf %861, %904 : vector<2x1xf32>
    %908 = math.exp %907 : vector<2x1xf32>
    %909 = arith.subf %867, %904 : vector<2x1xf32>
    %910 = math.exp %909 : vector<2x1xf32>
    %911 = arith.subf %873, %904 : vector<2x1xf32>
    %912 = math.exp %911 : vector<2x1xf32>
    %913 = arith.subf %879, %904 : vector<2x1xf32>
    %914 = math.exp %913 : vector<2x1xf32>
    %915 = arith.subf %885, %904 : vector<2x1xf32>
    %916 = math.exp %915 : vector<2x1xf32>
    %917 = arith.subf %891, %904 : vector<2x1xf32>
    %918 = math.exp %917 : vector<2x1xf32>
    %919 = arith.subf %897, %904 : vector<2x1xf32>
    %920 = math.exp %919 : vector<2x1xf32>
    %921 = arith.addf %906, %908 : vector<2x1xf32>
    %922 = arith.addf %921, %910 : vector<2x1xf32>
    %923 = arith.addf %922, %912 : vector<2x1xf32>
    %924 = arith.addf %923, %914 : vector<2x1xf32>
    %925 = arith.addf %924, %916 : vector<2x1xf32>
    %926 = arith.addf %925, %918 : vector<2x1xf32>
    %927 = arith.addf %926, %920 : vector<2x1xf32>
    %928 = vector.broadcast %906 : vector<2x1xf32> to vector<2x64xf32>
    %929 = arith.mulf %928, %298 : vector<2x64xf32>
    %930 = vector.broadcast %908 : vector<2x1xf32> to vector<2x64xf32>
    %931 = arith.mulf %930, %299 : vector<2x64xf32>
    %932 = arith.addf %929, %931 : vector<2x64xf32>
    %933 = vector.broadcast %910 : vector<2x1xf32> to vector<2x64xf32>
    %934 = arith.mulf %933, %300 : vector<2x64xf32>
    %935 = arith.addf %932, %934 : vector<2x64xf32>
    %936 = vector.broadcast %912 : vector<2x1xf32> to vector<2x64xf32>
    %937 = arith.mulf %936, %301 : vector<2x64xf32>
    %938 = arith.addf %935, %937 : vector<2x64xf32>
    %939 = vector.broadcast %914 : vector<2x1xf32> to vector<2x64xf32>
    %940 = arith.mulf %939, %302 : vector<2x64xf32>
    %941 = arith.addf %938, %940 : vector<2x64xf32>
    %942 = vector.broadcast %916 : vector<2x1xf32> to vector<2x64xf32>
    %943 = arith.mulf %942, %303 : vector<2x64xf32>
    %944 = arith.addf %941, %943 : vector<2x64xf32>
    %945 = vector.broadcast %918 : vector<2x1xf32> to vector<2x64xf32>
    %946 = arith.mulf %945, %304 : vector<2x64xf32>
    %947 = arith.addf %944, %946 : vector<2x64xf32>
    %948 = vector.broadcast %920 : vector<2x1xf32> to vector<2x64xf32>
    %949 = arith.mulf %948, %305 : vector<2x64xf32>
    %950 = arith.addf %947, %949 : vector<2x64xf32>
    %cst_205 = arith.constant 1.000000e+00 : f32
    %951 = vector.broadcast %cst_205 : f32 to vector<2x1xf32>
    %952 = arith.divf %951, %927 : vector<2x1xf32>
    %cst_206 = arith.constant 1.250000e-01 : f32
    %953 = vector.broadcast %cst_206 : f32 to vector<2x1xf32>
    %954 = arith.mulf %952, %953 : vector<2x1xf32>
    %955 = vector.broadcast %954 : vector<2x1xf32> to vector<2x64xf32>
    %956 = arith.mulf %950, %955 : vector<2x64xf32>
    %957 = vector.extract_strided_slice %16 {offsets = [6, 0], sizes = [2, 256], strides = [1, 1]} : vector<16x256xf32> to vector<2x256xf32>
    %958 = vector.broadcast %19 : vector<1x256xf32> to vector<2x256xf32>
    %959 = arith.addf %958, %957 : vector<2x256xf32>
    %cst_207 = arith.constant dense<0.000000e+00> : vector<2x256xf32>
    %960 = tpu.matmul %841, %18, %cst_207 {dimension_numbers = #tpu.dot_dimension_numbers<[1], [0], [0], [1], [0, 0, 1, 1], [], []>} : vector<2x64xf32>, vector<64x256xf32>, vector<2x256xf32> -> vector<2x256xf32>
    %961 = arith.addf %960, %959 : vector<2x256xf32>
    %962 = arith.negf %961 : vector<2x256xf32>
    %963 = math.exp %962 : vector<2x256xf32>
    %cst_208 = arith.constant 1.000000e+00 : f32
    %964 = vector.broadcast %cst_208 : f32 to vector<2x256xf32>
    %965 = arith.addf %964, %963 : vector<2x256xf32>
    %966 = arith.divf %964, %965 : vector<2x256xf32>
    %967 = math.tanh %961 : vector<2x256xf32>
    %968 = vector.extract_strided_slice %966 {offsets = [0, 0], sizes = [2, 64], strides = [1, 1]} : vector<2x256xf32> to vector<2x64xf32>
    %969 = vector.extract_strided_slice %966 {offsets = [0, 64], sizes = [2, 64], strides = [1, 1]} : vector<2x256xf32> to vector<2x64xf32>
    %970 = vector.extract_strided_slice %967 {offsets = [0, 128], sizes = [2, 64], strides = [1, 1]} : vector<2x256xf32> to vector<2x64xf32>
    %971 = vector.extract_strided_slice %966 {offsets = [0, 192], sizes = [2, 64], strides = [1, 1]} : vector<2x256xf32> to vector<2x64xf32>
    %972 = arith.mulf %969, %839 : vector<2x64xf32>
    %973 = arith.mulf %968, %970 : vector<2x64xf32>
    %974 = arith.addf %972, %973 : vector<2x64xf32>
    %975 = math.tanh %974 : vector<2x64xf32>
    %976 = arith.mulf %971, %975 : vector<2x64xf32>
    %977 = tpu.concatenate %976, %956 in 1 : vector<2x64xf32>, vector<2x64xf32> -> vector<2x128xf32>
    %cst_209 = arith.constant dense<0.000000e+00> : vector<2x16xf32>
    %978 = tpu.matmul %977, %306, %cst_209 {dimension_numbers = #tpu.dot_dimension_numbers<[1], [0], [0], [1], [0, 0, 1, 1], [], []>} : vector<2x128xf32>, vector<128x16xf32>, vector<2x16xf32> -> vector<2x16xf32>
    %979 = vector.broadcast %307 : vector<1x16xf32> to vector<2x16xf32>
    %980 = arith.addf %978, %979 : vector<2x16xf32>
    %c8_210 = arith.constant 8 : index
    %c0_211 = arith.constant 0 : index
    %981 = vector.load %arg18[%c8_210, %c0_211] : memref<16x16xf32, #tpu.memory_space<vmem>>, vector<2x16xf32>
    tpu.vector_store %arg18[%c8_210, %c0_211], %980 {strides = array<i32>} : memref<16x16xf32, #tpu.memory_space<vmem>>, vector<2x16xf32>,
    %cst_212 = arith.constant dense<0.000000e+00> : vector<2x64xf32>
    %982 = tpu.matmul %976, %286, %cst_212 {dimension_numbers = #tpu.dot_dimension_numbers<[1], [0], [0], [1], [0, 0, 1, 1], [], []>} : vector<2x64xf32>, vector<64x64xf32>, vector<2x64xf32> -> vector<2x64xf32>
    %983 = vector.broadcast %288 : vector<1x64xf32> to vector<2x64xf32>
    %984 = arith.addf %982, %983 : vector<2x64xf32>
    %985 = arith.addf %984, %290 : vector<2x64xf32>
    %986 = math.tanh %985 : vector<2x64xf32>
    %987 = vector.broadcast %289 : vector<1x64xf32> to vector<2x64xf32>
    %988 = arith.mulf %986, %987 : vector<2x64xf32>
    %cst_213 = arith.constant dense<0.000000e+00> : vector<2xf32>
    %989 = vector.multi_reduction <add>, %988, %cst_213 [1] : vector<2x64xf32> to vector<2xf32>
    %990 = vector.shape_cast %989 : vector<2xf32> to vector<2x1xf32>
    %991 = arith.addf %984, %291 : vector<2x64xf32>
    %992 = math.tanh %991 : vector<2x64xf32>
    %993 = vector.broadcast %289 : vector<1x64xf32> to vector<2x64xf32>
    %994 = arith.mulf %992, %993 : vector<2x64xf32>
    %cst_214 = arith.constant dense<0.000000e+00> : vector<2xf32>
    %995 = vector.multi_reduction <add>, %994, %cst_214 [1] : vector<2x64xf32> to vector<2xf32>
    %996 = vector.shape_cast %995 : vector<2xf32> to vector<2x1xf32>
    %997 = arith.addf %984, %292 : vector<2x64xf32>
    %998 = math.tanh %997 : vector<2x64xf32>
    %999 = vector.broadcast %289 : vector<1x64xf32> to vector<2x64xf32>
    %1000 = arith.mulf %998, %999 : vector<2x64xf32>
    %cst_215 = arith.constant dense<0.000000e+00> : vector<2xf32>
    %1001 = vector.multi_reduction <add>, %1000, %cst_215 [1] : vector<2x64xf32> to vector<2xf32>
    %1002 = vector.shape_cast %1001 : vector<2xf32> to vector<2x1xf32>
    %1003 = arith.addf %984, %293 : vector<2x64xf32>
    %1004 = math.tanh %1003 : vector<2x64xf32>
    %1005 = vector.broadcast %289 : vector<1x64xf32> to vector<2x64xf32>
    %1006 = arith.mulf %1004, %1005 : vector<2x64xf32>
    %cst_216 = arith.constant dense<0.000000e+00> : vector<2xf32>
    %1007 = vector.multi_reduction <add>, %1006, %cst_216 [1] : vector<2x64xf32> to vector<2xf32>
    %1008 = vector.shape_cast %1007 : vector<2xf32> to vector<2x1xf32>
    %1009 = arith.addf %984, %294 : vector<2x64xf32>
    %1010 = math.tanh %1009 : vector<2x64xf32>
    %1011 = vector.broadcast %289 : vector<1x64xf32> to vector<2x64xf32>
    %1012 = arith.mulf %1010, %1011 : vector<2x64xf32>
    %cst_217 = arith.constant dense<0.000000e+00> : vector<2xf32>
    %1013 = vector.multi_reduction <add>, %1012, %cst_217 [1] : vector<2x64xf32> to vector<2xf32>
    %1014 = vector.shape_cast %1013 : vector<2xf32> to vector<2x1xf32>
    %1015 = arith.addf %984, %295 : vector<2x64xf32>
    %1016 = math.tanh %1015 : vector<2x64xf32>
    %1017 = vector.broadcast %289 : vector<1x64xf32> to vector<2x64xf32>
    %1018 = arith.mulf %1016, %1017 : vector<2x64xf32>
    %cst_218 = arith.constant dense<0.000000e+00> : vector<2xf32>
    %1019 = vector.multi_reduction <add>, %1018, %cst_218 [1] : vector<2x64xf32> to vector<2xf32>
    %1020 = vector.shape_cast %1019 : vector<2xf32> to vector<2x1xf32>
    %1021 = arith.addf %984, %296 : vector<2x64xf32>
    %1022 = math.tanh %1021 : vector<2x64xf32>
    %1023 = vector.broadcast %289 : vector<1x64xf32> to vector<2x64xf32>
    %1024 = arith.mulf %1022, %1023 : vector<2x64xf32>
    %cst_219 = arith.constant dense<0.000000e+00> : vector<2xf32>
    %1025 = vector.multi_reduction <add>, %1024, %cst_219 [1] : vector<2x64xf32> to vector<2xf32>
    %1026 = vector.shape_cast %1025 : vector<2xf32> to vector<2x1xf32>
    %1027 = arith.addf %984, %297 : vector<2x64xf32>
    %1028 = math.tanh %1027 : vector<2x64xf32>
    %1029 = vector.broadcast %289 : vector<1x64xf32> to vector<2x64xf32>
    %1030 = arith.mulf %1028, %1029 : vector<2x64xf32>
    %cst_220 = arith.constant dense<0.000000e+00> : vector<2xf32>
    %1031 = vector.multi_reduction <add>, %1030, %cst_220 [1] : vector<2x64xf32> to vector<2xf32>
    %1032 = vector.shape_cast %1031 : vector<2xf32> to vector<2x1xf32>
    %1033 = arith.maximumf %990, %996 : vector<2x1xf32>
    %1034 = arith.maximumf %1033, %1002 : vector<2x1xf32>
    %1035 = arith.maximumf %1034, %1008 : vector<2x1xf32>
    %1036 = arith.maximumf %1035, %1014 : vector<2x1xf32>
    %1037 = arith.maximumf %1036, %1020 : vector<2x1xf32>
    %1038 = arith.maximumf %1037, %1026 : vector<2x1xf32>
    %1039 = arith.maximumf %1038, %1032 : vector<2x1xf32>
    %1040 = arith.subf %990, %1039 : vector<2x1xf32>
    %1041 = math.exp %1040 : vector<2x1xf32>
    %1042 = arith.subf %996, %1039 : vector<2x1xf32>
    %1043 = math.exp %1042 : vector<2x1xf32>
    %1044 = arith.subf %1002, %1039 : vector<2x1xf32>
    %1045 = math.exp %1044 : vector<2x1xf32>
    %1046 = arith.subf %1008, %1039 : vector<2x1xf32>
    %1047 = math.exp %1046 : vector<2x1xf32>
    %1048 = arith.subf %1014, %1039 : vector<2x1xf32>
    %1049 = math.exp %1048 : vector<2x1xf32>
    %1050 = arith.subf %1020, %1039 : vector<2x1xf32>
    %1051 = math.exp %1050 : vector<2x1xf32>
    %1052 = arith.subf %1026, %1039 : vector<2x1xf32>
    %1053 = math.exp %1052 : vector<2x1xf32>
    %1054 = arith.subf %1032, %1039 : vector<2x1xf32>
    %1055 = math.exp %1054 : vector<2x1xf32>
    %1056 = arith.addf %1041, %1043 : vector<2x1xf32>
    %1057 = arith.addf %1056, %1045 : vector<2x1xf32>
    %1058 = arith.addf %1057, %1047 : vector<2x1xf32>
    %1059 = arith.addf %1058, %1049 : vector<2x1xf32>
    %1060 = arith.addf %1059, %1051 : vector<2x1xf32>
    %1061 = arith.addf %1060, %1053 : vector<2x1xf32>
    %1062 = arith.addf %1061, %1055 : vector<2x1xf32>
    %1063 = vector.broadcast %1041 : vector<2x1xf32> to vector<2x64xf32>
    %1064 = arith.mulf %1063, %298 : vector<2x64xf32>
    %1065 = vector.broadcast %1043 : vector<2x1xf32> to vector<2x64xf32>
    %1066 = arith.mulf %1065, %299 : vector<2x64xf32>
    %1067 = arith.addf %1064, %1066 : vector<2x64xf32>
    %1068 = vector.broadcast %1045 : vector<2x1xf32> to vector<2x64xf32>
    %1069 = arith.mulf %1068, %300 : vector<2x64xf32>
    %1070 = arith.addf %1067, %1069 : vector<2x64xf32>
    %1071 = vector.broadcast %1047 : vector<2x1xf32> to vector<2x64xf32>
    %1072 = arith.mulf %1071, %301 : vector<2x64xf32>
    %1073 = arith.addf %1070, %1072 : vector<2x64xf32>
    %1074 = vector.broadcast %1049 : vector<2x1xf32> to vector<2x64xf32>
    %1075 = arith.mulf %1074, %302 : vector<2x64xf32>
    %1076 = arith.addf %1073, %1075 : vector<2x64xf32>
    %1077 = vector.broadcast %1051 : vector<2x1xf32> to vector<2x64xf32>
    %1078 = arith.mulf %1077, %303 : vector<2x64xf32>
    %1079 = arith.addf %1076, %1078 : vector<2x64xf32>
    %1080 = vector.broadcast %1053 : vector<2x1xf32> to vector<2x64xf32>
    %1081 = arith.mulf %1080, %304 : vector<2x64xf32>
    %1082 = arith.addf %1079, %1081 : vector<2x64xf32>
    %1083 = vector.broadcast %1055 : vector<2x1xf32> to vector<2x64xf32>
    %1084 = arith.mulf %1083, %305 : vector<2x64xf32>
    %1085 = arith.addf %1082, %1084 : vector<2x64xf32>
    %cst_221 = arith.constant 1.000000e+00 : f32
    %1086 = vector.broadcast %cst_221 : f32 to vector<2x1xf32>
    %1087 = arith.divf %1086, %1062 : vector<2x1xf32>
    %cst_222 = arith.constant 1.250000e-01 : f32
    %1088 = vector.broadcast %cst_222 : f32 to vector<2x1xf32>
    %1089 = arith.mulf %1087, %1088 : vector<2x1xf32>
    %1090 = vector.broadcast %1089 : vector<2x1xf32> to vector<2x64xf32>
    %1091 = arith.mulf %1085, %1090 : vector<2x64xf32>
    %1092 = vector.extract_strided_slice %16 {offsets = [8, 0], sizes = [2, 256], strides = [1, 1]} : vector<16x256xf32> to vector<2x256xf32>
    %1093 = vector.broadcast %19 : vector<1x256xf32> to vector<2x256xf32>
    %1094 = arith.addf %1093, %1092 : vector<2x256xf32>
    %cst_223 = arith.constant dense<0.000000e+00> : vector<2x256xf32>
    %1095 = tpu.matmul %976, %18, %cst_223 {dimension_numbers = #tpu.dot_dimension_numbers<[1], [0], [0], [1], [0, 0, 1, 1], [], []>} : vector<2x64xf32>, vector<64x256xf32>, vector<2x256xf32> -> vector<2x256xf32>
    %1096 = arith.addf %1095, %1094 : vector<2x256xf32>
    %1097 = arith.negf %1096 : vector<2x256xf32>
    %1098 = math.exp %1097 : vector<2x256xf32>
    %cst_224 = arith.constant 1.000000e+00 : f32
    %1099 = vector.broadcast %cst_224 : f32 to vector<2x256xf32>
    %1100 = arith.addf %1099, %1098 : vector<2x256xf32>
    %1101 = arith.divf %1099, %1100 : vector<2x256xf32>
    %1102 = math.tanh %1096 : vector<2x256xf32>
    %1103 = vector.extract_strided_slice %1101 {offsets = [0, 0], sizes = [2, 64], strides = [1, 1]} : vector<2x256xf32> to vector<2x64xf32>
    %1104 = vector.extract_strided_slice %1101 {offsets = [0, 64], sizes = [2, 64], strides = [1, 1]} : vector<2x256xf32> to vector<2x64xf32>
    %1105 = vector.extract_strided_slice %1102 {offsets = [0, 128], sizes = [2, 64], strides = [1, 1]} : vector<2x256xf32> to vector<2x64xf32>
    %1106 = vector.extract_strided_slice %1101 {offsets = [0, 192], sizes = [2, 64], strides = [1, 1]} : vector<2x256xf32> to vector<2x64xf32>
    %1107 = arith.mulf %1104, %974 : vector<2x64xf32>
    %1108 = arith.mulf %1103, %1105 : vector<2x64xf32>
    %1109 = arith.addf %1107, %1108 : vector<2x64xf32>
    %1110 = math.tanh %1109 : vector<2x64xf32>
    %1111 = arith.mulf %1106, %1110 : vector<2x64xf32>
    %1112 = tpu.concatenate %1111, %1091 in 1 : vector<2x64xf32>, vector<2x64xf32> -> vector<2x128xf32>
    %cst_225 = arith.constant dense<0.000000e+00> : vector<2x16xf32>
    %1113 = tpu.matmul %1112, %306, %cst_225 {dimension_numbers = #tpu.dot_dimension_numbers<[1], [0], [0], [1], [0, 0, 1, 1], [], []>} : vector<2x128xf32>, vector<128x16xf32>, vector<2x16xf32> -> vector<2x16xf32>
    %1114 = vector.broadcast %307 : vector<1x16xf32> to vector<2x16xf32>
    %1115 = arith.addf %1113, %1114 : vector<2x16xf32>
    %c10_226 = arith.constant 10 : index
    %c0_227 = arith.constant 0 : index
    %1116 = vector.load %arg18[%c10_226, %c0_227] : memref<16x16xf32, #tpu.memory_space<vmem>>, vector<2x16xf32>
    tpu.vector_store %arg18[%c10_226, %c0_227], %1115 {strides = array<i32>} : memref<16x16xf32, #tpu.memory_space<vmem>>, vector<2x16xf32>,
    %cst_228 = arith.constant dense<0.000000e+00> : vector<2x64xf32>
    %1117 = tpu.matmul %1111, %286, %cst_228 {dimension_numbers = #tpu.dot_dimension_numbers<[1], [0], [0], [1], [0, 0, 1, 1], [], []>} : vector<2x64xf32>, vector<64x64xf32>, vector<2x64xf32> -> vector<2x64xf32>
    %1118 = vector.broadcast %288 : vector<1x64xf32> to vector<2x64xf32>
    %1119 = arith.addf %1117, %1118 : vector<2x64xf32>
    %1120 = arith.addf %1119, %290 : vector<2x64xf32>
    %1121 = math.tanh %1120 : vector<2x64xf32>
    %1122 = vector.broadcast %289 : vector<1x64xf32> to vector<2x64xf32>
    %1123 = arith.mulf %1121, %1122 : vector<2x64xf32>
    %cst_229 = arith.constant dense<0.000000e+00> : vector<2xf32>
    %1124 = vector.multi_reduction <add>, %1123, %cst_229 [1] : vector<2x64xf32> to vector<2xf32>
    %1125 = vector.shape_cast %1124 : vector<2xf32> to vector<2x1xf32>
    %1126 = arith.addf %1119, %291 : vector<2x64xf32>
    %1127 = math.tanh %1126 : vector<2x64xf32>
    %1128 = vector.broadcast %289 : vector<1x64xf32> to vector<2x64xf32>
    %1129 = arith.mulf %1127, %1128 : vector<2x64xf32>
    %cst_230 = arith.constant dense<0.000000e+00> : vector<2xf32>
    %1130 = vector.multi_reduction <add>, %1129, %cst_230 [1] : vector<2x64xf32> to vector<2xf32>
    %1131 = vector.shape_cast %1130 : vector<2xf32> to vector<2x1xf32>
    %1132 = arith.addf %1119, %292 : vector<2x64xf32>
    %1133 = math.tanh %1132 : vector<2x64xf32>
    %1134 = vector.broadcast %289 : vector<1x64xf32> to vector<2x64xf32>
    %1135 = arith.mulf %1133, %1134 : vector<2x64xf32>
    %cst_231 = arith.constant dense<0.000000e+00> : vector<2xf32>
    %1136 = vector.multi_reduction <add>, %1135, %cst_231 [1] : vector<2x64xf32> to vector<2xf32>
    %1137 = vector.shape_cast %1136 : vector<2xf32> to vector<2x1xf32>
    %1138 = arith.addf %1119, %293 : vector<2x64xf32>
    %1139 = math.tanh %1138 : vector<2x64xf32>
    %1140 = vector.broadcast %289 : vector<1x64xf32> to vector<2x64xf32>
    %1141 = arith.mulf %1139, %1140 : vector<2x64xf32>
    %cst_232 = arith.constant dense<0.000000e+00> : vector<2xf32>
    %1142 = vector.multi_reduction <add>, %1141, %cst_232 [1] : vector<2x64xf32> to vector<2xf32>
    %1143 = vector.shape_cast %1142 : vector<2xf32> to vector<2x1xf32>
    %1144 = arith.addf %1119, %294 : vector<2x64xf32>
    %1145 = math.tanh %1144 : vector<2x64xf32>
    %1146 = vector.broadcast %289 : vector<1x64xf32> to vector<2x64xf32>
    %1147 = arith.mulf %1145, %1146 : vector<2x64xf32>
    %cst_233 = arith.constant dense<0.000000e+00> : vector<2xf32>
    %1148 = vector.multi_reduction <add>, %1147, %cst_233 [1] : vector<2x64xf32> to vector<2xf32>
    %1149 = vector.shape_cast %1148 : vector<2xf32> to vector<2x1xf32>
    %1150 = arith.addf %1119, %295 : vector<2x64xf32>
    %1151 = math.tanh %1150 : vector<2x64xf32>
    %1152 = vector.broadcast %289 : vector<1x64xf32> to vector<2x64xf32>
    %1153 = arith.mulf %1151, %1152 : vector<2x64xf32>
    %cst_234 = arith.constant dense<0.000000e+00> : vector<2xf32>
    %1154 = vector.multi_reduction <add>, %1153, %cst_234 [1] : vector<2x64xf32> to vector<2xf32>
    %1155 = vector.shape_cast %1154 : vector<2xf32> to vector<2x1xf32>
    %1156 = arith.addf %1119, %296 : vector<2x64xf32>
    %1157 = math.tanh %1156 : vector<2x64xf32>
    %1158 = vector.broadcast %289 : vector<1x64xf32> to vector<2x64xf32>
    %1159 = arith.mulf %1157, %1158 : vector<2x64xf32>
    %cst_235 = arith.constant dense<0.000000e+00> : vector<2xf32>
    %1160 = vector.multi_reduction <add>, %1159, %cst_235 [1] : vector<2x64xf32> to vector<2xf32>
    %1161 = vector.shape_cast %1160 : vector<2xf32> to vector<2x1xf32>
    %1162 = arith.addf %1119, %297 : vector<2x64xf32>
    %1163 = math.tanh %1162 : vector<2x64xf32>
    %1164 = vector.broadcast %289 : vector<1x64xf32> to vector<2x64xf32>
    %1165 = arith.mulf %1163, %1164 : vector<2x64xf32>
    %cst_236 = arith.constant dense<0.000000e+00> : vector<2xf32>
    %1166 = vector.multi_reduction <add>, %1165, %cst_236 [1] : vector<2x64xf32> to vector<2xf32>
    %1167 = vector.shape_cast %1166 : vector<2xf32> to vector<2x1xf32>
    %1168 = arith.maximumf %1125, %1131 : vector<2x1xf32>
    %1169 = arith.maximumf %1168, %1137 : vector<2x1xf32>
    %1170 = arith.maximumf %1169, %1143 : vector<2x1xf32>
    %1171 = arith.maximumf %1170, %1149 : vector<2x1xf32>
    %1172 = arith.maximumf %1171, %1155 : vector<2x1xf32>
    %1173 = arith.maximumf %1172, %1161 : vector<2x1xf32>
    %1174 = arith.maximumf %1173, %1167 : vector<2x1xf32>
    %1175 = arith.subf %1125, %1174 : vector<2x1xf32>
    %1176 = math.exp %1175 : vector<2x1xf32>
    %1177 = arith.subf %1131, %1174 : vector<2x1xf32>
    %1178 = math.exp %1177 : vector<2x1xf32>
    %1179 = arith.subf %1137, %1174 : vector<2x1xf32>
    %1180 = math.exp %1179 : vector<2x1xf32>
    %1181 = arith.subf %1143, %1174 : vector<2x1xf32>
    %1182 = math.exp %1181 : vector<2x1xf32>
    %1183 = arith.subf %1149, %1174 : vector<2x1xf32>
    %1184 = math.exp %1183 : vector<2x1xf32>
    %1185 = arith.subf %1155, %1174 : vector<2x1xf32>
    %1186 = math.exp %1185 : vector<2x1xf32>
    %1187 = arith.subf %1161, %1174 : vector<2x1xf32>
    %1188 = math.exp %1187 : vector<2x1xf32>
    %1189 = arith.subf %1167, %1174 : vector<2x1xf32>
    %1190 = math.exp %1189 : vector<2x1xf32>
    %1191 = arith.addf %1176, %1178 : vector<2x1xf32>
    %1192 = arith.addf %1191, %1180 : vector<2x1xf32>
    %1193 = arith.addf %1192, %1182 : vector<2x1xf32>
    %1194 = arith.addf %1193, %1184 : vector<2x1xf32>
    %1195 = arith.addf %1194, %1186 : vector<2x1xf32>
    %1196 = arith.addf %1195, %1188 : vector<2x1xf32>
    %1197 = arith.addf %1196, %1190 : vector<2x1xf32>
    %1198 = vector.broadcast %1176 : vector<2x1xf32> to vector<2x64xf32>
    %1199 = arith.mulf %1198, %298 : vector<2x64xf32>
    %1200 = vector.broadcast %1178 : vector<2x1xf32> to vector<2x64xf32>
    %1201 = arith.mulf %1200, %299 : vector<2x64xf32>
    %1202 = arith.addf %1199, %1201 : vector<2x64xf32>
    %1203 = vector.broadcast %1180 : vector<2x1xf32> to vector<2x64xf32>
    %1204 = arith.mulf %1203, %300 : vector<2x64xf32>
    %1205 = arith.addf %1202, %1204 : vector<2x64xf32>
    %1206 = vector.broadcast %1182 : vector<2x1xf32> to vector<2x64xf32>
    %1207 = arith.mulf %1206, %301 : vector<2x64xf32>
    %1208 = arith.addf %1205, %1207 : vector<2x64xf32>
    %1209 = vector.broadcast %1184 : vector<2x1xf32> to vector<2x64xf32>
    %1210 = arith.mulf %1209, %302 : vector<2x64xf32>
    %1211 = arith.addf %1208, %1210 : vector<2x64xf32>
    %1212 = vector.broadcast %1186 : vector<2x1xf32> to vector<2x64xf32>
    %1213 = arith.mulf %1212, %303 : vector<2x64xf32>
    %1214 = arith.addf %1211, %1213 : vector<2x64xf32>
    %1215 = vector.broadcast %1188 : vector<2x1xf32> to vector<2x64xf32>
    %1216 = arith.mulf %1215, %304 : vector<2x64xf32>
    %1217 = arith.addf %1214, %1216 : vector<2x64xf32>
    %1218 = vector.broadcast %1190 : vector<2x1xf32> to vector<2x64xf32>
    %1219 = arith.mulf %1218, %305 : vector<2x64xf32>
    %1220 = arith.addf %1217, %1219 : vector<2x64xf32>
    %cst_237 = arith.constant 1.000000e+00 : f32
    %1221 = vector.broadcast %cst_237 : f32 to vector<2x1xf32>
    %1222 = arith.divf %1221, %1197 : vector<2x1xf32>
    %cst_238 = arith.constant 1.250000e-01 : f32
    %1223 = vector.broadcast %cst_238 : f32 to vector<2x1xf32>
    %1224 = arith.mulf %1222, %1223 : vector<2x1xf32>
    %1225 = vector.broadcast %1224 : vector<2x1xf32> to vector<2x64xf32>
    %1226 = arith.mulf %1220, %1225 : vector<2x64xf32>
    %1227 = vector.extract_strided_slice %16 {offsets = [10, 0], sizes = [2, 256], strides = [1, 1]} : vector<16x256xf32> to vector<2x256xf32>
    %1228 = vector.broadcast %19 : vector<1x256xf32> to vector<2x256xf32>
    %1229 = arith.addf %1228, %1227 : vector<2x256xf32>
    %cst_239 = arith.constant dense<0.000000e+00> : vector<2x256xf32>
    %1230 = tpu.matmul %1111, %18, %cst_239 {dimension_numbers = #tpu.dot_dimension_numbers<[1], [0], [0], [1], [0, 0, 1, 1], [], []>} : vector<2x64xf32>, vector<64x256xf32>, vector<2x256xf32> -> vector<2x256xf32>
    %1231 = arith.addf %1230, %1229 : vector<2x256xf32>
    %1232 = arith.negf %1231 : vector<2x256xf32>
    %1233 = math.exp %1232 : vector<2x256xf32>
    %cst_240 = arith.constant 1.000000e+00 : f32
    %1234 = vector.broadcast %cst_240 : f32 to vector<2x256xf32>
    %1235 = arith.addf %1234, %1233 : vector<2x256xf32>
    %1236 = arith.divf %1234, %1235 : vector<2x256xf32>
    %1237 = math.tanh %1231 : vector<2x256xf32>
    %1238 = vector.extract_strided_slice %1236 {offsets = [0, 0], sizes = [2, 64], strides = [1, 1]} : vector<2x256xf32> to vector<2x64xf32>
    %1239 = vector.extract_strided_slice %1236 {offsets = [0, 64], sizes = [2, 64], strides = [1, 1]} : vector<2x256xf32> to vector<2x64xf32>
    %1240 = vector.extract_strided_slice %1237 {offsets = [0, 128], sizes = [2, 64], strides = [1, 1]} : vector<2x256xf32> to vector<2x64xf32>
    %1241 = vector.extract_strided_slice %1236 {offsets = [0, 192], sizes = [2, 64], strides = [1, 1]} : vector<2x256xf32> to vector<2x64xf32>
    %1242 = arith.mulf %1239, %1109 : vector<2x64xf32>
    %1243 = arith.mulf %1238, %1240 : vector<2x64xf32>
    %1244 = arith.addf %1242, %1243 : vector<2x64xf32>
    %1245 = math.tanh %1244 : vector<2x64xf32>
    %1246 = arith.mulf %1241, %1245 : vector<2x64xf32>
    %1247 = tpu.concatenate %1246, %1226 in 1 : vector<2x64xf32>, vector<2x64xf32> -> vector<2x128xf32>
    %cst_241 = arith.constant dense<0.000000e+00> : vector<2x16xf32>
    %1248 = tpu.matmul %1247, %306, %cst_241 {dimension_numbers = #tpu.dot_dimension_numbers<[1], [0], [0], [1], [0, 0, 1, 1], [], []>} : vector<2x128xf32>, vector<128x16xf32>, vector<2x16xf32> -> vector<2x16xf32>
    %1249 = vector.broadcast %307 : vector<1x16xf32> to vector<2x16xf32>
    %1250 = arith.addf %1248, %1249 : vector<2x16xf32>
    %c12_242 = arith.constant 12 : index
    %c0_243 = arith.constant 0 : index
    %1251 = vector.load %arg18[%c12_242, %c0_243] : memref<16x16xf32, #tpu.memory_space<vmem>>, vector<2x16xf32>
    tpu.vector_store %arg18[%c12_242, %c0_243], %1250 {strides = array<i32>} : memref<16x16xf32, #tpu.memory_space<vmem>>, vector<2x16xf32>,
    %cst_244 = arith.constant dense<0.000000e+00> : vector<2x64xf32>
    %1252 = tpu.matmul %1246, %286, %cst_244 {dimension_numbers = #tpu.dot_dimension_numbers<[1], [0], [0], [1], [0, 0, 1, 1], [], []>} : vector<2x64xf32>, vector<64x64xf32>, vector<2x64xf32> -> vector<2x64xf32>
    %1253 = vector.broadcast %288 : vector<1x64xf32> to vector<2x64xf32>
    %1254 = arith.addf %1252, %1253 : vector<2x64xf32>
    %1255 = arith.addf %1254, %290 : vector<2x64xf32>
    %1256 = math.tanh %1255 : vector<2x64xf32>
    %1257 = vector.broadcast %289 : vector<1x64xf32> to vector<2x64xf32>
    %1258 = arith.mulf %1256, %1257 : vector<2x64xf32>
    %cst_245 = arith.constant dense<0.000000e+00> : vector<2xf32>
    %1259 = vector.multi_reduction <add>, %1258, %cst_245 [1] : vector<2x64xf32> to vector<2xf32>
    %1260 = vector.shape_cast %1259 : vector<2xf32> to vector<2x1xf32>
    %1261 = arith.addf %1254, %291 : vector<2x64xf32>
    %1262 = math.tanh %1261 : vector<2x64xf32>
    %1263 = vector.broadcast %289 : vector<1x64xf32> to vector<2x64xf32>
    %1264 = arith.mulf %1262, %1263 : vector<2x64xf32>
    %cst_246 = arith.constant dense<0.000000e+00> : vector<2xf32>
    %1265 = vector.multi_reduction <add>, %1264, %cst_246 [1] : vector<2x64xf32> to vector<2xf32>
    %1266 = vector.shape_cast %1265 : vector<2xf32> to vector<2x1xf32>
    %1267 = arith.addf %1254, %292 : vector<2x64xf32>
    %1268 = math.tanh %1267 : vector<2x64xf32>
    %1269 = vector.broadcast %289 : vector<1x64xf32> to vector<2x64xf32>
    %1270 = arith.mulf %1268, %1269 : vector<2x64xf32>
    %cst_247 = arith.constant dense<0.000000e+00> : vector<2xf32>
    %1271 = vector.multi_reduction <add>, %1270, %cst_247 [1] : vector<2x64xf32> to vector<2xf32>
    %1272 = vector.shape_cast %1271 : vector<2xf32> to vector<2x1xf32>
    %1273 = arith.addf %1254, %293 : vector<2x64xf32>
    %1274 = math.tanh %1273 : vector<2x64xf32>
    %1275 = vector.broadcast %289 : vector<1x64xf32> to vector<2x64xf32>
    %1276 = arith.mulf %1274, %1275 : vector<2x64xf32>
    %cst_248 = arith.constant dense<0.000000e+00> : vector<2xf32>
    %1277 = vector.multi_reduction <add>, %1276, %cst_248 [1] : vector<2x64xf32> to vector<2xf32>
    %1278 = vector.shape_cast %1277 : vector<2xf32> to vector<2x1xf32>
    %1279 = arith.addf %1254, %294 : vector<2x64xf32>
    %1280 = math.tanh %1279 : vector<2x64xf32>
    %1281 = vector.broadcast %289 : vector<1x64xf32> to vector<2x64xf32>
    %1282 = arith.mulf %1280, %1281 : vector<2x64xf32>
    %cst_249 = arith.constant dense<0.000000e+00> : vector<2xf32>
    %1283 = vector.multi_reduction <add>, %1282, %cst_249 [1] : vector<2x64xf32> to vector<2xf32>
    %1284 = vector.shape_cast %1283 : vector<2xf32> to vector<2x1xf32>
    %1285 = arith.addf %1254, %295 : vector<2x64xf32>
    %1286 = math.tanh %1285 : vector<2x64xf32>
    %1287 = vector.broadcast %289 : vector<1x64xf32> to vector<2x64xf32>
    %1288 = arith.mulf %1286, %1287 : vector<2x64xf32>
    %cst_250 = arith.constant dense<0.000000e+00> : vector<2xf32>
    %1289 = vector.multi_reduction <add>, %1288, %cst_250 [1] : vector<2x64xf32> to vector<2xf32>
    %1290 = vector.shape_cast %1289 : vector<2xf32> to vector<2x1xf32>
    %1291 = arith.addf %1254, %296 : vector<2x64xf32>
    %1292 = math.tanh %1291 : vector<2x64xf32>
    %1293 = vector.broadcast %289 : vector<1x64xf32> to vector<2x64xf32>
    %1294 = arith.mulf %1292, %1293 : vector<2x64xf32>
    %cst_251 = arith.constant dense<0.000000e+00> : vector<2xf32>
    %1295 = vector.multi_reduction <add>, %1294, %cst_251 [1] : vector<2x64xf32> to vector<2xf32>
    %1296 = vector.shape_cast %1295 : vector<2xf32> to vector<2x1xf32>
    %1297 = arith.addf %1254, %297 : vector<2x64xf32>
    %1298 = math.tanh %1297 : vector<2x64xf32>
    %1299 = vector.broadcast %289 : vector<1x64xf32> to vector<2x64xf32>
    %1300 = arith.mulf %1298, %1299 : vector<2x64xf32>
    %cst_252 = arith.constant dense<0.000000e+00> : vector<2xf32>
    %1301 = vector.multi_reduction <add>, %1300, %cst_252 [1] : vector<2x64xf32> to vector<2xf32>
    %1302 = vector.shape_cast %1301 : vector<2xf32> to vector<2x1xf32>
    %1303 = arith.maximumf %1260, %1266 : vector<2x1xf32>
    %1304 = arith.maximumf %1303, %1272 : vector<2x1xf32>
    %1305 = arith.maximumf %1304, %1278 : vector<2x1xf32>
    %1306 = arith.maximumf %1305, %1284 : vector<2x1xf32>
    %1307 = arith.maximumf %1306, %1290 : vector<2x1xf32>
    %1308 = arith.maximumf %1307, %1296 : vector<2x1xf32>
    %1309 = arith.maximumf %1308, %1302 : vector<2x1xf32>
    %1310 = arith.subf %1260, %1309 : vector<2x1xf32>
    %1311 = math.exp %1310 : vector<2x1xf32>
    %1312 = arith.subf %1266, %1309 : vector<2x1xf32>
    %1313 = math.exp %1312 : vector<2x1xf32>
    %1314 = arith.subf %1272, %1309 : vector<2x1xf32>
    %1315 = math.exp %1314 : vector<2x1xf32>
    %1316 = arith.subf %1278, %1309 : vector<2x1xf32>
    %1317 = math.exp %1316 : vector<2x1xf32>
    %1318 = arith.subf %1284, %1309 : vector<2x1xf32>
    %1319 = math.exp %1318 : vector<2x1xf32>
    %1320 = arith.subf %1290, %1309 : vector<2x1xf32>
    %1321 = math.exp %1320 : vector<2x1xf32>
    %1322 = arith.subf %1296, %1309 : vector<2x1xf32>
    %1323 = math.exp %1322 : vector<2x1xf32>
    %1324 = arith.subf %1302, %1309 : vector<2x1xf32>
    %1325 = math.exp %1324 : vector<2x1xf32>
    %1326 = arith.addf %1311, %1313 : vector<2x1xf32>
    %1327 = arith.addf %1326, %1315 : vector<2x1xf32>
    %1328 = arith.addf %1327, %1317 : vector<2x1xf32>
    %1329 = arith.addf %1328, %1319 : vector<2x1xf32>
    %1330 = arith.addf %1329, %1321 : vector<2x1xf32>
    %1331 = arith.addf %1330, %1323 : vector<2x1xf32>
    %1332 = arith.addf %1331, %1325 : vector<2x1xf32>
    %1333 = vector.broadcast %1311 : vector<2x1xf32> to vector<2x64xf32>
    %1334 = arith.mulf %1333, %298 : vector<2x64xf32>
    %1335 = vector.broadcast %1313 : vector<2x1xf32> to vector<2x64xf32>
    %1336 = arith.mulf %1335, %299 : vector<2x64xf32>
    %1337 = arith.addf %1334, %1336 : vector<2x64xf32>
    %1338 = vector.broadcast %1315 : vector<2x1xf32> to vector<2x64xf32>
    %1339 = arith.mulf %1338, %300 : vector<2x64xf32>
    %1340 = arith.addf %1337, %1339 : vector<2x64xf32>
    %1341 = vector.broadcast %1317 : vector<2x1xf32> to vector<2x64xf32>
    %1342 = arith.mulf %1341, %301 : vector<2x64xf32>
    %1343 = arith.addf %1340, %1342 : vector<2x64xf32>
    %1344 = vector.broadcast %1319 : vector<2x1xf32> to vector<2x64xf32>
    %1345 = arith.mulf %1344, %302 : vector<2x64xf32>
    %1346 = arith.addf %1343, %1345 : vector<2x64xf32>
    %1347 = vector.broadcast %1321 : vector<2x1xf32> to vector<2x64xf32>
    %1348 = arith.mulf %1347, %303 : vector<2x64xf32>
    %1349 = arith.addf %1346, %1348 : vector<2x64xf32>
    %1350 = vector.broadcast %1323 : vector<2x1xf32> to vector<2x64xf32>
    %1351 = arith.mulf %1350, %304 : vector<2x64xf32>
    %1352 = arith.addf %1349, %1351 : vector<2x64xf32>
    %1353 = vector.broadcast %1325 : vector<2x1xf32> to vector<2x64xf32>
    %1354 = arith.mulf %1353, %305 : vector<2x64xf32>
    %1355 = arith.addf %1352, %1354 : vector<2x64xf32>
    %cst_253 = arith.constant 1.000000e+00 : f32
    %1356 = vector.broadcast %cst_253 : f32 to vector<2x1xf32>
    %1357 = arith.divf %1356, %1332 : vector<2x1xf32>
    %cst_254 = arith.constant 1.250000e-01 : f32
    %1358 = vector.broadcast %cst_254 : f32 to vector<2x1xf32>
    %1359 = arith.mulf %1357, %1358 : vector<2x1xf32>
    %1360 = vector.broadcast %1359 : vector<2x1xf32> to vector<2x64xf32>
    %1361 = arith.mulf %1355, %1360 : vector<2x64xf32>
    %1362 = vector.extract_strided_slice %16 {offsets = [12, 0], sizes = [2, 256], strides = [1, 1]} : vector<16x256xf32> to vector<2x256xf32>
    %1363 = vector.broadcast %19 : vector<1x256xf32> to vector<2x256xf32>
    %1364 = arith.addf %1363, %1362 : vector<2x256xf32>
    %cst_255 = arith.constant dense<0.000000e+00> : vector<2x256xf32>
    %1365 = tpu.matmul %1246, %18, %cst_255 {dimension_numbers = #tpu.dot_dimension_numbers<[1], [0], [0], [1], [0, 0, 1, 1], [], []>} : vector<2x64xf32>, vector<64x256xf32>, vector<2x256xf32> -> vector<2x256xf32>
    %1366 = arith.addf %1365, %1364 : vector<2x256xf32>
    %1367 = arith.negf %1366 : vector<2x256xf32>
    %1368 = math.exp %1367 : vector<2x256xf32>
    %cst_256 = arith.constant 1.000000e+00 : f32
    %1369 = vector.broadcast %cst_256 : f32 to vector<2x256xf32>
    %1370 = arith.addf %1369, %1368 : vector<2x256xf32>
    %1371 = arith.divf %1369, %1370 : vector<2x256xf32>
    %1372 = math.tanh %1366 : vector<2x256xf32>
    %1373 = vector.extract_strided_slice %1371 {offsets = [0, 0], sizes = [2, 64], strides = [1, 1]} : vector<2x256xf32> to vector<2x64xf32>
    %1374 = vector.extract_strided_slice %1371 {offsets = [0, 64], sizes = [2, 64], strides = [1, 1]} : vector<2x256xf32> to vector<2x64xf32>
    %1375 = vector.extract_strided_slice %1372 {offsets = [0, 128], sizes = [2, 64], strides = [1, 1]} : vector<2x256xf32> to vector<2x64xf32>
    %1376 = vector.extract_strided_slice %1371 {offsets = [0, 192], sizes = [2, 64], strides = [1, 1]} : vector<2x256xf32> to vector<2x64xf32>
    %1377 = arith.mulf %1374, %1244 : vector<2x64xf32>
    %1378 = arith.mulf %1373, %1375 : vector<2x64xf32>
    %1379 = arith.addf %1377, %1378 : vector<2x64xf32>
    %1380 = math.tanh %1379 : vector<2x64xf32>
    %1381 = arith.mulf %1376, %1380 : vector<2x64xf32>
    %1382 = tpu.concatenate %1381, %1361 in 1 : vector<2x64xf32>, vector<2x64xf32> -> vector<2x128xf32>
    %cst_257 = arith.constant dense<0.000000e+00> : vector<2x16xf32>
    %1383 = tpu.matmul %1382, %306, %cst_257 {dimension_numbers = #tpu.dot_dimension_numbers<[1], [0], [0], [1], [0, 0, 1, 1], [], []>} : vector<2x128xf32>, vector<128x16xf32>, vector<2x16xf32> -> vector<2x16xf32>
    %1384 = vector.broadcast %307 : vector<1x16xf32> to vector<2x16xf32>
    %1385 = arith.addf %1383, %1384 : vector<2x16xf32>
    %c14_258 = arith.constant 14 : index
    %c0_259 = arith.constant 0 : index
    %1386 = vector.load %arg18[%c14_258, %c0_259] : memref<16x16xf32, #tpu.memory_space<vmem>>, vector<2x16xf32>
    tpu.vector_store %arg18[%c14_258, %c0_259], %1385 {strides = array<i32>} : memref<16x16xf32, #tpu.memory_space<vmem>>, vector<2x16xf32>,
    return
  }
}

</mosaic_0001>

<bundles_post_ra>
// kernel: tpu_custom_call.1
= control target key start
LH: loop header
LB: loop body
LE: loop exit
PB: predicated region body
PF: predicated region fallthrough
CT: control target
= control target key end

     0   :  { %s9141_s0 = inlined_call_operand.hbm [shape: f32[16,16], index: 0, kind: input, shape index: {}]   ;;  %s9142_s1 = inlined_call_operand.hbm [shape: f32[2,16,256], index: 1, kind: input, shape index: {}]   ;;  %s9143_s2 = inlined_call_operand.hbm [shape: f32[2,1,256], index: 2, kind: input, shape index: {}]   ;;  %s9144_s3 = inlined_call_operand.vmem [shape: f32[64,256], index: 3, kind: input, shape index: {}]   ;;  %s9145_s4 = inlined_call_operand.hbm [shape: f32[16,256], index: 4, kind: input, shape index: {}]   ;;  %s9146_s5 = inlined_call_operand.hbm [shape: f32[1,256], index: 5, kind: input, shape index: {}]   ;;  %s9147_s6 = inlined_call_operand.hbm [shape: f32[64,256], index: 6, kind: input, shape index: {}]   ;;  %s9148_s7 = inlined_call_operand.vmem [shape: f32[32,64], index: 7, kind: input, shape index: {}]   ;;  %s9149_s8 = inlined_call_operand.vmem [shape: f32[1,64], index: 8, kind: input, shape index: {}]   ;;  %s9150_s9 = inlined_call_operand.hbm [shape: f32[64,128], index: 9, kind: input, shape index: {}]   ;;  %s9151_s10 = inlined_call_operand.hbm [shape: f32[1,128], index: 10, kind: input, shape index: {}]   ;;  %s9152_s11 = inlined_call_operand.hbm [shape: f32[2,64,64], index: 11, kind: input, shape index: {}]   ;;  %s9153_s12 = inlined_call_operand.hbm [shape: f32[2,1,64], index: 12, kind: input, shape index: {}]   ;;  %s9154_s13 = inlined_call_operand.hbm [shape: f32[1,64], index: 13, kind: input, shape index: {}]   ;;  %s9155_s14 = inlined_call_operand.vmem [shape: f32[128,16], index: 14, kind: input, shape index: {}]   ;;  %s9156_s15 = inlined_call_operand.vmem [shape: f32[1,16], index: 15, kind: input, shape index: {}]   ;;  %s9157_s16 = inlined_call_operand.vmem [shape: f32[2,2,32], index: 16, kind: input, shape index: {}]   ;;  %s9158_s17 = inlined_call_operand.vmem [shape: f32[16,64], index: 17, kind: input, shape index: {}]   ;;  %s9159_s18 = inlined_call_operand.hbm [shape: f32[16,16], index: 18, kind: output, shape index: {0}]   ;;  %s9160_s19 = inlined_call_operand.hbm [shape: f32[2,2,32], index: 19, kind: output, shape index: {1}]   ;;  %s9161_s20 = inlined_call_operand.hbm [shape: f32[16,64], index: 20, kind: output, shape index: {2}]   ;;  %s9162_s21 = inlined_call_operand.hbm [shape: f32[2,2,32], index: 21, kind: output, shape index: {3}]   ;;  %s9163_s22 = inlined_call_operand.hbm [shape: f32[16,64], index: 22, kind: output, shape index: {4}]   ;;  %s9164_s23 = inlined_call_operand.hbm [shape: f32[2,2,32], index: 23, kind: output, shape index: {5}]   ;;  %s9165_s24 = inlined_call_operand.hbm [shape: f32[16,64], index: 24, kind: output, shape index: {6}]  }
   0x1   :  { %9195 = sst [smem:[#allocation55_spill]] %s9141_s0 }
   0x2   :  { %9196 = sst [smem:[#allocation56_spill]] %s9142_s1 }
   0x3   :  { %9197 = sst [smem:[#allocation57_spill]] %s9143_s2 }
   0x4   :  { %9198 = sst [smem:[#allocation58_spill]] %s9144_s3 }
   0x5   :  { %9199 = sst [smem:[#allocation59_spill]] %s9145_s4 }
   0x6   :  { %9200 = sst [smem:[#allocation60_spill]] %s9146_s5 }
   0x7   :  { %9201 = sst [smem:[#allocation61_spill]] %s9147_s6 }
   0x8   :  { %9202 = sst [smem:[#allocation62_spill]] %s9148_s7 }
   0x9   :  { %9203 = sst [smem:[#allocation63_spill]] %s9149_s8 }
   0xa   :  { %9204 = sst [smem:[#allocation64_spill]] %s9159_s18 }
   0xb   :  { %9205 = sst [smem:[#allocation65_spill]] %s9163_s22 }
   0xc   :  { %9206 = sst [smem:[#allocation66_spill]] %s9165_s24 }
   0xd   :  { %30 = vsyncpa [#allocation4], 0 }
   0xe   :  { %31 = vsyncpa [#allocation7], 0 }
   0xf   :  { %32 = vsyncpa [#allocation10], 0 }
  0x10   :  { %33 = vsyncpa [#allocation13], 0 }
  0x11   :  { %34 = vsyncpa [#allocation16], 0 }
  0x12   :  { %35 = vsyncpa [#allocation19], 0 }
  0x13   :  { %36 = vsyncpa [#allocation5], 0 }
  0x14   :  { %37 = vsyncpa [#allocation23], 0 }
  0x15   :  { %38 = vsyncpa [#allocation26], 0 }
  0x16   :  { %39 = vsyncpa [#allocation29], 0  ;;  %s7191_s5 = smov [#allocation6]   ;;  %s9207_s6 = sld [smem:[#allocation56_spill]] }
  0x17   :  { %s57_s26 = sshll.u32 %s7191_s5, 4  ;;  %s58_s26 = int_to_ptr.vmem [resolvable:$true] %s57_s26 }
  0x1c   :  { %s6775_s2 = scalar_lea.hbm %s9207_s6, 1024 }
  0x1d   :  { %p6776_p0 = scmp.ne.s32.totalorder %s9207_s6, %s6775_s2  ;;  %p6779_p1 = scmp.lt.u32.totalorder %s6775_s2, %s9207_s6 }
  0x1f   :  { %p6781_p2 = pnand %p6779_p1, %p6776_p0 }
  0x21   :  { %6784 = shalt.err (!%p6781_p2)
}
  0x22   :  { %s6785_s3 = scalar_lea.vmem %s58_s26, 1024  ;;  %p6790_p4 = scmp.lt.s32.totalorder %s58_s26, %s58_s26 }
  0x23   :  { %p6786_p3 = scmp.ne.s32.totalorder %s58_s26, %s6785_s3  ;;  %p6791_p5 = scmp.lt.s32.totalorder %s6785_s3, %s6785_s3 }
  0x25   :  { %p6792_p6 = por %p6791_p5, %p6790_p4 }
  0x27   :  { %p6793_p7 = pnand %p6792_p6, %p6786_p3 }
  0x29   :  { %6796 = shalt.err (!%p6793_p7)
}
  0x2a   :  { %s7192_s25 = smov 256   ;;  %s7193_s8 = smov 16  }
  0x2b   :  { %63 = dma.hbm_to_vmem [thread:$0]  %s9207_s6, 1024, %s58_s26, [#allocation7], %s7192_s25, %s7192_s25, %s7193_s8  }
  0x2c   :  { %s7194_s5 = smov [#allocation9]   ;;  %s7195_s28 = smov [#allocation12]  }
  0x2d   :  { %s83_s27 = sshll.u32 %s7194_s5, 4  ;;  %s105_s2 = sshll.u32 %s7195_s28, 4  ;;  %s84_s27 = int_to_ptr.vmem [resolvable:$true] %s83_s27  ;;  %s106_s2 = int_to_ptr.vmem [resolvable:$true] %s105_s2 }
  0x2e   :  { %s9208_s7 = sld [smem:[#allocation59_spill]] }
  0x34   :  { %s6797_s30 = scalar_lea.hbm %s9208_s7, 512 }
  0x35   :  { %p6798_p8 = scmp.ne.s32.totalorder %s9208_s7, %s6797_s30  ;;  %p6801_p9 = scmp.lt.u32.totalorder %s6797_s30, %s9208_s7 }
  0x37   :  { %p6803_p10 = pnand %p6801_p9, %p6798_p8 }
  0x39   :  { %6806 = shalt.err (!%p6803_p10)
}
  0x3a   :  { %s6807_s26 = scalar_lea.vmem %s84_s27, 512  ;;  %p6812_p12 = scmp.lt.s32.totalorder %s84_s27, %s84_s27 }
  0x3b   :  { %p6808_p11 = scmp.ne.s32.totalorder %s84_s27, %s6807_s26  ;;  %p6813_p13 = scmp.lt.s32.totalorder %s6807_s26, %s6807_s26 }
  0x3d   :  { %p6814_p0 = por %p6813_p13, %p6812_p12 }
  0x3f   :  { %p6815_p1 = pnand %p6814_p0, %p6808_p11 }
  0x41   :  { %6818 = shalt.err (!%p6815_p1)
}
  0x42   :  { %89 = dma.hbm_to_vmem [thread:$0]  %s9208_s7, 512, %s84_s27, [#allocation10], %s7192_s25, %s7192_s25, %s7193_s8  }
  0x43   :  { %s9209_s24 = sld [smem:[#allocation61_spill]] }
  0x49   :  { %s6819_s1 = scalar_lea.hbm %s9209_s24, 2048 }
  0x4a   :  { %p6820_p2 = scmp.ne.s32.totalorder %s9209_s24, %s6819_s1  ;;  %p6823_p3 = scmp.lt.u32.totalorder %s6819_s1, %s9209_s24 }
  0x4c   :  { %p6825_p4 = pnand %p6823_p3, %p6820_p2 }
  0x4e   :  { %6828 = shalt.err (!%p6825_p4)
}
  0x4f   :  { %s6829_s30 = scalar_lea.vmem %s106_s2, 2048  ;;  %p6834_p6 = scmp.lt.s32.totalorder %s106_s2, %s106_s2 }
  0x50   :  { %p6830_p5 = scmp.ne.s32.totalorder %s106_s2, %s6829_s30  ;;  %p6835_p7 = scmp.lt.s32.totalorder %s6829_s30, %s6829_s30 }
  0x52   :  { %p6836_p8 = por %p6835_p7, %p6834_p6 }
  0x54   :  { %p6837_p9 = pnand %p6836_p8, %p6830_p5 }
  0x56   :  { %6840 = shalt.err (!%p6837_p9)
}
  0x57   :  { %111 = dma.hbm_to_vmem [thread:$0]  %s9209_s24, 2048, %s106_s2, [#allocation13], %s7192_s25, %s7192_s25, %s7193_s8  }
  0x58   :  { %s7196_s3 = smov [#allocation15]   ;;  %s7197_s6 = smov [#allocation18]  }
  0x59   :  { %s134_s26 = sshll.u32 %s7196_s3, 4  ;;  %s155_s4 = sshll.u32 %s7197_s6, 4  ;;  %s135_s26 = int_to_ptr.vmem [resolvable:$true] %s134_s26  ;;  %s156_s4 = int_to_ptr.vmem [resolvable:$true] %s155_s4 }
  0x5a   :  { %s6841_s1 = scalar_lea.hbm %s9151_s10, 16 }
  0x5b   :  { %p6842_p10 = scmp.ne.s32.totalorder %s9151_s10, %s6841_s1  ;;  %p6845_p11 = scmp.lt.u32.totalorder %s6841_s1, %s9151_s10 }
  0x5d   :  { %p6847_p12 = pnand %p6845_p11, %p6842_p10 }
  0x5f   :  { %6850 = shalt.err (!%p6847_p12)
}
  0x60   :  { %s6851_s25 = scalar_lea.vmem %s135_s26, 16  ;;  %s6855_s2 = scalar_lea.vmem %s135_s26, 32 }
  0x61   :  { %p6852_p13 = scmp.ne.s32.totalorder %s135_s26, %s6851_s25  ;;  %p6856_p0 = scmp.lt.s32.totalorder %s135_s26, %s135_s26 }
  0x62   :  { %p6857_p1 = scmp.lt.s32.totalorder %s6855_s2, %s6851_s25 }
  0x64   :  { %p6858_p2 = por %p6857_p1, %p6856_p0 }
  0x66   :  { %p6859_p3 = pnand %p6858_p2, %p6852_p13 }
  0x68   :  { %6862 = shalt.err (!%p6859_p3)
}
  0x69   :  { %137 = dma.hbm_to_vmem [thread:$0]  %s9151_s10, 16, %s135_s26, [#allocation16]  }
  0x6a   :  { %s6863_s3 = scalar_lea.hbm %s9153_s12, 32 }
  0x6b   :  { %p6864_p4 = scmp.ne.s32.totalorder %s9153_s12, %s6863_s3  ;;  %p6867_p5 = scmp.lt.u32.totalorder %s6863_s3, %s9153_s12 }
  0x6d   :  { %p6869_p6 = pnand %p6867_p5, %p6864_p4 }
  0x6f   :  { %6872 = shalt.err (!%p6869_p6)
}
  0x70   :  { %s6873_s5 = scalar_lea.vmem %s156_s4, 32  ;;  %p6878_p8 = scmp.lt.s32.totalorder %s156_s4, %s156_s4 }
  0x71   :  { %p6874_p7 = scmp.ne.s32.totalorder %s156_s4, %s6873_s5  ;;  %p6879_p9 = scmp.lt.s32.totalorder %s6873_s5, %s6873_s5 }
  0x73   :  { %p6880_p10 = por %p6879_p9, %p6878_p8 }
  0x75   :  { %p6881_p11 = pnand %p6880_p10, %p6874_p7 }
  0x77   :  { %6884 = shalt.err (!%p6881_p11)
}
  0x78   :  { %s7198_s10 = smov 1   ;;  %s7199_s29 = smov [#allocation3]  }
  0x79   :  { %161 = dma.hbm_to_vmem [thread:$0]  %s9153_s12, 32, %s156_s4, [#allocation19], %s7193_s8, %s7193_s8, %s7198_s10  }
  0x7a   :  { %s45_s0 = sshll.u32 %s7199_s29, 4  ;;  %s9210_s24 = sld [smem:[#allocation55_spill]]  ;;  %s46_s0 = int_to_ptr.vmem [resolvable:$true] %s45_s0 }
  0x80   :  { %s6885_s30 = scalar_lea.hbm %s9210_s24, 256 }
  0x81   :  { %p6886_p12 = scmp.ne.s32.totalorder %s9210_s24, %s6885_s30  ;;  %p6889_p13 = scmp.lt.u32.totalorder %s6885_s30, %s9210_s24 }
  0x83   :  { %p6891_p0 = pnand %p6889_p13, %p6886_p12 }
  0x85   :  { %6894 = shalt.err (!%p6891_p0)
}
  0x86   :  { %s6895_s18 = scalar_lea.vmem %s46_s0, 256  ;;  %p6900_p2 = scmp.lt.s32.totalorder %s46_s0, %s46_s0 }
  0x87   :  { %p6896_p1 = scmp.ne.s32.totalorder %s46_s0, %s6895_s18  ;;  %p6901_p3 = scmp.lt.s32.totalorder %s6895_s18, %s6895_s18 }
  0x89   :  { %p6902_p4 = por %p6901_p3, %p6900_p2 }
  0x8b   :  { %p6903_p5 = pnand %p6902_p4, %p6896_p1 }
  0x8d   :  { %6906 = shalt.err (!%p6903_p5)
}
  0x8e   :  { %s7200_s12 = smov 128   ;;  %s7201_s8 = smov 8  }
  0x8f   :  { %51 = dma.hbm_to_vmem [thread:$0]  %s9210_s24, 256, %s46_s0, [#allocation4], %s7200_s12, %s7200_s12, %s7201_s8  }
  0x90   :  { %s7202_s1 = smov [#allocation8]   ;;  %s9211_s28 = sld [smem:[#allocation57_spill]] }
  0x91   :  { %s69_s5 = sshll.u32 %s7202_s1, 4  ;;  %s70_s5 = int_to_ptr.vmem [resolvable:$true] %s69_s5 }
  0x96   :  { %s6907_s29 = scalar_lea.hbm %s9211_s28, 64 }
  0x97   :  { %p6908_p6 = scmp.ne.s32.totalorder %s9211_s28, %s6907_s29  ;;  %p6911_p7 = scmp.lt.u32.totalorder %s6907_s29, %s9211_s28 }
  0x99   :  { %p6913_p8 = pnand %p6911_p7, %p6908_p6 }
  0x9b   :  { %6916 = shalt.err (!%p6913_p8)
}
  0x9c   :  { %s6917_s7 = scalar_lea.vmem %s70_s5, 64  ;;  %p6922_p10 = scmp.lt.s32.totalorder %s70_s5, %s70_s5 }
  0x9d   :  { %p6918_p9 = scmp.ne.s32.totalorder %s70_s5, %s6917_s7  ;;  %p6923_p11 = scmp.lt.s32.totalorder %s6917_s7, %s6917_s7 }
  0x9f   :  { %p6924_p12 = por %p6923_p11, %p6922_p10 }
  0xa1   :  { %p6925_p13 = pnand %p6924_p12, %p6918_p9 }
  0xa3   :  { %6928 = shalt.err (!%p6925_p13)
}
  0xa4   :  { %s7203_s0 = smov 32   ;;  %s7204_s24 = smov 2  }
  0xa5   :  { %75 = dma.hbm_to_vmem [thread:$0]  %s9211_s28, 64, %s70_s5, [#allocation7], %s7203_s0, %s7203_s0, %s7204_s24  }
  0xa6   :  { %s7205_s18 = smov [#allocation11]   ;;  %s7206_s22 = smov [#allocation14]  }
  0xa7   :  { %s96_s4 = sshll.u32 %s7205_s18, 4  ;;  %s121_s1 = sshll.u32 %s7206_s22, 4  ;;  %s97_s4 = int_to_ptr.vmem [resolvable:$true] %s96_s4  ;;  %s7447_s1 = int_to_ptr.vmem [resolvable:$true] %s121_s1 }
  0xa8   :  { %s9212_s29 = sld [smem:[#allocation60_spill]] }
  0xae   :  { %s6929_s25 = scalar_lea.hbm %s9212_s29, 32 }
  0xaf   :  { %p6930_p0 = scmp.ne.s32.totalorder %s9212_s29, %s6929_s25  ;;  %p6933_p1 = scmp.lt.u32.totalorder %s6929_s25, %s9212_s29 }
  0xb1   :  { %p6935_p2 = pnand %p6933_p1, %p6930_p0 }
  0xb3   :  { %6938 = shalt.err (!%p6935_p2)
}
  0xb4   :  { %s6939_s5 = scalar_lea.vmem %s97_s4, 32  ;;  %p6944_p4 = scmp.lt.s32.totalorder %s97_s4, %s97_s4 }
  0xb5   :  { %p6940_p3 = scmp.ne.s32.totalorder %s97_s4, %s6939_s5  ;;  %p6945_p5 = scmp.lt.s32.totalorder %s6939_s5, %s6939_s5 }
  0xb7   :  { %p6946_p6 = por %p6945_p5, %p6944_p4 }
  0xb9   :  { %p6947_p7 = pnand %p6946_p6, %p6940_p3 }
  0xbb   :  { %6950 = shalt.err (!%p6947_p7)
}
  0xbc   :  { %99 = dma.hbm_to_vmem [thread:$0]  %s9212_s29, 32, %s97_s4, [#allocation10]  }
  0xbd   :  { %s6951_s22 = scalar_lea.hbm %s9150_s9, 1024 }
  0xbe   :  { %p6952_p8 = scmp.ne.s32.totalorder %s9150_s9, %s6951_s22  ;;  %p6955_p9 = scmp.lt.u32.totalorder %s6951_s22, %s9150_s9 }
  0xc0   :  { %p6957_p10 = pnand %p6955_p9, %p6952_p8 }
  0xc2   :  { %6960 = shalt.err (!%p6957_p10)
}
  0xc3   :  { %s6961_s30 = scalar_lea.vmem %s7447_s1, 1024  ;;  %p6966_p12 = scmp.lt.s32.totalorder %s7447_s1, %s7447_s1 }
  0xc4   :  { %p6962_p11 = scmp.ne.s32.totalorder %s7447_s1, %s6961_s30  ;;  %p6967_p13 = scmp.lt.s32.totalorder %s6961_s30, %s6961_s30 }
  0xc6   :  { %p6968_p0 = por %p6967_p13, %p6966_p12 }
  0xc8   :  { %p6969_p1 = pnand %p6968_p0, %p6962_p11 }
  0xca   :  { %6972 = shalt.err (!%p6969_p1)
}
  0xcb   :  { %127 = dma.hbm_to_vmem [thread:$0]  %s9150_s9, 1024, %s7447_s1, [#allocation13], %s7200_s12, %s7200_s12, %s7201_s8  }
  0xcc   :  { %s7207_s27 = smov [#allocation17]   ;;  %s7208_s5 = smov [#allocation20]  }
  0xcd   :  { %s143_s7 = sshll.u32 %s7207_s27, 4  ;;  %s168_s28 = sshll.u32 %s7208_s5, 4  ;;  %s144_s7 = int_to_ptr.vmem [resolvable:$true] %s143_s7  ;;  %s169_s28 = int_to_ptr.vmem [resolvable:$true] %s168_s28 }
  0xce   :  { %s6973_s18 = scalar_lea.hbm %s9152_s11, 2048 }
  0xcf   :  { %p6974_p2 = scmp.ne.s32.totalorder %s9152_s11, %s6973_s18  ;;  %p6977_p3 = scmp.lt.u32.totalorder %s6973_s18, %s9152_s11 }
  0xd1   :  { %p6979_p4 = pnand %p6977_p3, %p6974_p2 }
  0xd3   :  { %6982 = shalt.err (!%p6979_p4)
}
  0xd4   :  { %s6983_s9 = scalar_lea.vmem %s144_s7, 2048  ;;  %p6988_p6 = scmp.lt.s32.totalorder %s144_s7, %s144_s7 }
  0xd5   :  { %p6984_p5 = scmp.ne.s32.totalorder %s144_s7, %s6983_s9  ;;  %p6989_p7 = scmp.lt.s32.totalorder %s6983_s9, %s6983_s9 }
  0xd7   :  { %p6990_p8 = por %p6989_p7, %p6988_p6 }
  0xd9   :  { %p6991_p9 = pnand %p6990_p8, %p6984_p5 }
  0xdb   :  { %6994 = shalt.err (!%p6991_p9)
}
  0xdc   :  { %149 = dma.hbm_to_vmem [thread:$0]  %s9152_s11, 2048, %s144_s7, [#allocation16], %s7200_s12, %s7200_s12, %s7201_s8  }
  0xdd   :  { %s6995_s29 = scalar_lea.hbm %s9154_s13, 16 }
  0xde   :  { %p6996_p10 = scmp.ne.s32.totalorder %s9154_s13, %s6995_s29  ;;  %p6999_p11 = scmp.lt.u32.totalorder %s6995_s29, %s9154_s13 }
  0xe0   :  { %p7001_p12 = pnand %p6999_p11, %p6996_p10 }
  0xe2   :  { %7004 = shalt.err (!%p7001_p12)
}
  0xe3   :  { %s7005_s18 = scalar_lea.vmem %s169_s28, 16  ;;  %s7009_s22 = scalar_lea.vmem %s169_s28, 32 }
  0xe4   :  { %p7006_p13 = scmp.ne.s32.totalorder %s169_s28, %s7005_s18  ;;  %p7010_p0 = scmp.lt.s32.totalorder %s169_s28, %s169_s28 }
  0xe5   :  { %p7011_p1 = scmp.lt.s32.totalorder %s7009_s22, %s7005_s18 }
  0xe7   :  { %p7012_p2 = por %p7011_p1, %p7010_p0 }
  0xe9   :  { %p7013_p3 = pnand %p7012_p2, %p7006_p13 }
  0xeb   :  { %7016 = shalt.err (!%p7013_p3)
}
  0xec   :  { %171 = dma.hbm_to_vmem [thread:$0]  %s9154_s13, 16, %s169_s28, [#allocation19]  }
  0xed   :  { %7171 = dma.done.wait [#allocation4], 256  }
  0xee   :  { %7172 = vsyncadd [#allocation4], 4294967040 }
  0xef   :  { %7173 = dma.done.wait [#allocation7], 1088  }
  0xf0   :  { %7174 = vsyncadd [#allocation7], 4294966208 }
  0xf1   :  { %7175 = dma.done.wait [#allocation10], 544  }
  0xf2   :  { %7176 = vsyncadd [#allocation10], 4294966752 }
  0xf3   :  { %7177 = dma.done.wait [#allocation13], 3072  }
  0xf4   :  { %7178 = vsyncadd [#allocation13], 4294964224 }
  0xf5   :  { %7179 = dma.done.wait [#allocation16], 2064  }
  0xf6   :  { %7180 = vsyncadd [#allocation16], 4294965232 }
  0xf7   :  { %7181 = dma.done.wait [#allocation19], 48  }
  0xf8   :  { %7182 = vsyncadd [#allocation19], 4294967248  ;;  %v9177_v0 = vmov 0.0   ;;  %v216_v1 = vld [vmem:[#allocation6 + $0x8] sm:$0xff]  ;;  %v218_v2 = vld [vmem:[#allocation6 + $0x18] sm:$0xff]  ;;  %vm231_vm0 = vcmask 130048   ;;  %v221_v45 = vlaneseq }
  0xf9   :  { %302 = vmatprep.mubr.f32.mxu0 %v9177_v0  ;;  %308 = vmatprep.mubr.f32.mxu1 %v9177_v0  ;;  %v215_v3 = vld [vmem:[#allocation6] sm:$0xff]  ;;  %v5659_v4 = vpack.c.bf16 %v218_v2, %v216_v1  ;;  %v217_v5 = vld [vmem:[#allocation6 + $0x10] sm:$0xff]  ;;  %v214_v8 = vld [vmem:[#allocation3 + $0x8] sm:$0xff]  ;;  %s9213_s10 = sld [smem:[#allocation58_spill]]  ;;  %vm633_vm1 = vcmask 254976   ;;  %vm635_vm2 = vcmask 517376  }
  0xfa   :  { %v5661_v6 = vpack.c.bf16 %v217_v5, %v215_v3  ;;  %v213_v7 = vld [vmem:[#allocation3] sm:$0xff]  ;;  %v317_v9 = vld [vmem:[#allocation6 + $0x28] sm:$0xff]  ;;  %v319_v10 = vld [vmem:[#allocation6 + $0x38] sm:$0xff]  ;;  %v222_v46 = vshrl.u32 %v221_v45, 7  ;;  %vm532_vm3 = vcmask 523264   ;;  %s9214_s11 = sld [smem:[#allocation62_spill]] }
  0xfb   :  { %v411_v11 = vld [vmem:[#allocation9 + $0x8] sm:$0xff]  ;;  %5660 = vmatprep.subr.bf16.mxu0 %v5659_v4  ;;  %6259 = vmatprep.subr.bf16.mxu1 %v5659_v4  ;;  %v5663_v12 = vpack.c.bf16 %v319_v10, %v317_v9  ;;  %v413_v13 = vld [vmem:[#allocation9 + $0x18] sm:$0xff]  ;;  %v410_v18 = vld [vmem:[#allocation9] sm:$0xff]  ;;  %vm7212_vm4 = vmmov 0   ;;  %vm1407_vm5 = vcmask 261120   ;;  %s9215_s30 = sld [smem:[#allocation63_spill]] }
  0xfc   :  { %v316_v14 = vld [vmem:[#allocation6 + $0x20] sm:$0xff]  ;;  %v318_v15 = vld [vmem:[#allocation6 + $0x30] sm:$0xff]  ;;  %5662 = vmatpush1.bf16.msra.mxu0 %v5661_v6  ;;  %6260 = vmatpush1.bf16.msra.mxu1 %v5661_v6  ;;  %v5667_v16 = vpack.c.bf16 %v413_v13, %v411_v11  ;;  %v7614_v47 = vsub.s32 0, %v222_v46  ;;  %v7616_v49 = vsub.s32 1, %v222_v46  ;;  %s7213_s4 = smov 96   ;;  %vm1942_vm6 = vcmask 517120  }
  0xfd   :  { %v5665_v17 = vpack.c.bf16 %v318_v15, %v316_v14  ;;  %v412_v19 = vld [vmem:[#allocation9 + $0x10] sm:$0xff]  ;;  %5664 = vmatprep.subr.bf16.mxu1 %v5663_v12  ;;  %v219_v48 = vld [vmem:[#allocation8] sm:$0x3]  ;;  %v321_v50 = vld [vmem:[#allocation8 + $0x2] sm:$0x3]  ;;  %vm2260_vm7 = vcmask 123904  }
  0xfe   :  { %v5669_v21 = vpack.c.bf16 %v412_v19, %v410_v18  ;;  %5668 = vmatprep.subr.bf16.mxu0 %v5667_v16  ;;  %v224_v51 = vrot.slane %v219_v48, %v7614_v47  ;;  %v228_v53 = vrot.slane %v219_v48, %v7616_v49  ;;  %v326_v58 = vrot.slane %v321_v50, %v7614_v47 }
  0xff   :  { %v492_v20 = vld [vmem:[%s9213_s10 + $0x8] sm:$0xff]  ;;  %v494_v22 = vld [vmem:[%s9213_s10 + $0x18] sm:$0xff]  ;;  %v491_v23 = vld [vmem:[%s9213_s10] sm:$0xff]  ;;  %4855 = vmatmul.mubr.msk.f32.vlgmr.msra.gmra.mrb[0].mxu0 %vm231_vm0, %v213_v7  ;;  %4856 = vmatmul.mubr.msk.f32.vlgmr.msra.gmra.mrb[0].mxu1 %vm231_vm0, %v214_v8  ;;  %v330_v60 = vrot.slane %v321_v50, %v7616_v49 }
 0x100   :  { %v493_v24 = vld [vmem:[%s9213_s10 + $0x10] sm:$0xff]  ;;  %v7522_v25 = vpack.c.bf16 %v494_v22, %v492_v20  ;;  %v496_v26 = vld [vmem:[%s9213_s10 + $0x28] sm:$0xff]  ;;  %v498_v27 = vld [vmem:[%s9213_s10 + $0x38] sm:$0xff]  ;;  %5666 = vmatpush1.bf16.msra.mxu1 %v5665_v17  ;;  %5670 = vmatpush1.bf16.msra.mxu0 %v5669_v21 }
 0x101   :  { %v7532_v28 = vpack.c.bf16 %v493_v24, %v491_v23  ;;  %397 = vmatprep.mubr.f32.mxu1 %v9177_v0  ;;  %478 = vmatprep.mubr.f32.mxu0 %v9177_v0  ;;  %v7536_v29 = vpack.c.bf16 %v498_v27, %v496_v26  ;;  %v495_v30 = vld [vmem:[%s9213_s10 + $0x20] sm:$0xff]  ;;  %v497_v31 = vld [vmem:[%s9213_s10 + $0x30] sm:$0xff]  ;;  %v500_v32 = vld [vmem:[%s9213_s10 + $0x48] sm:$0xff] }
 0x102   :  { %5672 = vmatprep.subr.bf16.mxu0 %v7522_v25  ;;  %v502_v33 = vld [vmem:[%s9213_s10 + $0x58] sm:$0xff]  ;;  %5704 = vmatprep.subr.bf16.mxu1 %v7522_v25  ;;  %v7556_v34 = vpack.c.bf16 %v497_v31, %v495_v30  ;;  %v499_v36 = vld [vmem:[%s9213_s10 + $0x40] sm:$0xff]  ;;  %v501_v37 = vld [vmem:[%s9213_s10 + $0x50] sm:$0xff] }
 0x103   :  { %4857 = vmatmul.mubr.msk.f32.vlgmr.msra.gmra.mrb[2].mxu1 %vm231_vm0, %v213_v7  ;;  %4859 = vmatmul.mubr.msk.f32.vlgmr.msra.gmra.mrb[2].mxu0 %vm231_vm0, %v213_v7  ;;  %v7559_v35 = vpack.c.bf16 %v502_v33, %v500_v32  ;;  %v504_v38 = vld [vmem:[%s9213_s10 + $0x68] sm:$0xff]  ;;  %v506_v39 = vld [vmem:[%s9213_s10 + $0x78] sm:$0xff]  ;;  %v7578_v40 = vpack.c.bf16 %v501_v37, %v499_v36  ;;  %v503_v42 = vld [vmem:[%s9213_s10 + $0x60] sm:$0xff] }
 0x104   :  { %5674 = vmatpush1.bf16.msra.mxu0 %v7532_v28  ;;  %403 = vmatprep.mubr.f32.mxu1 %v9177_v0  ;;  %v7582_v41 = vpack.c.bf16 %v506_v39, %v504_v38  ;;  %v505_v43 = vld [vmem:[%s9213_s10 + $0x70] sm:$0xff]  ;;  %s7210_s10 = smov 64  }
 0x105   :  { %5676 = vmatprep.subr.bf16.mxu0 %v7536_v29  ;;  %484 = vmatprep.mubr.f32.mxu0 %v9177_v0  ;;  %v7595_v44 = vpack.c.bf16 %v505_v43, %v503_v42 }
 0x106   :  { %5706 = vmatpush1.bf16.msra.mxu1 %v7532_v28 }
 0x107   :  { %4858 = vmatmul.mubr.msk.f32.gmra.mrb[4].mxu1 %vm231_vm0, %v214_v8  ;;  %4860 = vmatmul.mubr.msk.f32.gmra.mrb[4].mxu0 %vm231_vm0, %v214_v8 }
 0x108   :  { %5678 = vmatpush1.bf16.msra.mxu0 %v7556_v34  ;;  %600 = vmatprep.mubr.f32.mxu0 %v9177_v0 }
 0x109   :  { %5680 = vmatprep.subr.bf16.mxu0 %v7559_v35  ;;  %5708 = vmatprep.subr.bf16.mxu1 %v7536_v29 }
 0x10a   :  { %5710 = vmatpush1.bf16.msra.mxu1 %v7556_v34  ;;  %822 = vmatprep.mubr.f32.mxu1 %v9177_v0 }
 0x10b   :  { %5712 = vmatprep.subr.bf16.mxu1 %v7559_v35 }
 0x10c   :  { %5682 = vmatpush1.bf16.msra.mxu0 %v7578_v40 }
 0x10d   :  { %5684 = vmatprep.subr.bf16.mxu0 %v7582_v41 }
 0x10e   :  { %5714 = vmatpush1.bf16.msra.mxu1 %v7578_v40 }
 0x10f   :  { %5716 = vmatprep.subr.bf16.mxu1 %v7582_v41 }
 0x110   :  { %5686 = vmatpush1.bf16.msra.mxu0 %v7595_v44 }
 0x111   :  { %5688 = vmatprep.subr.bf16.mxu0 %v7522_v25 }
 0x112   :  { %5718 = vmatpush1.bf16.msra.mxu1 %v7595_v44 }
 0x113   :  { %601 = vmatmul.mubr.f32.vlgmr.msra.gmra.mrb[6].mxu0 %v9177_v0  ;;  %5736 = vmatprep.subr.bf16.mxu1 %v7522_v25 }
 0x114   :  { %5690 = vmatpush1.bf16.msra.mxu0 %v7532_v28  ;;  %715 = vmatprep.mubr.f32.mxu0 %v9177_v0 }
 0x115   :  { %5692 = vmatprep.subr.bf16.mxu0 %v7536_v29 }
 0x118   :  { %5694 = vmatpush1.bf16.msra.mxu0 %v7556_v34 }
 0x119   :  { %5696 = vmatprep.subr.bf16.mxu0 %v7559_v35 }
 0x11c   :  { %5698 = vmatpush1.bf16.msra.mxu0 %v7578_v40 }
 0x11d   :  { %5700 = vmatprep.subr.bf16.mxu0 %v7582_v41 }
 0x120   :  { %5702 = vmatpush1.bf16.msra.mxu0 %v7595_v44 }
 0x121   :  { %5720 = vmatprep.subr.bf16.mxu0 %v7522_v25 }
 0x1d2   :  { %v304_v52 = vpop.f32.mrb[0].mxu0  ;;  %v310_v54 = vpop.f32.mrb[0].mxu1 }
 0x1d3   :  { %v306_v55 = vpop.f32.mrb[1].mxu0  ;;  %v311_v56 = vadd.f32 %v310_v54, %v224_v51  ;;  %v312_v57 = vpop.f32.mrb[1].mxu1  ;;  %v305_v18 = vadd.f32 %v304_v52, %v224_v51 }
 0x1d4   :  { %v313_v59 = vadd.f32 %v312_v57, %v228_v53  ;;  %v307_v21 = vadd.f32 %v306_v55, %v228_v53 }
 0x1d6   :  { %v399_v61 = vpop.f32.mrb[2].mxu1  ;;  %v7622_v62 = vpop.f32.mrb[2].mxu0 }
 0x1d7   :  { %v400_v63 = vadd.f32 %v399_v61, %v326_v58  ;;  %v401_v1 = vpop.f32.mrb[3].mxu1  ;;  %v7624_v2 = vpop.f32.mrb[3].mxu0 }
 0x1d8   :  { %v402_v3 = vadd.f32 %v401_v1, %v330_v60 }
 0x1d9   :  { %v964_v4 = vrot.slane %v400_v63, 6  ;;  %v1071_v5 = vrot.slane %v400_v63, 2 }
 0x1da   :  { %v965_v6 = vrot.slane %v402_v3, 6  ;;  %v1072_v7 = vrot.slane %v402_v3, 2  ;;  %v405_v8 = vpop.f32.mrb[4].mxu1  ;;  %v7626_v9 = vpop.f32.mrb[4].mxu0 }
 0x1db   :  { %v406_v10 = vadd.f32 %v405_v8, %v326_v58  ;;  %v407_v11 = vpop.f32.mrb[5].mxu1  ;;  %v7628_v12 = vpop.f32.mrb[5].mxu0  ;;  %v7630_v13 = vadd.f32 %v964_v4, %v311_v56  ;;  %v7632_v14 = vadd.f32 %v1071_v5, %v311_v56 }
 0x1dc   :  { %v408_v15 = vadd.f32 %v407_v11, %v330_v60  ;;  %v7634_v16 = vadd.f32 %v965_v6, %v313_v59  ;;  %v7636_v17 = vadd.f32 %v1072_v7, %v313_v59 }
 0x1dd   :  { %v526_v19 = vrot.slane %v406_v10, 6  ;;  %v637_v20 = vrot.slane %v406_v10, 2 }
 0x1de   :  { %v527_v22 = vrot.slane %v408_v15, 6  ;;  %v638_v23 = vrot.slane %v408_v15, 2 }
 0x1df   :  { %v7638_v24 = vadd.f32 %v526_v19, %v305_v18  ;;  %v7640_v26 = vadd.f32 %v637_v20, %v305_v18 }
 0x1e0   :  { %v7642_v27 = vadd.f32 %v527_v22, %v307_v21  ;;  %v7644_v30 = vadd.f32 %v638_v23, %v307_v21 }
 0x1e1   :  { %v645_v58 = vrot.slane %v7640_v26, 2 }
 0x1e2   :  { %v646_v60 = vrot.slane %v7644_v30, 2 }
 0x1e6   :  { %v602_v31 = vpop.f32.mrb[6].mxu0 }
 0x1e7   :  { %v603_v32 = vadd.f32 %v602_v31, %v7638_v24  ;;  %v604_v33 = vpop.f32.mrb[7].mxu0 }
 0x1e8   :  { %v605_v36 = vadd.f32 %v604_v33, %v7642_v27 }
 0x1e9   :  { %v4861_v37 = vmul.f32 -1.442695, %v603_v32  ;;  %v752_v32 = vrot.slane %v7638_v24, 4 }
 0x1ea   :  { %v4862_v46 = vmul.f32 -1.442695, %v605_v36 }
 0x1eb   :  { %6301 = vpow2.f32 %v4861_v37 }
 0x1ec   :  { %6303 = vtanh.f32 %v605_v36  ;;  %v753_v36 = vrot.slane %v7642_v27, 4 }
 0x1f5   :  { %v6302_v38 = vpop.eup %6301 }
 0x1f6   :  { %v613_v39 = vadd.f32 1.0, %v6302_v38  ;;  %v6304_v42 = vpop.eup %6303 }
 0x1f8   :  { %6305 = vrcp.f32 %v613_v39 }
 0x1f9   :  { %6307 = vpow2.f32 %v4862_v46 }
 0x202   :  { %v6306_v43 = vpop.eup %6305 }
 0x203   :  { %v621_v45 = vmul.f32 %v6306_v43, %v6304_v42  ;;  %v6308_v48 = vpop.eup %6307  ;;  %v620_v51 = vmul.f32 0.0, %v6306_v43 }
 0x204   :  { %v614_v50 = vadd.f32 1.0, %v6308_v48 }
 0x205   :  { %623 = vrot.lane.b32.xlu0 %v621_v45, %s7210_s10 }
 0x206   :  { %6309 = vrcp.f32 %v614_v50 }
 0x210   :  { %v6310_v54 = vpop.eup %6309 }
 0x277   :  { %v624_v52 = vpop.permute.xlu0 %623 }
 0x278   :  { %v626_v53 = vadd.f32 %v624_v52, %v620_v51 }
 0x27a   :  { %6311 = vtanh.f32 %v626_v53 }
 0x284   :  { %v6312_v55 = vpop.eup %6311 }
 0x285   :  { %v628_v56 = vmul.f32 %v6312_v55, %v6310_v54 }
 0x287   :  { %630 = vrot.lane.b32.xlu0 %v628_v56, %s7210_s10 }
 0x2f9   :  { %v631_v57 = vpop.permute.xlu0 %630 }
 0x2fa   :  { %634 = vst.msk [vmem:[#allocation2] sm:$0x3] %vm633_vm1, %v631_v57  ;;  %4863 = vmatmul.mubr.msk.f32.vlgmr.msra.gmra.mrb[8].mxu0 %vm532_vm3, %v631_v57 }
 0x2fb   :  { %636 = vst.msk [vmem:[#allocation2 + $0xe] sm:$0x3] %vm635_vm2, %v631_v57  ;;  %5722 = vmatpush1.bf16.msra.mxu0 %v7532_v28  ;;  %927 = vmatprep.mubr.f32.mxu0 %v9177_v0 }
 0x2fc   :  { %5724 = vmatprep.subr.bf16.mxu0 %v7536_v29 }
 0x2ff   :  { %5726 = vmatpush1.bf16.msra.mxu0 %v7556_v34 }
 0x300   :  { %5728 = vmatprep.subr.bf16.mxu0 %v7559_v35 }
 0x303   :  { %5730 = vmatpush1.bf16.msra.mxu0 %v7578_v40 }
 0x304   :  { %5732 = vmatprep.subr.bf16.mxu0 %v7582_v41 }
 0x307   :  { %5734 = vmatpush1.bf16.msra.mxu0 %v7595_v44 }
 0x308   :  { %5752 = vmatprep.subr.bf16.mxu0 %v7522_v25 }
 0x3cd   :  { %v717_v59 = vpop.f32.mrb[8].mxu0 }
 0x3ce   :  { %v718_v61 = vadd.f32 %v717_v59, %v645_v58  ;;  %v719_v63 = vpop.f32.mrb[9].mxu0  ;;  %v857_v59 = vrot.slane %v7640_v26, 6 }
 0x3cf   :  { %v720_v1 = vadd.f32 %v719_v63, %v646_v60 }
 0x3d0   :  { %v4864_v3 = vmul.f32 -1.442695, %v718_v61  ;;  %v858_v61 = vrot.slane %v7644_v30, 6 }
 0x3d1   :  { %v4865_v10 = vmul.f32 -1.442695, %v720_v1 }
 0x3d2   :  { %6313 = vpow2.f32 %v4864_v3 }
 0x3d3   :  { %6315 = vtanh.f32 %v720_v1 }
 0x3dc   :  { %v6314_v4 = vpop.eup %6313 }
 0x3dd   :  { %v728_v5 = vadd.f32 1.0, %v6314_v4  ;;  %v6316_v6 = vpop.eup %6315 }
 0x3df   :  { %6317 = vrcp.f32 %v728_v5 }
 0x3e0   :  { %6319 = vpow2.f32 %v4865_v10 }
 0x3e9   :  { %v6318_v7 = vpop.eup %6317 }
 0x3ea   :  { %v736_v8 = vmul.f32 %v6318_v7, %v6316_v6  ;;  %v6320_v11 = vpop.eup %6319  ;;  %v735_v18 = vmul.f32 %v6318_v7, %v626_v53 }
 0x3eb   :  { %v729_v15 = vadd.f32 1.0, %v6320_v11 }
 0x3ec   :  { %738 = vrot.lane.b32.xlu1 %v736_v8, %s7210_s10 }
 0x3ed   :  { %6321 = vrcp.f32 %v729_v15 }
 0x3f7   :  { %v6322_v21 = vpop.eup %6321 }
 0x45e   :  { %v739_v19 = vpop.permute.xlu1 %738 }
 0x45f   :  { %v741_v20 = vadd.f32 %v739_v19, %v735_v18 }
 0x461   :  { %6323 = vtanh.f32 %v741_v20 }
 0x46b   :  { %v6324_v22 = vpop.eup %6323 }
 0x46c   :  { %v743_v23 = vmul.f32 %v6324_v22, %v6322_v21 }
 0x46e   :  { %745 = vrot.lane.b32.xlu1 %v743_v23, %s7210_s10 }
 0x4e0   :  { %v746_v31 = vpop.permute.xlu1 %745 }
 0x4e1   :  { %748 = vst.msk [vmem:[#allocation2 + $0x2] sm:$0x3] %vm633_vm1, %v746_v31  ;;  %4866 = vmatmul.mubr.msk.f32.vlgmr.msra.gmra.mrb[6].mxu1 %vm532_vm3, %v746_v31 }
 0x4e2   :  { %749 = vst.msk [vmem:[#allocation2 + $0xc] sm:$0x3] %vm635_vm2, %v746_v31  ;;  %5738 = vmatpush1.bf16.msra.mxu1 %v7532_v28  ;;  %1036 = vmatprep.mubr.f32.mxu1 %v9177_v0 }
 0x4e3   :  { %5740 = vmatprep.subr.bf16.mxu1 %v7536_v29 }
 0x4e6   :  { %5742 = vmatpush1.bf16.msra.mxu1 %v7556_v34 }
 0x4e7   :  { %5744 = vmatprep.subr.bf16.mxu1 %v7559_v35 }
 0x4ea   :  { %5746 = vmatpush1.bf16.msra.mxu1 %v7578_v40 }
 0x4eb   :  { %5748 = vmatprep.subr.bf16.mxu1 %v7582_v41 }
 0x4ee   :  { %5750 = vmatpush1.bf16.msra.mxu1 %v7595_v44 }
 0x4ef   :  { %5768 = vmatprep.subr.bf16.mxu1 %v7522_v25 }
 0x5b4   :  { %v824_v33 = vpop.f32.mrb[6].mxu1 }
 0x5b5   :  { %v825_v37 = vadd.f32 %v824_v33, %v752_v32  ;;  %v826_v38 = vpop.f32.mrb[7].mxu1 }
 0x5b6   :  { %v827_v39 = vadd.f32 %v826_v38, %v753_v36 }
 0x5b7   :  { %v4867_v42 = vmul.f32 -1.442695, %v825_v37 }
 0x5b8   :  { %v4868_v51 = vmul.f32 -1.442695, %v827_v39 }
 0x5b9   :  { %6325 = vpow2.f32 %v4867_v42 }
 0x5ba   :  { %6327 = vtanh.f32 %v827_v39 }
 0x5c3   :  { %v6326_v43 = vpop.eup %6325 }
 0x5c4   :  { %v835_v45 = vadd.f32 1.0, %v6326_v43  ;;  %v6328_v46 = vpop.eup %6327 }
 0x5c6   :  { %6329 = vrcp.f32 %v835_v45 }
 0x5c7   :  { %6331 = vpow2.f32 %v4868_v51 }
 0x5d0   :  { %v6330_v48 = vpop.eup %6329 }
 0x5d1   :  { %v843_v50 = vmul.f32 %v6330_v48, %v6328_v46  ;;  %v6332_v24 = vpop.eup %6331  ;;  %v842_v53 = vmul.f32 %v6330_v48, %v741_v20 }
 0x5d2   :  { %v836_v52 = vadd.f32 1.0, %v6332_v24 }
 0x5d3   :  { %845 = vrot.lane.b32.xlu0 %v843_v50, %s7210_s10 }
 0x5d4   :  { %6333 = vrcp.f32 %v836_v52 }
 0x5de   :  { %v6334_v55 = vpop.eup %6333 }
 0x645   :  { %v846_v27 = vpop.permute.xlu0 %845 }
 0x646   :  { %v848_v54 = vadd.f32 %v846_v27, %v842_v53 }
 0x648   :  { %6335 = vtanh.f32 %v848_v54 }
 0x652   :  { %v6336_v56 = vpop.eup %6335 }
 0x653   :  { %v850_v57 = vmul.f32 %v6336_v56, %v6334_v55  ;;  %v1079_v55 = vrot.slane %v7632_v14, 2 }
 0x655   :  { %852 = vrot.lane.b32.xlu1 %v850_v57, %s7210_s10  ;;  %v1080_v57 = vrot.slane %v7636_v17, 2 }
 0x6c7   :  { %v853_v58 = vpop.permute.xlu1 %852 }
 0x6c8   :  { %855 = vst.msk [vmem:[#allocation2 + $0x4] sm:$0x3] %vm633_vm1, %v853_v58  ;;  %4869 = vmatmul.mubr.msk.f32.vlgmr.msra.gmra.mrb[10].mxu0 %vm532_vm3, %v853_v58 }
 0x6c9   :  { %856 = vst.msk [vmem:[#allocation2 + $0xa] sm:$0x3] %vm635_vm2, %v853_v58  ;;  %5754 = vmatpush1.bf16.msra.mxu0 %v7532_v28  ;;  %1149 = vmatprep.mubr.f32.mxu0 %v9177_v0 }
 0x6ca   :  { %5756 = vmatprep.subr.bf16.mxu0 %v7536_v29 }
 0x6cd   :  { %5758 = vmatpush1.bf16.msra.mxu0 %v7556_v34 }
 0x6ce   :  { %5760 = vmatprep.subr.bf16.mxu0 %v7559_v35 }
 0x6d1   :  { %5762 = vmatpush1.bf16.msra.mxu0 %v7578_v40 }
 0x6d2   :  { %5764 = vmatprep.subr.bf16.mxu0 %v7582_v41 }
 0x6d5   :  { %5766 = vmatpush1.bf16.msra.mxu0 %v7595_v44 }
 0x6d6   :  { %5784 = vmatprep.subr.bf16.mxu0 %v7522_v25 }
 0x79b   :  { %v929_v60 = vpop.f32.mrb[10].mxu0 }
 0x79c   :  { %v930_v63 = vadd.f32 %v929_v60, %v857_v59  ;;  %v931_v1 = vpop.f32.mrb[11].mxu0 }
 0x79d   :  { %v932_v3 = vadd.f32 %v931_v1, %v858_v61 }
 0x79e   :  { %v4870_v4 = vmul.f32 -1.442695, %v930_v63 }
 0x79f   :  { %v4871_v25 = vmul.f32 -1.442695, %v932_v3 }
 0x7a0   :  { %6337 = vpow2.f32 %v4870_v4 }
 0x7a1   :  { %6339 = vtanh.f32 %v932_v3 }
 0x7aa   :  { %v6338_v5 = vpop.eup %6337 }
 0x7ab   :  { %v940_v6 = vadd.f32 1.0, %v6338_v5  ;;  %v6340_v7 = vpop.eup %6339 }
 0x7ad   :  { %6341 = vrcp.f32 %v940_v6 }
 0x7ae   :  { %6343 = vpow2.f32 %v4871_v25 }
 0x7b7   :  { %v6342_v8 = vpop.eup %6341 }
 0x7b8   :  { %v948_v10 = vmul.f32 %v6342_v8, %v6340_v7  ;;  %v6344_v26 = vpop.eup %6343  ;;  %v947_v15 = vmul.f32 %v6342_v8, %v848_v54 }
 0x7b9   :  { %v941_v11 = vadd.f32 1.0, %v6344_v26 }
 0x7ba   :  { %950 = vrot.lane.b32.xlu0 %v948_v10, %s7210_s10  ;;  %v1186_v10 = vrot.slane %v7630_v13, 4 }
 0x7bb   :  { %6345 = vrcp.f32 %v941_v11 }
 0x7c5   :  { %v6346_v19 = vpop.eup %6345 }
 0x82c   :  { %v951_v30 = vpop.permute.xlu0 %950 }
 0x82d   :  { %v953_v18 = vadd.f32 %v951_v30, %v947_v15  ;;  %v1187_v30 = vrot.slane %v7634_v16, 4 }
 0x82f   :  { %6347 = vtanh.f32 %v953_v18 }
 0x839   :  { %v6348_v20 = vpop.eup %6347 }
 0x83a   :  { %v955_v21 = vmul.f32 %v6348_v20, %v6346_v19 }
 0x83c   :  { %957 = vrot.lane.b32.xlu1 %v955_v21, %s7210_s10 }
 0x8ae   :  { %v958_v22 = vpop.permute.xlu1 %957 }
 0x8af   :  { %960 = vst.msk [vmem:[#allocation2 + $0x6] sm:$0x3] %vm633_vm1, %v958_v22  ;;  %4872 = vmatmul.mubr.msk.f32.vlgmr.msra.gmra.mrb[8].mxu1 %vm532_vm3, %v958_v22 }
 0x8b0   :  { %961 = vst.msk [vmem:[#allocation2 + $0x8] sm:$0x3] %vm635_vm2, %v958_v22  ;;  %5770 = vmatpush1.bf16.msra.mxu1 %v7532_v28  ;;  %1256 = vmatprep.mubr.f32.mxu1 %v9177_v0 }
 0x8b1   :  { %5772 = vmatprep.subr.bf16.mxu1 %v7536_v29 }
 0x8b4   :  { %5774 = vmatpush1.bf16.msra.mxu1 %v7556_v34 }
 0x8b5   :  { %5776 = vmatprep.subr.bf16.mxu1 %v7559_v35 }
 0x8b8   :  { %5778 = vmatpush1.bf16.msra.mxu1 %v7578_v40 }
 0x8b9   :  { %5780 = vmatprep.subr.bf16.mxu1 %v7582_v41 }
 0x8bc   :  { %5782 = vmatpush1.bf16.msra.mxu1 %v7595_v44 }
 0x982   :  { %v1038_v23 = vpop.f32.mrb[8].mxu1 }
 0x983   :  { %v1039_v31 = vadd.f32 %v1038_v23, %v7630_v13  ;;  %v1040_v32 = vpop.f32.mrb[9].mxu1 }
 0x984   :  { %v1041_v36 = vadd.f32 %v1040_v32, %v7634_v16 }
 0x985   :  { %v4873_v33 = vmul.f32 -1.442695, %v1039_v31 }
 0x986   :  { %v4874_v45 = vmul.f32 -1.442695, %v1041_v36 }
 0x987   :  { %6349 = vpow2.f32 %v4873_v33 }
 0x988   :  { %6351 = vtanh.f32 %v1041_v36 }
 0x991   :  { %v6350_v37 = vpop.eup %6349 }
 0x992   :  { %v1049_v38 = vadd.f32 1.0, %v6350_v37  ;;  %v6352_v39 = vpop.eup %6351 }
 0x994   :  { %6353 = vrcp.f32 %v1049_v38 }
 0x995   :  { %6355 = vpow2.f32 %v4874_v45 }
 0x99e   :  { %v6354_v42 = vpop.eup %6353 }
 0x99f   :  { %v1057_v43 = vmul.f32 %v6354_v42, %v6352_v39  ;;  %v6356_v46 = vpop.eup %6355  ;;  %v1056_v50 = vmul.f32 %v6354_v42, %v953_v18 }
 0x9a0   :  { %v1050_v48 = vadd.f32 1.0, %v6356_v46  ;;  %v1292_v46 = vrot.slane %v7636_v17, 6  ;;  %v1397_v17 = vld [vmem:[%s9214_s11 + $0x8] sm:$0xff] }
 0x9a1   :  { %1059 = vrot.lane.b32.xlu0 %v1057_v43, %s7210_s10  ;;  %v1291_v43 = vrot.slane %v7632_v14, 6  ;;  %v1396_v14 = vld [vmem:[%s9214_s11] sm:$0xff] }
 0x9a2   :  { %6357 = vrcp.f32 %v1050_v48 }
 0x9ac   :  { %v6358_v52 = vpop.eup %6357 }
 0xa13   :  { %v1060_v51 = vpop.permute.xlu0 %1059 }
 0xa14   :  { %v1062_v24 = vadd.f32 %v1060_v51, %v1056_v50 }
 0xa16   :  { %6359 = vtanh.f32 %v1062_v24 }
 0xa20   :  { %v6360_v53 = vpop.eup %6359 }
 0xa21   :  { %v1064_v27 = vmul.f32 %v6360_v53, %v6358_v52 }
 0xa23   :  { %1066 = vrot.lane.b32.xlu1 %v1064_v27, %s7210_s10 }
 0xa95   :  { %v1067_v54 = vpop.permute.xlu1 %1066 }
 0xa96   :  { %1069 = vst.msk [vmem:[#allocation2 + $0x8] sm:$0x3] %vm633_vm1, %v1067_v54  ;;  %4875 = vmatmul.mubr.msk.f32.vlgmr.msra.gmra.mrb[12].mxu0 %vm532_vm3, %v1067_v54 }
 0xa97   :  { %1070 = vst.msk [vmem:[#allocation2 + $0x6] sm:$0x3] %vm635_vm2, %v1067_v54  ;;  %5786 = vmatpush1.bf16.msra.mxu0 %v7532_v28  ;;  %1361 = vmatprep.mubr.f32.mxu0 %v9177_v0 }
 0xa98   :  { %5788 = vmatprep.subr.bf16.mxu0 %v7536_v29 }
 0xa9b   :  { %5790 = vmatpush1.bf16.msra.mxu0 %v7556_v34 }
 0xa9c   :  { %5792 = vmatprep.subr.bf16.mxu0 %v7559_v35 }
 0xa9f   :  { %5794 = vmatpush1.bf16.msra.mxu0 %v7578_v40 }
 0xaa0   :  { %5796 = vmatprep.subr.bf16.mxu0 %v7582_v41 }
 0xaa3   :  { %5798 = vmatpush1.bf16.msra.mxu0 %v7595_v44 }
 0xb69   :  { %v1151_v56 = vpop.f32.mrb[12].mxu0 }
 0xb6a   :  { %v1152_v28 = vadd.f32 %v1151_v56, %v1079_v55  ;;  %v1153_v58 = vpop.f32.mrb[13].mxu0  ;;  %v1398_v56 = vld [vmem:[%s9214_s11 + $0x10] sm:$0xff] }
 0xb6b   :  { %v1154_v59 = vadd.f32 %v1153_v58, %v1080_v57  ;;  %v9179_v57 = vmov 0.0|0.0   ;;  %v1399_v58 = vld [vmem:[%s9214_s11 + $0x18] sm:$0xff] }
 0xb6c   :  { %v4876_v60 = vmul.f32 -1.442695, %v1152_v28  ;;  %5799 = vmatprep.subr.bf16.mxu1 %v9179_v57  ;;  %v5800_v28 = vpack.c.bf16 %v1397_v17, %v1396_v14  ;;  %5805 = vmatprep.subr.bf16.mxu0 %v9179_v57 }
 0xb6d   :  { %v4877_v41 = vmul.f32 -1.442695, %v1154_v59 }
 0xb6e   :  { %6361 = vpow2.f32 %v4876_v60  ;;  %v1600_v60 = vld [vmem:[#allocation14 + $0x8] sm:$0xff] }
 0xb6f   :  { %6363 = vtanh.f32 %v1154_v59  ;;  %v1599_v59 = vld [vmem:[#allocation14] sm:$0xff] }
 0xb78   :  { %v6362_v29 = vpop.eup %6361 }
 0xb79   :  { %v1162_v34 = vadd.f32 1.0, %v6362_v29  ;;  %v6364_v35 = vpop.eup %6363  ;;  %v5803_v29 = vpack.c.bf16 %v1399_v58, %v1398_v56  ;;  %v1737_v58 = vld [vmem:[#allocation17 + $0x78] sm:$0xff] }
 0xb7b   :  { %6365 = vrcp.f32 %v1162_v34  ;;  %v5811_v34 = vpack.c.bf16 %v1600_v60, %v1599_v59 }
 0xb7c   :  { %6367 = vpow2.f32 %v4877_v41 }
 0xb85   :  { %v6366_v40 = vpop.eup %6365 }
 0xb86   :  { %v1170_v61 = vmul.f32 %v6366_v40, %v6364_v35  ;;  %v6368_v44 = vpop.eup %6367  ;;  %v1169_v1 = vmul.f32 %v6366_v40, %v1062_v24 }
 0xb87   :  { %v1163_v63 = vadd.f32 1.0, %v6368_v44 }
 0xb88   :  { %1172 = vrot.lane.b32.xlu0 %v1170_v61, %s7210_s10 }
 0xb89   :  { %6369 = vrcp.f32 %v1163_v63 }
 0xb93   :  { %v6370_v5 = vpop.eup %6369 }
 0xbfa   :  { %v1173_v3 = vpop.permute.xlu0 %1172 }
 0xbfb   :  { %v1175_v4 = vadd.f32 %v1173_v3, %v1169_v1 }
 0xbfd   :  { %6371 = vtanh.f32 %v1175_v4 }
 0xc07   :  { %v6372_v6 = vpop.eup %6371 }
 0xc08   :  { %v1177_v7 = vmul.f32 %v6372_v6, %v6370_v5  ;;  %v1601_v5 = vld [vmem:[#allocation14 + $0x10] sm:$0xff]  ;;  %v1602_v6 = vld [vmem:[#allocation14 + $0x18] sm:$0xff] }
 0xc0a   :  { %1179 = vrot.lane.b32.xlu1 %v1177_v7, %s7210_s10  ;;  %v5815_v7 = vpack.c.bf16 %v1602_v6, %v1601_v5  ;;  %v1831_v6 = vld [vmem:[#allocation17 + $0x20] sm:$0xff] }
 0xc7c   :  { %v1180_v8 = vpop.permute.xlu1 %1179 }
 0xc7d   :  { %1182 = vst.msk [vmem:[#allocation2 + $0xa] sm:$0x3] %vm633_vm1, %v1180_v8  ;;  %4878 = vmatmul.mubr.msk.f32.vlgmr.msra.gmra.mrb[10].mxu1 %vm532_vm3, %v1180_v8 }
 0xc7e   :  { %1183 = vst.msk [vmem:[#allocation2 + $0x4] sm:$0x3] %vm635_vm2, %v1180_v8  ;;  %5175 = vmatprep.mubr.msk.f32.mxu1 %vm7212_vm4, %v9177_v0  ;;  %5801 = vmatpush3.bf16.msra.mxu1 %v5800_v28 }
 0xc7f   :  { %5802 = vmatprep.subr.bf16.mxu1 %v9179_v57 }
 0xc82   :  { %5804 = vmatpush3.bf16.msra.mxu1 %v5803_v29 }
 0xc83   :  { %5812 = vmatprep.subr.bf16.mxu1 %v5811_v34 }
 0xd50   :  { %v1258_v25 = vpop.f32.mrb[10].mxu1 }
 0xd51   :  { %v1259_v26 = vadd.f32 %v1258_v25, %v1186_v10  ;;  %v1260_v11 = vpop.f32.mrb[11].mxu1  ;;  %v1603_v25 = vld [vmem:[#allocation14 + $0x20] sm:$0xff] }
 0xd52   :  { %v1261_v18 = vadd.f32 %v1260_v11, %v1187_v30  ;;  %v1606_v30 = vld [vmem:[#allocation14 + $0x38] sm:$0xff] }
 0xd53   :  { %v4879_v15 = vmul.f32 -1.442695, %v1259_v26  ;;  %v1604_v26 = vld [vmem:[#allocation14 + $0x28] sm:$0xff] }
 0xd54   :  { %v4880_v31 = vmul.f32 -1.442695, %v1261_v18  ;;  %v5819_v11 = vpack.c.bf16 %v1604_v26, %v1603_v25  ;;  %v1833_v25 = vld [vmem:[#allocation17 + $0x30] sm:$0xff]  ;;  %v1834_v26 = vld [vmem:[#allocation17 + $0x38] sm:$0xff] }
 0xd55   :  { %6373 = vpow2.f32 %v4879_v15  ;;  %v1605_v15 = vld [vmem:[#allocation14 + $0x30] sm:$0xff] }
 0xd56   :  { %6375 = vtanh.f32 %v1261_v18  ;;  %v5823_v18 = vpack.c.bf16 %v1606_v30, %v1605_v15  ;;  %v4887_v15 = vld [vmem:[%s9157_s16 + $0x2] sm:$0x3] }
 0xd5f   :  { %v6374_v19 = vpop.eup %6373 }
 0xd60   :  { %v1269_v20 = vadd.f32 1.0, %v6374_v19  ;;  %v6376_v21 = vpop.eup %6375 }
 0xd62   :  { %6377 = vrcp.f32 %v1269_v20 }
 0xd63   :  { %6379 = vpow2.f32 %v4880_v31 }
 0xd6c   :  { %v6378_v22 = vpop.eup %6377 }
 0xd6d   :  { %v1277_v23 = vmul.f32 %v6378_v22, %v6376_v21  ;;  %v6380_v13 = vpop.eup %6379  ;;  %v1276_v33 = vmul.f32 %v6378_v22, %v1175_v4  ;;  %v4884_v21 = vld [vmem:[%s9215_s30] ss:$0 sm:$0xff] }
 0xd6e   :  { %v1270_v32 = vadd.f32 1.0, %v6380_v13 }
 0xd6f   :  { %1279 = vrot.lane.b32.xlu0 %v1277_v23, %s7210_s10 }
 0xd70   :  { %6381 = vrcp.f32 %v1270_v32 }
 0xd7a   :  { %v6382_v16 = vpop.eup %6381 }
 0xde1   :  { %v1280_v36 = vpop.permute.xlu0 %1279 }
 0xde2   :  { %v1282_v37 = vadd.f32 %v1280_v36, %v1276_v33 }
 0xde4   :  { %6383 = vtanh.f32 %v1282_v37 }
 0xdee   :  { %v6384_v38 = vpop.eup %6383 }
 0xdef   :  { %v1284_v39 = vmul.f32 %v6384_v38, %v6382_v16  ;;  %v1730_v16 = vld [vmem:[#allocation17 + $0x40] sm:$0xff]  ;;  %v1731_v38 = vld [vmem:[#allocation17 + $0x48] sm:$0xff] }
 0xdf1   :  { %1286 = vrot.lane.b32.xlu1 %v1284_v39, %s7210_s10  ;;  %v5827_v39 = vpack.c.bf16 %v1731_v38, %v1730_v16  ;;  %v512_v16 = vld [vmem:[#allocation12 + $0x28] sm:$0xff]  ;;  %v514_v38 = vld [vmem:[#allocation12 + $0x38] sm:$0xff] }
 0xe63   :  { %v1287_v42 = vpop.permute.xlu1 %1286 }
 0xe64   :  { %1289 = vst.msk [vmem:[#allocation2 + $0xc] sm:$0x3] %vm633_vm1, %v1287_v42  ;;  %4881 = vmatmul.mubr.msk.f32.vlgmr.msra.gmra.mrb[14].mxu0 %vm532_vm3, %v1287_v42 }
 0xe65   :  { %1290 = vst.msk [vmem:[#allocation2 + $0x2] sm:$0x3] %vm635_vm2, %v1287_v42  ;;  %5186 = vmatprep.mubr.msk.f32.mxu0 %vm7212_vm4, %v9177_v0  ;;  %5807 = vmatpush3.bf16.msra.mxu0 %v5800_v28  ;;  %v1732_v42 = vld [vmem:[#allocation17 + $0x50] sm:$0xff] }
 0xe66   :  { %5808 = vmatprep.subr.bf16.mxu0 %v9179_v57  ;;  %v1736_v28 = vld [vmem:[#allocation17 + $0x70] sm:$0xff] }
 0xe67   :  { %v5839_v60 = vpack.c.bf16 %v1737_v58, %v1736_v28  ;;  %v517_v28 = vld [vmem:[#allocation12 + $0x50] sm:$0xff]  ;;  %v520_v58 = vld [vmem:[#allocation12 + $0x68] sm:$0xff] }
 0xe69   :  { %5810 = vmatpush3.bf16.msra.mxu0 %v5803_v29 }
 0xe6a   :  { %5828 = vmatprep.subr.bf16.mxu0 %v5827_v39 }
 0xf37   :  { %v1363_v45 = vpop.f32.mrb[14].mxu0 }
 0xf38   :  { %v1364_v48 = vadd.f32 %v1363_v45, %v1291_v43  ;;  %v1365_v50 = vpop.f32.mrb[15].mxu0  ;;  %v1733_v43 = vld [vmem:[#allocation17 + $0x58] sm:$0xff] }
 0xf39   :  { %v1366_v51 = vadd.f32 %v1365_v50, %v1292_v46  ;;  %v5831_v45 = vpack.c.bf16 %v1733_v43, %v1732_v42  ;;  %v1734_v46 = vld [vmem:[#allocation17 + $0x60] sm:$0xff]  ;;  %v4888_v50 = vld [vmem:[#allocation15] ss:$0 sm:$0xff]  ;;  %v1480_v42 = vld [vmem:[%s9157_s16] sm:$0x3] }
 0xf3a   :  { %v4882_v24 = vmul.f32 -1.442695, %v1364_v48  ;;  %v1735_v48 = vld [vmem:[#allocation17 + $0x68] sm:$0xff] }
 0xf3b   :  { %v4883_v35 = vmul.f32 -1.442695, %v1366_v51 }
 0xf3c   :  { %6385 = vpow2.f32 %v4882_v24 }
 0xf3d   :  { %6387 = vtanh.f32 %v1366_v51  ;;  %v5835_v51 = vpack.c.bf16 %v1735_v48, %v1734_v46  ;;  %v7843_v48 = vpack.c.bf16 %v514_v38, %v512_v16 }
 0xf46   :  { %v6386_v52 = vpop.eup %6385 }
 0xf47   :  { %v1374_v53 = vadd.f32 1.0, %v6386_v52  ;;  %v6388_v27 = vpop.eup %6387 }
 0xf49   :  { %6389 = vrcp.f32 %v1374_v53 }
 0xf4a   :  { %6391 = vpow2.f32 %v4883_v35  ;;  %v510_v35 = vld [vmem:[#allocation12 + $0x18] sm:$0xff] }
 0xf53   :  { %v6390_v54 = vpop.eup %6389 }
 0xf54   :  { %v1382_v55 = vmul.f32 %v6390_v54, %v6388_v27  ;;  %v6392_v40 = vpop.eup %6391  ;;  %v1381_v41 = vmul.f32 %v6390_v54, %v1282_v37 }
 0xf55   :  { %v1375_v61 = vadd.f32 1.0, %v6392_v40  ;;  %v1827_v40 = vld [vmem:[#allocation17] sm:$0xff] }
 0xf56   :  { %1384 = vrot.lane.b32.xlu0 %v1382_v55, %s7210_s10 }
 0xf57   :  { %6393 = vrcp.f32 %v1375_v61 }
 0xf61   :  { %v6394_v1 = vpop.eup %6393 }
 0xfc8   :  { %v1385_v44 = vpop.permute.xlu0 %1384 }
 0xfc9   :  { %v1387_v63 = vadd.f32 %v1385_v44, %v1381_v41  ;;  %v1828_v41 = vld [vmem:[#allocation17 + $0x8] sm:$0xff] }
 0xfca   :  { %v7798_v44 = vpack.c.bf16 %v1828_v41, %v1827_v40 }
 0xfcb   :  { %6395 = vtanh.f32 %v1387_v63  ;;  %v1829_v63 = vld [vmem:[#allocation17 + $0x10] sm:$0xff] }
 0xfd5   :  { %v6396_v3 = vpop.eup %6395 }
 0xfd6   :  { %v1389_v4 = vmul.f32 %v6396_v3, %v6394_v1  ;;  %v1830_v3 = vld [vmem:[#allocation17 + $0x18] sm:$0xff] }
 0xfd7   :  { %v7803_v5 = vpack.c.bf16 %v1830_v3, %v1829_v63 }
 0xfd8   :  { %1391 = vrot.lane.b32.xlu0 %v1389_v4, %s7210_s10  ;;  %1497 = vrot.lane.b32.xlu1 %v1389_v4, %s7203_s0 }
0x104a   :  { %v1392_v8 = vpop.permute.xlu0 %1391  ;;  %v1498_v10 = vpop.permute.xlu1 %1497 }
0x104b   :  { %1394 = vst.msk [vmem:[#allocation2 + $0xe] sm:$0x3] %vm633_vm1, %v1392_v8  ;;  %5176 = vmatmul.mubr.msk.f32.vlgmr.msra.gmra.mrb[12].mxu1 %vm1407_vm5, %v1392_v8  ;;  %5187 = vmatmul.mubr.msk.f32.vlgmr.msra.gmra.mrb[16].mxu0 %vm1407_vm5, %v1498_v10 }
0x104c   :  { %1395 = vst.msk [vmem:[#allocation2] sm:$0x3] %vm635_vm2, %v1392_v8  ;;  %5814 = vmatpush3.bf16.msra.mxu1 %v5811_v34  ;;  %5830 = vmatpush3.bf16.msra.mxu0 %v5827_v39  ;;  %v508_v34 = vld [vmem:[#allocation12 + $0x8] sm:$0xff] }
0x104d   :  { %5816 = vmatprep.subr.bf16.mxu1 %v5815_v7  ;;  %5832 = vmatprep.subr.bf16.mxu0 %v5831_v45  ;;  %v7796_v61 = vpack.c.bf16 %v510_v35, %v508_v34  ;;  %v519_v34 = vld [vmem:[#allocation12 + $0x60] sm:$0xff]  ;;  %v521_v35 = vld [vmem:[#allocation12 + $0x70] sm:$0xff] }
0x104e   :  { %v7867_v40 = vpack.c.bf16 %v521_v35, %v519_v34 }
0x1050   :  { %5818 = vmatpush3.bf16.msra.mxu1 %v5815_v7  ;;  %5834 = vmatpush3.bf16.msra.mxu0 %v5831_v45  ;;  %v1832_v7 = vld [vmem:[#allocation17 + $0x28] sm:$0xff] }
0x1051   :  { %5820 = vmatprep.subr.bf16.mxu1 %v5819_v11  ;;  %5836 = vmatprep.subr.bf16.mxu0 %v5835_v51  ;;  %v7808_v10 = vpack.c.bf16 %v1832_v7, %v1831_v6 }
0x1052   :  { %v1598_v20 = vld [vmem:[#allocation2 + $0x8] sm:$0xff] }
0x1053   :  { %v1597_v19 = vld [vmem:[#allocation2] sm:$0xff] }
0x1054   :  { %5205 = vmatprep.mubr.msk.f32.mxu1 %vm532_vm3, %v1597_v19  ;;  %5822 = vmatpush3.bf16.msra.mxu1 %v5819_v11  ;;  %v7813_v11 = vpack.c.bf16 %v1834_v26, %v1833_v25 }
0x1055   :  { %5824 = vmatprep.subr.bf16.mxu1 %v5823_v18  ;;  %5838 = vmatpush3.bf16.msra.mxu0 %v5835_v51  ;;  %v513_v51 = vld [vmem:[#allocation12 + $0x30] sm:$0xff] }
0x1056   :  { %5840 = vmatprep.subr.bf16.mxu0 %v5839_v60 }
0x1058   :  { %5826 = vmatpush3.bf16.msra.mxu1 %v5823_v18 }
0x1059   :  { %5843 = vmatprep.subr.bf16.mxu1 %v9179_v57  ;;  %5842 = vmatpush3.bf16.msra.mxu0 %v5839_v60 }
0x105a   :  { %5856 = vmatprep.subr.bf16.mxu0 %v7796_v61 }
0x105b   :  { %5206 = vmatmul.mubr.msk.f32.vlgmr.msra.gmra.mrb[14].mxu1 %vm532_vm3, %v1598_v20  ;;  %v1696_v20 = vld [vmem:[%s9158_s17 + $0x8] sm:$0xff] }
0x105c   :  { %5243 = vmatprep.mubr.msk.f32.mxu1 %vm7212_vm4, %v9177_v0  ;;  %5845 = vmatpush3.bf16.msra.mxu1 %v7798_v44 }
0x105d   :  { %5846 = vmatprep.subr.bf16.mxu1 %v9179_v57 }
0x1060   :  { %5848 = vmatpush3.bf16.msra.mxu1 %v7803_v5 }
0x1061   :  { %5849 = vmatprep.subr.bf16.mxu1 %v9179_v57 }
0x1064   :  { %5851 = vmatpush3.bf16.msra.mxu1 %v7808_v10 }
0x1065   :  { %5852 = vmatprep.subr.bf16.mxu1 %v9179_v57 }
0x1068   :  { %5854 = vmatpush3.bf16.msra.mxu1 %v7813_v11 }
0x1069   :  { %5871 = vmatprep.subr.bf16.mxu1 %v9179_v57 }
0x111e   :  { %v1476_v22 = vpop.f32.mrb[12].mxu1  ;;  %v1567_v23 = vpop.f32.mrb[16].mxu0 }
0x111f   :  { %v7775_v31 = vadd.f32 %v4884_v21, %v1476_v22  ;;  %v7777_v13 = vadd.f32 %v4884_v21, %v1567_v23  ;;  %v5177_v32 = vpop.f32.mrb[13].mxu1  ;;  %v5188_v33 = vpop.f32.mrb[17].mxu0  ;;  %v1695_v21 = vld [vmem:[%s9158_s17] sm:$0xff] }
0x1120   :  { %v507_v33 = vld [vmem:[#allocation12] sm:$0xff] }
0x1121   :  { %9216 = vst [vmem:[#allocation41_spill] sm:$0xff] %v7775_v31  ;;  %9217 = vst [vmem:[#allocation42_spill] sm:$0xff] %v7777_v13  ;;  %v1573_v36 = vmul.f32 0.5, %v7777_v13  ;;  %v1481_v14 = vmul.f32 0.5, %v7775_v31 }
0x1122   :  { %1490 = vst.msk [vmem:[#allocation25] sm:$0x3] %vm633_vm1, %v7775_v31  ;;  %1583 = vst.msk [vmem:[#allocation25 + $0x2] sm:$0x3] %vm633_vm1, %v7777_v13 }
0x1123   :  { %v1574_v37 = vmul.f32 1.442695, %v1573_v36  ;;  %v1482_v29 = vmul.f32 1.442695, %v1481_v14  ;;  %v509_v36 = vld [vmem:[#allocation12 + $0x10] sm:$0xff] }
0x1124   :  { %v7839_v45 = vpack.c.bf16 %v509_v36, %v507_v33 }
0x1125   :  { %6397 = vpow2.f32 %v1574_v37 }
0x112e   :  { %v5207_v24 = vpop.f32.mrb[14].mxu1 }
0x112f   :  { %v7784_v52 = vadd.f32 %v5207_v24, %v4888_v50  ;;  %v1686_v53 = vpop.f32.mrb[15].mxu1  ;;  %v6398_v27 = vpop.eup %6397 }
0x1130   :  { %v7786_v54 = vadd.f32 %v4888_v50, %v1686_v53  ;;  %1577 = vrot.lane.b32.xlu1 %v6398_v27, %s7213_s4  ;;  %v511_v50 = vld [vmem:[#allocation12 + $0x20] sm:$0xff]  ;;  %v516_v53 = vld [vmem:[#allocation12 + $0x48] sm:$0xff]  ;;  %v518_v27 = vld [vmem:[#allocation12 + $0x58] sm:$0xff] }
0x1131   :  { %v1698_v55 = vmul.f32 0.5, %v7784_v52  ;;  %1716 = vst.msk [vmem:[#allocation27 + $0x8] sm:$0xff] %vm532_vm3, %v7784_v52  ;;  %v7853_v14 = vpack.c.bf16 %v513_v51, %v511_v50 }
0x1132   :  { %9218 = vst [vmem:[#allocation43_spill] sm:$0xff] %v7786_v54  ;;  %v1697_v17 = vmul.f32 0.5, %v7786_v54  ;;  %1715 = vst.msk [vmem:[#allocation27] sm:$0xff] %vm532_vm3, %v7786_v54 }
0x1133   :  { %v1701_v56 = vmul.f32 1.442695, %v1698_v55 }
0x1134   :  { %v1699_v59 = vmul.f32 1.442695, %v1697_v17  ;;  %v7857_v17 = vpack.c.bf16 %v518_v27, %v516_v53 }
0x1135   :  { %6399 = vpow2.f32 %v1701_v56  ;;  %v515_v56 = vld [vmem:[#allocation12 + $0x40] sm:$0xff] }
0x1136   :  { %6401 = vpow2.f32 %v1699_v59  ;;  %v522_v59 = vld [vmem:[#allocation12 + $0x78] sm:$0xff]  ;;  %v7861_v60 = vpack.c.bf16 %v517_v28, %v515_v56 }
0x1137   :  { %6403 = vpow2.f32 %v1482_v29  ;;  %v7864_v29 = vpack.c.bf16 %v522_v59, %v520_v58 }
0x113f   :  { %v6400_v1 = vpop.eup %6399 }
0x1140   :  { %v6402_v4 = vpop.eup %6401  ;;  %1707 = vrot.lane.b32.xlu1 %v6400_v1, %s7210_s10 }
0x1141   :  { %1705 = vrot.lane.b32.xlu0 %v6402_v4, %s7210_s10  ;;  %v6404_v8 = vpop.eup %6403  ;;  %v523_v4 = vld [vmem:[#allocation11] sm:$0x3] }
0x1142   :  { %v7892_v6 = vrot.slane %v523_v4, %v7614_v47 }
0x1144   :  { %v7932_v53 = vadd.f32 %v7892_v6, %v7622_v62 }
0x1145   :  { %1485 = vrot.lane.b32.xlu0 %v6404_v8, %s7213_s4 }
0x11a2   :  { %v1578_v30 = vpop.permute.xlu1 %1577 }
0x11a3   :  { %v1580_v18 = vmul.f32 %v4887_v15, %v1578_v30 }
0x11a5   :  { %v1581_v19 = vadd.f32 %v1580_v18, %v7777_v13  ;;  %v7898_v18 = vrot.slane %v523_v4, %v7616_v49 }
0x11a7   :  { %1593 = vrot.lane.b32.xlu1 %v1581_v19, %s7203_s0  ;;  %1591 = vst.msk [vmem:[#allocation22 + $0x2] sm:$0x3] %vm633_vm1, %v1581_v19  ;;  %v7937_v58 = vadd.f32 %v7898_v18, %v7624_v2 }
0x11b2   :  { %v1708_v22 = vpop.permute.xlu1 %1707 }
0x11b3   :  { %v1712_v23 = vmul.f32 %v1708_v22, %v1696_v20  ;;  %v1706_v32 = vpop.permute.xlu0 %1705 }
0x11b4   :  { %v1711_v37 = vmul.f32 %v1706_v32, %v1695_v21 }
0x11b5   :  { %v7831_v39 = vadd.f32 %v1712_v23, %v7784_v52 }
0x11b6   :  { %v7837_v43 = vadd.f32 %v1711_v37, %v7786_v54 }
0x11b7   :  { %1728 = vst.msk [vmem:[#allocation24 + $0x8] sm:$0xff] %vm532_vm3, %v7831_v39  ;;  %v1486_v46 = vpop.permute.xlu0 %1485 }
0x11b8   :  { %1727 = vst.msk [vmem:[#allocation24] sm:$0xff] %vm532_vm3, %v7837_v43  ;;  %v1488_v24 = vmul.f32 %v1486_v46, %v1480_v42  ;;  %5224 = vmatprep.mubr.msk.f32.mxu0 %vm532_vm3, %v7837_v43 }
0x11b9   :  { %5225 = vmatmul.mubr.msk.f32.vlgmr.msra.gmra.mrb[18].mxu0 %vm532_vm3, %v7831_v39 }
0x11ba   :  { %v1489_v55 = vadd.f32 %v1488_v24, %v7775_v31  ;;  %5858 = vmatpush1.bf16.msra.mxu0 %v7839_v45  ;;  %2146 = vmatprep.mubr.f32.mxu0 %v9177_v0 }
0x11bb   :  { %5860 = vmatprep.subr.bf16.mxu0 %v7843_v48 }
0x11bc   :  { %1496 = vst.msk [vmem:[#allocation22] sm:$0x3] %vm633_vm1, %v1489_v55 }
0x11be   :  { %5862 = vmatpush1.bf16.msra.mxu0 %v7853_v14 }
0x11bf   :  { %5864 = vmatprep.subr.bf16.mxu0 %v7857_v17 }
0x11c2   :  { %5866 = vmatpush1.bf16.msra.mxu0 %v7861_v60 }
0x11c3   :  { %5868 = vmatprep.subr.bf16.mxu0 %v7864_v29 }
0x11c6   :  { %5870 = vmatpush1.bf16.msra.mxu0 %v7867_v40 }
0x11c7   :  { %5895 = vmatprep.subr.bf16.mxu0 %v9179_v57 }
0x1219   :  { %v1594_v41 = vpop.permute.xlu1 %1593 }
0x121a   :  { %v1596_v63 = vsel %vm1407_vm5, %v1489_v55, %v1594_v41 }
0x121b   :  { %5244 = vmatmul.mubr.msk.f32.vlgmr.msra.gmra.mrb[16].mxu1 %vm532_vm3, %v1596_v63  ;;  %4897 = vmatmul.mubr.msk.f32.vlgmr.msra.gmra.mrb[20].mxu0 %vm532_vm3, %v1596_v63 }
0x121c   :  { %5897 = vmatpush3.bf16.msra.mxu0 %v7798_v44  ;;  %5297 = vmatprep.mubr.msk.f32.mxu0 %vm7212_vm4, %v9177_v0 }
0x121d   :  { %5898 = vmatprep.subr.bf16.mxu0 %v9179_v57  ;;  %5278 = vmatprep.mubr.msk.f32.mxu1 %vm7212_vm4, %v9177_v0 }
0x1220   :  { %5900 = vmatpush3.bf16.msra.mxu0 %v7803_v5 }
0x1221   :  { %5901 = vmatprep.subr.bf16.mxu0 %v9179_v57 }
0x1224   :  { %5903 = vmatpush3.bf16.msra.mxu0 %v7808_v10 }
0x1225   :  { %5904 = vmatprep.subr.bf16.mxu0 %v9179_v57 }
0x1228   :  { %5906 = vmatpush3.bf16.msra.mxu0 %v7813_v11 }
0x1229   :  { %5908 = vmatprep.subr.bf16.mxu0 %v7796_v61 }
0x128c   :  { %v7887_v1 = vpop.f32.mrb[18].mxu0 }
0x128d   :  { %v7889_v3 = vpop.f32.mrb[19].mxu0 }
0x12ee   :  { %v7894_v7 = vpop.f32.mrb[16].mxu1  ;;  %v2148_v8 = vpop.f32.mrb[20].mxu0 }
0x12ef   :  { %v2149_v25 = vadd.f32 %v2148_v8, %v7892_v6  ;;  %v5245_v26 = vpop.f32.mrb[17].mxu1  ;;  %v2150_v15 = vpop.f32.mrb[21].mxu0 }
0x12f0   :  { %v2151_v19 = vadd.f32 %v2150_v15, %v7898_v18 }
0x12f1   :  { %v4898_v30 = vmul.f32 -1.442695, %v2149_v25 }
0x12f2   :  { %v4899_v32 = vmul.f32 -1.442695, %v2151_v19 }
0x12f3   :  { %6405 = vpow2.f32 %v4898_v30 }
0x12f4   :  { %6407 = vtanh.f32 %v2151_v19 }
0x12fd   :  { %v6406_v20 = vpop.eup %6405 }
0x12fe   :  { %v2159_v21 = vadd.f32 1.0, %v6406_v20  ;;  %v6408_v47 = vpop.eup %6407 }
0x1300   :  { %6409 = vrcp.f32 %v2159_v21 }
0x1301   :  { %6411 = vpow2.f32 %v4899_v32 }
0x130a   :  { %v6410_v22 = vpop.eup %6409 }
0x130b   :  { %v2167_v23 = vmul.f32 %v6410_v22, %v6408_v47  ;;  %v6412_v33 = vpop.eup %6411  ;;  %v2166_v37 = vmul.f32 0.0, %v6410_v22 }
0x130c   :  { %v2160_v36 = vadd.f32 1.0, %v6412_v33 }
0x130d   :  { %2169 = vrot.lane.b32.xlu0 %v2167_v23, %s7210_s10  ;;  %v2793_v23 = vrot.slane %v7932_v53, 2 }
0x130e   :  { %6413 = vrcp.f32 %v2160_v36 }
0x1318   :  { %v6414_v49 = vpop.eup %6413 }
0x137f   :  { %v2170_v16 = vpop.permute.xlu0 %2169 }
0x1380   :  { %v2172_v38 = vadd.f32 %v2170_v16, %v2166_v37  ;;  %v2794_v16 = vrot.slane %v7937_v58, 2 }
0x1382   :  { %6415 = vtanh.f32 %v2172_v38 }
0x138c   :  { %v6416_v42 = vpop.eup %6415 }
0x138d   :  { %v2174_v46 = vmul.f32 %v6416_v42, %v6414_v49 }
0x138f   :  { %2176 = vrot.lane.b32.xlu1 %v2174_v46, %s7210_s10 }
0x1401   :  { %v7903_v50 = vpop.permute.xlu1 %2176 }
0x1402   :  { %5298 = vmatmul.mubr.msk.f32.vlgmr.msra.gmra.mrb[22].mxu0 %vm532_vm3, %v7903_v50 }
0x1403   :  { %5910 = vmatpush1.bf16.msra.mxu0 %v7839_v45  ;;  %2505 = vmatprep.mubr.f32.mxu0 %v9177_v0 }
0x1404   :  { %5912 = vmatprep.subr.bf16.mxu0 %v7843_v48 }
0x1407   :  { %5914 = vmatpush1.bf16.msra.mxu0 %v7853_v14 }
0x1408   :  { %5916 = vmatprep.subr.bf16.mxu0 %v7857_v17 }
0x140b   :  { %5918 = vmatpush1.bf16.msra.mxu0 %v7861_v60 }
0x140c   :  { %5920 = vmatprep.subr.bf16.mxu0 %v7864_v29 }
0x140f   :  { %5922 = vmatpush1.bf16.msra.mxu0 %v7867_v40 }
0x1410   :  { %5947 = vmatprep.subr.bf16.mxu0 %v9179_v57 }
0x1412   :  { %4902 = vmatmul.mubr.msk.f32.vlgmr.msra.gmra.mrb[24].mxu0 %vm532_vm3, %v7903_v50 }
0x1413   :  { %5949 = vmatpush3.bf16.msra.mxu0 %v7798_v44  ;;  %5351 = vmatprep.mubr.msk.f32.mxu0 %vm7212_vm4, %v9177_v0 }
0x1414   :  { %5950 = vmatprep.subr.bf16.mxu0 %v9179_v57 }
0x1417   :  { %5952 = vmatpush3.bf16.msra.mxu0 %v7803_v5 }
0x1418   :  { %5953 = vmatprep.subr.bf16.mxu0 %v9179_v57 }
0x141b   :  { %5955 = vmatpush3.bf16.msra.mxu0 %v7808_v10 }
0x141c   :  { %5956 = vmatprep.subr.bf16.mxu0 %v9179_v57 }
0x141f   :  { %5958 = vmatpush3.bf16.msra.mxu0 %v7813_v11 }
0x1420   :  { %5960 = vmatprep.subr.bf16.mxu0 %v7796_v61 }
0x14d5   :  { %v7928_v51 = vpop.f32.mrb[22].mxu0 }
0x14d6   :  { %v5299_v24 = vpop.f32.mrb[23].mxu0 }
0x14e5   :  { %v2507_v27 = vpop.f32.mrb[24].mxu0 }
0x14e6   :  { %v2508_v55 = vadd.f32 %v2507_v27, %v7932_v53  ;;  %v2509_v56 = vpop.f32.mrb[25].mxu0 }
0x14e7   :  { %v2510_v59 = vadd.f32 %v2509_v56, %v7937_v58 }
0x14e8   :  { %v4903_v28 = vmul.f32 -1.442695, %v2508_v55 }
0x14e9   :  { %v4904_v4 = vmul.f32 -1.442695, %v2510_v59 }
0x14ea   :  { %6417 = vpow2.f32 %v4903_v28 }
0x14eb   :  { %6419 = vtanh.f32 %v2510_v59 }
0x14f4   :  { %v6418_v34 = vpop.eup %6417 }
0x14f5   :  { %v2518_v35 = vadd.f32 1.0, %v6418_v34  ;;  %v6420_v41 = vpop.eup %6419 }
0x14f7   :  { %6421 = vrcp.f32 %v2518_v35 }
0x14f8   :  { %6423 = vpow2.f32 %v4904_v4 }
0x1501   :  { %v6422_v63 = vpop.eup %6421 }
0x1502   :  { %v2526_v62 = vmul.f32 %v6422_v63, %v6420_v41  ;;  %v6424_v8 = vpop.eup %6423  ;;  %v2525_v26 = vmul.f32 %v6422_v63, %v2172_v38 }
0x1503   :  { %v2519_v25 = vadd.f32 1.0, %v6424_v8 }
0x1504   :  { %2528 = vrot.lane.b32.xlu0 %v2526_v62, %s7210_s10 }
0x1505   :  { %6425 = vrcp.f32 %v2519_v25 }
0x150f   :  { %v6426_v2 = vpop.eup %6425 }
0x1576   :  { %v2529_v15 = vpop.permute.xlu0 %2528 }
0x1577   :  { %v2531_v30 = vadd.f32 %v2529_v15, %v2525_v26  ;;  %v3147_v26 = vrot.slane %v7932_v53, 4 }
0x1579   :  { %6427 = vtanh.f32 %v2531_v30 }
0x1583   :  { %v6428_v19 = vpop.eup %6427 }
0x1584   :  { %v2533_v20 = vmul.f32 %v6428_v19, %v6426_v2 }
0x1586   :  { %2535 = vrot.lane.b32.xlu1 %v2533_v20, %s7210_s10  ;;  %v3148_v20 = vrot.slane %v7937_v58, 4 }
0x15f8   :  { %v7942_v21 = vpop.permute.xlu1 %2535 }
0x15f9   :  { %9219 = vst [vmem:[#allocation44_spill] sm:$0xff] %v7942_v21  ;;  %5352 = vmatmul.mubr.msk.f32.vlgmr.msra.gmra.mrb[26].mxu0 %vm532_vm3, %v7942_v21 }
0x15fa   :  { %5962 = vmatpush1.bf16.msra.mxu0 %v7839_v45  ;;  %2861 = vmatprep.mubr.f32.mxu0 %v9177_v0 }
0x15fb   :  { %5964 = vmatprep.subr.bf16.mxu0 %v7843_v48 }
0x15fe   :  { %5966 = vmatpush1.bf16.msra.mxu0 %v7853_v14 }
0x15ff   :  { %5968 = vmatprep.subr.bf16.mxu0 %v7857_v17 }
0x1602   :  { %5970 = vmatpush1.bf16.msra.mxu0 %v7861_v60 }
0x1603   :  { %5972 = vmatprep.subr.bf16.mxu0 %v7864_v29 }
0x1606   :  { %5974 = vmatpush1.bf16.msra.mxu0 %v7867_v40 }
0x1607   :  { %5999 = vmatprep.subr.bf16.mxu0 %v9179_v57 }
0x1609   :  { %4906 = vmatmul.mubr.msk.f32.vlgmr.msra.gmra.mrb[28].mxu0 %vm532_vm3, %v7942_v21 }
0x160a   :  { %6001 = vmatpush3.bf16.msra.mxu0 %v7798_v44  ;;  %5405 = vmatprep.mubr.msk.f32.mxu0 %vm7212_vm4, %v9177_v0 }
0x160b   :  { %6002 = vmatprep.subr.bf16.mxu0 %v9179_v57 }
0x160e   :  { %6004 = vmatpush3.bf16.msra.mxu0 %v7803_v5 }
0x160f   :  { %6005 = vmatprep.subr.bf16.mxu0 %v9179_v57 }
0x1612   :  { %6007 = vmatpush3.bf16.msra.mxu0 %v7808_v10 }
0x1613   :  { %6008 = vmatprep.subr.bf16.mxu0 %v9179_v57 }
0x1616   :  { %6010 = vmatpush3.bf16.msra.mxu0 %v7813_v11 }
0x1617   :  { %6012 = vmatprep.subr.bf16.mxu0 %v7796_v61 }
0x16cc   :  { %v7967_v47 = vpop.f32.mrb[26].mxu0 }
0x16cd   :  { %v5353_v22 = vpop.f32.mrb[27].mxu0 }
0x16dc   :  { %v2863_v32 = vpop.f32.mrb[28].mxu0 }
0x16dd   :  { %v2864_v33 = vadd.f32 %v2863_v32, %v2793_v23  ;;  %v2865_v36 = vpop.f32.mrb[29].mxu0 }
0x16de   :  { %v2866_v38 = vadd.f32 %v2865_v36, %v2794_v16 }
0x16df   :  { %v4907_v37 = vmul.f32 -1.442695, %v2864_v33 }
0x16e0   :  { %v4908_v55 = vmul.f32 -1.442695, %v2866_v38 }
0x16e1   :  { %6429 = vpow2.f32 %v4907_v37 }
0x16e2   :  { %6431 = vtanh.f32 %v2866_v38 }
0x16eb   :  { %v6430_v49 = vpop.eup %6429 }
0x16ec   :  { %v2874_v42 = vadd.f32 1.0, %v6430_v49  ;;  %v6432_v46 = vpop.eup %6431 }
0x16ee   :  { %6433 = vrcp.f32 %v2874_v42 }
0x16ef   :  { %6435 = vpow2.f32 %v4908_v55 }
0x16f8   :  { %v6434_v24 = vpop.eup %6433 }
0x16f9   :  { %v2882_v27 = vmul.f32 %v6434_v24, %v6432_v46  ;;  %v6436_v56 = vpop.eup %6435  ;;  %v2881_v59 = vmul.f32 %v6434_v24, %v2531_v30 }
0x16fa   :  { %v2875_v28 = vadd.f32 1.0, %v6436_v56 }
0x16fb   :  { %2884 = vrot.lane.b32.xlu0 %v2882_v27, %s7210_s10 }
0x16fc   :  { %6437 = vrcp.f32 %v2875_v28 }
0x1706   :  { %v6438_v41 = vpop.eup %6437 }
0x176d   :  { %v2885_v34 = vpop.permute.xlu0 %2884 }
0x176e   :  { %v2887_v35 = vadd.f32 %v2885_v34, %v2881_v59 }
0x1770   :  { %6439 = vtanh.f32 %v2887_v35 }
0x177a   :  { %v6440_v63 = vpop.eup %6439 }
0x177b   :  { %v2889_v62 = vmul.f32 %v6440_v63, %v6438_v41 }
0x177d   :  { %2891 = vrot.lane.b32.xlu1 %v2889_v62, %s7210_s10 }
0x17ef   :  { %v7973_v4 = vpop.permute.xlu1 %2891 }
0x17f0   :  { %9220 = vst [vmem:[#allocation45_spill] sm:$0xff] %v7973_v4  ;;  %5406 = vmatmul.mubr.msk.f32.vlgmr.msra.gmra.mrb[30].mxu0 %vm532_vm3, %v7973_v4 }
0x17f1   :  { %6014 = vmatpush1.bf16.msra.mxu0 %v7839_v45  ;;  %3215 = vmatprep.mubr.f32.mxu0 %v9177_v0 }
0x17f2   :  { %6016 = vmatprep.subr.bf16.mxu0 %v7843_v48 }
0x17f5   :  { %6018 = vmatpush1.bf16.msra.mxu0 %v7853_v14 }
0x17f6   :  { %6020 = vmatprep.subr.bf16.mxu0 %v7857_v17 }
0x17f9   :  { %6022 = vmatpush1.bf16.msra.mxu0 %v7861_v60 }
0x17fa   :  { %6024 = vmatprep.subr.bf16.mxu0 %v7864_v29 }
0x17fd   :  { %6026 = vmatpush1.bf16.msra.mxu0 %v7867_v40 }
0x17fe   :  { %6051 = vmatprep.subr.bf16.mxu0 %v9179_v57 }
0x1800   :  { %4910 = vmatmul.mubr.msk.f32.vlgmr.msra.gmra.mrb[32].mxu0 %vm532_vm3, %v7973_v4 }
0x1801   :  { %6053 = vmatpush3.bf16.msra.mxu0 %v7798_v44  ;;  %5459 = vmatprep.mubr.msk.f32.mxu0 %vm7212_vm4, %v9177_v0 }
0x1802   :  { %6054 = vmatprep.subr.bf16.mxu0 %v9179_v57 }
0x1805   :  { %6056 = vmatpush3.bf16.msra.mxu0 %v7803_v5 }
0x1806   :  { %6057 = vmatprep.subr.bf16.mxu0 %v9179_v57 }
0x1809   :  { %6059 = vmatpush3.bf16.msra.mxu0 %v7808_v10 }
0x180a   :  { %6060 = vmatprep.subr.bf16.mxu0 %v9179_v57 }
0x180d   :  { %6062 = vmatpush3.bf16.msra.mxu0 %v7813_v11 }
0x180e   :  { %6064 = vmatprep.subr.bf16.mxu0 %v7796_v61 }
0x18c3   :  { %v7998_v8 = vpop.f32.mrb[30].mxu0 }
0x18c4   :  { %v5407_v25 = vpop.f32.mrb[31].mxu0 }
0x18d3   :  { %v3217_v15 = vpop.f32.mrb[32].mxu0 }
0x18d4   :  { %v3218_v30 = vadd.f32 %v3217_v15, %v3147_v26  ;;  %v3219_v2 = vpop.f32.mrb[33].mxu0  ;;  %v3502_v26 = vrot.slane %v7937_v58, 6 }
0x18d5   :  { %v3220_v22 = vadd.f32 %v3219_v2, %v3148_v20 }
0x18d6   :  { %v4911_v19 = vmul.f32 -1.442695, %v3218_v30 }
0x18d7   :  { %v4912_v16 = vmul.f32 -1.442695, %v3220_v22 }
0x18d8   :  { %6441 = vpow2.f32 %v4911_v19 }
0x18d9   :  { %6443 = vtanh.f32 %v3220_v22 }
0x18e2   :  { %v6442_v23 = vpop.eup %6441 }
0x18e3   :  { %v3228_v32 = vadd.f32 1.0, %v6442_v23  ;;  %v6444_v33 = vpop.eup %6443 }
0x18e5   :  { %6445 = vrcp.f32 %v3228_v32 }
0x18e6   :  { %6447 = vpow2.f32 %v4912_v16 }
0x18ef   :  { %v6446_v36 = vpop.eup %6445 }
0x18f0   :  { %v3236_v37 = vmul.f32 %v6446_v36, %v6444_v33  ;;  %v6448_v38 = vpop.eup %6447  ;;  %v3235_v42 = vmul.f32 %v6446_v36, %v2887_v35  ;;  %v3501_v35 = vrot.slane %v7932_v53, 6 }
0x18f1   :  { %v3229_v49 = vadd.f32 1.0, %v6448_v38 }
0x18f2   :  { %3238 = vrot.lane.b32.xlu0 %v3236_v37, %s7210_s10 }
0x18f3   :  { %6449 = vrcp.f32 %v3229_v49 }
0x18fd   :  { %v6450_v27 = vpop.eup %6449 }
0x1964   :  { %v3239_v46 = vpop.permute.xlu0 %3238 }
0x1965   :  { %v3241_v24 = vadd.f32 %v3239_v46, %v3235_v42 }
0x1967   :  { %6451 = vtanh.f32 %v3241_v24 }
0x1971   :  { %v6452_v55 = vpop.eup %6451 }
0x1972   :  { %v3243_v56 = vmul.f32 %v6452_v55, %v6450_v27 }
0x1974   :  { %3245 = vrot.lane.b32.xlu1 %v3243_v56, %s7210_s10 }
0x19e6   :  { %v8004_v28 = vpop.permute.xlu1 %3245 }
0x19e7   :  { %9221 = vst [vmem:[#allocation46_spill] sm:$0xff] %v8004_v28  ;;  %5460 = vmatmul.mubr.msk.f32.vlgmr.msra.gmra.mrb[34].mxu0 %vm532_vm3, %v8004_v28 }
0x19e8   :  { %6066 = vmatpush1.bf16.msra.mxu0 %v7839_v45  ;;  %3569 = vmatprep.mubr.f32.mxu0 %v9177_v0 }
0x19e9   :  { %6068 = vmatprep.subr.bf16.mxu0 %v7843_v48 }
0x19ec   :  { %6070 = vmatpush1.bf16.msra.mxu0 %v7853_v14 }
0x19ed   :  { %6072 = vmatprep.subr.bf16.mxu0 %v7857_v17 }
0x19f0   :  { %6074 = vmatpush1.bf16.msra.mxu0 %v7861_v60 }
0x19f1   :  { %6076 = vmatprep.subr.bf16.mxu0 %v7864_v29 }
0x19f4   :  { %6078 = vmatpush1.bf16.msra.mxu0 %v7867_v40 }
0x19f5   :  { %6103 = vmatprep.subr.bf16.mxu0 %v9179_v57 }
0x19f7   :  { %4914 = vmatmul.mubr.msk.f32.vlgmr.msra.gmra.mrb[36].mxu0 %vm532_vm3, %v8004_v28 }
0x19f8   :  { %6105 = vmatpush3.bf16.msra.mxu0 %v7798_v44  ;;  %5513 = vmatprep.mubr.msk.f32.mxu0 %vm7212_vm4, %v9177_v0 }
0x19f9   :  { %6106 = vmatprep.subr.bf16.mxu0 %v9179_v57 }
0x19fc   :  { %6108 = vmatpush3.bf16.msra.mxu0 %v7803_v5 }
0x19fd   :  { %6109 = vmatprep.subr.bf16.mxu0 %v9179_v57 }
0x1a00   :  { %6111 = vmatpush3.bf16.msra.mxu0 %v7808_v10 }
0x1a01   :  { %6112 = vmatprep.subr.bf16.mxu0 %v9179_v57 }
0x1a04   :  { %6114 = vmatpush3.bf16.msra.mxu0 %v7813_v11 }
0x1a05   :  { %6116 = vmatprep.subr.bf16.mxu0 %v7796_v61 }
0x1aba   :  { %v8029_v59 = vpop.f32.mrb[34].mxu0 }
0x1abb   :  { %v5461_v34 = vpop.f32.mrb[35].mxu0 }
0x1aca   :  { %v3571_v41 = vpop.f32.mrb[36].mxu0 }
0x1acb   :  { %v3572_v63 = vadd.f32 %v3571_v41, %v3501_v35  ;;  %v3573_v62 = vpop.f32.mrb[37].mxu0  ;;  %v8069_v35 = vadd.f32 %v7898_v18, %v7628_v12 }
0x1acc   :  { %v3574_v15 = vadd.f32 %v3573_v62, %v3502_v26 }
0x1acd   :  { %v4915_v25 = vmul.f32 -1.442695, %v3572_v63 }
0x1ace   :  { %v4916_v23 = vmul.f32 -1.442695, %v3574_v15 }
0x1acf   :  { %6453 = vpow2.f32 %v4915_v25 }
0x1ad0   :  { %6455 = vtanh.f32 %v3574_v15 }
0x1ad9   :  { %v6454_v30 = vpop.eup %6453 }
0x1ada   :  { %v3582_v2 = vadd.f32 1.0, %v6454_v30  ;;  %v6456_v19 = vpop.eup %6455 }
0x1adc   :  { %6457 = vrcp.f32 %v3582_v2 }
0x1add   :  { %6459 = vpow2.f32 %v4916_v23 }
0x1ae6   :  { %v6458_v20 = vpop.eup %6457 }
0x1ae7   :  { %v3590_v22 = vmul.f32 %v6458_v20, %v6456_v19  ;;  %v6460_v53 = vpop.eup %6459  ;;  %v3589_v33 = vmul.f32 %v6458_v20, %v3241_v24  ;;  %v8064_v24 = vadd.f32 %v7892_v6, %v7626_v9 }
0x1ae8   :  { %v3583_v32 = vadd.f32 1.0, %v6460_v53 }
0x1ae9   :  { %3592 = vrot.lane.b32.xlu0 %v3590_v22, %s7210_s10 }
0x1aea   :  { %6461 = vrcp.f32 %v3583_v32  ;;  %v4209_v32 = vrot.slane %v8064_v24, 2 }
0x1af4   :  { %v6462_v58 = vpop.eup %6461 }
0x1b5b   :  { %v3593_v36 = vpop.permute.xlu0 %3592 }
0x1b5c   :  { %v3595_v37 = vadd.f32 %v3593_v36, %v3589_v33 }
0x1b5e   :  { %6463 = vtanh.f32 %v3595_v37 }
0x1b68   :  { %v6464_v16 = vpop.eup %6463 }
0x1b69   :  { %v3597_v38 = vmul.f32 %v6464_v16, %v6462_v58 }
0x1b6b   :  { %3599 = vrot.lane.b32.xlu1 %v3597_v38, %s7210_s10 }
0x1bdd   :  { %v8035_v49 = vpop.permute.xlu1 %3599 }
0x1bde   :  { %9222 = vst [vmem:[#allocation47_spill] sm:$0xff] %v8035_v49  ;;  %5514 = vmatmul.mubr.msk.f32.vlgmr.msra.gmra.mrb[38].mxu0 %vm532_vm3, %v8035_v49 }
0x1bdf   :  { %6118 = vmatpush1.bf16.msra.mxu0 %v7839_v45  ;;  %3921 = vmatprep.mubr.f32.mxu0 %v9177_v0 }
0x1be0   :  { %6120 = vmatprep.subr.bf16.mxu0 %v7843_v48 }
0x1be3   :  { %6122 = vmatpush1.bf16.msra.mxu0 %v7853_v14 }
0x1be4   :  { %6124 = vmatprep.subr.bf16.mxu0 %v7857_v17 }
0x1be7   :  { %6126 = vmatpush1.bf16.msra.mxu0 %v7861_v60 }
0x1be8   :  { %6128 = vmatprep.subr.bf16.mxu0 %v7864_v29 }
0x1beb   :  { %6130 = vmatpush1.bf16.msra.mxu0 %v7867_v40 }
0x1bec   :  { %6155 = vmatprep.subr.bf16.mxu0 %v9179_v57 }
0x1bee   :  { %4918 = vmatmul.mubr.msk.f32.vlgmr.msra.gmra.mrb[40].mxu0 %vm532_vm3, %v8035_v49 }
0x1bef   :  { %6157 = vmatpush3.bf16.msra.mxu0 %v7798_v44  ;;  %5567 = vmatprep.mubr.msk.f32.mxu0 %vm7212_vm4, %v9177_v0 }
0x1bf0   :  { %6158 = vmatprep.subr.bf16.mxu0 %v9179_v57 }
0x1bf3   :  { %6160 = vmatpush3.bf16.msra.mxu0 %v7803_v5 }
0x1bf4   :  { %6161 = vmatprep.subr.bf16.mxu0 %v9179_v57 }
0x1bf7   :  { %6163 = vmatpush3.bf16.msra.mxu0 %v7808_v10 }
0x1bf8   :  { %6164 = vmatprep.subr.bf16.mxu0 %v9179_v57 }
0x1bfb   :  { %6166 = vmatpush3.bf16.msra.mxu0 %v7813_v11 }
0x1bfc   :  { %6168 = vmatprep.subr.bf16.mxu0 %v7796_v61 }
0x1cb1   :  { %v8060_v42 = vpop.f32.mrb[38].mxu0 }
0x1cb2   :  { %v5515_v46 = vpop.f32.mrb[39].mxu0 }
0x1cc1   :  { %v3923_v27 = vpop.f32.mrb[40].mxu0 }
0x1cc2   :  { %v3924_v55 = vadd.f32 %v3923_v27, %v8064_v24  ;;  %v3925_v56 = vpop.f32.mrb[41].mxu0  ;;  %v8113_v27 = vld [vmem:[#allocation18] ss:$0 sm:$0xff] }
0x1cc3   :  { %v3926_v41 = vadd.f32 %v3925_v56, %v8069_v35  ;;  %v8117_v56 = vadd.f32 %v8113_v27, %v7894_v7 }
0x1cc4   :  { %v4919_v34 = vmul.f32 -1.442695, %v3924_v55  ;;  %v4891_v55 = vld [vmem:[#allocation18 + $0x1] ss:$0 sm:$0xff] }
0x1cc5   :  { %v4920_v6 = vmul.f32 -1.442695, %v3926_v41 }
0x1cc6   :  { %6465 = vpow2.f32 %v4919_v34  ;;  %v8120_v34 = vadd.f32 %v4891_v55, %v7889_v3 }
0x1cc7   :  { %6467 = vtanh.f32 %v3926_v41 }
0x1cc8   :  { %v1933_v41 = vadd.f32 %v8117_v56, %v8120_v34 }
0x1cd0   :  { %v6466_v63 = vpop.eup %6465 }
0x1cd1   :  { %v3934_v62 = vadd.f32 1.0, %v6466_v63  ;;  %v6468_v25 = vpop.eup %6467  ;;  %v8125_v63 = vrot.slane %v8120_v34, 4 }
0x1cd3   :  { %6469 = vrcp.f32 %v3934_v62  ;;  %v1957_v62 = vadd.f32 %v8125_v63, %v8117_v56 }
0x1cd4   :  { %6471 = vpow2.f32 %v4920_v6 }
0x1cdd   :  { %v6470_v26 = vpop.eup %6469 }
0x1cde   :  { %v3942_v9 = vmul.f32 %v6470_v26, %v6468_v25  ;;  %v6472_v15 = vpop.eup %6471  ;;  %v3941_v2 = vmul.f32 %v6470_v26, %v3595_v37  ;;  %v8130_v25 = vadd.f32 %v7887_v1, %v4891_v55  ;;  %v8133_v26 = vrot.slane %v8120_v34, 6 }
0x1cdf   :  { %v3935_v30 = vadd.f32 1.0, %v6472_v15  ;;  %v8142_v15 = vld [vmem:[#allocation20] ss:$0 sm:$0xff] }
0x1ce0   :  { %3944 = vrot.lane.b32.xlu0 %v3942_v9, %s7210_s10  ;;  %v1965_v3 = vadd.f32 %v8133_v26, %v8117_v56  ;;  %v8138_v7 = vrot.slane %v8130_v25, 2  ;;  %v8145_v1 = vrot.slane %v8130_v25, 6 }
0x1ce1   :  { %6473 = vrcp.f32 %v3935_v30  ;;  %v8149_v30 = vadd.f32 %v8113_v27, %v7928_v51 }
0x1ce2   :  { %v1980_v9 = vadd.f32 %v8138_v7, %v8117_v56 }
0x1ce3   :  { %v2376_v55 = vadd.f32 %v8149_v30, %v8145_v1 }
0x1ceb   :  { %v6474_v12 = vpop.eup %6473 }
0x1d52   :  { %v3945_v19 = vpop.permute.xlu0 %3944 }
0x1d53   :  { %v8073_v20 = vadd.f32 %v3945_v19, %v3941_v2  ;;  %v1996_v2 = vadd.f32 %v8145_v1, %v8117_v56 }
0x1d55   :  { %6475 = vtanh.f32 %v8073_v20 }
0x1d5f   :  { %v6476_v18 = vpop.eup %6475 }
0x1d60   :  { %v3949_v22 = vmul.f32 %v6476_v18, %v6474_v12  ;;  %v8155_v18 = vrot.slane %v8120_v34, 2 }
0x1d62   :  { %3951 = vrot.lane.b32.xlu1 %v3949_v22, %s7210_s10  ;;  %v2340_v22 = vadd.f32 %v8149_v30, %v8155_v18 }
0x1dd4   :  { %v8077_v23 = vpop.permute.xlu1 %3951 }
0x1dd5   :  { %9223 = vst [vmem:[#allocation48_spill] sm:$0xff] %v8077_v23  ;;  %5568 = vmatmul.mubr.msk.f32.vlgmr.msra.gmra.mrb[42].mxu0 %vm532_vm3, %v8077_v23 }
0x1dd6   :  { %6170 = vmatpush1.bf16.msra.mxu0 %v7839_v45  ;;  %4277 = vmatprep.mubr.f32.mxu0 %v9177_v0 }
0x1dd7   :  { %6172 = vmatprep.subr.bf16.mxu0 %v7843_v48 }
0x1dda   :  { %6174 = vmatpush1.bf16.msra.mxu0 %v7853_v14 }
0x1ddb   :  { %6176 = vmatprep.subr.bf16.mxu0 %v7857_v17 }
0x1dde   :  { %6178 = vmatpush1.bf16.msra.mxu0 %v7861_v60 }
0x1ddf   :  { %6180 = vmatprep.subr.bf16.mxu0 %v7864_v29 }
0x1de2   :  { %6182 = vmatpush1.bf16.msra.mxu0 %v7867_v40 }
0x1de3   :  { %6207 = vmatprep.subr.bf16.mxu0 %v9179_v57 }
0x1de5   :  { %4922 = vmatmul.mubr.msk.f32.vlgmr.msra.gmra.mrb[44].mxu0 %vm532_vm3, %v8077_v23 }
0x1de6   :  { %6209 = vmatpush3.bf16.msra.mxu0 %v7798_v44  ;;  %5621 = vmatprep.mubr.msk.f32.mxu0 %vm7212_vm4, %v9177_v0 }
0x1de7   :  { %6210 = vmatprep.subr.bf16.mxu0 %v9179_v57 }
0x1dea   :  { %6212 = vmatpush3.bf16.msra.mxu0 %v7803_v5  ;;  %v4210_v5 = vrot.slane %v8069_v35, 2 }
0x1deb   :  { %6213 = vmatprep.subr.bf16.mxu0 %v9179_v57 }
0x1dee   :  { %6215 = vmatpush3.bf16.msra.mxu0 %v7808_v10 }
0x1def   :  { %6216 = vmatprep.subr.bf16.mxu0 %v9179_v57 }
0x1df2   :  { %6218 = vmatpush3.bf16.msra.mxu0 %v7813_v11 }
0x1df3   :  { %6220 = vmatprep.subr.bf16.mxu0 %v7796_v61 }
0x1ea8   :  { %v8102_v53 = vpop.f32.mrb[42].mxu0 }
0x1ea9   :  { %v5569_v44 = vpop.f32.mrb[43].mxu0 }
0x1eb8   :  { %v4279_v33 = vpop.f32.mrb[44].mxu0 }
0x1eb9   :  { %v4280_v36 = vadd.f32 %v4279_v33, %v4209_v32  ;;  %v4281_v37 = vpop.f32.mrb[45].mxu0  ;;  %v2352_v33 = vadd.f32 %v8149_v30, %v8133_v26 }
0x1eba   :  { %v8106_v16 = vadd.f32 %v4281_v37, %v4210_v5  ;;  %v2364_v5 = vadd.f32 %v8149_v30, %v8138_v7 }
0x1ebb   :  { %v4923_v58 = vmul.f32 -1.442695, %v4280_v36 }
0x1ebd   :  { %6477 = vpow2.f32 %v4923_v58 }
0x1ebe   :  { %6479 = vtanh.f32 %v8106_v16 }
0x1ec7   :  { %v6478_v10 = vpop.eup %6477 }
0x1ec8   :  { %v4290_v38 = vadd.f32 1.0, %v6478_v10  ;;  %v6480_v61 = vpop.eup %6479 }
0x1eca   :  { %6481 = vrcp.f32 %v4290_v38 }
0x1ecb   :  { %6483 = vtanh.f32 %v1933_v41 }
0x1ecc   :  { %6485 = vtanh.f32 %v1957_v62 }
0x1ecd   :  { %6487 = vtanh.f32 %v1965_v3 }
0x1ece   :  { %6489 = vtanh.f32 %v1980_v9 }
0x1ecf   :  { %6491 = vtanh.f32 %v1996_v2 }
0x1ed0   :  { %6493 = vtanh.f32 %v2340_v22 }
0x1ed1   :  { %6495 = vtanh.f32 %v2352_v33 }
0x1ed2   :  { %6497 = vtanh.f32 %v2364_v5 }
0x1ed3   :  { %6499 = vtanh.f32 %v2376_v55 }
0x1ed4   :  { %v8109_v11 = vpop.eup %6481 }
0x1ed5   :  { %v4298_v46 = vmul.f32 %v8109_v11, %v6480_v61  ;;  %v6484_v6 = vpop.eup %6483 }
0x1ed6   :  { %v1941_v19 = vmul.f32 %v6484_v6, %v8142_v15  ;;  %v6486_v12 = vpop.eup %6485 }
0x1ed7   :  { %4300 = vrot.lane.b32.xlu0 %v4298_v46, %s7210_s10  ;;  %v1959_v51 = vmul.f32 %v6486_v12, %v8142_v15  ;;  %v6488_v32 = vpop.eup %6487  ;;  %v8171_v46 = vadd.f32 %v8113_v27, %v7967_v47 }
0x1ed8   :  { %v1943_v44 = vsel %vm1942_vm6, %v1941_v19, 0.0  ;;  %v1967_v37 = vmul.f32 %v6488_v32, %v8142_v15  ;;  %v6490_v58 = vpop.eup %6489 }
0x1ed9   :  { %v1960_v36 = vsel %vm1942_vm6, %v1959_v51, 0.0  ;;  %v1982_v38 = vmul.f32 %v6490_v58, %v8142_v15  ;;  %v6492_v61 = vpop.eup %6491  ;;  %v2692_v9 = vadd.f32 %v8171_v46, %v8155_v18  ;;  %v2704_v19 = vadd.f32 %v8171_v46, %v8133_v26 }
0x1eda   :  { %v1968_v10 = vsel %vm1942_vm6, %v1967_v37, 0.0  ;;  %v1998_v62 = vmul.f32 %v6492_v61, %v8142_v15  ;;  %v6494_v3 = vpop.eup %6493  ;;  %v2716_v51 = vadd.f32 %v8171_v46, %v8138_v7  ;;  %v8191_v37 = vadd.f32 %v8113_v27, %v7998_v8 }
0x1edb   :  { %v1983_v41 = vsel %vm1942_vm6, %v1982_v38, 0.0  ;;  %v2342_v2 = vmul.f32 %v6494_v3, %v8142_v15  ;;  %v6496_v47 = vpop.eup %6495  ;;  %6501 = vtanh.f32 %v2692_v9  ;;  %v2728_v58 = vadd.f32 %v8171_v46, %v8145_v1 }
0x1edc   :  { %v1999_v6 = vsel %vm1942_vm6, %v1998_v62, 0.0  ;;  %v2354_v22 = vmul.f32 %v6496_v47, %v8142_v15  ;;  %6503 = vtanh.f32 %v2704_v19  ;;  %v3048_v61 = vadd.f32 %v8191_v37, %v8155_v18 }
0x1edd   :  { %v2343_v12 = vsel %vm1942_vm6, %v2342_v2, 0.0  ;;  %6505 = vtanh.f32 %v2716_v51  ;;  %v3060_v62 = vadd.f32 %v8191_v37, %v8133_v26  ;;  %v3072_v2 = vadd.f32 %v8191_v37, %v8138_v7 }
0x1ede   :  { %v2355_v32 = vsel %vm1942_vm6, %v2354_v22, 0.0  ;;  %6507 = vtanh.f32 %v2728_v58  ;;  %v8211_v22 = vadd.f32 %v8113_v27, %v8029_v59 }
0x1edf   :  { %6509 = vtanh.f32 %v3048_v61 }
0x1ee0   :  { %6511 = vtanh.f32 %v3060_v62 }
0x1ee1   :  { %6513 = vtanh.f32 %v3072_v2 }
0x1ef6   :  { %1944 = vadd.xlane.f32.xlu0 %v1943_v44  ;;  %v6498_v44 = vpop.eup %6497 }
0x1ef7   :  { %v2366_v33 = vmul.f32 %v6498_v44, %v8142_v15  ;;  %v3084_v44 = vadd.f32 %v8191_v37, %v8145_v1 }
0x1ef9   :  { %v2367_v5 = vsel %vm1942_vm6, %v2366_v33, 0.0  ;;  %6515 = vtanh.f32 %v3084_v44 }
0x1efa   :  { %1961 = vadd.xlane.f32.xlu0 %v1960_v36  ;;  %v6500_v36 = vpop.eup %6499 }
0x1efb   :  { %v6502_v38 = vpop.eup %6501 }
0x1efc   :  { %v6504_v8 = vpop.eup %6503 }
0x1efd   :  { %v2706_v9 = vmul.f32 %v6504_v8, %v8142_v15 }
0x1efe   :  { %1969 = vadd.xlane.f32.xlu0 %v1968_v10  ;;  %v2378_v10 = vmul.f32 %v6500_v36, %v8142_v15  ;;  %v3402_v36 = vadd.f32 %v8211_v22, %v8155_v18 }
0x1eff   :  { %v2707_v47 = vsel %vm1942_vm6, %v2706_v9, 0.0  ;;  %v3420_v9 = vadd.f32 %v8211_v22, %v8130_v25 }
0x1f00   :  { %v2379_v55 = vsel %vm1942_vm6, %v2378_v10, 0.0  ;;  %6517 = vtanh.f32 %v3402_v36  ;;  %v3408_v10 = vadd.f32 %v8211_v22, %v8125_v63  ;;  %v3438_v36 = vadd.f32 %v8211_v22, %v8145_v1 }
0x1f02   :  { %1984 = vadd.xlane.f32.xlu0 %v1983_v41  ;;  %v2694_v41 = vmul.f32 %v6502_v38, %v8142_v15  ;;  %6519 = vtanh.f32 %v3408_v10 }
0x1f04   :  { %v2695_v3 = vsel %vm1942_vm6, %v2694_v41, 0.0  ;;  %v3414_v41 = vadd.f32 %v8211_v22, %v8133_v26 }
0x1f06   :  { %2000 = vadd.xlane.f32.xlu0 %v1999_v6  ;;  %v6506_v6 = vpop.eup %6505  ;;  %6521 = vtanh.f32 %v3414_v41 }
0x1f07   :  { %v2718_v19 = vmul.f32 %v6506_v6, %v8142_v15  ;;  %6523 = vtanh.f32 %v3420_v9 }
0x1f09   :  { %v2719_v51 = vsel %vm1942_vm6, %v2718_v19, 0.0  ;;  %v3426_v19 = vadd.f32 %v8211_v22, %v8138_v7 }
0x1f0a   :  { %2344 = vadd.xlane.f32.xlu0 %v2343_v12  ;;  %v6508_v12 = vpop.eup %6507 }
0x1f0b   :  { %v6510_v33 = vpop.eup %6509  ;;  %6525 = vtanh.f32 %v3426_v19 }
0x1f0c   :  { %v6512_v59 = vpop.eup %6511 }
0x1f0d   :  { %v3062_v61 = vmul.f32 %v6512_v59, %v8142_v15 }
0x1f0e   :  { %2356 = vadd.xlane.f32.xlu0 %v2355_v32  ;;  %v2730_v32 = vmul.f32 %v6508_v12, %v8142_v15 }
0x1f0f   :  { %v3063_v8 = vsel %vm1942_vm6, %v3062_v61, 0.0 }
0x1f10   :  { %v2731_v58 = vsel %vm1942_vm6, %v2730_v32, 0.0  ;;  %v4924_v32 = vmul.f32 -1.442695, %v8106_v16 }
0x1f12   :  { %2368 = vadd.xlane.f32.xlu0 %v2367_v5  ;;  %v3050_v5 = vmul.f32 %v6510_v33, %v8142_v15  ;;  %v8240_v33 = vadd.f32 %v8113_v27, %v8060_v42  ;;  %6527 = vpow2.f32 %v4924_v32 }
0x1f13   :  { %6529 = vtanh.f32 %v3438_v36 }
0x1f14   :  { %v3051_v38 = vsel %vm1942_vm6, %v3050_v5, 0.0  ;;  %v3750_v16 = vadd.f32 %v8240_v33, %v8120_v34  ;;  %v3756_v61 = vadd.f32 %v8240_v33, %v8155_v18 }
0x1f16   :  { %2380 = vadd.xlane.f32.xlu0 %v2379_v55  ;;  %v6514_v55 = vpop.eup %6513  ;;  %6531 = vtanh.f32 %v3750_v16  ;;  %v3780_v16 = vadd.f32 %v8240_v33, %v8138_v7 }
0x1f17   :  { %v3074_v62 = vmul.f32 %v6514_v55, %v8142_v15  ;;  %6533 = vtanh.f32 %v3756_v61  ;;  %v8276_v61 = vrot.slane %v8130_v25, 4 }
0x1f19   :  { %v3075_v6 = vsel %vm1942_vm6, %v3074_v62, 0.0 }
0x1f1a   :  { %2696 = vadd.xlane.f32.xlu0 %v2695_v3  ;;  %v6516_v3 = vpop.eup %6515 }
0x1f1b   :  { %v3086_v2 = vmul.f32 %v6516_v3, %v8142_v15  ;;  %v3762_v3 = vadd.f32 %v8240_v33, %v8125_v63 }
0x1f1d   :  { %v3087_v12 = vsel %vm1942_vm6, %v3086_v2, 0.0  ;;  %6535 = vtanh.f32 %v3762_v3 }
0x1f1e   :  { %2708 = vadd.xlane.f32.xlu0 %v2707_v47  ;;  %v6518_v47 = vpop.eup %6517 }
0x1f1f   :  { %v3404_v44 = vmul.f32 %v6518_v47, %v8142_v15  ;;  %v3768_v47 = vadd.f32 %v8240_v33, %v8133_v26 }
0x1f21   :  { %6537 = vtanh.f32 %v3768_v47  ;;  %v3792_v47 = vadd.f32 %v8240_v33, %v8145_v1 }
0x1f22   :  { %2720 = vadd.xlane.f32.xlu0 %v2719_v51  ;;  %v6520_v51 = vpop.eup %6519 }
0x1f23   :  { %v3410_v5 = vmul.f32 %v6520_v51, %v8142_v15  ;;  %v6522_v59 = vpop.eup %6521 }
0x1f24   :  { %v3416_v42 = vmul.f32 %v6522_v59, %v8142_v15 }
0x1f25   :  { %v3411_v10 = vsel %vm1942_vm6, %v3410_v5, 0.0  ;;  %v3774_v5 = vadd.f32 %v8240_v33, %v8130_v25 }
0x1f26   :  { %2732 = vadd.xlane.f32.xlu0 %v2731_v58  ;;  %v3405_v58 = vsel %vm1942_vm6, %v3404_v44, 0.0  ;;  %v3417_v55 = vsel %vm1942_vm6, %v3416_v42, 0.0 }
0x1f2a   :  { %3052 = vadd.xlane.f32.xlu0 %v3051_v38  ;;  %v6524_v38 = vpop.eup %6523 }
0x1f2b   :  { %v3422_v41 = vmul.f32 %v6524_v38, %v8142_v15 }
0x1f2d   :  { %v3423_v9 = vsel %vm1942_vm6, %v3422_v41, 0.0  ;;  %v3786_v41 = vadd.f32 %v8240_v33, %v8276_v61 }
0x1f2e   :  { %3064 = vadd.xlane.f32.xlu0 %v3063_v8  ;;  %v6526_v8 = vpop.eup %6525 }
0x1f2f   :  { %v6528_v62 = vpop.eup %6527 }
0x1f30   :  { %v6530_v2 = vpop.eup %6529  ;;  %v4291_v19 = vadd.f32 1.0, %v6528_v62 }
0x1f31   :  { %v3440_v32 = vmul.f32 %v6530_v2, %v8142_v15  ;;  %v6532_v36 = vpop.eup %6531  ;;  %v8284_v2 = vadd.f32 %v8113_v27, %v8102_v53 }
0x1f32   :  { %3076 = vadd.xlane.f32.xlu0 %v3075_v6  ;;  %v3428_v6 = vmul.f32 %v6526_v8, %v8142_v15  ;;  %6539 = vrcp.f32 %v4291_v19 }
0x1f33   :  { %v3441_v59 = vsel %vm1942_vm6, %v3440_v32, 0.0  ;;  %v4114_v33 = vadd.f32 %v8284_v2, %v8125_v63 }
0x1f34   :  { %v3429_v51 = vsel %vm1942_vm6, %v3428_v6, 0.0 }
0x1f36   :  { %3088 = vadd.xlane.f32.xlu0 %v3087_v12  ;;  %v4297_v12 = vmul.f32 %v8109_v11, %v8073_v20  ;;  %v3752_v20 = vmul.f32 %v6532_v36, %v8142_v15  ;;  %v6534_v11 = vpop.eup %6533 }
0x1f37   :  { %v3758_v42 = vmul.f32 %v6534_v11, %v8142_v15  ;;  %v6536_v38 = vpop.eup %6535 }
0x1f38   :  { %v3764_v3 = vmul.f32 %v6536_v38, %v8142_v15  ;;  %v4126_v38 = vadd.f32 %v8284_v2, %v8130_v25 }
0x1f39   :  { %v3759_v62 = vsel %vm1942_vm6, %v3758_v42, 0.0  ;;  %v1949_v42 = vadd.f32 %v8155_v18, %v8117_v56 }
0x1f3a   :  { %3406 = vadd.xlane.f32.xlu0 %v3405_v58  ;;  %v3765_v19 = vsel %vm1942_vm6, %v3764_v3, 0.0  ;;  %v4132_v3 = vadd.f32 %v8284_v2, %v8138_v7 }
0x1f3e   :  { %3412 = vadd.xlane.f32.xlu0 %v3411_v10  ;;  %v3753_v10 = vsel %vm1942_vm6, %v3752_v20, 0.0  ;;  %v4120_v20 = vadd.f32 %v8284_v2, %v8133_v26 }
0x1f42   :  { %3418 = vadd.xlane.f32.xlu0 %v3417_v55  ;;  %v6538_v55 = vpop.eup %6537 }
0x1f43   :  { %v6540_v8 = vpop.eup %6539 }
0x1f46   :  { %3424 = vadd.xlane.f32.xlu0 %v3423_v9 }
0x1f49   :  { %v4301_v44 = vpop.permute.xlu0 %4300 }
0x1f4a   :  { %v8264_v58 = vadd.f32 %v4301_v44, %v4297_v12  ;;  %3430 = vadd.xlane.f32.xlu0 %v3429_v51  ;;  %v3770_v12 = vmul.f32 %v6538_v55, %v8142_v15  ;;  %v4108_v51 = vadd.f32 %v8284_v2, %v8155_v18 }
0x1f4c   :  { %9224 = vst [vmem:[#allocation49_spill] sm:$0xff] %v8264_v58  ;;  %6541 = vtanh.f32 %v8264_v58  ;;  %v3771_v32 = vsel %vm1942_vm6, %v3770_v12, 0.0  ;;  %v4144_v12 = vadd.f32 %v8284_v2, %v8145_v1 }
0x1f4d   :  { %6543 = vtanh.f32 %v3774_v5 }
0x1f4e   :  { %3442 = vadd.xlane.f32.xlu0 %v3441_v59  ;;  %6545 = vtanh.f32 %v3780_v16 }
0x1f4f   :  { %6547 = vtanh.f32 %v3786_v41 }
0x1f50   :  { %6549 = vtanh.f32 %v3792_v47 }
0x1f51   :  { %6551 = vtanh.f32 %v4108_v51 }
0x1f52   :  { %3754 = vadd.xlane.f32.xlu0 %v3753_v10  ;;  %6553 = vtanh.f32 %v4114_v33 }
0x1f53   :  { %6555 = vtanh.f32 %v4120_v20 }
0x1f54   :  { %6557 = vtanh.f32 %v1949_v42  ;;  %v2358_v42 = vadd.f32 %v8149_v30, %v8130_v25 }
0x1f55   :  { %6559 = vtanh.f32 %v4126_v38 }
0x1f56   :  { %v6542_v9 = vpop.eup %6541  ;;  %3760 = vadd.xlane.f32.xlu0 %v3759_v62  ;;  %v1971_v62 = vadd.f32 %v8117_v56, %v8130_v25 }
0x1f57   :  { %v4305_v6 = vmul.f32 %v6542_v9, %v6540_v8  ;;  %v6544_v44 = vpop.eup %6543 }
0x1f58   :  { %v3776_v53 = vmul.f32 %v6544_v44, %v8142_v15  ;;  %v6546_v27 = vpop.eup %6545  ;;  %6561 = vtanh.f32 %v1971_v62 }
0x1f59   :  { %4307 = vrot.lane.b32.xlu1 %v4305_v6, %s7210_s10  ;;  %v3782_v5 = vmul.f32 %v6546_v27, %v8142_v15  ;;  %v6548_v59 = vpop.eup %6547  ;;  %6563 = vtanh.f32 %v4132_v3 }
0x1f5a   :  { %3766 = vadd.xlane.f32.xlu0 %v3765_v19  ;;  %v3777_v36 = vsel %vm1942_vm6, %v3776_v53, 0.0  ;;  %v3788_v16 = vmul.f32 %v6548_v59, %v8142_v15  ;;  %v6550_v10 = vpop.eup %6549  ;;  %v1988_v19 = vadd.f32 %v8276_v61, %v8117_v56  ;;  %v2334_v53 = vadd.f32 %v8149_v30, %v8120_v34 }
0x1f5b   :  { %v3783_v11 = vsel %vm1942_vm6, %v3782_v5, 0.0  ;;  %v3794_v41 = vmul.f32 %v6550_v10, %v8142_v15  ;;  %v6552_v8 = vpop.eup %6551  ;;  %v2346_v5 = vadd.f32 %v8149_v30, %v8125_v63 }
0x1f5c   :  { %v3789_v55 = vsel %vm1942_vm6, %v3788_v16, 0.0  ;;  %v4110_v6 = vmul.f32 %v6552_v8, %v8142_v15  ;;  %v6554_v47 = vpop.eup %6553  ;;  %6565 = vtanh.f32 %v1988_v19 }
0x1f5d   :  { %v3795_v9 = vsel %vm1942_vm6, %v3794_v41, 0.0  ;;  %v4116_v51 = vmul.f32 %v6554_v47, %v8142_v15  ;;  %6567 = vtanh.f32 %v4144_v12 }
0x1f5e   :  { %3772 = vadd.xlane.f32.xlu0 %v3771_v32  ;;  %v4111_v44 = vsel %vm1942_vm6, %v4110_v6, 0.0  ;;  %v6556_v32 = vpop.eup %6555  ;;  %6569 = vtanh.f32 %v2334_v53 }
0x1f5f   :  { %v6558_v27 = vpop.eup %6557  ;;  %v4117_v33 = vsel %vm1942_vm6, %v4116_v51, 0.0  ;;  %v4122_v56 = vmul.f32 %v6556_v32, %v8142_v15  ;;  %6571 = vtanh.f32 %v2346_v5  ;;  %v2686_v51 = vadd.f32 %v8171_v46, %v8120_v34 }
0x1f60   :  { %v1951_v59 = vmul.f32 %v6558_v27, %v8142_v15  ;;  %6573 = vtanh.f32 %v2358_v42 }
0x1f62   :  { %3778 = vadd.xlane.f32.xlu0 %v3777_v36  ;;  %v6560_v36 = vpop.eup %6559  ;;  %v1952_v38 = vsel %vm1942_vm6, %v1951_v59, 0.0  ;;  %v2710_v59 = vadd.f32 %v8171_v46, %v8130_v25 }
0x1f63   :  { %v6562_v20 = vpop.eup %6561  ;;  %v4128_v16 = vmul.f32 %v6560_v36, %v8142_v15 }
0x1f64   :  { %v6564_v10 = vpop.eup %6563 }
0x1f65   :  { %v4129_v8 = vsel %vm1942_vm6, %v4128_v16, 0.0  ;;  %v4134_v62 = vmul.f32 %v6564_v10, %v8142_v15  ;;  %v2722_v10 = vadd.f32 %v8171_v46, %v8276_v61 }
0x1f66   :  { %3784 = vadd.xlane.f32.xlu0 %v3783_v11  ;;  %v4123_v11 = vsel %vm1942_vm6, %v4122_v56, 0.0  ;;  %v6566_v41 = vpop.eup %6565 }
0x1f67   :  { %v6568_v3 = vpop.eup %6567  ;;  %v1990_v47 = vmul.f32 %v6566_v41, %v8142_v15  ;;  %v4135_v12 = vsel %vm1942_vm6, %v4134_v62, 0.0  ;;  %v3042_v41 = vadd.f32 %v8191_v37, %v8120_v34 }
0x1f68   :  { %v6570_v19 = vpop.eup %6569 }
0x1f69   :  { %v1991_v32 = vsel %vm1942_vm6, %v1990_v47, 0.0  ;;  %v2336_v53 = vmul.f32 %v6570_v19, %v8142_v15  ;;  %v3066_v19 = vadd.f32 %v8191_v37, %v8130_v25 }
0x1f6a   :  { %3790 = vadd.xlane.f32.xlu0 %v3789_v55  ;;  %v1973_v55 = vmul.f32 %v6562_v20, %v8142_v15 }
0x1f6b   :  { %v2337_v56 = vsel %vm1942_vm6, %v2336_v53, 0.0 }
0x1f6c   :  { %v1974_v6 = vsel %vm1942_vm6, %v1973_v55, 0.0 }
0x1f6e   :  { %3796 = vadd.xlane.f32.xlu0 %v3795_v9  ;;  %v2370_v9 = vadd.f32 %v8149_v30, %v8276_v61  ;;  %v6572_v30 = vpop.eup %6571 }
0x1f6f   :  { %v2348_v36 = vmul.f32 %v6572_v30, %v8142_v15  ;;  %v6574_v5 = vpop.eup %6573 }
0x1f70   :  { %6575 = vtanh.f32 %v2370_v9 }
0x1f71   :  { %6577 = vtanh.f32 %v2686_v51  ;;  %v2349_v20 = vsel %vm1942_vm6, %v2348_v36, 0.0 }
0x1f72   :  { %4112 = vadd.xlane.f32.xlu0 %v4111_v44  ;;  %v4146_v44 = vmul.f32 %v6568_v3, %v8142_v15 }
0x1f74   :  { %v4147_v27 = vsel %vm1942_vm6, %v4146_v44, 0.0 }
0x1f76   :  { %4118 = vadd.xlane.f32.xlu0 %v4117_v33  ;;  %v2698_v33 = vadd.f32 %v8171_v46, %v8125_v63  ;;  %v3054_v46 = vadd.f32 %v8191_v37, %v8125_v63 }
0x1f78   :  { %6579 = vtanh.f32 %v2698_v33  ;;  %v3396_v33 = vadd.f32 %v8211_v22, %v8120_v34 }
0x1f79   :  { %6581 = vtanh.f32 %v2710_v59 }
0x1f7a   :  { %4124 = vadd.xlane.f32.xlu0 %v4123_v11  ;;  %v2360_v11 = vmul.f32 %v6574_v5, %v8142_v15  ;;  %v6576_v16 = vpop.eup %6575  ;;  %6583 = vtanh.f32 %v2722_v10 }
0x1f7b   :  { %v6578_v55 = vpop.eup %6577  ;;  %6585 = vtanh.f32 %v3042_v41 }
0x1f7c   :  { %v2361_v42 = vsel %vm1942_vm6, %v2360_v11, 0.0  ;;  %v2688_v62 = vmul.f32 %v6578_v55, %v8142_v15  ;;  %6587 = vtanh.f32 %v3054_v46 }
0x1f7d   :  { %1953 = vadd.xlane.f32.xlu1 %v1952_v38  ;;  %v2372_v38 = vmul.f32 %v6576_v16, %v8142_v15  ;;  %6589 = vtanh.f32 %v3066_v19 }
0x1f7e   :  { %4130 = vadd.xlane.f32.xlu0 %v4129_v8  ;;  %v2689_v9 = vsel %vm1942_vm6, %v2688_v62, 0.0 }
0x1f7f   :  { %v2373_v8 = vsel %vm1942_vm6, %v2372_v38, 0.0 }
0x1f81   :  { %1975 = vadd.xlane.f32.xlu1 %v1974_v6 }
0x1f82   :  { %4136 = vadd.xlane.f32.xlu0 %v4135_v12  ;;  %v6580_v3 = vpop.eup %6579 }
0x1f83   :  { %v2700_v6 = vmul.f32 %v6580_v3, %v8142_v15  ;;  %v6582_v47 = vpop.eup %6581  ;;  %v1945_v46 = vpop.xlane.xlu0 %1944 }
0x1f84   :  { %v2712_v44 = vmul.f32 %v6582_v47, %v8142_v15  ;;  %v6584_v51 = vpop.eup %6583 }
0x1f85   :  { %1992 = vadd.xlane.f32.xlu1 %v1991_v32  ;;  %v2701_v12 = vsel %vm1942_vm6, %v2700_v6, 0.0  ;;  %v3078_v32 = vadd.f32 %v8191_v37, %v8276_v61  ;;  %v2724_v30 = vmul.f32 %v6584_v51, %v8142_v15 }
0x1f86   :  { %4148 = vadd.xlane.f32.xlu0 %v4147_v27  ;;  %v2713_v53 = vsel %vm1942_vm6, %v2712_v44, 0.0  ;;  %v6586_v27 = vpop.eup %6585 }
0x1f87   :  { %6591 = vtanh.f32 %v3078_v32  ;;  %v3044_v36 = vmul.f32 %v6586_v27, %v8142_v15  ;;  %v6588_v5 = vpop.eup %6587 }
0x1f88   :  { %6593 = vtanh.f32 %v3396_v33  ;;  %v3056_v37 = vmul.f32 %v6588_v5, %v8142_v15 }
0x1f89   :  { %2338 = vadd.xlane.f32.xlu1 %v2337_v56  ;;  %v2725_v56 = vsel %vm1942_vm6, %v2724_v30, 0.0  ;;  %v3045_v59 = vsel %vm1942_vm6, %v3044_v36, 0.0 }
0x1f8a   :  { %v3057_v11 = vsel %vm1942_vm6, %v3056_v37, 0.0 }
0x1f8d   :  { %2350 = vadd.xlane.f32.xlu1 %v2349_v20  ;;  %v6590_v20 = vpop.eup %6589 }
0x1f8e   :  { %v3068_v16 = vmul.f32 %v6590_v20, %v8142_v15 }
0x1f91   :  { %2362 = vadd.xlane.f32.xlu1 %v2361_v42  ;;  %v6592_v10 = vpop.eup %6591  ;;  %v3069_v42 = vsel %vm1942_vm6, %v3068_v16, 0.0 }
0x1f92   :  { %v3080_v38 = vmul.f32 %v6592_v10, %v8142_v15  ;;  %v6594_v55 = vpop.eup %6593 }
0x1f94   :  { %v3081_v41 = vsel %vm1942_vm6, %v3080_v38, 0.0 }
0x1f95   :  { %2374 = vadd.xlane.f32.xlu1 %v2373_v8  ;;  %v3398_v8 = vmul.f32 %v6594_v55, %v8142_v15  ;;  %v1962_v15 = vpop.xlane.xlu0 %1961 }
0x1f97   :  { %v3399_v62 = vsel %vm1942_vm6, %v3398_v8, 0.0 }
0x1f99   :  { %2690 = vadd.xlane.f32.xlu1 %v2689_v9 }
0x1f9d   :  { %2702 = vadd.xlane.f32.xlu1 %v2701_v12 }
0x1fa1   :  { %2714 = vadd.xlane.f32.xlu1 %v2713_v53 }
0x1fa5   :  { %2726 = vadd.xlane.f32.xlu1 %v2725_v56 }
0x1fa9   :  { %3046 = vadd.xlane.f32.xlu1 %v3045_v59 }
0x1fad   :  { %3058 = vadd.xlane.f32.xlu1 %v3057_v11 }
0x1fb1   :  { %3070 = vadd.xlane.f32.xlu1 %v3069_v42 }
0x1fb5   :  { %3082 = vadd.xlane.f32.xlu1 %v3081_v41 }
0x1fb9   :  { %3400 = vadd.xlane.f32.xlu1 %v3399_v62 }
0x1fcb   :  { %v8388_v3 = vpop.permute.xlu1 %4307 }
0x1fcc   :  { %9225 = vst [vmem:[#allocation50_spill] sm:$0xff] %v8388_v3  ;;  %5622 = vmatmul.mubr.msk.f32.vlgmr.msra.gmra.mrb[46].mxu0 %vm532_vm3, %v8388_v3 }
0x1fcd   :  { %6222 = vmatpush1.bf16.msra.mxu0 %v7839_v45  ;;  %4631 = vmatprep.mubr.f32.mxu0 %v9177_v0  ;;  %v1970_v45 = vpop.xlane.xlu0 %1969 }
0x1fce   :  { %6224 = vmatprep.subr.bf16.mxu0 %v7843_v48 }
0x1fd1   :  { %6226 = vmatpush1.bf16.msra.mxu0 %v7853_v14  ;;  %v1985_v9 = vpop.xlane.xlu0 %1984 }
0x1fd2   :  { %6228 = vmatprep.subr.bf16.mxu0 %v7857_v17 }
0x1fd5   :  { %6230 = vmatpush1.bf16.msra.mxu0 %v7861_v60  ;;  %v8402_v6 = vpop.xlane.xlu0 %2000 }
0x1fd6   :  { %6232 = vmatprep.subr.bf16.mxu0 %v7864_v29 }
0x1fd9   :  { %6234 = vmatpush1.bf16.msra.mxu0 %v7867_v40  ;;  %v2345_v48 = vpop.xlane.xlu0 %2344 }
0x1fdc   :  { %4926 = vmatmul.mubr.msk.f32.vlgmr.msra.gmra.mrb[48].mxu0 %vm532_vm3, %v8388_v3 }
0x1fdd   :  { %v8404_v47 = vpop.xlane.xlu0 %2356 }
0x1fe1   :  { %v8406_v14 = vpop.xlane.xlu0 %2368 }
0x1fe5   :  { %v8408_v17 = vpop.xlane.xlu0 %2380 }
0x1fe9   :  { %v8410_v60 = vpop.xlane.xlu0 %2696 }
0x1fed   :  { %v8412_v40 = vpop.xlane.xlu0 %2708 }
0x1ff1   :  { %v8414_v27 = vpop.xlane.xlu0 %2720 }
0x1ff5   :  { %v8422_v11 = vpop.xlane.xlu0 %2732 }
0x200a   :  { %v1954_v29 = vpop.xlane.xlu1 %1953 }
0x200b   :  { %v2002_v19 = vmax.f32 %v1945_v46, %v1954_v29 }
0x200d   :  { %v2003_v12 = vmax.f32 %v2002_v19, %v1962_v15 }
0x200e   :  { %v1976_v44 = vpop.xlane.xlu1 %1975 }
0x200f   :  { %v2004_v51 = vmax.f32 %v2003_v12, %v1970_v45  ;;  %v8427_v12 = vpop.xlane.xlu0 %3052 }
0x2011   :  { %v2005_v32 = vmax.f32 %v2004_v51, %v1976_v44 }
0x2012   :  { %v1993_v53 = vpop.xlane.xlu1 %1992 }
0x2013   :  { %v2006_v30 = vmax.f32 %v2005_v32, %v1985_v9 }
0x2015   :  { %v2007_v33 = vmax.f32 %v2006_v30, %v1993_v53 }
0x2016   :  { %v2339_v56 = vpop.xlane.xlu1 %2338 }
0x2017   :  { %v8417_v36 = vmax.f32 %v2007_v33, %v8402_v6  ;;  %v2382_v5 = vmax.f32 %v2339_v56, %v2345_v48 }
0x2019   :  { %v2009_v59 = vsub.f32 %v1945_v46, %v8417_v36  ;;  %v2012_v37 = vsub.f32 %v1954_v29, %v8417_v36  ;;  %v2015_v20 = vsub.f32 %v1962_v15, %v8417_v36  ;;  %v2018_v55 = vsub.f32 %v1970_v45, %v8417_v36  ;;  %v1837_v15 = vld [vmem:[%s9155_s14] sm:$0xff]  ;;  %v1838_v45 = vld [vmem:[%s9155_s14 + $0x8] sm:$0xff] }
0x201a   :  { %v2351_v16 = vpop.xlane.xlu1 %2350  ;;  %v2021_v29 = vsub.f32 %v1976_v44, %v8417_v36  ;;  %v8436_v32 = vpack.c.bf16 %v1838_v45, %v1837_v15  ;;  %v2024_v44 = vsub.f32 %v1985_v9, %v8417_v36  ;;  %v2030_v45 = vsub.f32 %v8402_v6, %v8417_v36 }
0x201b   :  { %v2383_v10 = vmax.f32 %v2382_v5, %v2351_v16  ;;  %v2010_v42 = vmul.f32 1.442695, %v2009_v59  ;;  %v2013_v38 = vmul.f32 1.442695, %v2012_v37  ;;  %v2016_v8 = vmul.f32 1.442695, %v2015_v20  ;;  %v8442_v37 = vpop.xlane.xlu0 %3064 }
0x201c   :  { %v2019_v46 = vmul.f32 1.442695, %v2018_v55  ;;  %v2022_v5 = vmul.f32 1.442695, %v2021_v29  ;;  %5873 = vmatpush3.bf16.msra.mxu1 %v8436_v32  ;;  %v2027_v20 = vsub.f32 %v1993_v53, %v8417_v36  ;;  %v2031_v36 = vmul.f32 1.442695, %v2030_v45 }
0x201d   :  { %v2384_v41 = vmax.f32 %v2383_v10, %v8404_v47  ;;  %6595 = vpow2.f32 %v2010_v42  ;;  %5874 = vmatprep.subr.bf16.mxu1 %v9179_v57  ;;  %v2025_v42 = vmul.f32 1.442695, %v2024_v44 }
0x201e   :  { %v2363_v62 = vpop.xlane.xlu1 %2362  ;;  %6597 = vpow2.f32 %v2013_v38  ;;  %v2028_v0 = vmul.f32 1.442695, %v2027_v20 }
0x201f   :  { %v2385_v19 = vmax.f32 %v2384_v41, %v2363_v62  ;;  %6599 = vpow2.f32 %v2016_v8 }
0x2020   :  { %6601 = vpow2.f32 %v2019_v46 }
0x2021   :  { %v2386_v51 = vmax.f32 %v2385_v19, %v8406_v14  ;;  %6603 = vpow2.f32 %v2022_v5 }
0x2022   :  { %v2375_v30 = vpop.xlane.xlu1 %2374  ;;  %6605 = vpow2.f32 %v2025_v42 }
0x2023   :  { %v2387_v33 = vmax.f32 %v2386_v51, %v2375_v30 }
0x2025   :  { %v2388_v59 = vmax.f32 %v2387_v33, %v8408_v17 }
0x2026   :  { %v8445_v10 = vpop.xlane.xlu1 %2690 }
0x2027   :  { %v2389_v38 = vsub.f32 %v2339_v56, %v2388_v59  ;;  %v2392_v55 = vsub.f32 %v2345_v48, %v2388_v59  ;;  %v6596_v41 = vpop.eup %6595  ;;  %v2395_v8 = vsub.f32 %v2351_v16, %v2388_v59  ;;  %v2398_v29 = vsub.f32 %v8404_v47, %v2388_v59  ;;  %v8452_v56 = vpop.xlane.xlu0 %3076 }
0x2028   :  { %v6598_v19 = vpop.eup %6597  ;;  %v2401_v5 = vsub.f32 %v2363_v62, %v2388_v59  ;;  %v2404_v47 = vsub.f32 %v8406_v14, %v2388_v59  ;;  %v2407_v62 = vsub.f32 %v2375_v30, %v2388_v59  ;;  %v2410_v14 = vsub.f32 %v8408_v17, %v2388_v59 }
0x2029   :  { %v2390_v9 = vmul.f32 1.442695, %v2389_v38  ;;  %v2393_v46 = vmul.f32 1.442695, %v2392_v55  ;;  %v2033_v51 = vadd.f32 %v6598_v19, %v6596_v41  ;;  %v2396_v53 = vmul.f32 1.442695, %v2395_v8  ;;  %v6600_v33 = vpop.eup %6599 }
0x202a   :  { %v8448_v15 = vpop.xlane.xlu1 %2702  ;;  %v8454_v16 = vpop.eup %6601  ;;  %v2399_v44 = vmul.f32 1.442695, %v2398_v29  ;;  %v2734_v38 = vmax.f32 %v8445_v10, %v8410_v60  ;;  %v2402_v42 = vmul.f32 1.442695, %v2401_v5  ;;  %v2411_v17 = vmul.f32 1.442695, %v2410_v14 }
0x202b   :  { %v2034_v48 = vadd.f32 %v6600_v33, %v2033_v51  ;;  %6607 = vpow2.f32 %v2390_v9  ;;  %v8463_v8 = vpop.eup %6603  ;;  %v2405_v9 = vmul.f32 1.442695, %v2404_v47  ;;  %v8472_v51 = vrot.slane %v7837_v43, 2 }
0x202c   :  { %6609 = vpow2.f32 %v2393_v46  ;;  %v2735_v55 = vmax.f32 %v2734_v38, %v8448_v15  ;;  %v8466_v46 = vpop.xlane.xlu0 %3088 }
0x202d   :  { %v2035_v20 = vadd.f32 %v8454_v16, %v2034_v48  ;;  %6611 = vpow2.f32 %v2396_v53  ;;  %v2040_v53 = vmul.f32 %v6596_v41, %v7837_v43  ;;  %v2043_v5 = vmul.f32 %v6598_v19, %v8472_v51  ;;  %v8477_v48 = vpop.eup %6605 }
0x202e   :  { %v8459_v6 = vpop.xlane.xlu1 %2714  ;;  %6613 = vpow2.f32 %v2028_v0  ;;  %v2408_v0 = vmul.f32 1.442695, %v2407_v62  ;;  %v2736_v30 = vmax.f32 %v2735_v55, %v8412_v40 }
0x202f   :  { %6615 = vpow2.f32 %v2399_v44  ;;  %v2036_v45 = vadd.f32 %v8463_v8, %v2035_v20 }
0x2030   :  { %6617 = vpow2.f32 %v2031_v36  ;;  %v8483_v36 = vrot.slane %v7837_v43, 4  ;;  %v8486_v41 = vpop.xlane.xlu0 %3406  ;;  %v2737_v19 = vmax.f32 %v2736_v30, %v8459_v6 }
0x2031   :  { %6619 = vpow2.f32 %v2402_v42  ;;  %v2037_v47 = vadd.f32 %v8477_v48, %v2036_v45  ;;  %9226 = vst [vmem:[#allocation51_spill] sm:$0xff] %v8486_v41  ;;  %v2044_v42 = vadd.f32 %v2043_v5, %v2040_v53 }
0x2032   :  { %v8468_v29 = vpop.xlane.xlu1 %2726  ;;  %6621 = vpow2.f32 %v2405_v9  ;;  %v2047_v3 = vmul.f32 %v6600_v33, %v8483_v36 }
0x2033   :  { %6623 = vpow2.f32 %v2408_v0 }
0x2034   :  { %6625 = vpow2.f32 %v2411_v17  ;;  %v8504_v17 = vrot.slane %v7837_v43, 6 }
0x2035   :  { %v6608_v59 = vpop.eup %6607 }
0x2036   :  { %v8479_v44 = vpop.xlane.xlu1 %3046  ;;  %v6610_v38 = vpop.eup %6609  ;;  %v2420_v20 = vmul.f32 %v6608_v59, %v7837_v43 }
0x2037   :  { %v6612_v62 = vpop.eup %6611  ;;  %v2413_v55 = vadd.f32 %v6610_v38, %v6608_v59  ;;  %v2421_v9 = vmul.f32 %v6610_v38, %v8472_v51  ;;  %v3090_v45 = vmax.f32 %v8479_v44, %v8427_v12  ;;  %v2738_v59 = vmax.f32 %v2737_v19, %v8414_v27 }
0x2038   :  { %v8490_v14 = vpop.eup %6613  ;;  %v2423_v53 = vmul.f32 %v6612_v62, %v8483_v36  ;;  %v2048_v38 = vadd.f32 %v2047_v3, %v2044_v42  ;;  %v1839_v3 = vld [vmem:[%s9155_s14 + $0x10] sm:$0xff] }
0x2039   :  { %v2038_v57 = vadd.f32 %v8490_v14, %v2037_v47  ;;  %v2414_v54 = vadd.f32 %v6612_v62, %v2413_v55  ;;  %v2422_v23 = vadd.f32 %v2421_v9, %v2420_v20  ;;  %v6616_v13 = vpop.eup %6615  ;;  %v8507_v55 = vpop.xlane.xlu0 %3412  ;;  %v2051_v62 = vmul.f32 %v8454_v16, %v8504_v17  ;;  %v1842_v16 = vld [vmem:[%s9155_s14 + $0x28] sm:$0xff] }
0x203a   :  { %v8494_v0 = vpop.xlane.xlu1 %3058  ;;  %v8500_v5 = vpop.eup %6617  ;;  %9227 = vst [vmem:[#allocation52_spill] sm:$0xff] %v8507_v55  ;;  %v2425_v42 = vmul.f32 %v6616_v13, %v8504_v17 }
0x203b   :  { %v3091_v30 = vmax.f32 %v3090_v45, %v8494_v0  ;;  %v2415_v31 = vadd.f32 %v6616_v13, %v2414_v54  ;;  %v6620_v58 = vpop.eup %6619  ;;  %v2424_v33 = vadd.f32 %v2423_v53, %v2422_v23  ;;  %v2039_v9 = vadd.f32 %v8500_v5, %v2038_v57  ;;  %v1840_v54 = vld [vmem:[%s9155_s14 + $0x18] sm:$0xff] }
0x203c   :  { %v6622_v19 = vpop.eup %6621  ;;  %v2052_v57 = vadd.f32 %v2051_v62, %v2048_v38  ;;  %v8530_v55 = vpack.c.bf16 %v1840_v54, %v1839_v3  ;;  %v2053_v13 = vmul.f32 %v8463_v8, %v7831_v39  ;;  %v8547_v54 = vrot.slane %v7831_v39, 2 }
0x203d   :  { %v3092_v47 = vmax.f32 %v3091_v30, %v8442_v37  ;;  %v2416_v45 = vadd.f32 %v6620_v58, %v2415_v31  ;;  %v2739_v30 = vmax.f32 %v2738_v59, %v8468_v29  ;;  %v1841_v31 = vld [vmem:[%s9155_s14 + $0x20] sm:$0xff]  ;;  %v6624_v49 = vpop.eup %6623  ;;  %v2426_v4 = vadd.f32 %v2425_v42, %v2424_v33 }
0x203e   :  { %v8509_v20 = vpop.xlane.xlu1 %3070  ;;  %6627 = vrcp.f32 %v2039_v9  ;;  %v6626_v38 = vpop.eup %6625  ;;  %5876 = vmatpush3.bf16.msra.mxu1 %v8530_v55  ;;  %v8539_v41 = vpack.c.bf16 %v1842_v16, %v1841_v31  ;;  %v2054_v3 = vadd.f32 %v2053_v13, %v2052_v57  ;;  %v9229_v9 = vmov 0.0|0.0  }
0x203f   :  { %v3093_v23 = vmax.f32 %v3092_v47, %v8509_v20  ;;  %v2417_v53 = vadd.f32 %v6622_v19, %v2416_v45  ;;  %v2427_v45 = vmul.f32 %v6620_v58, %v7831_v39  ;;  %v8544_v33 = vmax.f32 %v2739_v30, %v8422_v11  ;;  %5877 = vmatprep.subr.bf16.mxu1 %v9229_v9  ;;  %v1844_v58 = vld [vmem:[%s9155_s14 + $0x38] sm:$0xff] }
0x2040   :  { %v2057_v57 = vmul.f32 %v8477_v48, %v8547_v54 }
0x2041   :  { %v3094_v28 = vmax.f32 %v3093_v23, %v8452_v56  ;;  %v2418_v59 = vadd.f32 %v6624_v49, %v2417_v53  ;;  %v8541_v23 = vpop.xlane.xlu0 %3418  ;;  %v2428_v30 = vadd.f32 %v2427_v45, %v2426_v4  ;;  %v2429_v53 = vmul.f32 %v6622_v19, %v8547_v54 }
0x2042   :  { %v8532_v47 = vpop.xlane.xlu1 %3082  ;;  %9228 = vst [vmem:[#allocation53_spill] sm:$0xff] %v8541_v23  ;;  %5879 = vmatpush3.bf16.msra.mxu1 %v8539_v41  ;;  %v2058_v48 = vadd.f32 %v2057_v57, %v2054_v3  ;;  %v8574_v19 = vrot.slane %v7831_v39, 4  ;;  %v2744_v57 = vsub.f32 %v8410_v60, %v8544_v33  ;;  %v1848_v60 = vld [vmem:[%s9155_s14 + $0x58] sm:$0xff] }
0x2043   :  { %v3095_v62 = vmax.f32 %v3094_v28, %v8532_v47  ;;  %v2419_v8 = vadd.f32 %v6626_v38, %v2418_v59  ;;  %v1843_v28 = vld [vmem:[%s9155_s14 + $0x30] sm:$0xff]  ;;  %5880 = vmatprep.subr.bf16.mxu1 %v9229_v9  ;;  %v2430_v3 = vadd.f32 %v2429_v53, %v2428_v30 }
0x2044   :  { %v8569_v59 = vpack.c.bf16 %v1844_v58, %v1843_v28  ;;  %v2431_v58 = vmul.f32 %v6624_v49, %v8574_v19  ;;  %v1847_v49 = vld [vmem:[%s9155_s14 + $0x50] sm:$0xff] }
0x2045   :  { %v8557_v42 = vmax.f32 %v3095_v62, %v8466_v46  ;;  %6629 = vrcp.f32 %v2419_v8  ;;  %v8585_v8 = vpop.xlane.xlu0 %3424  ;;  %v8615_v23 = vpack.c.bf16 %v1848_v60, %v1847_v49 }
0x2046   :  { %9230 = vst [vmem:[#allocation54_spill] sm:$0xff] %v8585_v8  ;;  %5882 = vmatpush3.bf16.msra.mxu1 %v8569_v59  ;;  %v2745_v8 = vmul.f32 1.442695, %v2744_v57 }
0x2047   :  { %v3097_v31 = vsub.f32 %v8479_v44, %v8557_v42  ;;  %v3100_v16 = vsub.f32 %v8427_v12, %v8557_v42  ;;  %v3103_v13 = vsub.f32 %v8494_v0, %v8557_v42  ;;  %v3106_v4 = vsub.f32 %v8442_v37, %v8557_v42  ;;  %v1845_v12 = vld [vmem:[%s9155_s14 + $0x40] sm:$0xff]  ;;  %v1846_v0 = vld [vmem:[%s9155_s14 + $0x48] sm:$0xff]  ;;  %5883 = vmatprep.subr.bf16.mxu1 %v9229_v9 }
0x2048   :  { %v2741_v44 = vsub.f32 %v8445_v10, %v8544_v33  ;;  %v3109_v28 = vsub.f32 %v8509_v20, %v8557_v42  ;;  %v2061_v10 = vmul.f32 %v8490_v14, %v8574_v19  ;;  %v3112_v53 = vsub.f32 %v8452_v56, %v8557_v42 }
0x2049   :  { %v3098_v62 = vmul.f32 1.442695, %v3097_v31  ;;  %v3101_v45 = vmul.f32 1.442695, %v3100_v16  ;;  %v3104_v37 = vmul.f32 1.442695, %v3103_v13  ;;  %v8595_v31 = vpack.c.bf16 %v1846_v0, %v1845_v12  ;;  %v6628_v16 = vpop.eup %6627 }
0x204a   :  { %v3107_v30 = vmul.f32 1.442695, %v3106_v4  ;;  %v8600_v20 = vrot.slane %v7831_v39, 6  ;;  %v2062_v14 = vadd.f32 %v2061_v10, %v2058_v48  ;;  %v2432_v13 = vadd.f32 %v2431_v58, %v2430_v3 }
0x204b   :  { %6631 = vpow2.f32 %v3098_v62  ;;  %v2742_v4 = vmul.f32 1.442695, %v2741_v44  ;;  %v3110_v12 = vmul.f32 1.442695, %v3109_v28  ;;  %v3115_v56 = vsub.f32 %v8532_v47, %v8557_v42  ;;  %5885 = vmatpush3.bf16.msra.mxu1 %v8595_v31  ;;  %v1850_v47 = vld [vmem:[%s9155_s14 + $0x68] sm:$0xff] }
0x204c   :  { %6633 = vpow2.f32 %v3101_v45  ;;  %v2065_v0 = vmul.f32 %v8500_v5, %v8600_v20  ;;  %v2069_v62 = vmul.f32 0.125, %v6628_v16  ;;  %v2433_v45 = vmul.f32 %v6626_v38, %v8600_v20  ;;  %5886 = vmatprep.subr.bf16.mxu1 %v9229_v9  ;;  %v1849_v5 = vld [vmem:[%s9155_s14 + $0x60] sm:$0xff] }
0x204d   :  { %6635 = vpow2.f32 %v3104_v37  ;;  %v8617_v37 = vpop.xlane.xlu0 %3430  ;;  %v3113_v48 = vmul.f32 1.442695, %v3112_v53  ;;  %v3118_v44 = vsub.f32 %v8466_v46, %v8557_v42  ;;  %v3116_v10 = vmul.f32 1.442695, %v3115_v56 }
0x204e   :  { %6637 = vpow2.f32 %v3107_v30  ;;  %v2066_v38 = vadd.f32 %v2065_v0, %v2062_v14  ;;  %v2434_v3 = vadd.f32 %v2433_v45, %v2432_v13  ;;  %v2747_v58 = vsub.f32 %v8448_v15, %v8544_v33  ;;  %v1852_v30 = vld [vmem:[%s9155_s14 + $0x78] sm:$0xff] }
0x204f   :  { %v6630_v21 = vpop.eup %6629  ;;  %6639 = vpow2.f32 %v2742_v4  ;;  %5888 = vmatpush3.bf16.msra.mxu1 %v8615_v23  ;;  %v8631_v57 = vpack.c.bf16 %v1850_v47, %v1849_v5  ;;  %v3119_v16 = vmul.f32 1.442695, %v3118_v44  ;;  %v2750_v13 = vsub.f32 %v8412_v40, %v8544_v33 }
0x2050   :  { %v2437_v28 = vmul.f32 0.125, %v6630_v21  ;;  %6641 = vpow2.f32 %v3110_v12  ;;  %v2070_v46 = vmul.f32 %v2069_v62, %v2066_v38  ;;  %5889 = vmatprep.subr.bf16.mxu1 %v9229_v9  ;;  %v1851_v21 = vld [vmem:[%s9155_s14 + $0x70] sm:$0xff]  ;;  %v2748_v14 = vmul.f32 1.442695, %v2747_v58 }
0x2051   :  { %6643 = vpow2.f32 %v2745_v8  ;;  %v8640_v8 = vpop.xlane.xlu0 %3442  ;;  %v8648_v0 = vpack.c.bf16 %v1852_v30, %v1851_v21  ;;  %v2751_v40 = vmul.f32 1.442695, %v2750_v13  ;;  %v2753_v5 = vsub.f32 %v8459_v6, %v8544_v33 }
0x2052   :  { %v2438_v42 = vmul.f32 %v2437_v28, %v2434_v3  ;;  %6645 = vpow2.f32 %v3113_v48  ;;  %v2756_v6 = vsub.f32 %v8414_v27, %v8544_v33  ;;  %v3432_v27 = vadd.f32 %v8211_v22, %v8276_v61 }
0x2053   :  { %6647 = vpow2.f32 %v3116_v10  ;;  %5891 = vmatpush3.bf16.msra.mxu1 %v8631_v57  ;;  %v2754_v21 = vmul.f32 1.442695, %v2753_v5 }
0x2054   :  { %v6291_v53 = vpack.i.bf16 %v2438_v42, %v2070_v46  ;;  %6649 = vpow2.f32 %v3119_v16  ;;  %5892 = vmatprep.subr.bf16.mxu1 %v9229_v9 }
0x2055   :  { %v6632_v15 = vpop.eup %6631  ;;  %6651 = vpow2.f32 %v2748_v14  ;;  %v8655_v28 = vpop.xlane.xlu0 %3754 }
0x2056   :  { %v6634_v49 = vpop.eup %6633  ;;  %v3128_v60 = vmul.f32 %v6632_v15, %v7837_v43  ;;  %6292 = vrot.lane.b32.xlu1 %v6291_v53, %s7210_s10  ;;  %6653 = vpow2.f32 %v2751_v40 }
0x2057   :  { %v6636_v4 = vpop.eup %6635  ;;  %v3121_v12 = vadd.f32 %v6634_v49, %v6632_v15  ;;  %v3129_v56 = vmul.f32 %v6634_v49, %v8472_v51  ;;  %5894 = vmatpush3.bf16.msra.mxu1 %v8648_v0  ;;  %6655 = vpow2.f32 %v2754_v21 }
0x2058   :  { %v6638_v48 = vpop.eup %6637  ;;  %v3131_v44 = vmul.f32 %v6636_v4, %v8483_v36  ;;  %5923 = vmatprep.subr.bf16.mxu1 %v9229_v9 }
0x2059   :  { %v3122_v62 = vadd.f32 %v6636_v4, %v3121_v12  ;;  %v3130_v45 = vadd.f32 %v3129_v56, %v3128_v60  ;;  %v6640_v47 = vpop.eup %6639  ;;  %v3133_v16 = vmul.f32 %v6638_v48, %v8504_v17  ;;  %v8661_v13 = vpop.xlane.xlu0 %3760  ;;  %v2759_v4 = vsub.f32 %v8468_v29, %v8544_v33 }
0x205a   :  { %v6642_v3 = vpop.eup %6641  ;;  %v2757_v56 = vmul.f32 1.442695, %v2756_v6 }
0x205b   :  { %v3123_v38 = vadd.f32 %v6638_v48, %v3122_v62  ;;  %v3132_v10 = vadd.f32 %v3131_v44, %v3130_v45  ;;  %v6644_v58 = vpop.eup %6643  ;;  %v3135_v12 = vmul.f32 %v6642_v3, %v7831_v39  ;;  %v2760_v40 = vmul.f32 1.442695, %v2759_v4 }
0x205c   :  { %v6646_v42 = vpop.eup %6645  ;;  %v2765_v60 = vadd.f32 %v6644_v58, %v6640_v47 }
0x205d   :  { %v3124_v46 = vadd.f32 %v6642_v3, %v3123_v38  ;;  %v6648_v15 = vpop.eup %6647  ;;  %v3134_v53 = vadd.f32 %v3133_v16, %v3132_v10  ;;  %v3137_v5 = vmul.f32 %v6646_v42, %v8547_v54  ;;  %v2762_v38 = vsub.f32 %v8422_v11, %v8544_v33  ;;  %v8671_v10 = vpop.xlane.xlu0 %3766 }
0x205e   :  { %v6650_v14 = vpop.eup %6649  ;;  %v3139_v22 = vmul.f32 %v6648_v15, %v8574_v19 }
0x205f   :  { %v3125_v30 = vadd.f32 %v6646_v42, %v3124_v46  ;;  %v6652_v45 = vpop.eup %6651  ;;  %v3136_v48 = vadd.f32 %v3135_v12, %v3134_v53  ;;  %v4102_v46 = vadd.f32 %v8284_v2, %v8120_v34  ;;  %v2763_v21 = vmul.f32 1.442695, %v2762_v38  ;;  %v8682_v38 = vld [vmem:[#allocation20] ss:$0 sm:$0xff] }
0x2060   :  { %v2766_v44 = vadd.f32 %v6652_v45, %v2765_v60  ;;  %v6654_v29 = vpop.eup %6653  ;;  %v3141_v11 = vmul.f32 %v6650_v14, %v8600_v20  ;;  %v2772_v12 = vmul.f32 %v6640_v47, %v7837_v43 }
0x2061   :  { %v3126_v49 = vadd.f32 %v6648_v15, %v3125_v30  ;;  %v3138_v3 = vadd.f32 %v3137_v5, %v3136_v48  ;;  %v6656_v6 = vpop.eup %6655  ;;  %v8676_v53 = vpop.xlane.xlu0 %3772 }
0x2062   :  { %v2767_v16 = vadd.f32 %v6654_v29, %v2766_v44 }
0x2063   :  { %v3127_v62 = vadd.f32 %v6650_v14, %v3126_v49  ;;  %v3140_v30 = vadd.f32 %v3139_v22, %v3138_v3  ;;  %v2775_v3 = vmul.f32 %v6652_v45, %v8483_v36  ;;  %v2779_v45 = vmul.f32 %v6656_v6, %v7831_v39 }
0x2064   :  { %v2768_v42 = vadd.f32 %v6656_v6, %v2767_v16 }
0x2065   :  { %6657 = vrcp.f32 %v3127_v62  ;;  %v3142_v60 = vadd.f32 %v3141_v11, %v3140_v30  ;;  %v3779_v44 = vpop.xlane.xlu0 %3778 }
0x2066   :  { %6659 = vpow2.f32 %v2757_v56  ;;  %v2773_v56 = vmul.f32 %v6644_v58, %v8472_v51 }
0x2067   :  { %6661 = vtanh.f32 %v3432_v27 }
0x2068   :  { %6663 = vpow2.f32 %v2760_v40  ;;  %v2774_v40 = vadd.f32 %v2773_v56, %v2772_v12 }
0x2069   :  { %6665 = vtanh.f32 %v4102_v46  ;;  %v3785_v58 = vpop.xlane.xlu0 %3784 }
0x206a   :  { %6667 = vpow2.f32 %v2763_v21  ;;  %v2776_v47 = vadd.f32 %v2775_v3, %v2774_v40 }
0x206d   :  { %v3791_v12 = vpop.xlane.xlu0 %3790 }
0x206f   :  { %v6658_v33 = vpop.eup %6657 }
0x2070   :  { %v6660_v49 = vpop.eup %6659  ;;  %v3145_v4 = vmul.f32 0.125, %v6658_v33  ;;  %v3798_v33 = vmax.f32 %v8655_v28, %v8661_v13 }
0x2071   :  { %v2769_v62 = vadd.f32 %v6660_v49, %v2768_v42  ;;  %v6662_v48 = vpop.eup %6661  ;;  %v2777_v42 = vmul.f32 %v6654_v29, %v8504_v17 }
0x2072   :  { %v3146_v15 = vmul.f32 %v3145_v4, %v3142_v60  ;;  %v6664_v27 = vpop.eup %6663  ;;  %v3434_v14 = vmul.f32 %v8682_v38, %v6662_v48  ;;  %v3799_v4 = vmax.f32 %v3798_v33, %v8671_v10 }
0x2073   :  { %v2770_v5 = vadd.f32 %v6664_v27, %v2769_v62  ;;  %v6666_v46 = vpop.eup %6665  ;;  %v2778_v11 = vadd.f32 %v2777_v42, %v2776_v47 }
0x2074   :  { %3249 = vrot.lane.b32.xlu0 %v3146_v15, %s7210_s10  ;;  %v6668_v16 = vpop.eup %6667  ;;  %v3435_v21 = vsel %vm1942_vm6, %v3434_v14, 0.0  ;;  %v4104_v30 = vmul.f32 %v8682_v38, %v6666_v46  ;;  %v3800_v62 = vmax.f32 %v3799_v4, %v8676_v53  ;;  %v2781_v15 = vmul.f32 %v6660_v49, %v8547_v54 }
0x2075   :  { %v2771_v22 = vadd.f32 %v6668_v16, %v2770_v5  ;;  %v2780_v56 = vadd.f32 %v2779_v45, %v2778_v11  ;;  %v3797_v5 = vpop.xlane.xlu0 %3796  ;;  %v2783_v14 = vmul.f32 %v6664_v27, %v8574_v19  ;;  %v2785_v6 = vmul.f32 %v6668_v16, %v8600_v20 }
0x2076   :  { %v4105_v60 = vsel %vm1942_vm6, %v4104_v30, 0.0  ;;  %v3801_v29 = vmax.f32 %v3800_v62, %v3779_v44 }
0x2077   :  { %6669 = vrcp.f32 %v2771_v22  ;;  %v2782_v48 = vadd.f32 %v2781_v15, %v2780_v56 }
0x2078   :  { %v3802_v40 = vmax.f32 %v3801_v29, %v3785_v58 }
0x2079   :  { %v2784_v47 = vadd.f32 %v2783_v14, %v2782_v48 }
0x207a   :  { %3436 = vadd.xlane.f32.xlu1 %v3435_v21  ;;  %v3803_v46 = vmax.f32 %v3802_v40, %v3791_v12  ;;  %v6774_v40 = vld [vmem:[#allocation18] ss:$0 sm:$0xff] }
0x207b   :  { %v2786_v30 = vadd.f32 %v2785_v6, %v2784_v47 }
0x207c   :  { %v3804_v22 = vmax.f32 %v3803_v46, %v3797_v5 }
0x207e   :  { %4106 = vadd.xlane.f32.xlu1 %v4105_v60  ;;  %v3805_v42 = vsub.f32 %v8655_v28, %v3804_v22  ;;  %v3808_v11 = vsub.f32 %v8661_v13, %v3804_v22  ;;  %v3811_v45 = vsub.f32 %v8671_v10, %v3804_v22  ;;  %v3814_v4 = vsub.f32 %v8676_v53, %v3804_v22 }
0x207f   :  { %v3817_v56 = vsub.f32 %v3779_v44, %v3804_v22  ;;  %v4138_v28 = vadd.f32 %v8284_v2, %v8276_v61  ;;  %v3820_v29 = vsub.f32 %v3785_v58, %v3804_v22  ;;  %v3823_v2 = vsub.f32 %v3791_v12, %v3804_v22 }
0x2080   :  { %v3806_v49 = vmul.f32 1.442695, %v3805_v42  ;;  %v3809_v60 = vmul.f32 1.442695, %v3808_v11  ;;  %v3812_v27 = vmul.f32 1.442695, %v3811_v45  ;;  %v3826_v42 = vsub.f32 %v3797_v5, %v3804_v22 }
0x2081   :  { %v6670_v3 = vpop.eup %6669  ;;  %v3815_v16 = vmul.f32 1.442695, %v3814_v4  ;;  %v3818_v15 = vmul.f32 1.442695, %v3817_v56  ;;  %v3821_v46 = vmul.f32 1.442695, %v3820_v29 }
0x2082   :  { %v2789_v21 = vmul.f32 0.125, %v6670_v3  ;;  %6671 = vpow2.f32 %v3806_v49 }
0x2083   :  { %6673 = vpow2.f32 %v3809_v60  ;;  %v4563_v60 = vrot.slane %v8064_v24, 4 }
0x2084   :  { %v2790_v33 = vmul.f32 %v2789_v21, %v2786_v30  ;;  %6675 = vpow2.f32 %v3812_v27  ;;  %v3824_v30 = vmul.f32 1.442695, %v3823_v2 }
0x2085   :  { %6677 = vpow2.f32 %v3815_v16 }
0x2086   :  { %6679 = vtanh.f32 %v4138_v28 }
0x2087   :  { %6681 = vpow2.f32 %v3818_v15 }
0x208c   :  { %v8705_v62 = vpop.eup %6671 }
0x208d   :  { %v6674_v48 = vpop.eup %6673 }
0x208e   :  { %v3829_v47 = vadd.f32 %v6674_v48, %v8705_v62  ;;  %v6676_v6 = vpop.eup %6675 }
0x208f   :  { %2895 = vrot.lane.b32.xlu1 %v2790_v33, %s7210_s10  ;;  %v3827_v33 = vmul.f32 1.442695, %v3826_v42 }
0x209f   :  { %v4454_v13 = vpop.f32.mrb[46].mxu0 }
0x20a0   :  { %v4455_v14 = vadd.f32 %v6774_v40, %v4454_v13  ;;  %v5623_v10 = vpop.f32.mrb[47].mxu0 }
0x20a2   :  { %v4458_v3 = vadd.f32 %v4455_v14, %v8120_v34  ;;  %v4476_v53 = vadd.f32 %v4455_v14, %v8133_v26  ;;  %v4464_v44 = vadd.f32 %v4455_v14, %v8155_v18  ;;  %v4470_v58 = vadd.f32 %v4455_v14, %v8125_v63  ;;  %v8714_v18 = vpop.eup %6677 }
0x20a3   :  { %v4488_v21 = vadd.f32 %v4455_v14, %v8138_v7  ;;  %v3830_v34 = vadd.f32 %v6676_v6, %v3829_v47  ;;  %v4482_v26 = vadd.f32 %v4455_v14, %v8130_v25  ;;  %v4494_v12 = vadd.f32 %v4455_v14, %v8276_v61  ;;  %v6680_v11 = vpop.eup %6679 }
0x20a4   :  { %6683 = vtanh.f32 %v4458_v3  ;;  %v8718_v49 = vpop.eup %6681  ;;  %v4500_v5 = vadd.f32 %v4455_v14, %v8145_v1  ;;  %v4140_v45 = vmul.f32 %v8682_v38, %v6680_v11  ;;  %v3836_v3 = vmul.f32 %v8705_v62, %v7837_v43 }
0x20a5   :  { %6685 = vtanh.f32 %v4476_v53  ;;  %v3831_v63 = vadd.f32 %v8714_v18, %v3830_v34  ;;  %v3837_v53 = vmul.f32 %v6674_v48, %v8472_v51 }
0x20a6   :  { %6687 = vtanh.f32 %v4464_v44  ;;  %v4141_v1 = vsel %vm1942_vm6, %v4140_v45, 0.0 }
0x20a7   :  { %6689 = vpow2.f32 %v3821_v46  ;;  %v3832_v27 = vadd.f32 %v8718_v49, %v3831_v63  ;;  %v3838_v42 = vadd.f32 %v3837_v53, %v3836_v3  ;;  %v3839_v63 = vmul.f32 %v6676_v6, %v8483_v36 }
0x20a8   :  { %6691 = vtanh.f32 %v4470_v58 }
0x20a9   :  { %6693 = vtanh.f32 %v4488_v21 }
0x20aa   :  { %6695 = vpow2.f32 %v3824_v30 }
0x20ab   :  { %6697 = vtanh.f32 %v4482_v26 }
0x20ac   :  { %6699 = vtanh.f32 %v4494_v12  ;;  %v4564_v12 = vrot.slane %v8069_v35, 4  ;;  %v3841_v35 = vmul.f32 %v8714_v18, %v8504_v17 }
0x20ad   :  { %6701 = vpow2.f32 %v3827_v33 }
0x20ae   :  { %v6684_v7 = vpop.eup %6683  ;;  %6703 = vtanh.f32 %v4500_v5 }
0x20af   :  { %v6686_v25 = vpop.eup %6685  ;;  %v4633_v22 = vpop.f32.mrb[48].mxu0  ;;  %v4460_v61 = vmul.f32 %v8682_v38, %v6684_v7 }
0x20b0   :  { %v6688_v4 = vpop.eup %6687  ;;  %v4634_v56 = vadd.f32 %v4633_v22, %v4563_v60  ;;  %v4635_v16 = vpop.f32.mrb[49].mxu0  ;;  %v4478_v40 = vmul.f32 %v8682_v38, %v6686_v25  ;;  %v3840_v25 = vadd.f32 %v3839_v63, %v3838_v42 }
0x20b1   :  { %v6690_v28 = vpop.eup %6689  ;;  %v4461_v13 = vsel %vm1942_vm6, %v4460_v61, 0.0  ;;  %v4466_v24 = vmul.f32 %v8682_v38, %v6688_v4  ;;  %v8742_v5 = vadd.f32 %v4635_v16, %v4564_v12 }
0x20b2   :  { %v6692_v15 = vpop.eup %6691  ;;  %v4927_v29 = vmul.f32 -1.442695, %v4634_v56  ;;  %4462 = vadd.xlane.f32.xlu0 %v4461_v13  ;;  %v3833_v14 = vadd.f32 %v6690_v28, %v3832_v27  ;;  %v4479_v58 = vsel %vm1942_vm6, %v4478_v40, 0.0  ;;  %v3842_v4 = vadd.f32 %v3841_v35, %v3840_v25 }
0x20b3   :  { %v6694_v10 = vpop.eup %6693  ;;  %4142 = vadd.xlane.f32.xlu1 %v4141_v1  ;;  %v4467_v46 = vsel %vm1942_vm6, %v4466_v24, 0.0  ;;  %v4472_v2 = vmul.f32 %v8682_v38, %v6692_v15  ;;  %v3843_v56 = vmul.f32 %v8718_v49, %v7831_v39  ;;  %v8753_v24 = vpop.xlane.xlu1 %3400  ;;  %v3845_v18 = vmul.f32 %v6690_v28, %v8547_v54 }
0x20b4   :  { %6705 = vpow2.f32 %v4927_v29  ;;  %v6696_v44 = vpop.eup %6695  ;;  %v4490_v21 = vmul.f32 %v8682_v38, %v6694_v10 }
0x20b5   :  { %v6698_v47 = vpop.eup %6697  ;;  %v3834_v30 = vadd.f32 %v6696_v44, %v3833_v14  ;;  %v4473_v26 = vsel %vm1942_vm6, %v4472_v2, 0.0  ;;  %v3844_v13 = vadd.f32 %v3843_v56, %v3842_v4  ;;  %v3847_v14 = vmul.f32 %v6696_v44, %v8574_v19 }
0x20b6   :  { %4468 = vadd.xlane.f32.xlu0 %v4467_v46  ;;  %v6700_v34 = vpop.eup %6699  ;;  %v4484_v62 = vmul.f32 %v8682_v38, %v6698_v47  ;;  %v4491_v11 = vsel %vm1942_vm6, %v4490_v21, 0.0  ;;  %v9231_v2 = vmov 0.0   ;;  %v9233_v21 = vld [vmem:[#allocation51_spill] sm:$0xff] }
0x20b7   :  { %4480 = vadd.xlane.f32.xlu1 %v4479_v58  ;;  %v6702_v48 = vpop.eup %6701  ;;  %v4496_v33 = vmul.f32 %v8682_v38, %v6700_v34  ;;  %v3846_v15 = vadd.f32 %v3845_v18, %v3844_v13  ;;  %v9234_v34 = vld [vmem:[#allocation52_spill] sm:$0xff] }
0x20b8   :  { %v3835_v7 = vadd.f32 %v6702_v48, %v3834_v30  ;;  %v6704_v60 = vpop.eup %6703  ;;  %v4485_v22 = vsel %vm1942_vm6, %v4484_v62, 0.0  ;;  %v3849_v28 = vmul.f32 %v6702_v48, %v8600_v20  ;;  %v3444_v30 = vmax.f32 %v8753_v24, %v9233_v21  ;;  %v9236_v48 = vld [vmem:[#allocation54_spill] sm:$0xff] }
0x20b9   :  { %v4497_v6 = vsel %vm1942_vm6, %v4496_v33, 0.0  ;;  %v4502_v27 = vmul.f32 %v8682_v38, %v6704_v60  ;;  %v3848_v3 = vadd.f32 %v3847_v14, %v3846_v15  ;;  %v8813_v60 = vpop.xlane.xlu0 %4112 }
0x20ba   :  { %4474 = vadd.xlane.f32.xlu0 %v4473_v26  ;;  %6707 = vrcp.f32 %v3835_v7  ;;  %v3445_v42 = vmax.f32 %v3444_v30, %v9234_v34  ;;  %v9235_v26 = vld [vmem:[#allocation53_spill] sm:$0xff] }
0x20bb   :  { %4492 = vadd.xlane.f32.xlu1 %v4491_v11  ;;  %6709 = vtanh.f32 %v8742_v5  ;;  %v4503_v16 = vsel %vm1942_vm6, %v4502_v27, 0.0  ;;  %v3850_v44 = vadd.f32 %v3849_v28, %v3848_v3 }
0x20bc   :  { %v3446_v62 = vmax.f32 %v3445_v42, %v9235_v26 }
0x20bd   :  { %v8824_v15 = vpop.xlane.xlu0 %4118 }
0x20be   :  { %v6706_v45 = vpop.eup %6705  ;;  %4486 = vadd.xlane.f32.xlu0 %v4485_v22  ;;  %v3447_v12 = vmax.f32 %v3446_v62, %v9236_v48 }
0x20bf   :  { %v4644_v61 = vadd.f32 1.0, %v6706_v45  ;;  %4498 = vadd.xlane.f32.xlu1 %v4497_v6 }
0x20c0   :  { %v3448_v63 = vmax.f32 %v3447_v12, %v8617_v37 }
0x20c1   :  { %6711 = vrcp.f32 %v4644_v61 }
0x20c3   :  { %4504 = vadd.xlane.f32.xlu1 %v4503_v16  ;;  %v9237_v16 = vld [vmem:[#allocation45_spill] sm:$0xff] }
0x20c4   :  { %v6708_v29 = vpop.eup %6707 }
0x20c5   :  { %v6710_v1 = vpop.eup %6709  ;;  %v3853_v46 = vmul.f32 0.125, %v6708_v29 }
0x20c7   :  { %v3854_v47 = vmul.f32 %v3853_v46, %v3850_v44 }
0x20c8   :  { %v6293_v38 = vpop.permute.xlu1 %6292 }
0x20c9   :  { %v6294_v40 = vunpack.i.l.bf16 %v6293_v38 }
0x20cb   :  { %v8757_v10 = vpop.eup %6711  ;;  %v2183_v49 = vsel %vm532_vm3, %v7903_v50, %v6294_v40  ;;  %v6295_v50 = vunpack.i.h.bf16 %v6293_v38 }
0x20cc   :  { %v8762_v53 = vmul.f32 %v8757_v10, %v6710_v1  ;;  %5279 = vmatmul.mubr.f32.vlgmr.msra.gmra.mrb[18].mxu1 %v2183_v49  ;;  %v8833_v49 = vpop.xlane.xlu0 %4124 }
0x20cd   :  { %5925 = vmatpush3.bf16.msra.mxu1 %v8436_v32  ;;  %5332 = vmatprep.mubr.msk.f32.mxu1 %vm7212_vm4, %v9231_v2 }
0x20ce   :  { %5926 = vmatprep.subr.bf16.mxu1 %v9229_v9 }
0x20d1   :  { %5928 = vmatpush3.bf16.msra.mxu1 %v8530_v55 }
0x20d2   :  { %5929 = vmatprep.subr.bf16.mxu1 %v9229_v9 }
0x20d4   :  { %3955 = vrot.lane.b32.xlu0 %v3854_v47, %s7210_s10 }
0x20d5   :  { %5931 = vmatpush3.bf16.msra.mxu1 %v8539_v41 }
0x20d6   :  { %5932 = vmatprep.subr.bf16.mxu1 %v9229_v9 }
0x20d8   :  { %1721 = vrot.lane.b32.xlu0 %v7784_v52, %s7210_s10  ;;  %v9232_v52 = vld [vmem:[#allocation44_spill] sm:$0xff] }
0x20d9   :  { %5934 = vmatpush3.bf16.msra.mxu1 %v8569_v59  ;;  %v2542_v58 = vsel %vm532_vm3, %v9232_v52, %v6295_v50  ;;  %v8839_v50 = vpop.xlane.xlu0 %4130 }
0x20da   :  { %5935 = vmatprep.subr.bf16.mxu1 %v9229_v9 }
0x20dd   :  { %5937 = vmatpush3.bf16.msra.mxu1 %v8595_v31 }
0x20de   :  { %5938 = vmatprep.subr.bf16.mxu1 %v9229_v9 }
0x20e1   :  { %5940 = vmatpush3.bf16.msra.mxu1 %v8615_v23 }
0x20e2   :  { %5941 = vmatprep.subr.bf16.mxu1 %v9229_v9 }
0x20e5   :  { %5943 = vmatpush3.bf16.msra.mxu1 %v8631_v57 }
0x20e6   :  { %5944 = vmatprep.subr.bf16.mxu1 %v9229_v9 }
0x20e9   :  { %5946 = vmatpush3.bf16.msra.mxu1 %v8648_v0 }
0x20ea   :  { %5975 = vmatprep.subr.bf16.mxu1 %v9229_v9 }
0x20ec   :  { %5333 = vmatmul.mubr.f32.vlgmr.msra.gmra.mrb[20].mxu1 %v2542_v58 }
0x20ed   :  { %5977 = vmatpush3.bf16.msra.mxu1 %v8436_v32  ;;  %5386 = vmatprep.mubr.msk.f32.mxu1 %vm7212_vm4, %v9231_v2 }
0x20ee   :  { %5978 = vmatprep.subr.bf16.mxu1 %v9229_v9 }
0x20f1   :  { %5980 = vmatpush3.bf16.msra.mxu1 %v8530_v55 }
0x20f2   :  { %5981 = vmatprep.subr.bf16.mxu1 %v9229_v9 }
0x20f5   :  { %5983 = vmatpush3.bf16.msra.mxu1 %v8539_v41 }
0x20f6   :  { %5984 = vmatprep.subr.bf16.mxu1 %v9229_v9 }
0x20f9   :  { %5986 = vmatpush3.bf16.msra.mxu1 %v8569_v59 }
0x20fa   :  { %5987 = vmatprep.subr.bf16.mxu1 %v9229_v9 }
0x20fd   :  { %5989 = vmatpush3.bf16.msra.mxu1 %v8595_v31 }
0x20fe   :  { %5990 = vmatprep.subr.bf16.mxu1 %v9229_v9 }
0x2101   :  { %5992 = vmatpush3.bf16.msra.mxu1 %v8615_v23 }
0x2102   :  { %5993 = vmatprep.subr.bf16.mxu1 %v9229_v9 }
0x2105   :  { %5995 = vmatpush3.bf16.msra.mxu1 %v8631_v57 }
0x2106   :  { %5996 = vmatprep.subr.bf16.mxu1 %v9229_v9 }
0x2107   :  { %v3437_v11 = vpop.xlane.xlu1 %3436 }
0x2108   :  { %v3449_v33 = vmax.f32 %v3448_v63, %v3437_v11 }
0x2109   :  { %5998 = vmatpush3.bf16.msra.mxu1 %v8648_v0 }
0x210a   :  { %v3450_v7 = vmax.f32 %v3449_v33, %v8640_v8  ;;  %6027 = vmatprep.subr.bf16.mxu1 %v9229_v9 }
0x210b   :  { %v8815_v25 = vpop.xlane.xlu1 %4106 }
0x210c   :  { %v3451_v22 = vsub.f32 %v8753_v24, %v3450_v7  ;;  %v3454_v45 = vsub.f32 %v9233_v21, %v3450_v7  ;;  %v3457_v35 = vsub.f32 %v9234_v34, %v3450_v7  ;;  %v3460_v27 = vsub.f32 %v9235_v26, %v3450_v7 }
0x210d   :  { %v3463_v18 = vsub.f32 %v9236_v48, %v3450_v7  ;;  %v3466_v29 = vsub.f32 %v8617_v37, %v3450_v7  ;;  %v3469_v38 = vsub.f32 %v3437_v11, %v3450_v7  ;;  %v3472_v14 = vsub.f32 %v8640_v8, %v3450_v7  ;;  %v8846_v48 = vpop.xlane.xlu0 %4136 }
0x210e   :  { %v3452_v61 = vmul.f32 1.442695, %v3451_v22  ;;  %v3455_v6 = vmul.f32 1.442695, %v3454_v45  ;;  %v3458_v56 = vmul.f32 1.442695, %v3457_v35 }
0x210f   :  { %v2896_v4 = vpop.permute.xlu1 %2895  ;;  %v3461_v24 = vmul.f32 1.442695, %v3460_v27  ;;  %v3464_v1 = vmul.f32 1.442695, %v3463_v18  ;;  %v3467_v40 = vmul.f32 1.442695, %v3466_v29  ;;  %v4150_v18 = vmax.f32 %v8815_v25, %v8813_v60 }
0x2110   :  { %v2898_v13 = vsel %vm532_vm3, %v9237_v16, %v2896_v4  ;;  %6713 = vpow2.f32 %v3452_v61  ;;  %v3470_v3 = vmul.f32 1.442695, %v3469_v38  ;;  %v3473_v37 = vmul.f32 1.442695, %v3472_v14 }
0x2111   :  { %5387 = vmatmul.mubr.f32.vlgmr.msra.gmra.mrb[22].mxu1 %v2898_v13  ;;  %6715 = vpow2.f32 %v3455_v6  ;;  %v8853_v6 = vpop.xlane.xlu0 %4148 }
0x2112   :  { %6029 = vmatpush3.bf16.msra.mxu1 %v8436_v32  ;;  %5440 = vmatprep.mubr.msk.f32.mxu1 %vm7212_vm4, %v9231_v2  ;;  %6717 = vpow2.f32 %v3458_v56 }
0x2113   :  { %6030 = vmatprep.subr.bf16.mxu1 %v9229_v9  ;;  %6719 = vpow2.f32 %v3461_v24  ;;  %v9238_v24 = vld [vmem:[#allocation46_spill] sm:$0xff] }
0x2114   :  { %6721 = vpow2.f32 %v3464_v1 }
0x2115   :  { %6723 = vpow2.f32 %v3467_v40  ;;  %v3250_v16 = vpop.permute.xlu0 %3249  ;;  %v4151_v40 = vmax.f32 %v4150_v18, %v8824_v15 }
0x2116   :  { %6032 = vmatpush3.bf16.msra.mxu1 %v8530_v55  ;;  %6725 = vpow2.f32 %v3470_v3  ;;  %v3252_v29 = vsel %vm532_vm3, %v9238_v24, %v3250_v16 }
0x2117   :  { %6033 = vmatprep.subr.bf16.mxu1 %v9229_v9  ;;  %6727 = vpow2.f32 %v3473_v37 }
0x211a   :  { %6035 = vmatpush3.bf16.msra.mxu1 %v8539_v41  ;;  %v6714_v28 = vpop.eup %6713 }
0x211b   :  { %6036 = vmatprep.subr.bf16.mxu1 %v9229_v9  ;;  %v6716_v46 = vpop.eup %6715  ;;  %v3482_v44 = vmul.f32 %v6714_v28, %v7837_v43 }
0x211c   :  { %v6718_v47 = vpop.eup %6717  ;;  %v3475_v8 = vadd.f32 %v6716_v46, %v6714_v28  ;;  %v3483_v52 = vmul.f32 %v6716_v46, %v8472_v51  ;;  %v4152_v46 = vmax.f32 %v4151_v40, %v8833_v49 }
0x211d   :  { %v6720_v30 = vpop.eup %6719  ;;  %v3485_v34 = vmul.f32 %v6718_v47, %v8483_v36 }
0x211e   :  { %6038 = vmatpush3.bf16.msra.mxu1 %v8569_v59  ;;  %v3476_v58 = vadd.f32 %v6718_v47, %v3475_v8  ;;  %v3484_v21 = vadd.f32 %v3483_v52, %v3482_v44  ;;  %v6722_v26 = vpop.eup %6721  ;;  %v3487_v11 = vmul.f32 %v6720_v30, %v8504_v17  ;;  %v4153_v47 = vmax.f32 %v4152_v46, %v8839_v50 }
0x211f   :  { %6039 = vmatprep.subr.bf16.mxu1 %v9229_v9  ;;  %v6724_v63 = vpop.eup %6723  ;;  %v3489_v61 = vmul.f32 %v6722_v26, %v7831_v39 }
0x2120   :  { %v3477_v42 = vadd.f32 %v6720_v30, %v3476_v58  ;;  %v3486_v62 = vadd.f32 %v3485_v34, %v3484_v21  ;;  %v6726_v7 = vpop.eup %6725  ;;  %v3491_v56 = vmul.f32 %v6724_v63, %v8547_v54  ;;  %v4154_v52 = vmax.f32 %v4153_v47, %v8846_v48 }
0x2121   :  { %v6728_v35 = vpop.eup %6727  ;;  %v3493_v38 = vmul.f32 %v6726_v7, %v8574_v19 }
0x2122   :  { %6041 = vmatpush3.bf16.msra.mxu1 %v8595_v31  ;;  %v3478_v12 = vadd.f32 %v6722_v26, %v3477_v42  ;;  %v3488_v22 = vadd.f32 %v3487_v11, %v3486_v62  ;;  %v3495_v14 = vmul.f32 %v6728_v35, %v8600_v20 }
0x2123   :  { %6042 = vmatprep.subr.bf16.mxu1 %v9229_v9 }
0x2124   :  { %v3479_v33 = vadd.f32 %v6724_v63, %v3478_v12  ;;  %v3490_v4 = vadd.f32 %v3489_v61, %v3488_v22 }
0x2126   :  { %6044 = vmatpush3.bf16.msra.mxu1 %v8615_v23  ;;  %v3480_v45 = vadd.f32 %v6726_v7, %v3479_v33  ;;  %v3492_v13 = vadd.f32 %v3491_v56, %v3490_v4 }
0x2127   :  { %6045 = vmatprep.subr.bf16.mxu1 %v9229_v9 }
0x2128   :  { %v3481_v27 = vadd.f32 %v6728_v35, %v3480_v45  ;;  %v3494_v1 = vadd.f32 %v3493_v38, %v3492_v13 }
0x212a   :  { %6047 = vmatpush3.bf16.msra.mxu1 %v8631_v57  ;;  %6729 = vrcp.f32 %v3481_v27  ;;  %v3496_v37 = vadd.f32 %v3495_v14, %v3494_v1 }
0x212b   :  { %6048 = vmatprep.subr.bf16.mxu1 %v9229_v9 }
0x212e   :  { %6050 = vmatpush3.bf16.msra.mxu1 %v8648_v0 }
0x212f   :  { %6079 = vmatprep.subr.bf16.mxu1 %v9229_v9 }
0x2131   :  { %5441 = vmatmul.mubr.f32.vlgmr.msra.gmra.mrb[24].mxu1 %v3252_v29 }
0x2132   :  { %6081 = vmatpush3.bf16.msra.mxu1 %v8436_v32  ;;  %5494 = vmatprep.mubr.msk.f32.mxu1 %vm7212_vm4, %v9231_v2 }
0x2133   :  { %6082 = vmatprep.subr.bf16.mxu1 %v9229_v9 }
0x2134   :  { %v6730_v3 = vpop.eup %6729 }
0x2135   :  { %v3499_v28 = vmul.f32 0.125, %v6730_v3 }
0x2136   :  { %6084 = vmatpush3.bf16.msra.mxu1 %v8530_v55 }
0x2137   :  { %6085 = vmatprep.subr.bf16.mxu1 %v9229_v9  ;;  %v3500_v44 = vmul.f32 %v3499_v28, %v3496_v37 }
0x2139   :  { %3603 = vrot.lane.b32.xlu1 %v3500_v44, %s7210_s10 }
0x213a   :  { %6087 = vmatpush3.bf16.msra.mxu1 %v8539_v41 }
0x213b   :  { %6088 = vmatprep.subr.bf16.mxu1 %v9229_v9 }
0x213d   :  { %4654 = vrot.lane.b32.xlu1 %v8762_v53, %s7210_s10 }
0x213e   :  { %6090 = vmatpush3.bf16.msra.mxu1 %v8569_v59 }
0x213f   :  { %v8880_v8 = vpop.xlane.xlu0 %4462  ;;  %6091 = vmatprep.subr.bf16.mxu1 %v9229_v9 }
0x2140   :  { %v4143_v58 = vpop.xlane.xlu1 %4142 }
0x2141   :  { %v4155_v21 = vmax.f32 %v4154_v52, %v4143_v58 }
0x2142   :  { %6093 = vmatpush3.bf16.msra.mxu1 %v8595_v31 }
0x2143   :  { %v4469_v30 = vpop.xlane.xlu0 %4468  ;;  %v4156_v34 = vmax.f32 %v4155_v21, %v8853_v6  ;;  %6094 = vmatprep.subr.bf16.mxu1 %v9229_v9 }
0x2144   :  { %v4506_v42 = vmax.f32 %v8880_v8, %v4469_v30  ;;  %v4481_v53 = vpop.xlane.xlu1 %4480 }
0x2145   :  { %v4157_v26 = vsub.f32 %v8815_v25, %v4156_v34  ;;  %v4160_v62 = vsub.f32 %v8813_v60, %v4156_v34  ;;  %v4163_v12 = vsub.f32 %v8824_v15, %v4156_v34  ;;  %v4166_v22 = vsub.f32 %v8833_v49, %v4156_v34 }
0x2146   :  { %6096 = vmatpush3.bf16.msra.mxu1 %v8615_v23  ;;  %v4169_v25 = vsub.f32 %v8839_v50, %v4156_v34  ;;  %v4172_v4 = vsub.f32 %v8846_v48, %v4156_v34  ;;  %v4175_v56 = vsub.f32 %v4143_v58, %v4156_v34  ;;  %v4178_v50 = vsub.f32 %v8853_v6, %v4156_v34 }
0x2147   :  { %v4475_v63 = vpop.xlane.xlu0 %4474  ;;  %v4158_v33 = vmul.f32 1.442695, %v4157_v26  ;;  %v4161_v7 = vmul.f32 1.442695, %v4160_v62  ;;  %6097 = vmatprep.subr.bf16.mxu1 %v9229_v9  ;;  %v4164_v35 = vmul.f32 1.442695, %v4163_v12 }
0x2148   :  { %v4507_v11 = vmax.f32 %v4506_v42, %v4475_v63  ;;  %v8895_v45 = vpop.xlane.xlu1 %4492  ;;  %v4167_v15 = vmul.f32 1.442695, %v4166_v22  ;;  %v4170_v13 = vmul.f32 1.442695, %v4169_v25  ;;  %v4173_v29 = vmul.f32 1.442695, %v4172_v4 }
0x2149   :  { %6731 = vpow2.f32 %v4158_v33  ;;  %v4176_v38 = vmul.f32 1.442695, %v4175_v56  ;;  %v4179_v14 = vmul.f32 1.442695, %v4178_v50 }
0x214a   :  { %v4508_v61 = vmax.f32 %v4507_v11, %v4481_v53  ;;  %6099 = vmatpush3.bf16.msra.mxu1 %v8631_v57  ;;  %6733 = vpow2.f32 %v4161_v7 }
0x214b   :  { %v4487_v27 = vpop.xlane.xlu0 %4486  ;;  %6100 = vmatprep.subr.bf16.mxu1 %v9229_v9  ;;  %6735 = vpow2.f32 %v4164_v35 }
0x214c   :  { %v4509_v60 = vmax.f32 %v4508_v61, %v4487_v27  ;;  %v4499_v49 = vpop.xlane.xlu1 %4498  ;;  %6737 = vpow2.f32 %v4167_v15 }
0x214d   :  { %6739 = vpow2.f32 %v4170_v13 }
0x214e   :  { %v4510_v16 = vmax.f32 %v4509_v60, %v8895_v45  ;;  %6102 = vmatpush3.bf16.msra.mxu1 %v8648_v0  ;;  %6741 = vpow2.f32 %v4173_v29 }
0x214f   :  { %v8902_v18 = vpop.permute.xlu0 %3955  ;;  %6131 = vmatprep.subr.bf16.mxu1 %v9229_v9  ;;  %6743 = vpow2.f32 %v4176_v38 }
0x2150   :  { %v4511_v24 = vmax.f32 %v4510_v16, %v4499_v49  ;;  %v4505_v48 = vpop.xlane.xlu1 %4504  ;;  %6745 = vpow2.f32 %v4179_v14 }
0x2152   :  { %v4512_v1 = vmax.f32 %v4511_v24, %v4505_v48 }
0x2153   :  { %v1722_v40 = vpop.permute.xlu0 %1721  ;;  %v6732_v28 = vpop.eup %6731 }
0x2154   :  { %v4513_v3 = vsub.f32 %v8880_v8, %v4512_v1  ;;  %v4516_v37 = vsub.f32 %v4469_v30, %v4512_v1  ;;  %1726 = vst.msk [vmem:[#allocation30 + $0x8] sm:$0xff] %vm532_vm3, %v1722_v40  ;;  %v4519_v6 = vsub.f32 %v4475_v63, %v4512_v1  ;;  %v4522_v46 = vsub.f32 %v4481_v53, %v4512_v1  ;;  %v6734_v47 = vpop.eup %6733 }
0x2155   :  { %v4525_v44 = vsub.f32 %v4487_v27, %v4512_v1  ;;  %v4188_v52 = vmul.f32 %v6732_v28, %v7837_v43  ;;  %v6736_v34 = vpop.eup %6735  ;;  %v4181_v42 = vadd.f32 %v6734_v47, %v6732_v28  ;;  %v4189_v26 = vmul.f32 %v6734_v47, %v8472_v51 }
0x2156   :  { %v4514_v58 = vmul.f32 1.442695, %v4513_v3  ;;  %v4517_v21 = vmul.f32 1.442695, %v4516_v37  ;;  %v4520_v62 = vmul.f32 1.442695, %v4519_v6  ;;  %v4528_v30 = vsub.f32 %v8895_v45, %v4512_v1  ;;  %v6738_v53 = vpop.eup %6737 }
0x2157   :  { %v4523_v8 = vmul.f32 1.442695, %v4522_v46  ;;  %v4182_v12 = vadd.f32 %v6736_v34, %v4181_v42  ;;  %v4190_v63 = vadd.f32 %v4189_v26, %v4188_v52  ;;  %v4191_v11 = vmul.f32 %v6736_v34, %v8483_v36  ;;  %v6740_v35 = vpop.eup %6739 }
0x2158   :  { %6747 = vpow2.f32 %v4514_v58  ;;  %v4526_v33 = vmul.f32 1.442695, %v4525_v44  ;;  %v4531_v7 = vsub.f32 %v4499_v49, %v4512_v1  ;;  %v4534_v61 = vsub.f32 %v4505_v48, %v4512_v1  ;;  %v6742_v15 = vpop.eup %6741 }
0x2159   :  { %6749 = vpow2.f32 %v4517_v21  ;;  %v4183_v22 = vadd.f32 %v6738_v53, %v4182_v12  ;;  %v4192_v25 = vadd.f32 %v4191_v11, %v4190_v63  ;;  %v4529_v27 = vmul.f32 1.442695, %v4528_v30  ;;  %v6744_v16 = vpop.eup %6743 }
0x215a   :  { %6751 = vpow2.f32 %v4520_v62  ;;  %v4193_v45 = vmul.f32 %v6738_v53, %v8504_v17  ;;  %v4532_v4 = vmul.f32 1.442695, %v4531_v7  ;;  %v4535_v13 = vmul.f32 1.442695, %v4534_v61  ;;  %v6746_v49 = vpop.eup %6745 }
0x215b   :  { %6753 = vpow2.f32 %v4523_v8  ;;  %v4184_v60 = vadd.f32 %v6740_v35, %v4183_v22  ;;  %v4195_v29 = vmul.f32 %v6740_v35, %v7831_v39  ;;  %v4197_v46 = vmul.f32 %v6742_v15, %v8547_v54 }
0x215c   :  { %6755 = vpow2.f32 %v4526_v33  ;;  %v4194_v50 = vadd.f32 %v4193_v45, %v4192_v25  ;;  %v4201_v7 = vmul.f32 %v6746_v49, %v8600_v20 }
0x215d   :  { %v4185_v56 = vadd.f32 %v6742_v15, %v4184_v60  ;;  %6757 = vpow2.f32 %v4529_v27 }
0x215e   :  { %6759 = vpow2.f32 %v4532_v4  ;;  %v4196_v40 = vadd.f32 %v4195_v29, %v4194_v50 }
0x215f   :  { %v4186_v24 = vadd.f32 %v6744_v16, %v4185_v56  ;;  %6761 = vpow2.f32 %v4535_v13  ;;  %v4928_v13 = vmul.f32 -1.442695, %v8742_v5  ;;  %v9240_v5 = vld [vmem:[#allocation49_spill] sm:$0xff] }
0x2160   :  { %v4198_v21 = vadd.f32 %v4197_v46, %v4196_v40  ;;  %v4651_v40 = vmul.f32 %v8757_v10, %v9240_v5 }
0x2161   :  { %v4187_v38 = vadd.f32 %v6746_v49, %v4186_v24 }
0x2162   :  { %v6748_v48 = vpop.eup %6747 }
0x2163   :  { %v6750_v1 = vpop.eup %6749  ;;  %v4544_v14 = vmul.f32 %v6748_v48, %v7837_v43  ;;  %6763 = vrcp.f32 %v4187_v38  ;;  %v4199_v43 = vmul.f32 %v6744_v16, %v8574_v19 }
0x2164   :  { %v6752_v3 = vpop.eup %6751  ;;  %v4537_v37 = vadd.f32 %v6750_v1, %v6748_v48  ;;  %v4545_v6 = vmul.f32 %v6750_v1, %v8472_v51  ;;  %v9239_v48 = vld [vmem:[#allocation47_spill] sm:$0xff] }
0x2165   :  { %v6754_v28 = vpop.eup %6753  ;;  %v4547_v52 = vmul.f32 %v6752_v3, %v8483_v36  ;;  %v4200_v63 = vadd.f32 %v4199_v43, %v4198_v21  ;;  %v9243_v21 = vld [vmem:[#allocation48_spill] sm:$0xff] }
0x2166   :  { %v4538_v44 = vadd.f32 %v6752_v3, %v4537_v37  ;;  %v4546_v47 = vadd.f32 %v4545_v6, %v4544_v14  ;;  %v6756_v58 = vpop.eup %6755  ;;  %v4549_v26 = vmul.f32 %v6754_v28, %v8504_v17 }
0x2167   :  { %v6758_v62 = vpop.eup %6757  ;;  %v4551_v51 = vmul.f32 %v6756_v58, %v7831_v39  ;;  %v4202_v25 = vadd.f32 %v4201_v7, %v4200_v63 }
0x2168   :  { %v4539_v34 = vadd.f32 %v6754_v28, %v4538_v44  ;;  %v4548_v42 = vadd.f32 %v4547_v52, %v4546_v47  ;;  %v6760_v12 = vpop.eup %6759  ;;  %v4553_v33 = vmul.f32 %v6758_v62, %v8547_v54  ;;  %v9241_v52 = vld [vmem:[#allocation41_spill] sm:$0xff] }
0x2169   :  { %v6762_v36 = vpop.eup %6761  ;;  %v4555_v17 = vmul.f32 %v6760_v12, %v8574_v19  ;;  %v8931_v19 = vld [vmem:[%s9156_s15] ss:$0 sm:$0xff]  ;;  %s7214_s15 = smov [#allocation22]  }
0x216a   :  { %v4540_v8 = vadd.f32 %v6756_v58, %v4539_v34  ;;  %v4550_v30 = vadd.f32 %v4549_v26, %v4548_v42  ;;  %v4557_v39 = vmul.f32 %v6762_v36, %v8600_v20  ;;  %v9242_v58 = vld [vmem:[#allocation42_spill] sm:$0xff]  ;;  %v3958_v34 = vsel %vm532_vm3, %v9243_v21, %v8902_v18  ;;  %v9244_v42 = vld [vmem:[#allocation43_spill] sm:$0xff] }
0x216c   :  { %v4541_v53 = vadd.f32 %v6758_v62, %v4540_v8  ;;  %v4552_v11 = vadd.f32 %v4551_v51, %v4550_v30  ;;  %v9245_v8 = vld [vmem:[#allocation50_spill] sm:$0xff] }
0x216d   :  { %v6764_v22 = vpop.eup %6763 }
0x216e   :  { %v4542_v35 = vadd.f32 %v6760_v12, %v4541_v53  ;;  %v4554_v61 = vadd.f32 %v4553_v33, %v4552_v11  ;;  %v4205_v27 = vmul.f32 0.125, %v6764_v22 }
0x2170   :  { %v4543_v60 = vadd.f32 %v6762_v36, %v4542_v35  ;;  %v4556_v15 = vadd.f32 %v4555_v17, %v4554_v61  ;;  %v4206_v45 = vmul.f32 %v4205_v27, %v4202_v25 }
0x2172   :  { %v4558_v4 = vadd.f32 %v4557_v39, %v4556_v15  ;;  %6765 = vrcp.f32 %v4543_v60  ;;  %4311 = vrot.lane.b32.xlu1 %v4206_v45, %s7210_s10 }
0x2173   :  { %6767 = vpow2.f32 %v4928_v13 }
0x217c   :  { %v6766_v54 = vpop.eup %6765 }
0x217d   :  { %v4561_v56 = vmul.f32 0.125, %v6766_v54  ;;  %v6768_v49 = vpop.eup %6767 }
0x217e   :  { %v4645_v1 = vadd.f32 1.0, %v6768_v49 }
0x217f   :  { %v4562_v16 = vmul.f32 %v4561_v56, %v4558_v4 }
0x2180   :  { %6769 = vrcp.f32 %v4645_v1 }
0x218a   :  { %v6770_v10 = vpop.eup %6769 }
0x219f   :  { %v2256_v50 = vpop.f32.mrb[18].mxu1 }
0x21a0   :  { %v2257_v24 = vadd.f32 %v8931_v19, %v2256_v50  ;;  %v5280_v20 = vpop.f32.mrb[19].mxu1 }
0x21a2   :  { %2261 = vst.msk [vmem:[#allocation21] sm:$0x3] %vm2260_vm7, %v2257_v24 }
0x21ab   :  { %v3604_v29 = vpop.permute.xlu1 %3603 }
0x21ac   :  { %v3606_v38 = vsel %vm532_vm3, %v9239_v48, %v3604_v29 }
0x21ad   :  { %5495 = vmatmul.mubr.f32.vlgmr.msra.gmra.mrb[26].mxu1 %v3606_v38 }
0x21ae   :  { %6133 = vmatpush3.bf16.msra.mxu1 %v8436_v32  ;;  %5548 = vmatprep.mubr.msk.f32.mxu1 %vm7212_vm4, %v9231_v2 }
0x21af   :  { %v4655_v14 = vpop.permute.xlu1 %4654  ;;  %6134 = vmatprep.subr.bf16.mxu1 %v9229_v9 }
0x21b0   :  { %v4657_v3 = vadd.f32 %v4655_v14, %v4651_v40 }
0x21b2   :  { %6771 = vtanh.f32 %v4657_v3  ;;  %6136 = vmatpush3.bf16.msra.mxu1 %v8530_v55 }
0x21b3   :  { %6137 = vmatprep.subr.bf16.mxu1 %v9229_v9 }
0x21b6   :  { %6139 = vmatpush3.bf16.msra.mxu1 %v8539_v41 }
0x21b7   :  { %6140 = vmatprep.subr.bf16.mxu1 %v9229_v9 }
0x21ba   :  { %6142 = vmatpush3.bf16.msra.mxu1 %v8569_v59 }
0x21bb   :  { %6143 = vmatprep.subr.bf16.mxu1 %v9229_v9 }
0x21bc   :  { %v6772_v37 = vpop.eup %6771 }
0x21bd   :  { %v4659_v6 = vmul.f32 %v6772_v37, %v6770_v10 }
0x21be   :  { %6145 = vmatpush3.bf16.msra.mxu1 %v8595_v31 }
0x21bf   :  { %v2609_v28 = vpop.f32.mrb[20].mxu1  ;;  %6146 = vmatprep.subr.bf16.mxu1 %v9229_v9  ;;  %v6296_v47 = vpack.i.bf16 %v4562_v16, %v4659_v6 }
0x21c0   :  { %v2610_v46 = vadd.f32 %v8931_v19, %v2609_v28  ;;  %v5334_v44 = vpop.f32.mrb[21].mxu1 }
0x21c1   :  { %6297 = vrot.lane.b32.xlu1 %v6296_v47, %s7210_s10 }
0x21c2   :  { %2613 = vst.msk [vmem:[#allocation21 + $0x2] sm:$0x3] %vm2260_vm7, %v2610_v46  ;;  %6148 = vmatpush3.bf16.msra.mxu1 %v8615_v23 }
0x21c3   :  { %6149 = vmatprep.subr.bf16.mxu1 %v9229_v9 }
0x21c5   :  { %1492 = vrot.lane.b32.xlu1 %v9241_v52, %s7213_s4 }
0x21c6   :  { %6151 = vmatpush3.bf16.msra.mxu1 %v8631_v57 }
0x21c7   :  { %6152 = vmatprep.subr.bf16.mxu1 %v9229_v9 }
0x21c9   :  { %1585 = vrot.lane.b32.xlu1 %v9242_v58, %s7213_s4  ;;  %s7215_s4 = smov [#allocation25]  }
0x21ca   :  { %6154 = vmatpush3.bf16.msra.mxu1 %v8648_v0  ;;  %s4781_s3 = sshll.u32 %s7215_s4, 4  ;;  %s9016_s3 = int_to_ptr.vmem [resolvable:$true] %s4781_s3 }
0x21cb   :  { %6183 = vmatprep.subr.bf16.mxu1 %v9229_v9 }
0x21cd   :  { %5549 = vmatmul.mubr.f32.vlgmr.msra.gmra.mrb[28].mxu1 %v3958_v34  ;;  %1719 = vrot.lane.b32.xlu1 %v9244_v42, %s7210_s10  ;;  %s4757_s10 = sshll.u32 %s7214_s15, 4  ;;  %s4758_s10 = int_to_ptr.vmem [resolvable:$true] %s4757_s10 }
0x21ce   :  { %6185 = vmatpush3.bf16.msra.mxu1 %v8436_v32  ;;  %5602 = vmatprep.mubr.msk.f32.mxu1 %vm7212_vm4, %v9231_v2  ;;  %s7017_s6 = scalar_lea.vmem %s4758_s10, 64  ;;  %p7022_p5 = scmp.lt.s32.totalorder %s4758_s10, %s4758_s10 }
0x21cf   :  { %6186 = vmatprep.subr.bf16.mxu1 %v9229_v9  ;;  %p7018_p4 = scmp.ne.s32.totalorder %s4758_s10, %s7017_s6  ;;  %p7023_p6 = scmp.lt.s32.totalorder %s7017_s6, %s7017_s6 }
0x21d1   :  { %p7024_p7 = por %p7023_p6, %p7022_p5 }
0x21d2   :  { %6188 = vmatpush3.bf16.msra.mxu1 %v8530_v55 }
0x21d3   :  { %6189 = vmatprep.subr.bf16.mxu1 %v9229_v9  ;;  %p7025_p8 = pnand %p7024_p7, %p7018_p4 }
0x21d6   :  { %6191 = vmatpush3.bf16.msra.mxu1 %v8539_v41 }
0x21d7   :  { %6192 = vmatprep.subr.bf16.mxu1 %v9229_v9 }
0x21da   :  { %6194 = vmatpush3.bf16.msra.mxu1 %v8569_v59 }
0x21db   :  { %6195 = vmatprep.subr.bf16.mxu1 %v9229_v9 }
0x21de   :  { %6197 = vmatpush3.bf16.msra.mxu1 %v8595_v31 }
0x21df   :  { %6198 = vmatprep.subr.bf16.mxu1 %v9229_v9 }
0x21e2   :  { %6200 = vmatpush3.bf16.msra.mxu1 %v8615_v23 }
0x21e3   :  { %6201 = vmatprep.subr.bf16.mxu1 %v9229_v9 }
0x21e4   :  { %v2965_v18 = vpop.f32.mrb[22].mxu1  ;;  %v4312_v43 = vpop.permute.xlu1 %4311 }
0x21e5   :  { %v2966_v26 = vadd.f32 %v8931_v19, %v2965_v18  ;;  %v5388_v62 = vpop.f32.mrb[23].mxu1  ;;  %v4314_v30 = vsel %vm532_vm3, %v9245_v8, %v4312_v43 }
0x21e6   :  { %6203 = vmatpush3.bf16.msra.mxu1 %v8631_v57 }
0x21e7   :  { %2969 = vst.msk [vmem:[#allocation21 + $0x4] sm:$0x3] %vm2260_vm7, %v2966_v26  ;;  %6204 = vmatprep.subr.bf16.mxu1 %v9229_v9 }
0x21ea   :  { %6206 = vmatpush3.bf16.msra.mxu1 %v8648_v0 }
0x21eb   :  { %6235 = vmatprep.subr.bf16.mxu1 %v9229_v9 }
0x21ed   :  { %5603 = vmatmul.mubr.f32.vlgmr.msra.gmra.mrb[30].mxu1 %v4314_v30 }
0x21ee   :  { %6237 = vmatpush3.bf16.msra.mxu1 %v8436_v32  ;;  %5656 = vmatprep.mubr.msk.f32.mxu1 %vm7212_vm4, %v9231_v2 }
0x21ef   :  { %6238 = vmatprep.subr.bf16.mxu1 %v9229_v9 }
0x21f2   :  { %6240 = vmatpush3.bf16.msra.mxu1 %v8530_v55 }
0x21f3   :  { %6241 = vmatprep.subr.bf16.mxu1 %v9229_v9 }
0x21f6   :  { %6243 = vmatpush3.bf16.msra.mxu1 %v8539_v41 }
0x21f7   :  { %6244 = vmatprep.subr.bf16.mxu1 %v9229_v9 }
0x21fa   :  { %6246 = vmatpush3.bf16.msra.mxu1 %v8569_v59 }
0x21fb   :  { %6247 = vmatprep.subr.bf16.mxu1 %v9229_v9 }
0x21fe   :  { %6249 = vmatpush3.bf16.msra.mxu1 %v8595_v31 }
0x21ff   :  { %6250 = vmatprep.subr.bf16.mxu1 %v9229_v9 }
0x2202   :  { %6252 = vmatpush3.bf16.msra.mxu1 %v8615_v23 }
0x2203   :  { %6253 = vmatprep.subr.bf16.mxu1 %v9229_v9 }
0x2204   :  { %v3319_v32 = vpop.f32.mrb[24].mxu1 }
0x2205   :  { %v3320_v55 = vadd.f32 %v8931_v19, %v3319_v32  ;;  %v5442_v2 = vpop.f32.mrb[25].mxu1 }
0x2206   :  { %6255 = vmatpush3.bf16.msra.mxu1 %v8631_v57 }
0x2207   :  { %3323 = vst.msk [vmem:[#allocation21 + $0x6] sm:$0x3] %vm2260_vm7, %v3320_v55  ;;  %6256 = vmatprep.subr.bf16.mxu1 %v9229_v9 }
0x220a   :  { %6258 = vmatpush3.bf16.msra.mxu1 %v8648_v0 }
0x2233   :  { %v6298_v41 = vpop.permute.xlu1 %6297 }
0x2234   :  { %v6300_v59 = vunpack.i.h.bf16 %v6298_v41  ;;  %v6299_v31 = vunpack.i.l.bf16 %v6298_v41 }
0x2236   :  { %v4668_v51 = vsel %vm532_vm3, %v6299_v31, %v6300_v59 }
0x2237   :  { %v1493_v23 = vpop.permute.xlu1 %1492  ;;  %5657 = vmatmul.mubr.f32.vlgmr.msra.gmra.mrb[32].mxu1 %v4668_v51 }
0x2238   :  { %1495 = vst.msk [vmem:[#allocation28] sm:$0x3] %vm633_vm1, %v1493_v23 }
0x223b   :  { %v1586_v12 = vpop.permute.xlu1 %1585 }
0x223c   :  { %1589 = vst.msk [vmem:[#allocation28 + $0x2] sm:$0x3] %vm633_vm1, %v1586_v12 }
0x223f   :  { %v1720_v63 = vpop.permute.xlu1 %1719 }
0x2240   :  { %1725 = vst.msk [vmem:[#allocation30] sm:$0xff] %vm532_vm3, %v1720_v63 }
0x2280   :  { %v3673_v57 = vpop.f32.mrb[26].mxu1 }
0x2281   :  { %v3674_v9 = vadd.f32 %v8931_v19, %v3673_v57  ;;  %v5496_v53 = vpop.f32.mrb[27].mxu1 }
0x2283   :  { %3677 = vst.msk [vmem:[#allocation21 + $0x8] sm:$0x3] %vm2260_vm7, %v3674_v9 }
0x2284   :  { %7028 = shalt.err (!%p7025_p8)
}
0x2285   :  { %s7029_s11 = scalar_lea.hbm %s9160_s19, 64 }
0x2286   :  { %p7030_p9 = scmp.ne.s32.totalorder %s9160_s19, %s7029_s11  ;;  %p7033_p10 = scmp.lt.u32.totalorder %s7029_s11, %s9160_s19 }
0x2288   :  { %p7035_p11 = pnand %p7033_p10, %p7030_p9 }
0x228a   :  { %7038 = shalt.err (!%p7035_p11)
}
0x228b   :  { %4763 = dma.vmem_to_hbm [thread:$0]  %s4758_s10, 64, %s9160_s19, [#allocation23], %s7203_s0, %s7203_s0, %s7204_s24  }
0x228c   :  { %s7039_s25 = scalar_lea.vmem %s9016_s3, 64  ;;  %p7044_p13 = scmp.lt.s32.totalorder %s9016_s3, %s9016_s3 }
0x228d   :  { %p7040_p12 = scmp.ne.s32.totalorder %s9016_s3, %s7039_s25  ;;  %p7045_p0 = scmp.lt.s32.totalorder %s7039_s25, %s7039_s25 }
0x228f   :  { %p7046_p1 = por %p7045_p0, %p7044_p13 }
0x2291   :  { %p7047_p2 = pnand %p7046_p1, %p7040_p12 }
0x2293   :  { %7050 = shalt.err (!%p7047_p2)
}
0x2294   :  { %s7051_s2 = scalar_lea.hbm %s9162_s21, 64 }
0x2295   :  { %p7052_p3 = scmp.ne.s32.totalorder %s9162_s21, %s7051_s2  ;;  %p7055_p4 = scmp.lt.u32.totalorder %s7051_s2, %s9162_s21 }
0x2297   :  { %p7057_p5 = pnand %p7055_p4, %p7052_p3 }
0x2299   :  { %7060 = shalt.err (!%p7057_p5)
}
0x229a   :  { %4787 = dma.vmem_to_hbm [thread:$0]  %s9016_s3, 64, %s9162_s21, [#allocation26], %s7203_s0, %s7203_s0, %s7204_s24  }
0x229b   :  { %s7216_s15 = smov [#allocation28]  }
0x229c   :  { %s4805_s10 = sshll.u32 %s7216_s15, 4  ;;  %s4806_s10 = int_to_ptr.vmem [resolvable:$true] %s4805_s10 }
0x229d   :  { %s7061_s4 = scalar_lea.vmem %s4806_s10, 64  ;;  %p7066_p7 = scmp.lt.s32.totalorder %s4806_s10, %s4806_s10 }
0x229e   :  { %p7062_p6 = scmp.ne.s32.totalorder %s4806_s10, %s7061_s4  ;;  %p7067_p8 = scmp.lt.s32.totalorder %s7061_s4, %s7061_s4 }
0x22a0   :  { %p7068_p9 = por %p7067_p8, %p7066_p7 }
0x22a2   :  { %p7069_p10 = pnand %p7068_p9, %p7062_p6 }
0x22a4   :  { %7072 = shalt.err (!%p7069_p10)
}
0x22a5   :  { %s7073_s22 = scalar_lea.hbm %s9164_s23, 64 }
0x22a6   :  { %p7074_p11 = scmp.ne.s32.totalorder %s9164_s23, %s7073_s22  ;;  %p7077_p12 = scmp.lt.u32.totalorder %s7073_s22, %s9164_s23 }
0x22a8   :  { %p7079_p13 = pnand %p7077_p12, %p7074_p11 }
0x22aa   :  { %7082 = shalt.err (!%p7079_p13)
}
0x22ab   :  { %4811 = dma.vmem_to_hbm [thread:$0]  %s4806_s10, 64, %s9164_s23, [#allocation29], %s7203_s0, %s7203_s0, %s7204_s24  }
0x22ac   :  { %s7217_s13 = smov [#allocation24]   ;;  %s7218_s26 = smov [#allocation27]  }
0x22ad   :  { %s4769_s28 = sshll.u32 %s7217_s13, 4  ;;  %s4793_s25 = sshll.u32 %s7218_s26, 4  ;;  %s4770_s28 = int_to_ptr.vmem [resolvable:$true] %s4769_s28  ;;  %s9068_s25 = int_to_ptr.vmem [resolvable:$true] %s4793_s25 }
0x22ae   :  { %s7083_s9 = scalar_lea.vmem %s4770_s28, 256  ;;  %p7088_p1 = scmp.lt.s32.totalorder %s4770_s28, %s4770_s28 }
0x22af   :  { %p7084_p0 = scmp.ne.s32.totalorder %s4770_s28, %s7083_s9  ;;  %p7089_p2 = scmp.lt.s32.totalorder %s7083_s9, %s7083_s9 }
0x22b1   :  { %p7090_p3 = por %p7089_p2, %p7088_p1 }
0x22b3   :  { %p7091_p4 = pnand %p7090_p3, %p7084_p0 }
0x22b5   :  { %7094 = shalt.err (!%p7091_p4)
}
0x22b6   :  { %s7095_s30 = scalar_lea.hbm %s9161_s20, 256 }
0x22b7   :  { %p7096_p5 = scmp.ne.s32.totalorder %s9161_s20, %s7095_s30  ;;  %p7099_p6 = scmp.lt.u32.totalorder %s7095_s30, %s9161_s20 }
0x22b9   :  { %p7101_p7 = pnand %p7099_p6, %p7096_p5 }
0x22bb   :  { %7104 = shalt.err (!%p7101_p7)
}
0x22bc   :  { %4775 = dma.vmem_to_hbm [thread:$0]  %s4770_s28, 256, %s9161_s20, [#allocation23], %s7200_s12, %s7200_s12, %s7201_s8  }
0x22bd   :  { %s7105_s19 = scalar_lea.vmem %s9068_s25, 256  ;;  %p7110_p9 = scmp.lt.s32.totalorder %s9068_s25, %s9068_s25 }
0x22be   :  { %p7106_p8 = scmp.ne.s32.totalorder %s9068_s25, %s7105_s19  ;;  %p7111_p10 = scmp.lt.s32.totalorder %s7105_s19, %s7105_s19 }
0x22c0   :  { %p7112_p11 = por %p7111_p10, %p7110_p9 }
0x22c2   :  { %p7113_p12 = pnand %p7112_p11, %p7106_p8 }
0x22c4   :  { %7116 = shalt.err (!%p7113_p12)
}
0x22c5   :  { %s9246_s10 = sld [smem:[#allocation65_spill]] }
0x22cb   :  { %s7117_s4 = scalar_lea.hbm %s9246_s10, 256 }
0x22cc   :  { %p7118_p13 = scmp.ne.s32.totalorder %s9246_s10, %s7117_s4  ;;  %p7121_p0 = scmp.lt.u32.totalorder %s7117_s4, %s9246_s10 }
0x22ce   :  { %p7123_p1 = pnand %p7121_p0, %p7118_p13 }
0x22d0   :  { %7126 = shalt.err (!%p7123_p1)
}
0x22d1   :  { %4799 = dma.vmem_to_hbm [thread:$0]  %s9068_s25, 256, %s9246_s10, [#allocation26], %s7200_s12, %s7200_s12, %s7201_s8  }
0x22d2   :  { %s7219_s17 = smov [#allocation30]  }
0x22d3   :  { %s4817_s21 = sshll.u32 %s7219_s17, 4  ;;  %s4818_s21 = int_to_ptr.vmem [resolvable:$true] %s4817_s21 }
0x22d4   :  { %s7127_s3 = scalar_lea.vmem %s4818_s21, 256  ;;  %p7132_p3 = scmp.lt.s32.totalorder %s4818_s21, %s4818_s21 }
0x22d5   :  { %p7128_p2 = scmp.ne.s32.totalorder %s4818_s21, %s7127_s3  ;;  %p7133_p4 = scmp.lt.s32.totalorder %s7127_s3, %s7127_s3 }
0x22d7   :  { %p7134_p5 = por %p7133_p4, %p7132_p3 }
0x22d9   :  { %p7135_p6 = pnand %p7134_p5, %p7128_p2 }
0x22db   :  { %7138 = shalt.err (!%p7135_p6)
}
0x22dc   :  { %s9247_s28 = sld [smem:[#allocation66_spill]] }
0x22e2   :  { %s7139_s26 = scalar_lea.hbm %s9247_s28, 256 }
0x22e3   :  { %p7140_p7 = scmp.ne.s32.totalorder %s9247_s28, %s7139_s26  ;;  %p7143_p8 = scmp.lt.u32.totalorder %s7139_s26, %s9247_s28 }
0x22e5   :  { %p7145_p9 = pnand %p7143_p8, %p7140_p7 }
0x22e7   :  { %7148 = shalt.err (!%p7145_p9)
}
0x22e8   :  { %4823 = dma.vmem_to_hbm [thread:$0]  %s4818_s21, 256, %s9247_s28, [#allocation29], %s7200_s12, %s7200_s12, %s7201_s8   ;;  %v4025_v0 = vpop.f32.mrb[28].mxu1 }
0x22e9   :  { %v4026_v11 = vadd.f32 %v8931_v19, %v4025_v0  ;;  %v5550_v33 = vpop.f32.mrb[29].mxu1  ;;  %s7220_s23 = smov [#allocation21]  }
0x22ea   :  { %v4381_v36 = vpop.f32.mrb[30].mxu1  ;;  %s4745_s0 = sshll.u32 %s7220_s23, 4  ;;  %s4746_s0 = int_to_ptr.vmem [resolvable:$true] %s4745_s0 }
0x22eb   :  { %4029 = vst.msk [vmem:[#allocation21 + $0xa] sm:$0x3] %vm2260_vm7, %v4026_v11  ;;  %v4382_v7 = vadd.f32 %v8931_v19, %v4381_v36  ;;  %v5604_v22 = vpop.f32.mrb[31].mxu1  ;;  %s7149_s24 = scalar_lea.vmem %s4746_s0, 256  ;;  %p7154_p11 = scmp.lt.s32.totalorder %s4746_s0, %s4746_s0 }
0x22ec   :  { %p7150_p10 = scmp.ne.s32.totalorder %s4746_s0, %s7149_s24  ;;  %p7155_p12 = scmp.lt.s32.totalorder %s7149_s24, %s7149_s24 }
0x22ed   :  { %4385 = vst.msk [vmem:[#allocation21 + $0xc] sm:$0x3] %vm2260_vm7, %v4382_v7 }
0x22ee   :  { %p7156_p13 = por %p7155_p12, %p7154_p11 }
0x22f0   :  { %p7157_p0 = pnand %p7156_p13, %p7150_p10 }
0x230a   :  { %v4735_v35 = vpop.f32.mrb[32].mxu1 }
0x230b   :  { %v4736_v61 = vadd.f32 %v8931_v19, %v4735_v35  ;;  %v5658_v17 = vpop.f32.mrb[33].mxu1 }
0x230d   :  { %4739 = vst.msk [vmem:[#allocation21 + $0xe] sm:$0x3] %vm2260_vm7, %v4736_v61 }
0x230e   :  { %7160 = shalt.err (!%p7157_p0)
}
0x230f   :  { %s9248_s19 = sld [smem:[#allocation64_spill]] }
0x2315   :  { %s7161_s5 = scalar_lea.hbm %s9248_s19, 256 }
0x2316   :  { %p7162_p1 = scmp.ne.s32.totalorder %s9248_s19, %s7161_s5  ;;  %p7165_p2 = scmp.lt.u32.totalorder %s7161_s5, %s9248_s19 }
0x2318   :  { %p7167_p3 = pnand %p7165_p2, %p7162_p1 }
0x231a   :  { %7170 = shalt.err (!%p7167_p3)
}
0x231b   :  { %4751 = dma.vmem_to_hbm [thread:$0]  %s4746_s0, 256, %s9248_s19, [#allocation5], %s7200_s12, %s7200_s12, %s7201_s8  }
0x231c   :  { %7183 = dma.done.wait [#allocation5], 256  }
0x231d   :  { %7184 = vsyncadd [#allocation5], 4294967040 }
0x231e   :  { %7185 = dma.done.wait [#allocation23], 320  }
0x231f   :  { %7186 = vsyncadd [#allocation23], 4294966976 }
0x2320   :  { %7187 = dma.done.wait [#allocation26], 320  }
0x2321   :  { %7188 = vsyncadd [#allocation26], 4294966976 }
0x2322   :  { %7189 = dma.done.wait [#allocation29], 320  }
0x2323   :  { %7190 = vsyncadd [#allocation29], 4294966976 }
0x2324   :  { %4845 = vsyncpa [#allocation4], 1 }
0x2325   :  { %4846 = vsyncpa [#allocation7], 1 }
0x2326   :  { %4847 = vsyncpa [#allocation10], 1 }
0x2327   :  { %4848 = vsyncpa [#allocation13], 1 }
0x2328   :  { %4849 = vsyncpa [#allocation16], 1 }
0x2329   :  { %4850 = vsyncpa [#allocation19], 1 }
0x232a   :  { %4851 = vsyncpa [#allocation5], 1 }
0x232b   :  { %4852 = vsyncpa [#allocation23], 1 }
0x232c   :  { %4853 = vsyncpa [#allocation26], 1 }
0x232d   :  { %4854 = vsyncpa [#allocation29], 1 }

</bundles_post_ra>
